<compile_context>
chip_gen: v7x
topology: tpu7x:2x2x1
jax: 0.10.0
libtpu: 0.0.40
codegen_flags: <defaults>
</compile_context>

<pallas_src>
import functools

import jax
import jax.numpy as jnp
from jax.experimental import pallas as pl
from jax.experimental.pallas import tpu as pltpu


# ----------------------------------------------------------------------------
# Conv + ReLU + MaxPool kernel: one fused matmul per grid step.
#   x_ref: (bt*4*ppad, K)  im2col rows, batch-major, then phase, then pixel
#   w_ref: (K, Cout)       flattened conv weights (row = tap*Cin + cin)
#   b_ref: (1, Cout)
#   o_ref: (bt, ppad, Cout) pooled output (pixels padded to ppad)
# ----------------------------------------------------------------------------
def _conv_relu_pool_kernel(x_ref, w_ref, b_ref, o_ref, *, bt, ppad):
    y = jnp.dot(x_ref[...], w_ref[...], preferred_element_type=jnp.float32)
    y = jnp.maximum(y + b_ref[...], 0.0)          # (bt*4*ppad, Cout)
    for b in range(bt):                           # small static loop
        base = b * 4 * ppad
        pooled = y[base:base + ppad]              # phase 0 slab (8-aligned)
        for f in range(1, 4):                     # running max over phases
            pooled = jnp.maximum(pooled, y[base + f * ppad: base + (f + 1) * ppad])
        o_ref[b] = pooled


def _pick_bt(B, cap=8):
    for d in range(min(B, cap), 0, -1):
        if B % d == 0:
            return d
    return 1


def conv_relu_pool(x_flat, w_col, b_row, *, B, ppad):
    M, K = x_flat.shape                 # M = B * 4 * ppad
    Cout = w_col.shape[1]
    bt = _pick_bt(B)
    grid = (B // bt,)
    return pl.pallas_call(
        functools.partial(_conv_relu_pool_kernel, bt=bt, ppad=ppad),
        out_shape=jax.ShapeDtypeStruct((B, ppad, Cout), jnp.float32),
        grid=grid,
        in_specs=[
            pl.BlockSpec((bt * 4 * ppad, K), lambda i: (i, 0)),
            pl.BlockSpec((K, Cout), lambda i: (0, 0)),
            pl.BlockSpec((1, Cout), lambda i: (0, 0)),
        ],
        out_specs=pl.BlockSpec((bt, ppad, Cout), lambda i: (i, 0, 0)),
        compiler_params=pltpu.CompilerParams(dimension_semantics=("parallel",)),
    )(x_flat, w_col, b_row)


# ----------------------------------------------------------------------------
# fc1: N-tiled linear (+ReLU).  x stays resident, weight streamed in
# lane-aligned (K, tn) blocks, parallel grid axis (megacore-friendly).
# ----------------------------------------------------------------------------
def _linear_nt_kernel(x_ref, w_ref, b_ref, o_ref, *, relu):
    y = jnp.dot(x_ref[...], w_ref[...], preferred_element_type=jnp.float32) + b_ref[...]
    if relu:
        y = jnp.maximum(y, 0.0)
    o_ref[...] = y.astype(o_ref.dtype)


def linear_ntiled(x, w, b_row, *, relu, tn=256):
    B, K = x.shape
    N = w.shape[1]
    assert N % tn == 0
    return pl.pallas_call(
        functools.partial(_linear_nt_kernel, relu=relu),
        out_shape=jax.ShapeDtypeStruct((B, N), jnp.float32),
        grid=(N // tn,),
        in_specs=[
            pl.BlockSpec((B, K), lambda j: (0, 0)),
            pl.BlockSpec((K, tn), lambda j: (0, j)),
            pl.BlockSpec((1, tn), lambda j: (0, j)),
        ],
        out_specs=pl.BlockSpec((B, tn), lambda j: (0, j)),
        compiler_params=pltpu.CompilerParams(dimension_semantics=("parallel",)),
    )(x, w, b_row)


# ----------------------------------------------------------------------------
# fc2 (+ReLU) + fc3 fused in one pallas_call.  fc3 is padded to 128 output
# lanes (sliced back to 62 outside).  Everything fits in VMEM comfortably.
# ----------------------------------------------------------------------------
def _fc23_kernel(h_ref, w2_ref, b2_ref, w3_ref, b3_ref, o_ref):
    h2 = jnp.dot(h_ref[...], w2_ref[...], preferred_element_type=jnp.float32) + b2_ref[...]
    h2 = jnp.maximum(h2, 0.0)
    o_ref[...] = (jnp.dot(h2, w3_ref[...], preferred_element_type=jnp.float32)
                  + b3_ref[...]).astype(o_ref.dtype)


def fc23_fused(h, w2, b2, w3p, b3p):
    B = h.shape[0]
    K2, N2 = w2.shape
    N3 = w3p.shape[1]
    return pl.pallas_call(
        _fc23_kernel,
        out_shape=jax.ShapeDtypeStruct((B, N3), jnp.float32),
        grid=(1,),
        in_specs=[
            pl.BlockSpec((B, K2), lambda i: (0, 0)),
            pl.BlockSpec((K2, N2), lambda i: (0, 0)),
            pl.BlockSpec((1, N2), lambda i: (0, 0)),
            pl.BlockSpec((N2, N3), lambda i: (0, 0)),
            pl.BlockSpec((1, N3), lambda i: (0, 0)),
        ],
        out_specs=pl.BlockSpec((B, N3), lambda i: (0, 0)),
        compiler_params=pltpu.CompilerParams(dimension_semantics=("arbitrary",)),
    )(h, w2, b2, w3p, b3p)


# ----------------------------------------------------------------------------
# JAX glue: im2col patches arranged by 2x2 pool-window phase, pixels padded to
# a multiple of 8 so phase slabs stay sublane-tile aligned inside the kernel.
# Returns a flat (B*4*ppad, 9*C) matrix (batch-major, phase, pooled pixel).
# ----------------------------------------------------------------------------
def extract_pooled_phases(x_nhwc, ppad):
    B, H, W, C = x_nhwc.shape
    xp = jnp.pad(x_nhwc, ((0, 0), (1, 1), (1, 1), (0, 0)))
    patches = jnp.stack(
        [xp[:, dy:dy + H, dx:dx + W, :] for dy in range(3) for dx in range(3)],
        axis=3)                                           # (B, H, W, 9, C)
    patches = patches.reshape(B, H, W, 9 * C)
    phases = jnp.stack(
        [patches[:, py::2, px::2, :] for py in range(2) for px in range(2)],
        axis=1)                                           # (B, 4, H//2, W//2, 9C)
    P = (H // 2) * (W // 2)
    phases = phases.reshape(B, 4, P, 9 * C)
    if ppad > P:
        phases = jnp.pad(phases, ((0, 0), (0, 0), (0, ppad - P), (0, 0)))
    return phases.reshape(B * 4 * ppad, 9 * C)


# ----------------------------------------------------------------------------
# Parameters (deterministic, PyTorch-default-style uniform init)
# ----------------------------------------------------------------------------
def _uniform(key, shape, fan_in):
    bound = 1.0 / jnp.sqrt(jnp.float32(fan_in))
    return jax.random.uniform(key, shape, jnp.float32, -bound, bound)


def init_params(key):
    ks = jax.random.split(key, 10)
    raw = {  # PyTorch layouts, kept for the reference check
        "w1": _uniform(ks[0], (32, 1, 3, 3), 1 * 9),
        "b1": _uniform(ks[1], (32,), 1 * 9),
        "w2": _uniform(ks[2], (64, 32, 3, 3), 32 * 9),
        "b2": _uniform(ks[3], (64,), 32 * 9),
        "fw1": _uniform(ks[4], (1024, 64 * 7 * 7), 64 * 7 * 7),
        "fb1": _uniform(ks[5], (1024,), 64 * 7 * 7),
        "fw2": _uniform(ks[6], (512, 1024), 1024),
        "fb2": _uniform(ks[7], (512,), 1024),
        "fw3": _uniform(ks[8], (62, 512), 512),
        "fb3": _uniform(ks[9], (62,), 512),
    }

    def conv_cols(w):  # (Cout, Cin, 3, 3) -> (9*Cin, Cout), row = tap*Cin + cin
        return jnp.transpose(w, (2, 3, 1, 0)).reshape(-1, w.shape[0])

    # Fold PyTorch's NCHW flatten order into fw1: permute rows from (c,h,w)
    # order to the NHWC flatten order (h,w,c) so the kernel consumes the conv2
    # activation without a runtime transpose.
    fw1_hwc = (raw["fw1"].T.reshape(64, 7, 7, 1024)
               .transpose(1, 2, 0, 3).reshape(64 * 7 * 7, 1024))

    # Pad fc3 to 128 lanes for a lane-dense output store; sliced back later.
    fw3p = jnp.zeros((512, 128), jnp.float32).at[:, :62].set(raw["fw3"].T)
    fb3p = jnp.zeros((1, 128), jnp.float32).at[:, :62].set(raw["fb3"])

    params = {
        "w1": conv_cols(raw["w1"]), "b1": raw["b1"].reshape(1, -1),
        "w2": conv_cols(raw["w2"]), "b2": raw["b2"].reshape(1, -1),
        "fw1": fw1_hwc, "fb1": raw["fb1"].reshape(1, -1),
        "fw2": raw["fw2"].T, "fb2": raw["fb2"].reshape(1, -1),
        "fw3p": fw3p, "fb3p": fb3p,
    }
    return params, raw


# ----------------------------------------------------------------------------
# Forward pass (matches CNNModel.forward)
# ----------------------------------------------------------------------------
P1, PP1 = 14 * 14, 200   # conv1 pooled pixels, padded to multiple of 8
P2, PP2 = 7 * 7, 56      # conv2 pooled pixels, padded to multiple of 8


@jax.jit
def cnn_forward(x_nchw, params):
    B = x_nchw.shape[0]
    x = jnp.transpose(x_nchw, (0, 2, 3, 1))                     # NCHW -> NHWC

    ph1 = extract_pooled_phases(x, PP1)                          # (B*4*200, 9)
    f1 = conv_relu_pool(ph1, params["w1"], params["b1"], B=B, ppad=PP1)
    f1 = f1[:, :P1, :].reshape(B, 14, 14, 32)                    # NHWC

    ph2 = extract_pooled_phases(f1, PP2)                         # (B*4*56, 288)
    f2 = conv_relu_pool(ph2, params["w2"], params["b2"], B=B, ppad=PP2)
    flat = f2[:, :P2, :].reshape(B, P2 * 64)                     # (h,w,c) order

    h1 = linear_ntiled(flat, params["fw1"], params["fb1"], relu=True, tn=256)
    out = fc23_fused(h1, params["fw2"], params["fb2"],
                     params["fw3p"], params["fb3p"])             # (B, 128)
    return out[:, :62]


# ----------------------------------------------------------------------------
# Pure-JAX reference (PyTorch semantics) for a correctness check
# ----------------------------------------------------------------------------
@jax.jit
def reference_forward(x_nchw, raw):
    dn = ("NCHW", "OIHW", "NCHW")
    y = jax.lax.conv_general_dilated(x_nchw, raw["w1"], (1, 1),
                                     ((1, 1), (1, 1)), dimension_numbers=dn)
    y = jnp.maximum(y + raw["b1"][None, :, None, None], 0.0)
    y = jax.lax.reduce_window(y, -jnp.inf, jax.lax.max,
                              (1, 1, 2, 2), (1, 1, 2, 2), "VALID")
    y = jax.lax.conv_general_dilated(y, raw["w2"], (1, 1),
                                     ((1, 1), (1, 1)), dimension_numbers=dn)
    y = jnp.maximum(y + raw["b2"][None, :, None, None], 0.0)
    y = jax.lax.reduce_window(y, -jnp.inf, jax.lax.max,
                              (1, 1, 2, 2), (1, 1, 2, 2), "VALID")
    flat = y.reshape(y.shape[0], -1)                             # NCHW flatten
    h = jnp.maximum(flat @ raw["fw1"].T + raw["fb1"], 0.0)
    h = jnp.maximum(h @ raw["fw2"].T + raw["fb2"], 0.0)
    return h @ raw["fw3"].T + raw["fb3"]


if __name__ == "__main__":
    # Spatial size must be 28x28 (the module's 64*7*7 flatten implies it).
    key = jax.random.PRNGKey(0)
    k_x, k_p = jax.random.split(key)
    B = 2
    x = jax.random.normal(k_x, (B, 1, 28, 28), jnp.float32)      # NCHW like PyTorch
    params, raw = init_params(k_p)

    out = cnn_forward(x, params)
    out = jax.block_until_ready(out)
    assert out.shape == (B, 62), out.shape
    assert out.dtype == jnp.float32

    ref = jax.block_until_ready(reference_forward(x, raw))
    assert jnp.allclose(out, ref, rtol=5e-2, atol=5e-2), \
        f"mismatch vs reference, max abs err {float(jnp.max(jnp.abs(out - ref)))}"

    print("KERNEL_OK")
</pallas_src>

<mosaic_0001>
module attributes {stable_mosaic.version = 11 : i64} {
  func.func @_conv_relu_pool_kernel(%arg0: i32, %arg1: memref<1600x9xf32, #tpu.memory_space<vmem>>, %arg2: memref<9x32xf32, #tpu.memory_space<vmem>>, %arg3: memref<1x32xf32, #tpu.memory_space<vmem>>, %arg4: memref<2x200x32xf32, #tpu.memory_space<vmem>>) attributes {dimension_semantics = [#tpu.dimension_semantics<parallel>], iteration_bounds = array<i64: 1>, scalar_prefetch = 0 : i64, scratch_operands = 0 : i64, tpu.core_type = #tpu.core_type<tc>, window_params = [{transform_indices = @transform_0, window_bounds = array<i64: 1600, 9>}, {pipeline_mode = #tpu.pipeline_mode<synchronous>, transform_indices = @transform_1, window_bounds = array<i64: 9, 32>}, {pipeline_mode = #tpu.pipeline_mode<synchronous>, transform_indices = @transform_2, window_bounds = array<i64: 1, 32>}, {transform_indices = @transform_3, window_bounds = array<i64: 2, 200, 32>}]} {
    %c0 = arith.constant 0 : index
    %c0_0 = arith.constant 0 : index
    %0 = vector.load %arg1[%c0, %c0_0] : memref<1600x9xf32, #tpu.memory_space<vmem>>, vector<1600x9xf32>
    %c0_1 = arith.constant 0 : index
    %c0_2 = arith.constant 0 : index
    %1 = vector.load %arg2[%c0_1, %c0_2] : memref<9x32xf32, #tpu.memory_space<vmem>>, vector<9x32xf32>
    %cst = arith.constant dense<0.000000e+00> : vector<1600x32xf32>
    %2 = tpu.matmul %0, %1, %cst {dimension_numbers = #tpu.dot_dimension_numbers<[1], [0], [0], [1], [0, 0, 1, 1], [], []>} : vector<1600x9xf32>, vector<9x32xf32>, vector<1600x32xf32> -> vector<1600x32xf32>
    %c0_3 = arith.constant 0 : index
    %c0_4 = arith.constant 0 : index
    %3 = vector.load %arg3[%c0_3, %c0_4] : memref<1x32xf32, #tpu.memory_space<vmem>>, vector<1x32xf32>
    %4 = vector.broadcast %3 : vector<1x32xf32> to vector<1600x32xf32>
    %5 = arith.addf %2, %4 : vector<1600x32xf32>
    %cst_5 = arith.constant 0.000000e+00 : f32
    %6 = vector.broadcast %cst_5 : f32 to vector<1600x32xf32>
    %7 = arith.maximumf %5, %6 : vector<1600x32xf32>
    %8 = vector.extract_strided_slice %7 {offsets = [0, 0], sizes = [200, 32], strides = [1, 1]} : vector<1600x32xf32> to vector<200x32xf32>
    %9 = vector.extract_strided_slice %7 {offsets = [200, 0], sizes = [200, 32], strides = [1, 1]} : vector<1600x32xf32> to vector<200x32xf32>
    %10 = arith.maximumf %8, %9 : vector<200x32xf32>
    %11 = vector.extract_strided_slice %7 {offsets = [400, 0], sizes = [200, 32], strides = [1, 1]} : vector<1600x32xf32> to vector<200x32xf32>
    %12 = arith.maximumf %10, %11 : vector<200x32xf32>
    %13 = vector.extract_strided_slice %7 {offsets = [600, 0], sizes = [200, 32], strides = [1, 1]} : vector<1600x32xf32> to vector<200x32xf32>
    %14 = arith.maximumf %12, %13 : vector<200x32xf32>
    %c0_6 = arith.constant 0 : index
    %c0_7 = arith.constant 0 : index
    %c0_8 = arith.constant 0 : index
    %15 = vector.load %arg4[%c0_6, %c0_7, %c0_8] : memref<2x200x32xf32, #tpu.memory_space<vmem>>, vector<1x200x32xf32>
    %16 = vector.shape_cast %15 : vector<1x200x32xf32> to vector<200x32xf32>
    %17 = vector.shape_cast %14 : vector<200x32xf32> to vector<1x200x32xf32>
    tpu.vector_store %arg4[%c0_6, %c0_7, %c0_8], %17 {strides = array<i32>} : memref<2x200x32xf32, #tpu.memory_space<vmem>>, vector<1x200x32xf32>,
    %18 = vector.extract_strided_slice %7 {offsets = [800, 0], sizes = [200, 32], strides = [1, 1]} : vector<1600x32xf32> to vector<200x32xf32>
    %19 = vector.extract_strided_slice %7 {offsets = [1000, 0], sizes = [200, 32], strides = [1, 1]} : vector<1600x32xf32> to vector<200x32xf32>
    %20 = arith.maximumf %18, %19 : vector<200x32xf32>
    %21 = vector.extract_strided_slice %7 {offsets = [1200, 0], sizes = [200, 32], strides = [1, 1]} : vector<1600x32xf32> to vector<200x32xf32>
    %22 = arith.maximumf %20, %21 : vector<200x32xf32>
    %23 = vector.extract_strided_slice %7 {offsets = [1400, 0], sizes = [200, 32], strides = [1, 1]} : vector<1600x32xf32> to vector<200x32xf32>
    %24 = arith.maximumf %22, %23 : vector<200x32xf32>
    %c1 = arith.constant 1 : index
    %c0_9 = arith.constant 0 : index
    %c0_10 = arith.constant 0 : index
    %25 = vector.load %arg4[%c1, %c0_9, %c0_10] : memref<2x200x32xf32, #tpu.memory_space<vmem>>, vector<1x200x32xf32>
    %26 = vector.shape_cast %25 : vector<1x200x32xf32> to vector<200x32xf32>
    %27 = vector.shape_cast %24 : vector<200x32xf32> to vector<1x200x32xf32>
    tpu.vector_store %arg4[%c1, %c0_9, %c0_10], %27 {strides = array<i32>} : memref<2x200x32xf32, #tpu.memory_space<vmem>>, vector<1x200x32xf32>,
    return
  }
  func.func @transform_0(%arg0: i32) -> (i32, i32) {
    %c0_i32 = arith.constant 0 : i32
    %c0_i32_0 = arith.constant 0 : i32
    return %arg0, %c0_i32 : i32, i32
  }
  func.func @transform_1(%arg0: i32) -> (i32, i32) {
    %c0_i32 = arith.constant 0 : i32
    %c0_i32_0 = arith.constant 0 : i32
    %c0_i32_1 = arith.constant 0 : i32
    return %c0_i32, %c0_i32_0 : i32, i32
  }
  func.func @transform_2(%arg0: i32) -> (i32, i32) {
    %c0_i32 = arith.constant 0 : i32
    %c0_i32_0 = arith.constant 0 : i32
    %c0_i32_1 = arith.constant 0 : i32
    return %c0_i32, %c0_i32_0 : i32, i32
  }
  func.func @transform_3(%arg0: i32) -> (i32, i32, i32) {
    %c0_i32 = arith.constant 0 : i32
    %c0_i32_0 = arith.constant 0 : i32
    %c0_i32_1 = arith.constant 0 : i32
    return %arg0, %c0_i32, %c0_i32_0 : i32, i32, i32
  }
}

module attributes {stable_mosaic.version = 11 : i64} {
  func.func @_conv_relu_pool_kernel(%arg0: i32, %arg1: memref<448x288xf32, #tpu.memory_space<vmem>>, %arg2: memref<288x64xf32, #tpu.memory_space<vmem>>, %arg3: memref<1x64xf32, #tpu.memory_space<vmem>>, %arg4: memref<2x56x64xf32, #tpu.memory_space<vmem>>) attributes {dimension_semantics = [#tpu.dimension_semantics<parallel>], iteration_bounds = array<i64: 1>, scalar_prefetch = 0 : i64, scratch_operands = 0 : i64, tpu.core_type = #tpu.core_type<tc>, window_params = [{transform_indices = @transform_0, window_bounds = array<i64: 448, 288>}, {pipeline_mode = #tpu.pipeline_mode<synchronous>, transform_indices = @transform_1, window_bounds = array<i64: 288, 64>}, {pipeline_mode = #tpu.pipeline_mode<synchronous>, transform_indices = @transform_2, window_bounds = array<i64: 1, 64>}, {transform_indices = @transform_3, window_bounds = array<i64: 2, 56, 64>}]} {
    %c0 = arith.constant 0 : index
    %c0_0 = arith.constant 0 : index
    %0 = vector.load %arg1[%c0, %c0_0] : memref<448x288xf32, #tpu.memory_space<vmem>>, vector<448x288xf32>
    %c0_1 = arith.constant 0 : index
    %c0_2 = arith.constant 0 : index
    %1 = vector.load %arg2[%c0_1, %c0_2] : memref<288x64xf32, #tpu.memory_space<vmem>>, vector<288x64xf32>
    %cst = arith.constant dense<0.000000e+00> : vector<448x64xf32>
    %2 = tpu.matmul %0, %1, %cst {dimension_numbers = #tpu.dot_dimension_numbers<[1], [0], [0], [1], [0, 0, 1, 1], [], []>} : vector<448x288xf32>, vector<288x64xf32>, vector<448x64xf32> -> vector<448x64xf32>
    %c0_3 = arith.constant 0 : index
    %c0_4 = arith.constant 0 : index
    %3 = vector.load %arg3[%c0_3, %c0_4] : memref<1x64xf32, #tpu.memory_space<vmem>>, vector<1x64xf32>
    %4 = vector.broadcast %3 : vector<1x64xf32> to vector<448x64xf32>
    %5 = arith.addf %2, %4 : vector<448x64xf32>
    %cst_5 = arith.constant 0.000000e+00 : f32
    %6 = vector.broadcast %cst_5 : f32 to vector<448x64xf32>
    %7 = arith.maximumf %5, %6 : vector<448x64xf32>
    %8 = vector.extract_strided_slice %7 {offsets = [0, 0], sizes = [56, 64], strides = [1, 1]} : vector<448x64xf32> to vector<56x64xf32>
    %9 = vector.extract_strided_slice %7 {offsets = [56, 0], sizes = [56, 64], strides = [1, 1]} : vector<448x64xf32> to vector<56x64xf32>
    %10 = arith.maximumf %8, %9 : vector<56x64xf32>
    %11 = vector.extract_strided_slice %7 {offsets = [112, 0], sizes = [56, 64], strides = [1, 1]} : vector<448x64xf32> to vector<56x64xf32>
    %12 = arith.maximumf %10, %11 : vector<56x64xf32>
    %13 = vector.extract_strided_slice %7 {offsets = [168, 0], sizes = [56, 64], strides = [1, 1]} : vector<448x64xf32> to vector<56x64xf32>
    %14 = arith.maximumf %12, %13 : vector<56x64xf32>
    %c0_6 = arith.constant 0 : index
    %c0_7 = arith.constant 0 : index
    %c0_8 = arith.constant 0 : index
    %15 = vector.load %arg4[%c0_6, %c0_7, %c0_8] : memref<2x56x64xf32, #tpu.memory_space<vmem>>, vector<1x56x64xf32>
    %16 = vector.shape_cast %15 : vector<1x56x64xf32> to vector<56x64xf32>
    %17 = vector.shape_cast %14 : vector<56x64xf32> to vector<1x56x64xf32>
    tpu.vector_store %arg4[%c0_6, %c0_7, %c0_8], %17 {strides = array<i32>} : memref<2x56x64xf32, #tpu.memory_space<vmem>>, vector<1x56x64xf32>,
    %18 = vector.extract_strided_slice %7 {offsets = [224, 0], sizes = [56, 64], strides = [1, 1]} : vector<448x64xf32> to vector<56x64xf32>
    %19 = vector.extract_strided_slice %7 {offsets = [280, 0], sizes = [56, 64], strides = [1, 1]} : vector<448x64xf32> to vector<56x64xf32>
    %20 = arith.maximumf %18, %19 : vector<56x64xf32>
    %21 = vector.extract_strided_slice %7 {offsets = [336, 0], sizes = [56, 64], strides = [1, 1]} : vector<448x64xf32> to vector<56x64xf32>
    %22 = arith.maximumf %20, %21 : vector<56x64xf32>
    %23 = vector.extract_strided_slice %7 {offsets = [392, 0], sizes = [56, 64], strides = [1, 1]} : vector<448x64xf32> to vector<56x64xf32>
    %24 = arith.maximumf %22, %23 : vector<56x64xf32>
    %c1 = arith.constant 1 : index
    %c0_9 = arith.constant 0 : index
    %c0_10 = arith.constant 0 : index
    %25 = vector.load %arg4[%c1, %c0_9, %c0_10] : memref<2x56x64xf32, #tpu.memory_space<vmem>>, vector<1x56x64xf32>
    %26 = vector.shape_cast %25 : vector<1x56x64xf32> to vector<56x64xf32>
    %27 = vector.shape_cast %24 : vector<56x64xf32> to vector<1x56x64xf32>
    tpu.vector_store %arg4[%c1, %c0_9, %c0_10], %27 {strides = array<i32>} : memref<2x56x64xf32, #tpu.memory_space<vmem>>, vector<1x56x64xf32>,
    return
  }
  func.func @transform_0(%arg0: i32) -> (i32, i32) {
    %c0_i32 = arith.constant 0 : i32
    %c0_i32_0 = arith.constant 0 : i32
    return %arg0, %c0_i32 : i32, i32
  }
  func.func @transform_1(%arg0: i32) -> (i32, i32) {
    %c0_i32 = arith.constant 0 : i32
    %c0_i32_0 = arith.constant 0 : i32
    %c0_i32_1 = arith.constant 0 : i32
    return %c0_i32, %c0_i32_0 : i32, i32
  }
  func.func @transform_2(%arg0: i32) -> (i32, i32) {
    %c0_i32 = arith.constant 0 : i32
    %c0_i32_0 = arith.constant 0 : i32
    %c0_i32_1 = arith.constant 0 : i32
    return %c0_i32, %c0_i32_0 : i32, i32
  }
  func.func @transform_3(%arg0: i32) -> (i32, i32, i32) {
    %c0_i32 = arith.constant 0 : i32
    %c0_i32_0 = arith.constant 0 : i32
    %c0_i32_1 = arith.constant 0 : i32
    return %arg0, %c0_i32, %c0_i32_0 : i32, i32, i32
  }
}

module attributes {stable_mosaic.version = 11 : i64} {
  func.func @_linear_nt_kernel(%arg0: i32, %arg1: memref<2x3136xf32, #tpu.memory_space<vmem>>, %arg2: memref<3136x256xf32, #tpu.memory_space<vmem>>, %arg3: memref<1x256xf32, #tpu.memory_space<vmem>>, %arg4: memref<2x256xf32, #tpu.memory_space<vmem>>) attributes {dimension_semantics = [#tpu.dimension_semantics<parallel>], iteration_bounds = array<i64: 4>, scalar_prefetch = 0 : i64, scratch_operands = 0 : i64, tpu.core_type = #tpu.core_type<tc>, window_params = [{pipeline_mode = #tpu.pipeline_mode<synchronous>, transform_indices = @transform_0, window_bounds = array<i64: 2, 3136>}, {transform_indices = @transform_1, window_bounds = array<i64: 3136, 256>}, {transform_indices = @transform_2, window_bounds = array<i64: 1, 256>}, {transform_indices = @transform_3, window_bounds = array<i64: 2, 256>}]} {
    %c0 = arith.constant 0 : index
    %c0_0 = arith.constant 0 : index
    %0 = vector.load %arg1[%c0, %c0_0] : memref<2x3136xf32, #tpu.memory_space<vmem>>, vector<2x3136xf32>
    %c0_1 = arith.constant 0 : index
    %c0_2 = arith.constant 0 : index
    %1 = vector.load %arg2[%c0_1, %c0_2] : memref<3136x256xf32, #tpu.memory_space<vmem>>, vector<3136x256xf32>
    %cst = arith.constant dense<0.000000e+00> : vector<2x256xf32>
    %2 = tpu.matmul %0, %1, %cst {dimension_numbers = #tpu.dot_dimension_numbers<[1], [0], [0], [1], [0, 0, 1, 1], [], []>} : vector<2x3136xf32>, vector<3136x256xf32>, vector<2x256xf32> -> vector<2x256xf32>
    %c0_3 = arith.constant 0 : index
    %c0_4 = arith.constant 0 : index
    %3 = vector.load %arg3[%c0_3, %c0_4] : memref<1x256xf32, #tpu.memory_space<vmem>>, vector<1x256xf32>
    %4 = vector.broadcast %3 : vector<1x256xf32> to vector<2x256xf32>
    %5 = arith.addf %2, %4 : vector<2x256xf32>
    %cst_5 = arith.constant 0.000000e+00 : f32
    %6 = vector.broadcast %cst_5 : f32 to vector<2x256xf32>
    %7 = arith.maximumf %5, %6 : vector<2x256xf32>
    %c0_6 = arith.constant 0 : index
    %c0_7 = arith.constant 0 : index
    %8 = vector.load %arg4[%c0_6, %c0_7] : memref<2x256xf32, #tpu.memory_space<vmem>>, vector<2x256xf32>
    tpu.vector_store %arg4[%c0_6, %c0_7], %7 {strides = array<i32>} : memref<2x256xf32, #tpu.memory_space<vmem>>, vector<2x256xf32>,
    return
  }
  func.func @transform_0(%arg0: i32) -> (i32, i32) {
    %c0_i32 = arith.constant 0 : i32
    %c0_i32_0 = arith.constant 0 : i32
    %c0_i32_1 = arith.constant 0 : i32
    return %c0_i32, %c0_i32_0 : i32, i32
  }
  func.func @transform_1(%arg0: i32) -> (i32, i32) {
    %c0_i32 = arith.constant 0 : i32
    %c0_i32_0 = arith.constant 0 : i32
    return %c0_i32, %arg0 : i32, i32
  }
  func.func @transform_2(%arg0: i32) -> (i32, i32) {
    %c0_i32 = arith.constant 0 : i32
    %c0_i32_0 = arith.constant 0 : i32
    return %c0_i32, %arg0 : i32, i32
  }
  func.func @transform_3(%arg0: i32) -> (i32, i32) {
    %c0_i32 = arith.constant 0 : i32
    %c0_i32_0 = arith.constant 0 : i32
    return %c0_i32, %arg0 : i32, i32
  }
}

module attributes {stable_mosaic.version = 11 : i64} {
  func.func @_fc23_kernel(%arg0: i32, %arg1: memref<2x1024xf32, #tpu.memory_space<vmem>>, %arg2: memref<1024x512xf32, #tpu.memory_space<vmem>>, %arg3: memref<1x512xf32, #tpu.memory_space<vmem>>, %arg4: memref<512x128xf32, #tpu.memory_space<vmem>>, %arg5: memref<1x128xf32, #tpu.memory_space<vmem>>, %arg6: memref<2x128xf32, #tpu.memory_space<vmem>>) attributes {dimension_semantics = [#tpu.dimension_semantics<arbitrary>], iteration_bounds = array<i64: 1>, scalar_prefetch = 0 : i64, scratch_operands = 0 : i64, tpu.core_type = #tpu.core_type<tc>, window_params = [{pipeline_mode = #tpu.pipeline_mode<synchronous>, transform_indices = @transform_0, window_bounds = array<i64: 2, 1024>}, {pipeline_mode = #tpu.pipeline_mode<synchronous>, transform_indices = @transform_1, window_bounds = array<i64: 1024, 512>}, {pipeline_mode = #tpu.pipeline_mode<synchronous>, transform_indices = @transform_2, window_bounds = array<i64: 1, 512>}, {pipeline_mode = #tpu.pipeline_mode<synchronous>, transform_indices = @transform_3, window_bounds = array<i64: 512, 128>}, {pipeline_mode = #tpu.pipeline_mode<synchronous>, transform_indices = @transform_4, window_bounds = array<i64: 1, 128>}, {pipeline_mode = #tpu.pipeline_mode<synchronous>, transform_indices = @transform_5, window_bounds = array<i64: 2, 128>}]} {
    %c0 = arith.constant 0 : index
    %c0_0 = arith.constant 0 : index
    %0 = vector.load %arg1[%c0, %c0_0] : memref<2x1024xf32, #tpu.memory_space<vmem>>, vector<2x1024xf32>
    %c0_1 = arith.constant 0 : index
    %c0_2 = arith.constant 0 : index
    %1 = vector.load %arg2[%c0_1, %c0_2] : memref<1024x512xf32, #tpu.memory_space<vmem>>, vector<1024x512xf32>
    %cst = arith.constant dense<0.000000e+00> : vector<2x512xf32>
    %2 = tpu.matmul %0, %1, %cst {dimension_numbers = #tpu.dot_dimension_numbers<[1], [0], [0], [1], [0, 0, 1, 1], [], []>} : vector<2x1024xf32>, vector<1024x512xf32>, vector<2x512xf32> -> vector<2x512xf32>
    %c0_3 = arith.constant 0 : index
    %c0_4 = arith.constant 0 : index
    %3 = vector.load %arg3[%c0_3, %c0_4] : memref<1x512xf32, #tpu.memory_space<vmem>>, vector<1x512xf32>
    %4 = vector.broadcast %3 : vector<1x512xf32> to vector<2x512xf32>
    %5 = arith.addf %2, %4 : vector<2x512xf32>
    %cst_5 = arith.constant 0.000000e+00 : f32
    %6 = vector.broadcast %cst_5 : f32 to vector<2x512xf32>
    %7 = arith.maximumf %5, %6 : vector<2x512xf32>
    %c0_6 = arith.constant 0 : index
    %c0_7 = arith.constant 0 : index
    %8 = vector.load %arg4[%c0_6, %c0_7] : memref<512x128xf32, #tpu.memory_space<vmem>>, vector<512x128xf32>
    %cst_8 = arith.constant dense<0.000000e+00> : vector<2x128xf32>
    %9 = tpu.matmul %7, %8, %cst_8 {dimension_numbers = #tpu.dot_dimension_numbers<[1], [0], [0], [1], [0, 0, 1, 1], [], []>} : vector<2x512xf32>, vector<512x128xf32>, vector<2x128xf32> -> vector<2x128xf32>
    %c0_9 = arith.constant 0 : index
    %c0_10 = arith.constant 0 : index
    %10 = vector.load %arg5[%c0_9, %c0_10] : memref<1x128xf32, #tpu.memory_space<vmem>>, vector<1x128xf32>
    %11 = vector.broadcast %10 : vector<1x128xf32> to vector<2x128xf32>
    %12 = arith.addf %9, %11 : vector<2x128xf32>
    %c0_11 = arith.constant 0 : index
    %c0_12 = arith.constant 0 : index
    %13 = vector.load %arg6[%c0_11, %c0_12] : memref<2x128xf32, #tpu.memory_space<vmem>>, vector<2x128xf32>
    tpu.vector_store %arg6[%c0_11, %c0_12], %12 {strides = array<i32>} : memref<2x128xf32, #tpu.memory_space<vmem>>, vector<2x128xf32>,
    return
  }
  func.func @transform_0(%arg0: i32) -> (i32, i32) {
    %c0_i32 = arith.constant 0 : i32
    %c0_i32_0 = arith.constant 0 : i32
    %c0_i32_1 = arith.constant 0 : i32
    return %c0_i32, %c0_i32_0 : i32, i32
  }
  func.func @transform_1(%arg0: i32) -> (i32, i32) {
    %c0_i32 = arith.constant 0 : i32
    %c0_i32_0 = arith.constant 0 : i32
    %c0_i32_1 = arith.constant 0 : i32
    return %c0_i32, %c0_i32_0 : i32, i32
  }
  func.func @transform_2(%arg0: i32) -> (i32, i32) {
    %c0_i32 = arith.constant 0 : i32
    %c0_i32_0 = arith.constant 0 : i32
    %c0_i32_1 = arith.constant 0 : i32
    return %c0_i32, %c0_i32_0 : i32, i32
  }
  func.func @transform_3(%arg0: i32) -> (i32, i32) {
    %c0_i32 = arith.constant 0 : i32
    %c0_i32_0 = arith.constant 0 : i32
    %c0_i32_1 = arith.constant 0 : i32
    return %c0_i32, %c0_i32_0 : i32, i32
  }
  func.func @transform_4(%arg0: i32) -> (i32, i32) {
    %c0_i32 = arith.constant 0 : i32
    %c0_i32_0 = arith.constant 0 : i32
    %c0_i32_1 = arith.constant 0 : i32
    return %c0_i32, %c0_i32_0 : i32, i32
  }
  func.func @transform_5(%arg0: i32) -> (i32, i32) {
    %c0_i32 = arith.constant 0 : i32
    %c0_i32_0 = arith.constant 0 : i32
    %c0_i32_1 = arith.constant 0 : i32
    return %c0_i32, %c0_i32_0 : i32, i32
  }
}

</mosaic_0001>

<bundles_post_ra>
// kernel: cnn_forward.4
= control target key start
LH: loop header
LB: loop body
LE: loop exit
PB: predicated region body
PF: predicated region fallthrough
CT: control target
= control target key end

     0   :  { %vm824_vm0 = vcmask 1040384   ;;  %vm223_vm1 = vcmask 72704   ;;  %vm3042_vm2 = vmmov 1   ;;  %vm2168_vm4 = vcmask 261120   ;;  %s4863_s1 = inlined_call_operand.vmem [shape: f32[9,32], index: 1, kind: input, shape index: {}]   ;;  %s4864_s0 = inlined_call_operand.vmem [shape: f32[1600,9], index: 0, kind: input, shape index: {}]   ;;  %s4865_s2 = inlined_call_operand.vmem [shape: f32[1,32], index: 2, kind: input, shape index: {}]   ;;  %s4866_s3 = inlined_call_operand.vmem [shape: f32[2,200,32], index: 3, kind: output, shape index: {}]  }
   0x1   :  { %v214_v0 = vld [vmem:[%s4863_s1] sm:$0xff]  ;;  %v215_v1 = vld [vmem:[%s4863_s1 + $0x8] sm:$0x1]  ;;  %vm3033_vm3 = vmpackc.low %vm824_vm0, %vm3042_vm2 }
   0x2   :  { %v3032_v2 = vpack.c.bf16 %v215_v1, %v214_v0  ;;  %v14_v3 = vld [vmem:[%s4864_s0] sm:$0xff]  ;;  %v15_v5 = vld [vmem:[%s4864_s0 + $0x8] sm:$0xff]  ;;  %v16_v7 = vld [vmem:[%s4864_s0 + $0x10] sm:$0xff] }
   0x3   :  { %v114_v4 = vld [vmem:[%s4864_s0 + $0x320] sm:$0xff]  ;;  %2732 = vmatprep.mubr.msk.f32.mxu0 %vm223_vm1, %v14_v3  ;;  %v115_v6 = vld [vmem:[%s4864_s0 + $0x328] sm:$0xff]  ;;  %v116_v8 = vld [vmem:[%s4864_s0 + $0x330] sm:$0xff] }
   0x4   :  { %2882 = vmatprep.mubr.msk.f32.mxu1 %vm223_vm1, %v114_v4  ;;  %3034 = vmatprep.subr.msk.bf16.mxu0 %vm3033_vm3, %v3032_v2  ;;  %v17_v9 = vld [vmem:[%s4864_s0 + $0x18] sm:$0xff]  ;;  %v18_v11 = vld [vmem:[%s4864_s0 + $0x20] sm:$0xff]  ;;  %v19_v13 = vld [vmem:[%s4864_s0 + $0x28] sm:$0xff] }
   0x5   :  { %3038 = vmatprep.subr.msk.bf16.mxu1 %vm3033_vm3, %v3032_v2  ;;  %3037 = vmatpush3.bf16.msk.msra.mxu0 %vm3033_vm3, %v3032_v2  ;;  %v117_v10 = vld [vmem:[%s4864_s0 + $0x338] sm:$0xff]  ;;  %v118_v12 = vld [vmem:[%s4864_s0 + $0x340] sm:$0xff]  ;;  %v119_v14 = vld [vmem:[%s4864_s0 + $0x348] sm:$0xff] }
   0x6   :  { %3039 = vmatpush3.bf16.msk.msra.mxu1 %vm3033_vm3, %v3032_v2  ;;  %v20_v15 = vld [vmem:[%s4864_s0 + $0x30] sm:$0xff]  ;;  %v21_v17 = vld [vmem:[%s4864_s0 + $0x38] sm:$0xff]  ;;  %v22_v19 = vld [vmem:[%s4864_s0 + $0x40] sm:$0xff] }
   0x7   :  { %v120_v16 = vld [vmem:[%s4864_s0 + $0x350] sm:$0xff]  ;;  %v121_v18 = vld [vmem:[%s4864_s0 + $0x358] sm:$0xff]  ;;  %v122_v20 = vld [vmem:[%s4864_s0 + $0x360] sm:$0xff] }
   0x8   :  { %2733 = vmatmul.mubr.msk.f32.vlgmr.msra.gmra.mrb[0].mxu0 %vm223_vm1, %v15_v5  ;;  %v23_v21 = vld [vmem:[%s4864_s0 + $0x48] sm:$0xff]  ;;  %v24_v23 = vld [vmem:[%s4864_s0 + $0x50] sm:$0xff]  ;;  %v25_v25 = vld [vmem:[%s4864_s0 + $0x58] sm:$0xff] }
   0x9   :  { %2883 = vmatmul.mubr.msk.f32.vlgmr.msra.gmra.mrb[0].mxu1 %vm223_vm1, %v115_v6  ;;  %2735 = vmatprep.mubr.msk.f32.mxu0 %vm223_vm1, %v16_v7  ;;  %v123_v22 = vld [vmem:[%s4864_s0 + $0x368] sm:$0xff]  ;;  %v124_v24 = vld [vmem:[%s4864_s0 + $0x370] sm:$0xff]  ;;  %v125_v26 = vld [vmem:[%s4864_s0 + $0x378] sm:$0xff] }
   0xa   :  { %2885 = vmatprep.mubr.msk.f32.mxu1 %vm223_vm1, %v116_v8  ;;  %v26_v27 = vld [vmem:[%s4864_s0 + $0x60] sm:$0xff]  ;;  %v27_v29 = vld [vmem:[%s4864_s0 + $0x68] sm:$0xff]  ;;  %v28_v31 = vld [vmem:[%s4864_s0 + $0x70] sm:$0xff] }
   0xb   :  { %v126_v28 = vld [vmem:[%s4864_s0 + $0x380] sm:$0xff]  ;;  %v127_v30 = vld [vmem:[%s4864_s0 + $0x388] sm:$0xff]  ;;  %v128_v32 = vld [vmem:[%s4864_s0 + $0x390] sm:$0xff] }
   0xc   :  { %2736 = vmatmul.mubr.msk.f32.gmra.mrb[2].mxu0 %vm223_vm1, %v17_v9  ;;  %v29_v33 = vld [vmem:[%s4864_s0 + $0x78] sm:$0xff]  ;;  %v30_v35 = vld [vmem:[%s4864_s0 + $0x80] sm:$0xff]  ;;  %v31_v37 = vld [vmem:[%s4864_s0 + $0x88] sm:$0xff] }
   0xd   :  { %2886 = vmatmul.mubr.msk.f32.gmra.mrb[2].mxu1 %vm223_vm1, %v117_v10  ;;  %2738 = vmatprep.mubr.msk.f32.mxu0 %vm223_vm1, %v18_v11  ;;  %v129_v34 = vld [vmem:[%s4864_s0 + $0x398] sm:$0xff]  ;;  %v130_v36 = vld [vmem:[%s4864_s0 + $0x3a0] sm:$0xff]  ;;  %v131_v38 = vld [vmem:[%s4864_s0 + $0x3a8] sm:$0xff] }
   0xe   :  { %2888 = vmatprep.mubr.msk.f32.mxu1 %vm223_vm1, %v118_v12  ;;  %v32_v39 = vld [vmem:[%s4864_s0 + $0x90] sm:$0xff]  ;;  %v33_v41 = vld [vmem:[%s4864_s0 + $0x98] sm:$0xff]  ;;  %v34_v43 = vld [vmem:[%s4864_s0 + $0xa0] sm:$0xff] }
   0xf   :  { %v132_v40 = vld [vmem:[%s4864_s0 + $0x3b0] sm:$0xff]  ;;  %v133_v42 = vld [vmem:[%s4864_s0 + $0x3b8] sm:$0xff]  ;;  %v134_v44 = vld [vmem:[%s4864_s0 + $0x3c0] sm:$0xff] }
  0x10   :  { %2739 = vmatmul.mubr.msk.f32.gmra.mrb[4].mxu0 %vm223_vm1, %v19_v13  ;;  %v35_v45 = vld [vmem:[%s4864_s0 + $0xa8] sm:$0xff]  ;;  %v36_v47 = vld [vmem:[%s4864_s0 + $0xb0] sm:$0xff]  ;;  %v37_v49 = vld [vmem:[%s4864_s0 + $0xb8] sm:$0xff] }
  0x11   :  { %2889 = vmatmul.mubr.msk.f32.gmra.mrb[4].mxu1 %vm223_vm1, %v119_v14  ;;  %2741 = vmatprep.mubr.msk.f32.mxu0 %vm223_vm1, %v20_v15  ;;  %v135_v46 = vld [vmem:[%s4864_s0 + $0x3c8] sm:$0xff]  ;;  %v136_v48 = vld [vmem:[%s4864_s0 + $0x3d0] sm:$0xff]  ;;  %v137_v50 = vld [vmem:[%s4864_s0 + $0x3d8] sm:$0xff] }
  0x12   :  { %2891 = vmatprep.mubr.msk.f32.mxu1 %vm223_vm1, %v120_v16  ;;  %v38_v51 = vld [vmem:[%s4864_s0 + $0xc0] sm:$0xff]  ;;  %v39_v53 = vld [vmem:[%s4864_s0 + $0xc8] sm:$0xff]  ;;  %v40_v55 = vld [vmem:[%s4864_s0 + $0xd0] sm:$0xff] }
  0x13   :  { %v138_v52 = vld [vmem:[%s4864_s0 + $0x3e0] sm:$0xff]  ;;  %v139_v54 = vld [vmem:[%s4864_s0 + $0x3e8] sm:$0xff]  ;;  %v140_v56 = vld [vmem:[%s4864_s0 + $0x3f0] sm:$0xff] }
  0x14   :  { %2742 = vmatmul.mubr.msk.f32.gmra.mrb[6].mxu0 %vm223_vm1, %v21_v17  ;;  %v41_v57 = vld [vmem:[%s4864_s0 + $0xd8] sm:$0xff]  ;;  %v42_v59 = vld [vmem:[%s4864_s0 + $0xe0] sm:$0xff]  ;;  %v43_v61 = vld [vmem:[%s4864_s0 + $0xe8] sm:$0xff] }
  0x15   :  { %2892 = vmatmul.mubr.msk.f32.gmra.mrb[6].mxu1 %vm223_vm1, %v121_v18  ;;  %2744 = vmatprep.mubr.msk.f32.mxu0 %vm223_vm1, %v22_v19  ;;  %v141_v58 = vld [vmem:[%s4864_s0 + $0x3f8] sm:$0xff]  ;;  %v142_v60 = vld [vmem:[%s4864_s0 + $0x400] sm:$0xff]  ;;  %v143_v62 = vld [vmem:[%s4864_s0 + $0x408] sm:$0xff] }
  0x16   :  { %2894 = vmatprep.mubr.msk.f32.mxu1 %vm223_vm1, %v122_v20  ;;  %v44_v63 = vld [vmem:[%s4864_s0 + $0xf0] sm:$0xff]  ;;  %v45_v1 = vld [vmem:[%s4864_s0 + $0xf8] sm:$0xff]  ;;  %v46_v3 = vld [vmem:[%s4864_s0 + $0x100] sm:$0xff] }
  0x17   :  { %v144_v0 = vld [vmem:[%s4864_s0 + $0x410] sm:$0xff]  ;;  %v145_v2 = vld [vmem:[%s4864_s0 + $0x418] sm:$0xff]  ;;  %v146_v4 = vld [vmem:[%s4864_s0 + $0x420] sm:$0xff] }
  0x18   :  { %2745 = vmatmul.mubr.msk.f32.gmra.mrb[8].mxu0 %vm223_vm1, %v23_v21  ;;  %v47_v5 = vld [vmem:[%s4864_s0 + $0x108] sm:$0xff]  ;;  %v48_v7 = vld [vmem:[%s4864_s0 + $0x110] sm:$0xff]  ;;  %v49_v9 = vld [vmem:[%s4864_s0 + $0x118] sm:$0xff] }
  0x19   :  { %2895 = vmatmul.mubr.msk.f32.gmra.mrb[8].mxu1 %vm223_vm1, %v123_v22  ;;  %2747 = vmatprep.mubr.msk.f32.mxu0 %vm223_vm1, %v24_v23  ;;  %v147_v6 = vld [vmem:[%s4864_s0 + $0x428] sm:$0xff]  ;;  %v148_v8 = vld [vmem:[%s4864_s0 + $0x430] sm:$0xff]  ;;  %v149_v10 = vld [vmem:[%s4864_s0 + $0x438] sm:$0xff] }
  0x1a   :  { %2897 = vmatprep.mubr.msk.f32.mxu1 %vm223_vm1, %v124_v24  ;;  %v50_v11 = vld [vmem:[%s4864_s0 + $0x120] sm:$0xff]  ;;  %v51_v13 = vld [vmem:[%s4864_s0 + $0x128] sm:$0xff]  ;;  %v52_v15 = vld [vmem:[%s4864_s0 + $0x130] sm:$0xff] }
  0x1b   :  { %v150_v12 = vld [vmem:[%s4864_s0 + $0x440] sm:$0xff]  ;;  %v151_v14 = vld [vmem:[%s4864_s0 + $0x448] sm:$0xff]  ;;  %v152_v16 = vld [vmem:[%s4864_s0 + $0x450] sm:$0xff] }
  0x1c   :  { %2748 = vmatmul.mubr.msk.f32.gmra.mrb[10].mxu0 %vm223_vm1, %v25_v25  ;;  %v53_v17 = vld [vmem:[%s4864_s0 + $0x138] sm:$0xff]  ;;  %v54_v19 = vld [vmem:[%s4864_s0 + $0x140] sm:$0xff]  ;;  %v55_v21 = vld [vmem:[%s4864_s0 + $0x148] sm:$0xff] }
  0x1d   :  { %2898 = vmatmul.mubr.msk.f32.gmra.mrb[10].mxu1 %vm223_vm1, %v125_v26  ;;  %2750 = vmatprep.mubr.msk.f32.mxu0 %vm223_vm1, %v26_v27  ;;  %v153_v18 = vld [vmem:[%s4864_s0 + $0x458] sm:$0xff]  ;;  %v154_v20 = vld [vmem:[%s4864_s0 + $0x460] sm:$0xff]  ;;  %v155_v22 = vld [vmem:[%s4864_s0 + $0x468] sm:$0xff] }
  0x1e   :  { %2900 = vmatprep.mubr.msk.f32.mxu1 %vm223_vm1, %v126_v28  ;;  %v56_v23 = vld [vmem:[%s4864_s0 + $0x150] sm:$0xff]  ;;  %v57_v25 = vld [vmem:[%s4864_s0 + $0x158] sm:$0xff]  ;;  %v58_v27 = vld [vmem:[%s4864_s0 + $0x160] sm:$0xff] }
  0x1f   :  { %v156_v24 = vld [vmem:[%s4864_s0 + $0x470] sm:$0xff]  ;;  %v157_v26 = vld [vmem:[%s4864_s0 + $0x478] sm:$0xff]  ;;  %v158_v28 = vld [vmem:[%s4864_s0 + $0x480] sm:$0xff] }
  0x20   :  { %2751 = vmatmul.mubr.msk.f32.gmra.mrb[12].mxu0 %vm223_vm1, %v27_v29  ;;  %v59_v29 = vld [vmem:[%s4864_s0 + $0x168] sm:$0xff] }
  0x21   :  { %2901 = vmatmul.mubr.msk.f32.gmra.mrb[12].mxu1 %vm223_vm1, %v127_v30  ;;  %2753 = vmatprep.mubr.msk.f32.mxu0 %vm223_vm1, %v28_v31  ;;  %v159_v30 = vld [vmem:[%s4864_s0 + $0x488] sm:$0xff]  ;;  %v60_v31 = vld [vmem:[%s4864_s0 + $0x170] sm:$0xff] }
  0x22   :  { %2903 = vmatprep.mubr.msk.f32.mxu1 %vm223_vm1, %v128_v32  ;;  %v160_v32 = vld [vmem:[%s4864_s0 + $0x490] sm:$0xff] }
  0x24   :  { %2754 = vmatmul.mubr.msk.f32.gmra.mrb[14].mxu0 %vm223_vm1, %v29_v33  ;;  %v61_v33 = vld [vmem:[%s4864_s0 + $0x178] sm:$0xff] }
  0x25   :  { %2904 = vmatmul.mubr.msk.f32.gmra.mrb[14].mxu1 %vm223_vm1, %v129_v34  ;;  %2756 = vmatprep.mubr.msk.f32.mxu0 %vm223_vm1, %v30_v35  ;;  %v161_v34 = vld [vmem:[%s4864_s0 + $0x498] sm:$0xff]  ;;  %v62_v35 = vld [vmem:[%s4864_s0 + $0x180] sm:$0xff] }
  0x26   :  { %2906 = vmatprep.mubr.msk.f32.mxu1 %vm223_vm1, %v130_v36  ;;  %v162_v36 = vld [vmem:[%s4864_s0 + $0x4a0] sm:$0xff] }
  0x28   :  { %2757 = vmatmul.mubr.msk.f32.gmra.mrb[16].mxu0 %vm223_vm1, %v31_v37  ;;  %v63_v37 = vld [vmem:[%s4864_s0 + $0x188] sm:$0xff] }
  0x29   :  { %2907 = vmatmul.mubr.msk.f32.gmra.mrb[16].mxu1 %vm223_vm1, %v131_v38  ;;  %2759 = vmatprep.mubr.msk.f32.mxu0 %vm223_vm1, %v32_v39  ;;  %v163_v38 = vld [vmem:[%s4864_s0 + $0x4a8] sm:$0xff]  ;;  %v64_v39 = vld [vmem:[%s4864_s0 + $0x190] sm:$0xff] }
  0x2a   :  { %2909 = vmatprep.mubr.msk.f32.mxu1 %vm223_vm1, %v132_v40  ;;  %v164_v40 = vld [vmem:[%s4864_s0 + $0x4b0] sm:$0xff] }
  0x2c   :  { %2760 = vmatmul.mubr.msk.f32.gmra.mrb[18].mxu0 %vm223_vm1, %v33_v41  ;;  %v65_v41 = vld [vmem:[%s4864_s0 + $0x198] sm:$0xff] }
  0x2d   :  { %2910 = vmatmul.mubr.msk.f32.gmra.mrb[18].mxu1 %vm223_vm1, %v133_v42  ;;  %2762 = vmatprep.mubr.msk.f32.mxu0 %vm223_vm1, %v34_v43  ;;  %v165_v42 = vld [vmem:[%s4864_s0 + $0x4b8] sm:$0xff]  ;;  %v66_v43 = vld [vmem:[%s4864_s0 + $0x1a0] sm:$0xff] }
  0x2e   :  { %2912 = vmatprep.mubr.msk.f32.mxu1 %vm223_vm1, %v134_v44  ;;  %v166_v44 = vld [vmem:[%s4864_s0 + $0x4c0] sm:$0xff] }
  0x30   :  { %2763 = vmatmul.mubr.msk.f32.gmra.mrb[20].mxu0 %vm223_vm1, %v35_v45  ;;  %v67_v45 = vld [vmem:[%s4864_s0 + $0x1a8] sm:$0xff] }
  0x31   :  { %2913 = vmatmul.mubr.msk.f32.gmra.mrb[20].mxu1 %vm223_vm1, %v135_v46  ;;  %2765 = vmatprep.mubr.msk.f32.mxu0 %vm223_vm1, %v36_v47  ;;  %v167_v46 = vld [vmem:[%s4864_s0 + $0x4c8] sm:$0xff]  ;;  %v68_v47 = vld [vmem:[%s4864_s0 + $0x1b0] sm:$0xff] }
  0x32   :  { %2915 = vmatprep.mubr.msk.f32.mxu1 %vm223_vm1, %v136_v48  ;;  %v168_v48 = vld [vmem:[%s4864_s0 + $0x4d0] sm:$0xff] }
  0x34   :  { %2766 = vmatmul.mubr.msk.f32.gmra.mrb[22].mxu0 %vm223_vm1, %v37_v49  ;;  %v69_v49 = vld [vmem:[%s4864_s0 + $0x1b8] sm:$0xff] }
  0x35   :  { %2916 = vmatmul.mubr.msk.f32.gmra.mrb[22].mxu1 %vm223_vm1, %v137_v50  ;;  %2768 = vmatprep.mubr.msk.f32.mxu0 %vm223_vm1, %v38_v51  ;;  %v169_v50 = vld [vmem:[%s4864_s0 + $0x4d8] sm:$0xff]  ;;  %v70_v51 = vld [vmem:[%s4864_s0 + $0x1c0] sm:$0xff] }
  0x36   :  { %2918 = vmatprep.mubr.msk.f32.mxu1 %vm223_vm1, %v138_v52  ;;  %v170_v52 = vld [vmem:[%s4864_s0 + $0x4e0] sm:$0xff] }
  0x38   :  { %2769 = vmatmul.mubr.msk.f32.gmra.mrb[24].mxu0 %vm223_vm1, %v39_v53  ;;  %v71_v53 = vld [vmem:[%s4864_s0 + $0x1c8] sm:$0xff] }
  0x39   :  { %2919 = vmatmul.mubr.msk.f32.gmra.mrb[24].mxu1 %vm223_vm1, %v139_v54  ;;  %2771 = vmatprep.mubr.msk.f32.mxu0 %vm223_vm1, %v40_v55  ;;  %v171_v54 = vld [vmem:[%s4864_s0 + $0x4e8] sm:$0xff]  ;;  %v72_v55 = vld [vmem:[%s4864_s0 + $0x1d0] sm:$0xff] }
  0x3a   :  { %2921 = vmatprep.mubr.msk.f32.mxu1 %vm223_vm1, %v140_v56  ;;  %v172_v56 = vld [vmem:[%s4864_s0 + $0x4f0] sm:$0xff] }
  0x3c   :  { %2772 = vmatmul.mubr.msk.f32.gmra.mrb[26].mxu0 %vm223_vm1, %v41_v57  ;;  %v73_v57 = vld [vmem:[%s4864_s0 + $0x1d8] sm:$0xff] }
  0x3d   :  { %2922 = vmatmul.mubr.msk.f32.gmra.mrb[26].mxu1 %vm223_vm1, %v141_v58  ;;  %2774 = vmatprep.mubr.msk.f32.mxu0 %vm223_vm1, %v42_v59  ;;  %v173_v58 = vld [vmem:[%s4864_s0 + $0x4f8] sm:$0xff]  ;;  %v74_v59 = vld [vmem:[%s4864_s0 + $0x1e0] sm:$0xff] }
  0x3e   :  { %2924 = vmatprep.mubr.msk.f32.mxu1 %vm223_vm1, %v142_v60  ;;  %v174_v60 = vld [vmem:[%s4864_s0 + $0x500] sm:$0xff] }
  0x40   :  { %2775 = vmatmul.mubr.msk.f32.gmra.mrb[28].mxu0 %vm223_vm1, %v43_v61  ;;  %v75_v61 = vld [vmem:[%s4864_s0 + $0x1e8] sm:$0xff] }
  0x41   :  { %2925 = vmatmul.mubr.msk.f32.gmra.mrb[28].mxu1 %vm223_vm1, %v143_v62  ;;  %2777 = vmatprep.mubr.msk.f32.mxu0 %vm223_vm1, %v44_v63  ;;  %v175_v62 = vld [vmem:[%s4864_s0 + $0x508] sm:$0xff]  ;;  %v76_v63 = vld [vmem:[%s4864_s0 + $0x1f0] sm:$0xff] }
  0x42   :  { %2927 = vmatprep.mubr.msk.f32.mxu1 %vm223_vm1, %v144_v0  ;;  %v176_v0 = vld [vmem:[%s4864_s0 + $0x510] sm:$0xff] }
  0x44   :  { %2778 = vmatmul.mubr.msk.f32.gmra.mrb[30].mxu0 %vm223_vm1, %v45_v1  ;;  %v77_v1 = vld [vmem:[%s4864_s0 + $0x1f8] sm:$0xff] }
  0x45   :  { %2928 = vmatmul.mubr.msk.f32.gmra.mrb[30].mxu1 %vm223_vm1, %v145_v2  ;;  %2780 = vmatprep.mubr.msk.f32.mxu0 %vm223_vm1, %v46_v3  ;;  %v177_v2 = vld [vmem:[%s4864_s0 + $0x518] sm:$0xff]  ;;  %v78_v3 = vld [vmem:[%s4864_s0 + $0x200] sm:$0xff] }
  0x46   :  { %2930 = vmatprep.mubr.msk.f32.mxu1 %vm223_vm1, %v146_v4  ;;  %v178_v4 = vld [vmem:[%s4864_s0 + $0x520] sm:$0xff] }
  0x48   :  { %2781 = vmatmul.mubr.msk.f32.gmra.mrb[32].mxu0 %vm223_vm1, %v47_v5  ;;  %v79_v5 = vld [vmem:[%s4864_s0 + $0x208] sm:$0xff] }
  0x49   :  { %2931 = vmatmul.mubr.msk.f32.gmra.mrb[32].mxu1 %vm223_vm1, %v147_v6  ;;  %2783 = vmatprep.mubr.msk.f32.mxu0 %vm223_vm1, %v48_v7  ;;  %v179_v6 = vld [vmem:[%s4864_s0 + $0x528] sm:$0xff]  ;;  %v80_v7 = vld [vmem:[%s4864_s0 + $0x210] sm:$0xff] }
  0x4a   :  { %2933 = vmatprep.mubr.msk.f32.mxu1 %vm223_vm1, %v148_v8  ;;  %v180_v8 = vld [vmem:[%s4864_s0 + $0x530] sm:$0xff] }
  0x4c   :  { %2784 = vmatmul.mubr.msk.f32.gmra.mrb[34].mxu0 %vm223_vm1, %v49_v9  ;;  %v81_v9 = vld [vmem:[%s4864_s0 + $0x218] sm:$0xff] }
  0x4d   :  { %2934 = vmatmul.mubr.msk.f32.gmra.mrb[34].mxu1 %vm223_vm1, %v149_v10  ;;  %2786 = vmatprep.mubr.msk.f32.mxu0 %vm223_vm1, %v50_v11  ;;  %v181_v10 = vld [vmem:[%s4864_s0 + $0x538] sm:$0xff]  ;;  %v82_v11 = vld [vmem:[%s4864_s0 + $0x220] sm:$0xff] }
  0x4e   :  { %2936 = vmatprep.mubr.msk.f32.mxu1 %vm223_vm1, %v150_v12  ;;  %v182_v12 = vld [vmem:[%s4864_s0 + $0x540] sm:$0xff] }
  0x50   :  { %2787 = vmatmul.mubr.msk.f32.gmra.mrb[36].mxu0 %vm223_vm1, %v51_v13  ;;  %v83_v13 = vld [vmem:[%s4864_s0 + $0x228] sm:$0xff] }
  0x51   :  { %2937 = vmatmul.mubr.msk.f32.gmra.mrb[36].mxu1 %vm223_vm1, %v151_v14  ;;  %2789 = vmatprep.mubr.msk.f32.mxu0 %vm223_vm1, %v52_v15  ;;  %v183_v14 = vld [vmem:[%s4864_s0 + $0x548] sm:$0xff]  ;;  %v84_v15 = vld [vmem:[%s4864_s0 + $0x230] sm:$0xff] }
  0x52   :  { %2939 = vmatprep.mubr.msk.f32.mxu1 %vm223_vm1, %v152_v16  ;;  %v184_v16 = vld [vmem:[%s4864_s0 + $0x550] sm:$0xff] }
  0x54   :  { %2790 = vmatmul.mubr.msk.f32.gmra.mrb[38].mxu0 %vm223_vm1, %v53_v17  ;;  %v85_v17 = vld [vmem:[%s4864_s0 + $0x238] sm:$0xff] }
  0x55   :  { %2940 = vmatmul.mubr.msk.f32.gmra.mrb[38].mxu1 %vm223_vm1, %v153_v18  ;;  %2792 = vmatprep.mubr.msk.f32.mxu0 %vm223_vm1, %v54_v19  ;;  %v185_v18 = vld [vmem:[%s4864_s0 + $0x558] sm:$0xff]  ;;  %v86_v19 = vld [vmem:[%s4864_s0 + $0x240] sm:$0xff] }
  0x56   :  { %2942 = vmatprep.mubr.msk.f32.mxu1 %vm223_vm1, %v154_v20  ;;  %v186_v20 = vld [vmem:[%s4864_s0 + $0x560] sm:$0xff] }
  0x58   :  { %2793 = vmatmul.mubr.msk.f32.gmra.mrb[40].mxu0 %vm223_vm1, %v55_v21  ;;  %v87_v21 = vld [vmem:[%s4864_s0 + $0x248] sm:$0xff] }
  0x59   :  { %2943 = vmatmul.mubr.msk.f32.gmra.mrb[40].mxu1 %vm223_vm1, %v155_v22  ;;  %2795 = vmatprep.mubr.msk.f32.mxu0 %vm223_vm1, %v56_v23  ;;  %v187_v22 = vld [vmem:[%s4864_s0 + $0x568] sm:$0xff]  ;;  %v88_v23 = vld [vmem:[%s4864_s0 + $0x250] sm:$0xff] }
  0x5a   :  { %2945 = vmatprep.mubr.msk.f32.mxu1 %vm223_vm1, %v156_v24  ;;  %v188_v24 = vld [vmem:[%s4864_s0 + $0x570] sm:$0xff] }
  0x5c   :  { %2796 = vmatmul.mubr.msk.f32.gmra.mrb[42].mxu0 %vm223_vm1, %v57_v25  ;;  %v89_v25 = vld [vmem:[%s4864_s0 + $0x258] sm:$0xff] }
  0x5d   :  { %2946 = vmatmul.mubr.msk.f32.gmra.mrb[42].mxu1 %vm223_vm1, %v157_v26  ;;  %2798 = vmatprep.mubr.msk.f32.mxu0 %vm223_vm1, %v58_v27  ;;  %v189_v26 = vld [vmem:[%s4864_s0 + $0x578] sm:$0xff]  ;;  %v90_v27 = vld [vmem:[%s4864_s0 + $0x260] sm:$0xff] }
  0x5e   :  { %2948 = vmatprep.mubr.msk.f32.mxu1 %vm223_vm1, %v158_v28  ;;  %v190_v28 = vld [vmem:[%s4864_s0 + $0x580] sm:$0xff] }
  0x60   :  { %2799 = vmatmul.mubr.msk.f32.gmra.mrb[44].mxu0 %vm223_vm1, %v59_v29  ;;  %v91_v29 = vld [vmem:[%s4864_s0 + $0x268] sm:$0xff] }
  0x61   :  { %2949 = vmatmul.mubr.msk.f32.gmra.mrb[44].mxu1 %vm223_vm1, %v159_v30  ;;  %2801 = vmatprep.mubr.msk.f32.mxu0 %vm223_vm1, %v60_v31  ;;  %v191_v30 = vld [vmem:[%s4864_s0 + $0x588] sm:$0xff]  ;;  %v92_v31 = vld [vmem:[%s4864_s0 + $0x270] sm:$0xff] }
  0x62   :  { %2951 = vmatprep.mubr.msk.f32.mxu1 %vm223_vm1, %v160_v32  ;;  %v192_v32 = vld [vmem:[%s4864_s0 + $0x590] sm:$0xff] }
  0x64   :  { %2802 = vmatmul.mubr.msk.f32.gmra.mrb[46].mxu0 %vm223_vm1, %v61_v33  ;;  %v93_v33 = vld [vmem:[%s4864_s0 + $0x278] sm:$0xff] }
  0x65   :  { %2952 = vmatmul.mubr.msk.f32.gmra.mrb[46].mxu1 %vm223_vm1, %v161_v34  ;;  %2804 = vmatprep.mubr.msk.f32.mxu0 %vm223_vm1, %v62_v35  ;;  %v193_v34 = vld [vmem:[%s4864_s0 + $0x598] sm:$0xff]  ;;  %v94_v35 = vld [vmem:[%s4864_s0 + $0x280] sm:$0xff] }
  0x66   :  { %2954 = vmatprep.mubr.msk.f32.mxu1 %vm223_vm1, %v162_v36  ;;  %v194_v36 = vld [vmem:[%s4864_s0 + $0x5a0] sm:$0xff] }
  0x68   :  { %2805 = vmatmul.mubr.msk.f32.gmra.mrb[48].mxu0 %vm223_vm1, %v63_v37  ;;  %v95_v37 = vld [vmem:[%s4864_s0 + $0x288] sm:$0xff] }
  0x69   :  { %2955 = vmatmul.mubr.msk.f32.gmra.mrb[48].mxu1 %vm223_vm1, %v163_v38  ;;  %2807 = vmatprep.mubr.msk.f32.mxu0 %vm223_vm1, %v64_v39  ;;  %v195_v38 = vld [vmem:[%s4864_s0 + $0x5a8] sm:$0xff]  ;;  %v96_v39 = vld [vmem:[%s4864_s0 + $0x290] sm:$0xff] }
  0x6a   :  { %2957 = vmatprep.mubr.msk.f32.mxu1 %vm223_vm1, %v164_v40  ;;  %v196_v40 = vld [vmem:[%s4864_s0 + $0x5b0] sm:$0xff] }
  0x6c   :  { %2808 = vmatmul.mubr.msk.f32.gmra.mrb[50].mxu0 %vm223_vm1, %v65_v41  ;;  %v97_v41 = vld [vmem:[%s4864_s0 + $0x298] sm:$0xff] }
  0x6d   :  { %2958 = vmatmul.mubr.msk.f32.gmra.mrb[50].mxu1 %vm223_vm1, %v165_v42  ;;  %2810 = vmatprep.mubr.msk.f32.mxu0 %vm223_vm1, %v66_v43  ;;  %v197_v42 = vld [vmem:[%s4864_s0 + $0x5b8] sm:$0xff]  ;;  %v98_v43 = vld [vmem:[%s4864_s0 + $0x2a0] sm:$0xff] }
  0x6e   :  { %2960 = vmatprep.mubr.msk.f32.mxu1 %vm223_vm1, %v166_v44  ;;  %v198_v44 = vld [vmem:[%s4864_s0 + $0x5c0] sm:$0xff] }
  0x70   :  { %2811 = vmatmul.mubr.msk.f32.gmra.mrb[52].mxu0 %vm223_vm1, %v67_v45  ;;  %v99_v45 = vld [vmem:[%s4864_s0 + $0x2a8] sm:$0xff] }
  0x71   :  { %2961 = vmatmul.mubr.msk.f32.gmra.mrb[52].mxu1 %vm223_vm1, %v167_v46  ;;  %2813 = vmatprep.mubr.msk.f32.mxu0 %vm223_vm1, %v68_v47  ;;  %v199_v46 = vld [vmem:[%s4864_s0 + $0x5c8] sm:$0xff]  ;;  %v100_v47 = vld [vmem:[%s4864_s0 + $0x2b0] sm:$0xff] }
  0x72   :  { %2963 = vmatprep.mubr.msk.f32.mxu1 %vm223_vm1, %v168_v48  ;;  %v200_v48 = vld [vmem:[%s4864_s0 + $0x5d0] sm:$0xff] }
  0x74   :  { %2814 = vmatmul.mubr.msk.f32.gmra.mrb[54].mxu0 %vm223_vm1, %v69_v49  ;;  %v101_v49 = vld [vmem:[%s4864_s0 + $0x2b8] sm:$0xff] }
  0x75   :  { %2964 = vmatmul.mubr.msk.f32.gmra.mrb[54].mxu1 %vm223_vm1, %v169_v50  ;;  %2816 = vmatprep.mubr.msk.f32.mxu0 %vm223_vm1, %v70_v51  ;;  %v201_v50 = vld [vmem:[%s4864_s0 + $0x5d8] sm:$0xff]  ;;  %v102_v51 = vld [vmem:[%s4864_s0 + $0x2c0] sm:$0xff] }
  0x76   :  { %2966 = vmatprep.mubr.msk.f32.mxu1 %vm223_vm1, %v170_v52  ;;  %v202_v52 = vld [vmem:[%s4864_s0 + $0x5e0] sm:$0xff] }
  0x78   :  { %2817 = vmatmul.mubr.msk.f32.gmra.mrb[56].mxu0 %vm223_vm1, %v71_v53  ;;  %v103_v53 = vld [vmem:[%s4864_s0 + $0x2c8] sm:$0xff] }
  0x79   :  { %2967 = vmatmul.mubr.msk.f32.gmra.mrb[56].mxu1 %vm223_vm1, %v171_v54  ;;  %2819 = vmatprep.mubr.msk.f32.mxu0 %vm223_vm1, %v72_v55  ;;  %v203_v54 = vld [vmem:[%s4864_s0 + $0x5e8] sm:$0xff]  ;;  %v104_v55 = vld [vmem:[%s4864_s0 + $0x2d0] sm:$0xff] }
  0x7a   :  { %2969 = vmatprep.mubr.msk.f32.mxu1 %vm223_vm1, %v172_v56  ;;  %v204_v56 = vld [vmem:[%s4864_s0 + $0x5f0] sm:$0xff] }
  0x7c   :  { %2820 = vmatmul.mubr.msk.f32.gmra.mrb[58].mxu0 %vm223_vm1, %v73_v57  ;;  %v105_v57 = vld [vmem:[%s4864_s0 + $0x2d8] sm:$0xff] }
  0x7d   :  { %2970 = vmatmul.mubr.msk.f32.gmra.mrb[58].mxu1 %vm223_vm1, %v173_v58  ;;  %2822 = vmatprep.mubr.msk.f32.mxu0 %vm223_vm1, %v74_v59  ;;  %v205_v58 = vld [vmem:[%s4864_s0 + $0x5f8] sm:$0xff]  ;;  %v106_v59 = vld [vmem:[%s4864_s0 + $0x2e0] sm:$0xff] }
  0x7e   :  { %2972 = vmatprep.mubr.msk.f32.mxu1 %vm223_vm1, %v174_v60  ;;  %v206_v60 = vld [vmem:[%s4864_s0 + $0x600] sm:$0xff] }
  0x80   :  { %2823 = vmatmul.mubr.msk.f32.gmra.mrb[60].mxu0 %vm223_vm1, %v75_v61  ;;  %v107_v61 = vld [vmem:[%s4864_s0 + $0x2e8] sm:$0xff] }
  0x81   :  { %2973 = vmatmul.mubr.msk.f32.gmra.mrb[60].mxu1 %vm223_vm1, %v175_v62  ;;  %2825 = vmatprep.mubr.msk.f32.mxu0 %vm223_vm1, %v76_v63  ;;  %v207_v62 = vld [vmem:[%s4864_s0 + $0x608] sm:$0xff]  ;;  %v108_v63 = vld [vmem:[%s4864_s0 + $0x2f0] sm:$0xff] }
  0x82   :  { %2975 = vmatprep.mubr.msk.f32.mxu1 %vm223_vm1, %v176_v0  ;;  %v208_v0 = vld [vmem:[%s4864_s0 + $0x610] sm:$0xff] }
  0x84   :  { %2826 = vmatmul.mubr.msk.f32.gmra.mrb[62].mxu0 %vm223_vm1, %v77_v1  ;;  %v109_v1 = vld [vmem:[%s4864_s0 + $0x2f8] sm:$0xff] }
  0x85   :  { %2976 = vmatmul.mubr.msk.f32.gmra.mrb[62].mxu1 %vm223_vm1, %v177_v2  ;;  %2828 = vmatprep.mubr.msk.f32.mxu0 %vm223_vm1, %v78_v3  ;;  %v209_v2 = vld [vmem:[%s4864_s0 + $0x618] sm:$0xff]  ;;  %v110_v3 = vld [vmem:[%s4864_s0 + $0x300] sm:$0xff] }
  0x86   :  { %2978 = vmatprep.mubr.msk.f32.mxu1 %vm223_vm1, %v178_v4  ;;  %v210_v4 = vld [vmem:[%s4864_s0 + $0x620] sm:$0xff] }
  0x88   :  { %2829 = vmatmul.mubr.msk.f32.gmra.mrb[64].mxu0 %vm223_vm1, %v79_v5  ;;  %v111_v5 = vld [vmem:[%s4864_s0 + $0x308] sm:$0xff] }
  0x89   :  { %2979 = vmatmul.mubr.msk.f32.gmra.mrb[64].mxu1 %vm223_vm1, %v179_v6  ;;  %2831 = vmatprep.mubr.msk.f32.mxu0 %vm223_vm1, %v80_v7  ;;  %v211_v6 = vld [vmem:[%s4864_s0 + $0x628] sm:$0xff]  ;;  %v112_v7 = vld [vmem:[%s4864_s0 + $0x310] sm:$0xff] }
  0x8a   :  { %2981 = vmatprep.mubr.msk.f32.mxu1 %vm223_vm1, %v180_v8  ;;  %v212_v8 = vld [vmem:[%s4864_s0 + $0x630] sm:$0xff] }
  0x8c   :  { %2832 = vmatmul.mubr.msk.f32.gmra.mrb[66].mxu0 %vm223_vm1, %v81_v9  ;;  %v113_v9 = vld [vmem:[%s4864_s0 + $0x318] sm:$0xff] }
  0x8d   :  { %2982 = vmatmul.mubr.msk.f32.gmra.mrb[66].mxu1 %vm223_vm1, %v181_v10  ;;  %2834 = vmatprep.mubr.msk.f32.mxu0 %vm223_vm1, %v82_v11  ;;  %v213_v10 = vld [vmem:[%s4864_s0 + $0x638] sm:$0xff] }
  0x8e   :  { %2984 = vmatprep.mubr.msk.f32.mxu1 %vm223_vm1, %v182_v12 }
  0x90   :  { %2835 = vmatmul.mubr.msk.f32.gmra.mrb[68].mxu0 %vm223_vm1, %v83_v13 }
  0x91   :  { %2985 = vmatmul.mubr.msk.f32.gmra.mrb[68].mxu1 %vm223_vm1, %v183_v14  ;;  %2837 = vmatprep.mubr.msk.f32.mxu0 %vm223_vm1, %v84_v15 }
  0x92   :  { %2987 = vmatprep.mubr.msk.f32.mxu1 %vm223_vm1, %v184_v16 }
  0x94   :  { %2838 = vmatmul.mubr.msk.f32.gmra.mrb[70].mxu0 %vm223_vm1, %v85_v17 }
  0x95   :  { %2988 = vmatmul.mubr.msk.f32.gmra.mrb[70].mxu1 %vm223_vm1, %v185_v18  ;;  %2840 = vmatprep.mubr.msk.f32.mxu0 %vm223_vm1, %v86_v19 }
  0x96   :  { %2990 = vmatprep.mubr.msk.f32.mxu1 %vm223_vm1, %v186_v20 }
  0x98   :  { %2841 = vmatmul.mubr.msk.f32.gmra.mrb[72].mxu0 %vm223_vm1, %v87_v21 }
  0x99   :  { %2991 = vmatmul.mubr.msk.f32.gmra.mrb[72].mxu1 %vm223_vm1, %v187_v22  ;;  %2843 = vmatprep.mubr.msk.f32.mxu0 %vm223_vm1, %v88_v23 }
  0x9a   :  { %2993 = vmatprep.mubr.msk.f32.mxu1 %vm223_vm1, %v188_v24 }
  0x9c   :  { %2844 = vmatmul.mubr.msk.f32.gmra.mrb[74].mxu0 %vm223_vm1, %v89_v25 }
  0x9d   :  { %2994 = vmatmul.mubr.msk.f32.gmra.mrb[74].mxu1 %vm223_vm1, %v189_v26  ;;  %2846 = vmatprep.mubr.msk.f32.mxu0 %vm223_vm1, %v90_v27 }
  0x9e   :  { %2996 = vmatprep.mubr.msk.f32.mxu1 %vm223_vm1, %v190_v28 }
  0xa0   :  { %2847 = vmatmul.mubr.msk.f32.gmra.mrb[76].mxu0 %vm223_vm1, %v91_v29 }
  0xa1   :  { %2997 = vmatmul.mubr.msk.f32.gmra.mrb[76].mxu1 %vm223_vm1, %v191_v30  ;;  %2849 = vmatprep.mubr.msk.f32.mxu0 %vm223_vm1, %v92_v31 }
  0xa2   :  { %2999 = vmatprep.mubr.msk.f32.mxu1 %vm223_vm1, %v192_v32 }
  0xa4   :  { %2850 = vmatmul.mubr.msk.f32.gmra.mrb[78].mxu0 %vm223_vm1, %v93_v33 }
  0xa5   :  { %3000 = vmatmul.mubr.msk.f32.gmra.mrb[78].mxu1 %vm223_vm1, %v193_v34  ;;  %2852 = vmatprep.mubr.msk.f32.mxu0 %vm223_vm1, %v94_v35 }
  0xa6   :  { %3002 = vmatprep.mubr.msk.f32.mxu1 %vm223_vm1, %v194_v36 }
  0xa8   :  { %2853 = vmatmul.mubr.msk.f32.gmra.mrb[80].mxu0 %vm223_vm1, %v95_v37 }
  0xa9   :  { %3003 = vmatmul.mubr.msk.f32.gmra.mrb[80].mxu1 %vm223_vm1, %v195_v38  ;;  %2855 = vmatprep.mubr.msk.f32.mxu0 %vm223_vm1, %v96_v39 }
  0xaa   :  { %3005 = vmatprep.mubr.msk.f32.mxu1 %vm223_vm1, %v196_v40 }
  0xac   :  { %2856 = vmatmul.mubr.msk.f32.gmra.mrb[82].mxu0 %vm223_vm1, %v97_v41 }
  0xad   :  { %3006 = vmatmul.mubr.msk.f32.gmra.mrb[82].mxu1 %vm223_vm1, %v197_v42  ;;  %2858 = vmatprep.mubr.msk.f32.mxu0 %vm223_vm1, %v98_v43 }
  0xae   :  { %3008 = vmatprep.mubr.msk.f32.mxu1 %vm223_vm1, %v198_v44 }
  0xb0   :  { %2859 = vmatmul.mubr.msk.f32.gmra.mrb[84].mxu0 %vm223_vm1, %v99_v45 }
  0xb1   :  { %3009 = vmatmul.mubr.msk.f32.gmra.mrb[84].mxu1 %vm223_vm1, %v199_v46  ;;  %2861 = vmatprep.mubr.msk.f32.mxu0 %vm223_vm1, %v100_v47  ;;  %v3904_v47 = vld [vmem:[%s4865_s2] ss:$0 sm:$0xff] }
  0xb2   :  { %3011 = vmatprep.mubr.msk.f32.mxu1 %vm223_vm1, %v200_v48 }
  0xb4   :  { %2862 = vmatmul.mubr.msk.f32.gmra.mrb[86].mxu0 %vm223_vm1, %v101_v49 }
  0xb5   :  { %3012 = vmatmul.mubr.msk.f32.gmra.mrb[86].mxu1 %vm223_vm1, %v201_v50  ;;  %2864 = vmatprep.mubr.msk.f32.mxu0 %vm223_vm1, %v102_v51 }
  0xb6   :  { %3014 = vmatprep.mubr.msk.f32.mxu1 %vm223_vm1, %v202_v52 }
  0xb8   :  { %2865 = vmatmul.mubr.msk.f32.gmra.mrb[88].mxu0 %vm223_vm1, %v103_v53 }
  0xb9   :  { %3015 = vmatmul.mubr.msk.f32.gmra.mrb[88].mxu1 %vm223_vm1, %v203_v54  ;;  %2867 = vmatprep.mubr.msk.f32.mxu0 %vm223_vm1, %v104_v55 }
  0xba   :  { %3017 = vmatprep.mubr.msk.f32.mxu1 %vm223_vm1, %v204_v56 }
  0xbc   :  { %2868 = vmatmul.mubr.msk.f32.gmra.mrb[90].mxu0 %vm223_vm1, %v105_v57 }
  0xbd   :  { %3018 = vmatmul.mubr.msk.f32.gmra.mrb[90].mxu1 %vm223_vm1, %v205_v58  ;;  %2870 = vmatprep.mubr.msk.f32.mxu0 %vm223_vm1, %v106_v59 }
  0xbe   :  { %3020 = vmatprep.mubr.msk.f32.mxu1 %vm223_vm1, %v206_v60 }
  0xc0   :  { %2871 = vmatmul.mubr.msk.f32.gmra.mrb[92].mxu0 %vm223_vm1, %v107_v61 }
  0xc1   :  { %3021 = vmatmul.mubr.msk.f32.gmra.mrb[92].mxu1 %vm223_vm1, %v207_v62  ;;  %2873 = vmatprep.mubr.msk.f32.mxu0 %vm223_vm1, %v108_v63 }
  0xc2   :  { %3023 = vmatprep.mubr.msk.f32.mxu1 %vm223_vm1, %v208_v0 }
  0xc4   :  { %2874 = vmatmul.mubr.msk.f32.gmra.mrb[94].mxu0 %vm223_vm1, %v109_v1 }
  0xc5   :  { %3024 = vmatmul.mubr.msk.f32.gmra.mrb[94].mxu1 %vm223_vm1, %v209_v2  ;;  %2876 = vmatprep.mubr.msk.f32.mxu0 %vm223_vm1, %v110_v3 }
  0xc6   :  { %3026 = vmatprep.mubr.msk.f32.mxu1 %vm223_vm1, %v210_v4 }
  0xc8   :  { %2877 = vmatmul.mubr.msk.f32.gmra.mrb[96].mxu0 %vm223_vm1, %v111_v5 }
  0xc9   :  { %3027 = vmatmul.mubr.msk.f32.gmra.mrb[96].mxu1 %vm223_vm1, %v211_v6  ;;  %2879 = vmatprep.mubr.msk.f32.mxu0 %vm223_vm1, %v112_v7 }
  0xca   :  { %3029 = vmatprep.mubr.msk.f32.mxu1 %vm223_vm1, %v212_v8 }
  0xcc   :  { %2880 = vmatmul.mubr.msk.f32.gmra.mrb[98].mxu0 %vm223_vm1, %v113_v9 }
  0xcd   :  { %3030 = vmatmul.mubr.msk.f32.gmra.mrb[98].mxu1 %vm223_vm1, %v213_v10 }
  0xdb   :  { %v2734_v11 = vpop.f32.mrb[0].mxu0 }
  0xdc   :  { %v2884_v12 = vpop.f32.mrb[0].mxu1  ;;  %v894_v13 = vpop.f32.mrb[1].mxu0  ;;  %v3911_v50 = vadd.f32 %v2734_v11, %v3904_v47 }
  0xdd   :  { %v1394_v14 = vpop.f32.mrb[1].mxu1  ;;  %v3914_v51 = vadd.f32 %v2884_v12, %v3904_v47  ;;  %v3921_v54 = vadd.f32 %v3904_v47, %v894_v13 }
  0xde   :  { %v3924_v55 = vadd.f32 %v3904_v47, %v1394_v14 }
  0xdf   :  { %v2737_v15 = vpop.f32.mrb[2].mxu0  ;;  %v1893_v2 = vmax.f32 %v3921_v54, 0.0 }
  0xe0   :  { %v2887_v16 = vpop.f32.mrb[2].mxu1  ;;  %v904_v17 = vpop.f32.mrb[3].mxu0  ;;  %v3927_v56 = vadd.f32 %v2737_v15, %v3904_v47  ;;  %v1993_v3 = vmax.f32 %v3924_v55, 0.0 }
  0xe1   :  { %v1404_v18 = vpop.f32.mrb[3].mxu1  ;;  %v3930_v57 = vadd.f32 %v2887_v16, %v3904_v47  ;;  %v3939_v62 = vadd.f32 %v3904_v47, %v904_v17 }
  0xe2   :  { %v3942_v63 = vadd.f32 %v3904_v47, %v1404_v18 }
  0xe3   :  { %v2740_v19 = vpop.f32.mrb[4].mxu0  ;;  %v1895_v16 = vmax.f32 %v3939_v62, 0.0 }
  0xe4   :  { %v2890_v20 = vpop.f32.mrb[4].mxu1  ;;  %v914_v21 = vpop.f32.mrb[5].mxu0  ;;  %v3951_v4 = vadd.f32 %v2740_v19, %v3904_v47  ;;  %v1995_v17 = vmax.f32 %v3942_v63, 0.0 }
  0xe5   :  { %v1414_v22 = vpop.f32.mrb[5].mxu1  ;;  %v3954_v5 = vadd.f32 %v2890_v20, %v3904_v47  ;;  %v3957_v6 = vadd.f32 %v3904_v47, %v914_v21 }
  0xe6   :  { %v3960_v7 = vadd.f32 %v3904_v47, %v1414_v22 }
  0xe7   :  { %v2743_v23 = vpop.f32.mrb[6].mxu0 }
  0xe8   :  { %v2893_v24 = vpop.f32.mrb[6].mxu1  ;;  %v924_v25 = vpop.f32.mrb[7].mxu0  ;;  %v3963_v8 = vadd.f32 %v2743_v23, %v3904_v47 }
  0xe9   :  { %v1424_v26 = vpop.f32.mrb[7].mxu1  ;;  %v3966_v9 = vadd.f32 %v2893_v24, %v3904_v47  ;;  %v3971_v12 = vadd.f32 %v3904_v47, %v924_v25 }
  0xea   :  { %v3974_v13 = vadd.f32 %v3904_v47, %v1424_v26 }
  0xeb   :  { %v2746_v27 = vpop.f32.mrb[8].mxu0 }
  0xec   :  { %v2896_v28 = vpop.f32.mrb[8].mxu1  ;;  %v934_v29 = vpop.f32.mrb[9].mxu0  ;;  %v3983_v18 = vadd.f32 %v2746_v27, %v3904_v47 }
  0xed   :  { %v1434_v30 = vpop.f32.mrb[9].mxu1  ;;  %v3986_v19 = vadd.f32 %v2896_v28, %v3904_v47  ;;  %v3995_v24 = vadd.f32 %v3904_v47, %v934_v29 }
  0xee   :  { %v3998_v25 = vadd.f32 %v3904_v47, %v1434_v30 }
  0xef   :  { %v3869_v31 = vpop.f32.mrb[10].mxu0 }
  0xf0   :  { %v3871_v32 = vpop.f32.mrb[10].mxu1  ;;  %v3873_v33 = vpop.f32.mrb[11].mxu0  ;;  %v4008_v63 = vadd.f32 %v3869_v31, %v3904_v47 }
  0xf1   :  { %v3875_v34 = vpop.f32.mrb[11].mxu1  ;;  %v4012_v29 = vadd.f32 %v3871_v32, %v3904_v47  ;;  %v4026_v32 = vadd.f32 %v3904_v47, %v3873_v33 }
  0xf2   :  { %v4030_v22 = vadd.f32 %v3904_v47, %v3875_v34 }
  0xf3   :  { %v3877_v35 = vpop.f32.mrb[12].mxu0 }
  0xf4   :  { %v3879_v36 = vpop.f32.mrb[12].mxu1  ;;  %v3881_v37 = vpop.f32.mrb[13].mxu0 }
  0xf5   :  { %v3883_v38 = vpop.f32.mrb[13].mxu1  ;;  %v4044_v33 = vadd.f32 %v3904_v47, %v3881_v37 }
  0xf6   :  { %v4048_v34 = vadd.f32 %v3904_v47, %v3883_v38 }
  0xf7   :  { %v3885_v39 = vpop.f32.mrb[14].mxu0 }
  0xf8   :  { %v3887_v40 = vpop.f32.mrb[14].mxu1  ;;  %v3889_v41 = vpop.f32.mrb[15].mxu0 }
  0xf9   :  { %v3891_v42 = vpop.f32.mrb[15].mxu1 }
  0xfb   :  { %v3893_v43 = vpop.f32.mrb[16].mxu0 }
  0xfc   :  { %v3895_v44 = vpop.f32.mrb[16].mxu1  ;;  %v3897_v45 = vpop.f32.mrb[17].mxu0 }
  0xfd   :  { %v3899_v46 = vpop.f32.mrb[17].mxu1 }
  0xff   :  { %v3906_v48 = vpop.f32.mrb[18].mxu0 }
 0x100   :  { %v3908_v49 = vpop.f32.mrb[18].mxu1  ;;  %v3916_v52 = vpop.f32.mrb[19].mxu0 }
 0x101   :  { %v3918_v53 = vpop.f32.mrb[19].mxu1 }
 0x103   :  { %v3932_v58 = vpop.f32.mrb[20].mxu0 }
 0x104   :  { %v3934_v59 = vpop.f32.mrb[20].mxu1  ;;  %v3944_v0 = vpop.f32.mrb[21].mxu0 }
 0x105   :  { %v3946_v1 = vpop.f32.mrb[21].mxu1 }
 0x107   :  { %v3976_v14 = vpop.f32.mrb[22].mxu0 }
 0x108   :  { %4867 = vst [vmem:[#allocation2_spill] sm:$0xff] %v3976_v14  ;;  %v3978_v15 = vpop.f32.mrb[22].mxu1  ;;  %v3988_v20 = vpop.f32.mrb[23].mxu0 }
 0x109   :  { %4868 = vst [vmem:[#allocation3_spill] sm:$0xff] %v3978_v15  ;;  %v3990_v21 = vpop.f32.mrb[23].mxu1 }
 0x10b   :  { %v2770_v30 = vpop.f32.mrb[24].mxu0 }
 0x10c   :  { %v2920_v23 = vpop.f32.mrb[24].mxu1  ;;  %v1020_v54 = vadd.f32 %v2770_v30, %v3904_v47  ;;  %v4018_v11 = vpop.f32.mrb[25].mxu0  ;;  %v4034_v30 = vadd.f32 %v3877_v35, %v3904_v47 }
 0x10d   :  { %v1520_v55 = vadd.f32 %v2920_v23, %v3904_v47  ;;  %v4020_v62 = vpop.f32.mrb[25].mxu1  ;;  %v4038_v23 = vadd.f32 %v3879_v36, %v3904_v47 }
 0x10e   :  { %4869 = vst [vmem:[#allocation4_spill] sm:$0xff] %v4020_v62  ;;  %v1918_v28 = vmax.f32 %v1020_v54, 0.0 }
 0x10f   :  { %v2018_v31 = vmax.f32 %v1520_v55, 0.0  ;;  %v2773_v35 = vpop.f32.mrb[26].mxu0 }
 0x110   :  { %v2923_v26 = vpop.f32.mrb[26].mxu1  ;;  %v4050_v61 = vmax.f32 %v1893_v2, %v1918_v28  ;;  %v1030_v54 = vadd.f32 %v2773_v35, %v3904_v47  ;;  %v1024_v10 = vpop.f32.mrb[27].mxu0 }
 0x111   :  { %v4052_v36 = vmax.f32 %v1993_v3, %v2018_v31  ;;  %v1530_v55 = vadd.f32 %v2923_v26, %v3904_v47  ;;  %v1524_v27 = vpop.f32.mrb[27].mxu1  ;;  %v1025_v15 = vadd.f32 %v3904_v47, %v1024_v10  ;;  %v4873_v26 = vmax.f32 %v3914_v51, 0.0 }
 0x112   :  { %4870 = vst [vmem:[#allocation5_spill] sm:$0xff] %v4050_v61  ;;  %v1525_v38 = vadd.f32 %v3904_v47, %v1524_v27  ;;  %v1920_v3 = vmax.f32 %v1030_v54, 0.0  ;;  %v4872_v54 = vmax.f32 %v3911_v50, 0.0  ;;  %v4094_v51 = vadd.f32 %v3904_v47, %v3891_v42 }
 0x113   :  { %4871 = vst [vmem:[#allocation6_spill] sm:$0xff] %v4052_v36  ;;  %v2020_v28 = vmax.f32 %v1530_v55, 0.0  ;;  %v1919_v35 = vmax.f32 %v1025_v15, 0.0  ;;  %v2776_v61 = vpop.f32.mrb[28].mxu0  ;;  %v4876_v42 = vmax.f32 %v3927_v56, 0.0  ;;  %v4880_v56 = vmax.f32 %v3951_v4, 0.0 }
 0x114   :  { %v2019_v36 = vmax.f32 %v1525_v38, 0.0  ;;  %v2926_v60 = vpop.f32.mrb[28].mxu1  ;;  %v4064_v62 = vmax.f32 %v1895_v16, %v1920_v3  ;;  %v1040_v10 = vadd.f32 %v2776_v61, %v3904_v47  ;;  %v1034_v14 = vpop.f32.mrb[29].mxu0  ;;  %v4090_v3 = vadd.f32 %v3904_v47, %v3889_v41 }
 0x115   :  { %v4066_v37 = vmax.f32 %v1995_v17, %v2020_v28  ;;  %v1540_v27 = vadd.f32 %v2926_v60, %v3904_v47  ;;  %v1534_v2 = vpop.f32.mrb[29].mxu1  ;;  %v4072_v55 = vmax.f32 %v4872_v54, %v1919_v35  ;;  %v1035_v38 = vadd.f32 %v3904_v47, %v1034_v14 }
 0x116   :  { %v4076_v15 = vmax.f32 %v4873_v26, %v2019_v36  ;;  %v1535_v16 = vadd.f32 %v3904_v47, %v1534_v2  ;;  %v4082_v17 = vadd.f32 %v3885_v39, %v3904_v47  ;;  %v4086_v60 = vadd.f32 %v3887_v40, %v3904_v47 }
 0x117   :  { %v1922_v61 = vmax.f32 %v1040_v10, 0.0  ;;  %v2022_v50 = vmax.f32 %v1540_v27, 0.0  ;;  %v1921_v14 = vmax.f32 %v1035_v38, 0.0  ;;  %v2779_v2 = vpop.f32.mrb[30].mxu0  ;;  %v4874_v39 = vmax.f32 %v3957_v6, 0.0 }
 0x118   :  { %v2021_v36 = vmax.f32 %v1535_v16, 0.0  ;;  %v2929_v28 = vpop.f32.mrb[30].mxu1  ;;  %v4875_v40 = vmax.f32 %v3960_v7, 0.0  ;;  %v1050_v10 = vadd.f32 %v2779_v2, %v3904_v47  ;;  %v1044_v27 = vpop.f32.mrb[31].mxu0  ;;  %v4877_v16 = vmax.f32 %v3930_v57, 0.0 }
 0x119   :  { %v4098_v26 = vmax.f32 %v4874_v39, %v1922_v61  ;;  %v1550_v41 = vadd.f32 %v2929_v28, %v3904_v47  ;;  %v1544_v54 = vpop.f32.mrb[31].mxu1  ;;  %v4108_v38 = vmax.f32 %v4876_v42, %v1921_v14  ;;  %v1045_v6 = vadd.f32 %v3904_v47, %v1044_v27 }
 0x11a   :  { %v4102_v35 = vmax.f32 %v4875_v40, %v2022_v50  ;;  %v4112_v31 = vmax.f32 %v4877_v16, %v2021_v36  ;;  %v1545_v7 = vadd.f32 %v3904_v47, %v1544_v54  ;;  %v1924_v2 = vmax.f32 %v1050_v10, 0.0 }
 0x11b   :  { %v2024_v28 = vmax.f32 %v1550_v41, 0.0  ;;  %v1923_v14 = vmax.f32 %v1045_v6, 0.0  ;;  %v2782_v42 = vpop.f32.mrb[32].mxu0  ;;  %v4878_v36 = vmax.f32 %v3971_v12, 0.0  ;;  %v4879_v27 = vmax.f32 %v3974_v13, 0.0 }
 0x11c   :  { %v2023_v40 = vmax.f32 %v1545_v7, 0.0  ;;  %v2932_v57 = vpop.f32.mrb[32].mxu1  ;;  %v1060_v50 = vadd.f32 %v2782_v42, %v3904_v47  ;;  %v1054_v41 = vpop.f32.mrb[33].mxu0  ;;  %v4881_v7 = vmax.f32 %v3954_v5, 0.0  ;;  %v4154_v5 = vadd.f32 %v3904_v47, %v3899_v46 }
 0x11d   :  { %v4122_v16 = vmax.f32 %v4878_v36, %v1924_v2  ;;  %v4126_v54 = vmax.f32 %v4879_v27, %v2024_v28  ;;  %v1560_v10 = vadd.f32 %v2932_v57, %v3904_v47  ;;  %v1554_v61 = vpop.f32.mrb[33].mxu1  ;;  %v4132_v6 = vmax.f32 %v4880_v56, %v1923_v14 }
 0x11e   :  { %v4136_v39 = vmax.f32 %v4881_v7, %v2023_v40  ;;  %v1055_v12 = vadd.f32 %v3904_v47, %v1054_v41  ;;  %v1555_v13 = vadd.f32 %v3904_v47, %v1554_v61  ;;  %v4142_v2 = vadd.f32 %v3893_v43, %v3904_v47 }
 0x11f   :  { %v4146_v28 = vadd.f32 %v3895_v44, %v3904_v47  ;;  %v1926_v42 = vmax.f32 %v1060_v50, 0.0  ;;  %v2026_v4 = vmax.f32 %v1560_v10, 0.0  ;;  %v4150_v56 = vadd.f32 %v3904_v47, %v3897_v45  ;;  %v2785_v40 = vpop.f32.mrb[34].mxu0 }
 0x120   :  { %v1925_v14 = vmax.f32 %v1055_v12, 0.0  ;;  %v2025_v61 = vmax.f32 %v1555_v13, 0.0  ;;  %v2935_v57 = vpop.f32.mrb[34].mxu1  ;;  %v4882_v43 = vmax.f32 %v3995_v24, 0.0  ;;  %v4883_v44 = vmax.f32 %v3998_v25, 0.0  ;;  %v1064_v10 = vpop.f32.mrb[35].mxu0 }
 0x121   :  { %v1070_v27 = vadd.f32 %v2785_v40, %v3904_v47  ;;  %v1570_v45 = vadd.f32 %v2935_v57, %v3904_v47  ;;  %v1564_v41 = vpop.f32.mrb[35].mxu1  ;;  %v4884_v46 = vmax.f32 %v3963_v8, 0.0  ;;  %v4885_v12 = vmax.f32 %v3966_v9, 0.0 }
 0x122   :  { %v4158_v36 = vmax.f32 %v4882_v43, %v1926_v42  ;;  %v4162_v50 = vmax.f32 %v4883_v44, %v2026_v4  ;;  %v1065_v24 = vadd.f32 %v3904_v47, %v1064_v10  ;;  %v1565_v25 = vadd.f32 %v3904_v47, %v1564_v41 }
 0x123   :  { %v4168_v7 = vmax.f32 %v4884_v46, %v1925_v14  ;;  %v4172_v13 = vmax.f32 %v4885_v12, %v2025_v61  ;;  %v1928_v40 = vmax.f32 %v1070_v27, 0.0  ;;  %v2028_v57 = vmax.f32 %v1570_v45, 0.0  ;;  %v2788_v46 = vpop.f32.mrb[36].mxu0 }
 0x124   :  { %v1927_v14 = vmax.f32 %v1065_v24, 0.0  ;;  %v2027_v44 = vmax.f32 %v1565_v25, 0.0  ;;  %v2938_v9 = vpop.f32.mrb[36].mxu1  ;;  %v4886_v61 = vmax.f32 %v4026_v32, 0.0  ;;  %v4887_v10 = vmax.f32 %v4030_v22, 0.0  ;;  %v1074_v45 = vpop.f32.mrb[37].mxu0 }
 0x125   :  { %v1080_v4 = vadd.f32 %v2788_v46, %v3904_v47  ;;  %v1580_v27 = vadd.f32 %v2938_v9, %v3904_v47  ;;  %v1574_v42 = vpop.f32.mrb[37].mxu1  ;;  %v4888_v8 = vmax.f32 %v3983_v18, 0.0  ;;  %v4889_v25 = vmax.f32 %v3986_v19, 0.0 }
 0x126   :  { %v4182_v12 = vmax.f32 %v4886_v61, %v1928_v40  ;;  %v4186_v41 = vmax.f32 %v4887_v10, %v2028_v57  ;;  %v1075_v32 = vadd.f32 %v3904_v47, %v1074_v45  ;;  %v1575_v22 = vadd.f32 %v3904_v47, %v1574_v42 }
 0x127   :  { %v4192_v24 = vmax.f32 %v4888_v8, %v1927_v14  ;;  %v4196_v43 = vmax.f32 %v4889_v25, %v2027_v44  ;;  %v4202_v40 = vadd.f32 %v3906_v48, %v3904_v47  ;;  %v4206_v57 = vadd.f32 %v3908_v49, %v3904_v47  ;;  %v2791_v44 = vpop.f32.mrb[38].mxu0 }
 0x128   :  { %v1930_v46 = vmax.f32 %v1080_v4, 0.0  ;;  %v2030_v18 = vmax.f32 %v1580_v27, 0.0  ;;  %v4210_v8 = vadd.f32 %v3904_v47, %v3916_v52  ;;  %v4214_v19 = vadd.f32 %v3904_v47, %v3918_v53  ;;  %v2941_v9 = vpop.f32.mrb[38].mxu1  ;;  %v1084_v27 = vpop.f32.mrb[39].mxu0 }
 0x129   :  { %v1929_v14 = vmax.f32 %v1075_v32, 0.0  ;;  %v2029_v42 = vmax.f32 %v1575_v22, 0.0  ;;  %v4890_v48 = vmax.f32 %v4044_v33, 0.0  ;;  %v4891_v49 = vmax.f32 %v4048_v34, 0.0  ;;  %v1584_v45 = vpop.f32.mrb[39].mxu1 }
 0x12a   :  { %v1090_v10 = vadd.f32 %v2791_v44, %v3904_v47  ;;  %v1590_v52 = vadd.f32 %v2941_v9, %v3904_v47  ;;  %v4892_v53 = vmax.f32 %v4008_v63, 0.0  ;;  %v4893_v32 = vmax.f32 %v4012_v29, 0.0 }
 0x12b   :  { %v4218_v61 = vmax.f32 %v4890_v48, %v1930_v46  ;;  %v4222_v4 = vmax.f32 %v4891_v49, %v2030_v18  ;;  %v1085_v33 = vadd.f32 %v3904_v47, %v1084_v27  ;;  %v1585_v34 = vadd.f32 %v3904_v47, %v1584_v45 }
 0x12c   :  { %v4228_v25 = vmax.f32 %v4892_v53, %v1929_v14  ;;  %v4232_v22 = vmax.f32 %v4893_v32, %v2029_v42  ;;  %v1932_v44 = vmax.f32 %v1090_v10, 0.0  ;;  %v2032_v9 = vmax.f32 %v1590_v52, 0.0  ;;  %v2794_v53 = vpop.f32.mrb[40].mxu0  ;;  %v2944_v29 = vpop.f32.mrb[40].mxu1 }
 0x12d   :  { %v1911_v48 = vmax.f32 %v4210_v8, 0.0  ;;  %v2011_v63 = vmax.f32 %v4214_v19, 0.0  ;;  %v1931_v14 = vmax.f32 %v1085_v33, 0.0  ;;  %v2031_v49 = vmax.f32 %v1585_v34, 0.0  ;;  %v1094_v52 = vpop.f32.mrb[41].mxu0  ;;  %v1594_v8 = vpop.f32.mrb[41].mxu1 }
 0x12e   :  { %v4894_v42 = vmax.f32 %v4090_v3, 0.0  ;;  %v4895_v27 = vmax.f32 %v4094_v51, 0.0  ;;  %v1100_v18 = vadd.f32 %v2794_v53, %v3904_v47  ;;  %v1600_v10 = vadd.f32 %v2944_v29, %v3904_v47 }
 0x12f   :  { %v4896_v19 = vmax.f32 %v4034_v30, 0.0  ;;  %v4897_v34 = vmax.f32 %v4038_v23, 0.0  ;;  %v1095_v3 = vadd.f32 %v3904_v47, %v1094_v52  ;;  %v1595_v51 = vadd.f32 %v3904_v47, %v1594_v8 }
 0x130   :  { %v4242_v32 = vmax.f32 %v4894_v42, %v1932_v44  ;;  %v4246_v45 = vmax.f32 %v4895_v27, %v2032_v9  ;;  %v4262_v44 = vadd.f32 %v3932_v58, %v3904_v47  ;;  %v4266_v9 = vadd.f32 %v3934_v59, %v3904_v47  ;;  %v2797_v42 = vpop.f32.mrb[42].mxu0  ;;  %v2947_v27 = vpop.f32.mrb[42].mxu1 }
 0x131   :  { %v4252_v33 = vmax.f32 %v4896_v19, %v1931_v14  ;;  %v4256_v46 = vmax.f32 %v4897_v34, %v2031_v49  ;;  %v1934_v53 = vmax.f32 %v1100_v18, 0.0  ;;  %v2034_v30 = vmax.f32 %v1600_v10, 0.0  ;;  %v1604_v19 = vpop.f32.mrb[43].mxu1 }
 0x132   :  { %v995_v14 = vadd.f32 %v3904_v47, %v3944_v0  ;;  %v1495_v23 = vadd.f32 %v3904_v47, %v3946_v1  ;;  %v1933_v49 = vmax.f32 %v1095_v3, 0.0  ;;  %v2033_v29 = vmax.f32 %v1595_v51, 0.0  ;;  %v1104_v0 = vpop.f32.mrb[43].mxu0 }
 0x133   :  { %v4898_v52 = vmax.f32 %v4150_v56, 0.0  ;;  %v4899_v8 = vmax.f32 %v4154_v5, 0.0  ;;  %v1110_v18 = vadd.f32 %v2797_v42, %v3904_v47  ;;  %v1610_v10 = vadd.f32 %v2947_v27, %v3904_v47 }
 0x134   :  { %v4901_v1 = vmax.f32 %v4082_v17, 0.0  ;;  %v4902_v3 = vmax.f32 %v4086_v60, 0.0  ;;  %v1105_v56 = vadd.f32 %v3904_v47, %v1104_v0  ;;  %v1605_v5 = vadd.f32 %v3904_v47, %v1604_v19 }
 0x135   :  { %v4274_v58 = vmax.f32 %v4898_v52, %v1934_v53  ;;  %v4278_v59 = vmax.f32 %v4899_v8, %v2034_v30  ;;  %v1914_v53 = vmax.f32 %v4262_v44, 0.0  ;;  %v2014_v30 = vmax.f32 %v4266_v9, 0.0  ;;  %v2950_v8 = vpop.f32.mrb[44].mxu1 }
 0x136   :  { %v4284_v34 = vmax.f32 %v4901_v1, %v1933_v49  ;;  %v4288_v51 = vmax.f32 %v4902_v3, %v2033_v29  ;;  %v1936_v42 = vmax.f32 %v1110_v18, 0.0  ;;  %v2036_v27 = vmax.f32 %v1610_v10, 0.0  ;;  %v2800_v29 = vpop.f32.mrb[44].mxu0  ;;  %v1614_v10 = vpop.f32.mrb[45].mxu1 }
 0x137   :  { %4900 = vst [vmem:[#allocation7_spill] sm:$0xff] %v4278_v59  ;;  %v1005_v52 = vadd.f32 %v3904_v47, %v3988_v20  ;;  %v1505_v17 = vadd.f32 %v3904_v47, %v3990_v21  ;;  %v1935_v49 = vmax.f32 %v1105_v56, 0.0  ;;  %v2035_v60 = vmax.f32 %v1605_v5, 0.0  ;;  %v1114_v18 = vpop.f32.mrb[45].mxu0 }
 0x138   :  { %v4298_v1 = vmax.f32 %v1911_v48, %v1936_v42  ;;  %v4300_v0 = vmax.f32 %v2011_v63, %v2036_v27  ;;  %v1120_v44 = vadd.f32 %v2800_v29, %v3904_v47  ;;  %v1620_v9 = vadd.f32 %v2950_v8, %v3904_v47  ;;  %v2803_v59 = vpop.f32.mrb[46].mxu0 }
 0x139   :  { %v4905_v19 = vmax.f32 %v4142_v2, 0.0  ;;  %v4906_v21 = vmax.f32 %v4146_v28, 0.0  ;;  %v1115_v56 = vadd.f32 %v3904_v47, %v1114_v18  ;;  %v1615_v48 = vadd.f32 %v3904_v47, %v1614_v10  ;;  %v2953_v2 = vpop.f32.mrb[46].mxu1  ;;  %v1124_v18 = vpop.f32.mrb[47].mxu0 }
 0x13a   :  { %4903 = vst [vmem:[#allocation8_spill] sm:$0xff] %v4298_v1  ;;  %4904 = vst [vmem:[#allocation9_spill] sm:$0xff] %v4300_v0  ;;  %v1913_v63 = vmax.f32 %v995_v14, 0.0  ;;  %v2013_v5 = vmax.f32 %v1495_v23, 0.0  ;;  %v1938_v42 = vmax.f32 %v1120_v44, 0.0  ;;  %v2038_v27 = vmax.f32 %v1620_v9, 0.0 }
 0x13b   :  { %v4306_v20 = vmax.f32 %v4905_v19, %v1935_v49  ;;  %v4310_v3 = vmax.f32 %v4906_v21, %v2035_v60  ;;  %v1915_v29 = vmax.f32 %v1005_v52, 0.0  ;;  %v2015_v8 = vmax.f32 %v1505_v17, 0.0  ;;  %v1624_v10 = vpop.f32.mrb[47].mxu1 }
 0x13c   :  { %v1937_v0 = vmax.f32 %v1115_v56, 0.0  ;;  %v2037_v1 = vmax.f32 %v1615_v48, 0.0  ;;  %v4314_v49 = vmax.f32 %v1913_v63, %v1938_v42  ;;  %v4316_v19 = vmax.f32 %v2013_v5, %v2038_v27  ;;  %v4912_v5 = vld [vmem:[#allocation3_spill] sm:$0xff]  ;;  %v2806_v27 = vpop.f32.mrb[48].mxu0 }
 0x13d   :  { %v1130_v28 = vadd.f32 %v2803_v59, %v3904_v47  ;;  %v1630_v60 = vadd.f32 %v2953_v2, %v3904_v47  ;;  %v4908_v14 = vmax.f32 %v4202_v40, 0.0  ;;  %v4909_v52 = vmax.f32 %v4206_v57, 0.0  ;;  %v4910_v59 = vld [vmem:[#allocation4_spill] sm:$0xff]  ;;  %v4911_v40 = vld [vmem:[#allocation2_spill] sm:$0xff]  ;;  %v2956_v2 = vpop.f32.mrb[48].mxu1 }
 0x13e   :  { %4907 = vst [vmem:[#allocation10_spill] sm:$0xff] %v4316_v19  ;;  %v1125_v44 = vadd.f32 %v3904_v47, %v1124_v18  ;;  %v1625_v9 = vadd.f32 %v3904_v47, %v1624_v10  ;;  %v1015_v21 = vadd.f32 %v3904_v47, %v4018_v11  ;;  %v1515_v56 = vadd.f32 %v3904_v47, %v4910_v59 }
 0x13f   :  { %v4322_v23 = vmax.f32 %v4908_v14, %v1937_v0  ;;  %v4326_v17 = vmax.f32 %v4909_v52, %v2037_v1  ;;  %v1940_v48 = vmax.f32 %v1130_v28, 0.0  ;;  %v2040_v63 = vmax.f32 %v1630_v60, 0.0  ;;  %v1134_v28 = vpop.f32.mrb[49].mxu0  ;;  %v1634_v60 = vpop.f32.mrb[49].mxu1 }
 0x140   :  { %v1010_v0 = vadd.f32 %v4911_v40, %v3904_v47  ;;  %v1510_v57 = vadd.f32 %v4912_v5, %v3904_v47  ;;  %v1939_v1 = vmax.f32 %v1125_v44, 0.0  ;;  %v2039_v42 = vmax.f32 %v1625_v9, 0.0 }
 0x141   :  { %v4338_v18 = vmax.f32 %v1915_v29, %v1940_v48  ;;  %v4340_v10 = vmax.f32 %v2015_v8, %v2040_v63  ;;  %v1140_v11 = vadd.f32 %v2806_v27, %v3904_v47  ;;  %v1640_v14 = vadd.f32 %v2956_v2, %v3904_v47  ;;  %v2959_v2 = vpop.f32.mrb[50].mxu1 }
 0x142   :  { %v4344_v52 = vmax.f32 %v1914_v53, %v1939_v1  ;;  %v4346_v59 = vmax.f32 %v2014_v30, %v2039_v42  ;;  %v1135_v40 = vadd.f32 %v3904_v47, %v1134_v28  ;;  %v1635_v44 = vadd.f32 %v3904_v47, %v1634_v60  ;;  %v1644_v28 = vpop.f32.mrb[51].mxu1 }
 0x143   :  { %4913 = vst [vmem:[#allocation4_spill] sm:$0xff] %v4338_v18  ;;  %4914 = vst [vmem:[#allocation2_spill] sm:$0xff] %v4340_v10  ;;  %v1917_v9 = vmax.f32 %v1015_v21, 0.0  ;;  %v2017_v5 = vmax.f32 %v1515_v56, 0.0  ;;  %v1942_v29 = vmax.f32 %v1140_v11, 0.0  ;;  %v2042_v48 = vmax.f32 %v1640_v14, 0.0 }
 0x144   :  { %v1916_v8 = vmax.f32 %v1010_v0, 0.0  ;;  %v2016_v63 = vmax.f32 %v1510_v57, 0.0  ;;  %v1941_v10 = vmax.f32 %v1135_v40, 0.0  ;;  %v2041_v27 = vmax.f32 %v1635_v44, 0.0  ;;  %v2809_v18 = vpop.f32.mrb[50].mxu0 }
 0x145   :  { %v4350_v19 = vmax.f32 %v1917_v9, %v1942_v29  ;;  %v4352_v53 = vmax.f32 %v2017_v5, %v2042_v48  ;;  %v1150_v30 = vadd.f32 %v2809_v18, %v3904_v47  ;;  %v1650_v1 = vadd.f32 %v2959_v2, %v3904_v47  ;;  %v1144_v42 = vpop.f32.mrb[51].mxu0  ;;  %v2962_v9 = vpop.f32.mrb[52].mxu1  ;;  %v4916_v2 = vld [vmem:[#allocation6_spill] sm:$0xff] }
 0x146   :  { %v4356_v21 = vmax.f32 %v1916_v8, %v1941_v10  ;;  %v4358_v56 = vmax.f32 %v2016_v63, %v2041_v27  ;;  %v1145_v0 = vadd.f32 %v3904_v47, %v1144_v42  ;;  %v1645_v57 = vadd.f32 %v3904_v47, %v1644_v28  ;;  %v2812_v44 = vpop.f32.mrb[52].mxu0  ;;  %v1654_v8 = vpop.f32.mrb[53].mxu1  ;;  %v4915_v63 = vld [vmem:[#allocation5_spill] sm:$0xff] }
 0x147   :  { %v1944_v11 = vmax.f32 %v1150_v30, 0.0  ;;  %v2044_v14 = vmax.f32 %v1650_v1, 0.0  ;;  %v1160_v10 = vadd.f32 %v2812_v44, %v3904_v47  ;;  %v1660_v29 = vadd.f32 %v2962_v9, %v3904_v47  ;;  %v1154_v48 = vpop.f32.mrb[53].mxu0 }
 0x148   :  { %v1943_v60 = vmax.f32 %v1145_v0, 0.0  ;;  %v2043_v40 = vmax.f32 %v1645_v57, 0.0  ;;  %v1155_v1 = vadd.f32 %v3904_v47, %v1154_v48  ;;  %v2815_v57 = vpop.f32.mrb[54].mxu0 }
 0x149   :  { %v4363_v18 = vmax.f32 %v4072_v55, %v1944_v11  ;;  %v4366_v5 = vmax.f32 %v4076_v15, %v2044_v14  ;;  %v1655_v55 = vadd.f32 %v3904_v47, %v1654_v8  ;;  %v1946_v42 = vmax.f32 %v1160_v10, 0.0  ;;  %v2965_v11 = vpop.f32.mrb[54].mxu1  ;;  %v1164_v9 = vpop.f32.mrb[55].mxu0 }
 0x14a   :  { %v4371_v27 = vmax.f32 %v4915_v63, %v1943_v60  ;;  %v4374_v30 = vmax.f32 %v4916_v2, %v2043_v40  ;;  %v2046_v28 = vmax.f32 %v1660_v29, 0.0  ;;  %v1945_v15 = vmax.f32 %v1155_v1, 0.0  ;;  %v1664_v48 = vpop.f32.mrb[55].mxu1 }
 0x14b   :  { %v2045_v0 = vmax.f32 %v1655_v55, 0.0  ;;  %v4379_v14 = vmax.f32 %v4108_v38, %v1946_v42  ;;  %v1170_v60 = vadd.f32 %v2815_v57, %v3904_v47  ;;  %v1670_v40 = vadd.f32 %v2965_v11, %v3904_v47  ;;  %v2818_v55 = vpop.f32.mrb[56].mxu0 }
 0x14c   :  { %v4382_v44 = vmax.f32 %v4112_v31, %v2046_v28  ;;  %v4387_v8 = vmax.f32 %v4064_v62, %v1945_v15  ;;  %v1165_v29 = vadd.f32 %v3904_v47, %v1164_v9  ;;  %v1665_v38 = vadd.f32 %v3904_v47, %v1664_v48  ;;  %v2968_v42 = vpop.f32.mrb[56].mxu1  ;;  %v1174_v15 = vpop.f32.mrb[57].mxu0 }
 0x14d   :  { %v4390_v10 = vmax.f32 %v4066_v37, %v2045_v0  ;;  %v1948_v63 = vmax.f32 %v1170_v60, 0.0  ;;  %v2048_v2 = vmax.f32 %v1670_v40, 0.0  ;;  %v1180_v62 = vadd.f32 %v2818_v55, %v3904_v47  ;;  %v1674_v0 = vpop.f32.mrb[57].mxu1 }
 0x14e   :  { %v1947_v31 = vmax.f32 %v1165_v29, 0.0  ;;  %v2047_v1 = vmax.f32 %v1665_v38, 0.0  ;;  %v1680_v37 = vadd.f32 %v2968_v42, %v3904_v47  ;;  %v1175_v40 = vadd.f32 %v3904_v47, %v1174_v15 }
 0x14f   :  { %v4395_v28 = vmax.f32 %v4132_v6, %v1948_v63  ;;  %v4398_v57 = vmax.f32 %v4136_v39, %v2048_v2  ;;  %v1675_v6 = vadd.f32 %v3904_v47, %v1674_v0  ;;  %v1950_v9 = vmax.f32 %v1180_v62, 0.0  ;;  %v2821_v38 = vpop.f32.mrb[58].mxu0 }
 0x150   :  { %v4403_v11 = vmax.f32 %v4098_v26, %v1947_v31  ;;  %v4406_v60 = vmax.f32 %v4102_v35, %v2047_v1  ;;  %v2050_v48 = vmax.f32 %v1680_v37, 0.0  ;;  %v1949_v39 = vmax.f32 %v1175_v40, 0.0  ;;  %v2971_v63 = vpop.f32.mrb[58].mxu1  ;;  %v1184_v31 = vpop.f32.mrb[59].mxu0 }
 0x151   :  { %v2049_v29 = vmax.f32 %v1675_v6, 0.0  ;;  %v4411_v2 = vmax.f32 %v4168_v7, %v1950_v9  ;;  %v1190_v26 = vadd.f32 %v2821_v38, %v3904_v47  ;;  %v1690_v35 = vadd.f32 %v2971_v63, %v3904_v47  ;;  %v1684_v1 = vpop.f32.mrb[59].mxu1 }
 0x152   :  { %v4414_v55 = vmax.f32 %v4172_v13, %v2050_v48  ;;  %v4419_v42 = vmax.f32 %v4122_v16, %v1949_v39  ;;  %v1185_v37 = vadd.f32 %v3904_v47, %v1184_v31  ;;  %v1685_v7 = vadd.f32 %v3904_v47, %v1684_v1 }
 0x153   :  { %v4422_v62 = vmax.f32 %v4126_v54, %v2049_v29  ;;  %v1952_v15 = vmax.f32 %v1190_v26, 0.0  ;;  %v2052_v0 = vmax.f32 %v1690_v35, 0.0  ;;  %v2824_v6 = vpop.f32.mrb[60].mxu0 }
 0x154   :  { %v1951_v13 = vmax.f32 %v1185_v37, 0.0  ;;  %v2051_v40 = vmax.f32 %v1685_v7, 0.0  ;;  %v2974_v9 = vpop.f32.mrb[60].mxu1  ;;  %v1200_v16 = vadd.f32 %v2824_v6, %v3904_v47  ;;  %v1194_v39 = vpop.f32.mrb[61].mxu0 }
 0x155   :  { %v4427_v48 = vmax.f32 %v4192_v24, %v1952_v15  ;;  %v4430_v38 = vmax.f32 %v4196_v43, %v2052_v0  ;;  %v1700_v54 = vadd.f32 %v2974_v9, %v3904_v47  ;;  %v1694_v29 = vpop.f32.mrb[61].mxu1  ;;  %v1195_v35 = vadd.f32 %v3904_v47, %v1194_v39 }
 0x156   :  { %v4435_v63 = vmax.f32 %v4158_v36, %v1951_v13  ;;  %v4438_v26 = vmax.f32 %v4162_v50, %v2051_v40  ;;  %v1695_v24 = vadd.f32 %v3904_v47, %v1694_v29  ;;  %v1954_v31 = vmax.f32 %v1200_v16, 0.0 }
 0x157   :  { %v2054_v1 = vmax.f32 %v1700_v54, 0.0  ;;  %v1953_v43 = vmax.f32 %v1195_v35, 0.0  ;;  %v2827_v7 = vpop.f32.mrb[62].mxu0 }
 0x158   :  { %v2053_v37 = vmax.f32 %v1695_v24, 0.0  ;;  %v2977_v15 = vpop.f32.mrb[62].mxu1  ;;  %v4443_v0 = vmax.f32 %v4228_v25, %v1954_v31  ;;  %v1210_v36 = vadd.f32 %v2827_v7, %v3904_v47  ;;  %v1204_v13 = vpop.f32.mrb[63].mxu0 }
 0x159   :  { %v4446_v6 = vmax.f32 %v4232_v22, %v2054_v1  ;;  %v1710_v50 = vadd.f32 %v2977_v15, %v3904_v47  ;;  %v1704_v40 = vpop.f32.mrb[63].mxu1  ;;  %v4451_v9 = vmax.f32 %v4182_v12, %v1953_v43  ;;  %v1205_v54 = vadd.f32 %v3904_v47, %v1204_v13 }
 0x15a   :  { %v4454_v16 = vmax.f32 %v4186_v41, %v2053_v37  ;;  %v1705_v25 = vadd.f32 %v3904_v47, %v1704_v40  ;;  %v1956_v39 = vmax.f32 %v1210_v36, 0.0 }
 0x15b   :  { %v2056_v29 = vmax.f32 %v1710_v50, 0.0  ;;  %v1955_v22 = vmax.f32 %v1205_v54, 0.0  ;;  %v2830_v24 = vpop.f32.mrb[64].mxu0 }
 0x15c   :  { %v2055_v35 = vmax.f32 %v1705_v25, 0.0  ;;  %v2980_v31 = vpop.f32.mrb[64].mxu1  ;;  %v4459_v1 = vmax.f32 %v4252_v33, %v1956_v39  ;;  %v1220_v12 = vadd.f32 %v2830_v24, %v3904_v47  ;;  %v1214_v43 = vpop.f32.mrb[65].mxu0 }
 0x15d   :  { %v4462_v7 = vmax.f32 %v4256_v46, %v2056_v29  ;;  %v1720_v41 = vadd.f32 %v2980_v31, %v3904_v47  ;;  %v1714_v37 = vpop.f32.mrb[65].mxu1  ;;  %v4467_v15 = vmax.f32 %v4218_v61, %v1955_v22  ;;  %v1215_v50 = vadd.f32 %v3904_v47, %v1214_v43 }
 0x15e   :  { %v4470_v36 = vmax.f32 %v4222_v4, %v2055_v35  ;;  %v1715_v33 = vadd.f32 %v3904_v47, %v1714_v37  ;;  %v1958_v13 = vmax.f32 %v1220_v12, 0.0 }
 0x15f   :  { %v2058_v40 = vmax.f32 %v1720_v41, 0.0  ;;  %v1957_v46 = vmax.f32 %v1215_v50, 0.0  ;;  %v2833_v25 = vpop.f32.mrb[66].mxu0 }
 0x160   :  { %v2057_v54 = vmax.f32 %v1715_v33, 0.0  ;;  %v2983_v39 = vpop.f32.mrb[66].mxu1  ;;  %v4475_v29 = vmax.f32 %v4284_v34, %v1958_v13  ;;  %v1230_v61 = vadd.f32 %v2833_v25, %v3904_v47  ;;  %v1224_v22 = vpop.f32.mrb[67].mxu0 }
 0x161   :  { %v4478_v24 = vmax.f32 %v4288_v51, %v2058_v40  ;;  %v1730_v4 = vadd.f32 %v2983_v39, %v3904_v47  ;;  %v1724_v35 = vpop.f32.mrb[67].mxu1  ;;  %v4483_v31 = vmax.f32 %v4242_v32, %v1957_v46  ;;  %v1225_v41 = vadd.f32 %v3904_v47, %v1224_v22 }
 0x162   :  { %v4486_v12 = vmax.f32 %v4246_v45, %v2057_v54  ;;  %v1725_v34 = vadd.f32 %v3904_v47, %v1724_v35  ;;  %v1960_v43 = vmax.f32 %v1230_v61, 0.0  ;;  %v4917_v61 = vld [vmem:[#allocation7_spill] sm:$0xff] }
 0x163   :  { %v2060_v37 = vmax.f32 %v1730_v4, 0.0  ;;  %v1959_v51 = vmax.f32 %v1225_v41, 0.0  ;;  %v2836_v33 = vpop.f32.mrb[68].mxu0 }
 0x164   :  { %v2059_v50 = vmax.f32 %v1725_v34, 0.0  ;;  %v2986_v13 = vpop.f32.mrb[68].mxu1  ;;  %v4491_v40 = vmax.f32 %v4306_v20, %v1960_v43  ;;  %v1240_v32 = vadd.f32 %v2836_v33, %v3904_v47  ;;  %v1234_v46 = vpop.f32.mrb[69].mxu0 }
 0x165   :  { %v4494_v25 = vmax.f32 %v4310_v3, %v2060_v37  ;;  %v1740_v45 = vadd.f32 %v2986_v13, %v3904_v47  ;;  %v1734_v54 = vpop.f32.mrb[69].mxu1  ;;  %v4499_v39 = vmax.f32 %v4274_v58, %v1959_v51  ;;  %v1235_v22 = vadd.f32 %v3904_v47, %v1234_v46 }
 0x166   :  { %v4502_v4 = vmax.f32 %v4917_v61, %v2059_v50  ;;  %v1735_v20 = vadd.f32 %v3904_v47, %v1734_v54  ;;  %v1962_v35 = vmax.f32 %v1240_v32, 0.0  ;;  %v4920_v61 = vld [vmem:[#allocation8_spill] sm:$0xff]  ;;  %v4921_v32 = vld [vmem:[#allocation9_spill] sm:$0xff] }
 0x167   :  { %v2062_v41 = vmax.f32 %v1740_v45, 0.0  ;;  %v1961_v3 = vmax.f32 %v1235_v22, 0.0  ;;  %v2839_v43 = vpop.f32.mrb[70].mxu0 }
 0x168   :  { %v2061_v34 = vmax.f32 %v1735_v20, 0.0  ;;  %v2989_v37 = vpop.f32.mrb[70].mxu1  ;;  %v4507_v33 = vmax.f32 %v4322_v23, %v1962_v35  ;;  %v1250_v58 = vadd.f32 %v2839_v43, %v3904_v47  ;;  %v1244_v50 = vpop.f32.mrb[71].mxu0 }
 0x169   :  { %v4510_v13 = vmax.f32 %v4326_v17, %v2062_v41  ;;  %v1750_v51 = vadd.f32 %v2989_v37, %v3904_v47  ;;  %v1744_v46 = vpop.f32.mrb[71].mxu1  ;;  %v4515_v54 = vmax.f32 %v4920_v61, %v1961_v3  ;;  %v1245_v22 = vadd.f32 %v3904_v47, %v1244_v50 }
 0x16a   :  { %4918 = vst [vmem:[#allocation3_spill] sm:$0xff] %v4507_v33  ;;  %v4518_v45 = vmax.f32 %v4921_v32, %v2061_v34  ;;  %v1745_v23 = vadd.f32 %v3904_v47, %v1744_v46  ;;  %v1964_v20 = vmax.f32 %v1250_v58, 0.0  ;;  %v4923_v58 = vld [vmem:[#allocation10_spill] sm:$0xff] }
 0x16b   :  { %4919 = vst [vmem:[#allocation5_spill] sm:$0xff] %v4510_v13  ;;  %v2064_v35 = vmax.f32 %v1750_v51, 0.0  ;;  %v1963_v17 = vmax.f32 %v1245_v22, 0.0  ;;  %v2842_v13 = vpop.f32.mrb[72].mxu0 }
 0x16c   :  { %v2063_v41 = vmax.f32 %v1745_v23, 0.0  ;;  %v2992_v43 = vpop.f32.mrb[72].mxu1  ;;  %v4523_v37 = vmax.f32 %v4344_v52, %v1964_v20  ;;  %v1260_v3 = vadd.f32 %v2842_v13, %v3904_v47  ;;  %v1254_v61 = vpop.f32.mrb[73].mxu0 }
 0x16d   :  { %v4526_v33 = vmax.f32 %v4346_v59, %v2064_v35  ;;  %v1760_v34 = vadd.f32 %v2992_v43, %v3904_v47  ;;  %v1754_v50 = vpop.f32.mrb[73].mxu1  ;;  %v4531_v46 = vmax.f32 %v4314_v49, %v1963_v17  ;;  %v1255_v32 = vadd.f32 %v3904_v47, %v1254_v61 }
 0x16e   :  { %v4534_v51 = vmax.f32 %v4923_v58, %v2063_v41  ;;  %v1755_v52 = vadd.f32 %v3904_v47, %v1754_v50  ;;  %v1966_v22 = vmax.f32 %v1260_v3, 0.0  ;;  %v4926_v58 = vld [vmem:[#allocation4_spill] sm:$0xff]  ;;  %v4927_v3 = vld [vmem:[#allocation2_spill] sm:$0xff] }
 0x16f   :  { %4922 = vst [vmem:[#allocation6_spill] sm:$0xff] %v4526_v33  ;;  %v2066_v23 = vmax.f32 %v1760_v34, 0.0  ;;  %v1965_v59 = vmax.f32 %v1255_v32, 0.0  ;;  %v2845_v35 = vpop.f32.mrb[74].mxu0 }
 0x170   :  { %v2065_v20 = vmax.f32 %v1755_v52, 0.0  ;;  %v2995_v13 = vpop.f32.mrb[74].mxu1  ;;  %v4539_v43 = vmax.f32 %v4356_v21, %v1966_v22  ;;  %v1270_v49 = vadd.f32 %v2845_v35, %v3904_v47  ;;  %v1264_v41 = vpop.f32.mrb[75].mxu0  ;;  %v4555_v21 = vld [vmem:[%s4865_s2] ss:$0 sm:$0xff] }
 0x171   :  { %v4542_v33 = vmax.f32 %v4358_v56, %v2066_v23  ;;  %v1770_v17 = vadd.f32 %v2995_v13, %v3904_v47  ;;  %v1764_v61 = vpop.f32.mrb[75].mxu1  ;;  %v4547_v50 = vmax.f32 %v4926_v58, %v1965_v59  ;;  %v1265_v56 = vadd.f32 %v4555_v21, %v1264_v41 }
 0x172   :  { %4924 = vst [vmem:[#allocation7_spill] sm:$0xff] %v4539_v43  ;;  %v4550_v34 = vmax.f32 %v4927_v3, %v2065_v20  ;;  %v1765_v32 = vadd.f32 %v4555_v21, %v1764_v61  ;;  %v1968_v52 = vmax.f32 %v1270_v49, 0.0 }
 0x173   :  { %4925 = vst [vmem:[#allocation8_spill] sm:$0xff] %v4542_v33  ;;  %v2068_v22 = vmax.f32 %v1770_v17, 0.0  ;;  %v1967_v47 = vmax.f32 %v1265_v56, 0.0  ;;  %v2848_v35 = vpop.f32.mrb[76].mxu0 }
 0x174   :  { %v2067_v23 = vmax.f32 %v1765_v32, 0.0  ;;  %v2998_v59 = vpop.f32.mrb[76].mxu1  ;;  %v2143_v13 = vmax.f32 %v4371_v27, %v1968_v52  ;;  %v1280_v58 = vadd.f32 %v4555_v21, %v2848_v35  ;;  %v1274_v33 = vpop.f32.mrb[77].mxu0 }
 0x175   :  { %v2244_v20 = vmax.f32 %v4374_v30, %v2068_v22  ;;  %v1780_v3 = vadd.f32 %v4555_v21, %v2998_v59  ;;  %v1774_v43 = vpop.f32.mrb[77].mxu1  ;;  %v4564_v41 = vmax.f32 %v4350_v19, %v1967_v47  ;;  %v1275_v17 = vadd.f32 %v4555_v21, %v1274_v33 }
 0x176   :  { %v4567_v49 = vmax.f32 %v4352_v53, %v2067_v23  ;;  %v1775_v61 = vadd.f32 %v4555_v21, %v1774_v43  ;;  %2169 = vst.msk [vmem:[%s4866_s3] sm:$0xff] %vm2168_vm4, %v2143_v13  ;;  %v1970_v27 = vmax.f32 %v1280_v58, 0.0 }
 0x177   :  { %2501 = vst.msk [vmem:[%s4866_s3 + $0xc8] sm:$0xff] %vm2168_vm4, %v2244_v20  ;;  %v2070_v19 = vmax.f32 %v1780_v3, 0.0  ;;  %v1969_v30 = vmax.f32 %v1275_v17, 0.0  ;;  %v2851_v53 = vpop.f32.mrb[78].mxu0 }
 0x178   :  { %v2069_v56 = vmax.f32 %v1775_v61, 0.0  ;;  %v3001_v32 = vpop.f32.mrb[78].mxu1  ;;  %v2145_v33 = vmax.f32 %v4387_v8, %v1970_v27  ;;  %v1290_v52 = vadd.f32 %v4555_v21, %v2851_v53  ;;  %v1284_v47 = vpop.f32.mrb[79].mxu0 }
 0x179   :  { %v2246_v43 = vmax.f32 %v4390_v10, %v2070_v19  ;;  %v1790_v22 = vadd.f32 %v4555_v21, %v3001_v32  ;;  %v1784_v23 = vpop.f32.mrb[79].mxu1  ;;  %v2144_v35 = vmax.f32 %v4363_v18, %v1969_v30  ;;  %v1285_v13 = vadd.f32 %v4555_v21, %v1284_v47 }
 0x17a   :  { %v2245_v59 = vmax.f32 %v4366_v5, %v2069_v56  ;;  %v1785_v20 = vadd.f32 %v4555_v21, %v1784_v23  ;;  %2171 = vst.msk [vmem:[%s4866_s3 + $0x10] sm:$0xff] %vm2168_vm4, %v2145_v33  ;;  %v1972_v8 = vmax.f32 %v1290_v52, 0.0 }
 0x17b   :  { %2503 = vst.msk [vmem:[%s4866_s3 + $0xd8] sm:$0xff] %vm2168_vm4, %v2246_v43  ;;  %v2072_v10 = vmax.f32 %v1790_v22, 0.0  ;;  %2170 = vst.msk [vmem:[%s4866_s3 + $0x8] sm:$0xff] %vm2168_vm4, %v2144_v35  ;;  %v1971_v18 = vmax.f32 %v1285_v13, 0.0  ;;  %v2854_v58 = vpop.f32.mrb[80].mxu0 }
 0x17c   :  { %2502 = vst.msk [vmem:[%s4866_s3 + $0xd0] sm:$0xff] %vm2168_vm4, %v2245_v59  ;;  %v2071_v5 = vmax.f32 %v1785_v20, 0.0  ;;  %v3004_v3 = vpop.f32.mrb[80].mxu1  ;;  %v2147_v17 = vmax.f32 %v4403_v11, %v1972_v8  ;;  %v1300_v27 = vadd.f32 %v4555_v21, %v2854_v58  ;;  %v1294_v30 = vpop.f32.mrb[81].mxu0 }
 0x17d   :  { %v2248_v61 = vmax.f32 %v4406_v60, %v2072_v10  ;;  %v1800_v19 = vadd.f32 %v4555_v21, %v3004_v3  ;;  %v1794_v56 = vpop.f32.mrb[81].mxu1  ;;  %v2146_v53 = vmax.f32 %v4379_v14, %v1971_v18  ;;  %v1295_v33 = vadd.f32 %v4555_v21, %v1294_v30 }
 0x17e   :  { %v2247_v32 = vmax.f32 %v4382_v44, %v2071_v5  ;;  %v1795_v43 = vadd.f32 %v4555_v21, %v1794_v56  ;;  %2173 = vst.msk [vmem:[%s4866_s3 + $0x20] sm:$0xff] %vm2168_vm4, %v2147_v17  ;;  %v1974_v11 = vmax.f32 %v1300_v27, 0.0 }
 0x17f   :  { %2505 = vst.msk [vmem:[%s4866_s3 + $0xe8] sm:$0xff] %vm2168_vm4, %v2248_v61  ;;  %v2074_v60 = vmax.f32 %v1800_v19, 0.0  ;;  %2172 = vst.msk [vmem:[%s4866_s3 + $0x18] sm:$0xff] %vm2168_vm4, %v2146_v53  ;;  %v1973_v14 = vmax.f32 %v1295_v33, 0.0  ;;  %v2857_v52 = vpop.f32.mrb[82].mxu0 }
 0x180   :  { %2504 = vst.msk [vmem:[%s4866_s3 + $0xe0] sm:$0xff] %vm2168_vm4, %v2247_v32  ;;  %v2073_v44 = vmax.f32 %v1795_v43, 0.0  ;;  %v3007_v22 = vpop.f32.mrb[82].mxu1  ;;  %v2149_v47 = vmax.f32 %v4419_v42, %v1974_v11  ;;  %v1310_v35 = vadd.f32 %v4555_v21, %v2857_v52  ;;  %v1304_v13 = vpop.f32.mrb[83].mxu0 }
 0x181   :  { %v2250_v23 = vmax.f32 %v4422_v62, %v2074_v60  ;;  %v1810_v59 = vadd.f32 %v4555_v21, %v3007_v22  ;;  %v1804_v20 = vpop.f32.mrb[83].mxu1  ;;  %v2148_v8 = vmax.f32 %v4395_v28, %v1973_v14  ;;  %v1305_v18 = vadd.f32 %v4555_v21, %v1304_v13 }
 0x182   :  { %v2249_v10 = vmax.f32 %v4398_v57, %v2073_v44  ;;  %v1805_v5 = vadd.f32 %v4555_v21, %v1804_v20  ;;  %2175 = vst.msk [vmem:[%s4866_s3 + $0x30] sm:$0xff] %vm2168_vm4, %v2149_v47  ;;  %v1976_v42 = vmax.f32 %v1310_v35, 0.0 }
 0x183   :  { %2507 = vst.msk [vmem:[%s4866_s3 + $0xf8] sm:$0xff] %vm2168_vm4, %v2250_v23  ;;  %v2076_v62 = vmax.f32 %v1810_v59, 0.0  ;;  %2174 = vst.msk [vmem:[%s4866_s3 + $0x28] sm:$0xff] %vm2168_vm4, %v2148_v8  ;;  %v1975_v28 = vmax.f32 %v1305_v18, 0.0  ;;  %v2860_v58 = vpop.f32.mrb[84].mxu0 }
 0x184   :  { %2506 = vst.msk [vmem:[%s4866_s3 + $0xf0] sm:$0xff] %vm2168_vm4, %v2249_v10  ;;  %v2075_v57 = vmax.f32 %v1805_v5, 0.0  ;;  %v3010_v3 = vpop.f32.mrb[84].mxu1  ;;  %v2151_v17 = vmax.f32 %v4435_v63, %v1976_v42  ;;  %v1320_v27 = vadd.f32 %v4555_v21, %v2860_v58  ;;  %v1314_v30 = vpop.f32.mrb[85].mxu0 }
 0x185   :  { %v2252_v61 = vmax.f32 %v4438_v26, %v2076_v62  ;;  %v1820_v19 = vadd.f32 %v4555_v21, %v3010_v3  ;;  %v1814_v56 = vpop.f32.mrb[85].mxu1  ;;  %v2150_v53 = vmax.f32 %v4411_v2, %v1975_v28  ;;  %v1315_v33 = vadd.f32 %v4555_v21, %v1314_v30 }
 0x186   :  { %v2251_v32 = vmax.f32 %v4414_v55, %v2075_v57  ;;  %v1815_v43 = vadd.f32 %v4555_v21, %v1814_v56  ;;  %2177 = vst.msk [vmem:[%s4866_s3 + $0x40] sm:$0xff] %vm2168_vm4, %v2151_v17  ;;  %v1978_v63 = vmax.f32 %v1320_v27, 0.0 }
 0x187   :  { %2509 = vst.msk [vmem:[%s4866_s3 + $0x108] sm:$0xff] %vm2168_vm4, %v2252_v61  ;;  %v2078_v26 = vmax.f32 %v1820_v19, 0.0  ;;  %2176 = vst.msk [vmem:[%s4866_s3 + $0x38] sm:$0xff] %vm2168_vm4, %v2150_v53  ;;  %v1977_v2 = vmax.f32 %v1315_v33, 0.0  ;;  %v2863_v11 = vpop.f32.mrb[86].mxu0 }
 0x188   :  { %2508 = vst.msk [vmem:[%s4866_s3 + $0x100] sm:$0xff] %vm2168_vm4, %v2251_v32  ;;  %v2077_v55 = vmax.f32 %v1815_v43, 0.0  ;;  %v3013_v60 = vpop.f32.mrb[86].mxu1  ;;  %v2153_v14 = vmax.f32 %v4451_v9, %v1978_v63  ;;  %v1330_v52 = vadd.f32 %v4555_v21, %v2863_v11  ;;  %v1324_v47 = vpop.f32.mrb[87].mxu0 }
 0x189   :  { %v2254_v44 = vmax.f32 %v4454_v16, %v2078_v26  ;;  %v1830_v22 = vadd.f32 %v4555_v21, %v3013_v60  ;;  %v1824_v23 = vpop.f32.mrb[87].mxu1  ;;  %v2152_v35 = vmax.f32 %v4427_v48, %v1977_v2  ;;  %v1325_v13 = vadd.f32 %v4555_v21, %v1324_v47 }
 0x18a   :  { %v2253_v59 = vmax.f32 %v4430_v38, %v2077_v55  ;;  %v1825_v20 = vadd.f32 %v4555_v21, %v1824_v23  ;;  %2179 = vst.msk [vmem:[%s4866_s3 + $0x50] sm:$0xff] %vm2168_vm4, %v2153_v14  ;;  %v1980_v9 = vmax.f32 %v1330_v52, 0.0 }
 0x18b   :  { %2511 = vst.msk [vmem:[%s4866_s3 + $0x118] sm:$0xff] %vm2168_vm4, %v2254_v44  ;;  %v2080_v16 = vmax.f32 %v1830_v22, 0.0  ;;  %2178 = vst.msk [vmem:[%s4866_s3 + $0x48] sm:$0xff] %vm2168_vm4, %v2152_v35  ;;  %v1979_v48 = vmax.f32 %v1325_v13, 0.0  ;;  %v2866_v8 = vpop.f32.mrb[88].mxu0 }
 0x18c   :  { %2510 = vst.msk [vmem:[%s4866_s3 + $0x110] sm:$0xff] %vm2168_vm4, %v2253_v59  ;;  %v2079_v38 = vmax.f32 %v1825_v20, 0.0  ;;  %v3016_v10 = vpop.f32.mrb[88].mxu1  ;;  %v2155_v18 = vmax.f32 %v4467_v15, %v1980_v9  ;;  %v1340_v42 = vadd.f32 %v4555_v21, %v2866_v8  ;;  %v1334_v28 = vpop.f32.mrb[89].mxu0 }
 0x18d   :  { %v2256_v5 = vmax.f32 %v4470_v36, %v2080_v16  ;;  %v1840_v62 = vadd.f32 %v4555_v21, %v3016_v10  ;;  %v1834_v57 = vpop.f32.mrb[89].mxu1  ;;  %v2154_v58 = vmax.f32 %v4443_v0, %v1979_v48  ;;  %v1335_v17 = vadd.f32 %v4555_v21, %v1334_v28 }
 0x18e   :  { %v2255_v3 = vmax.f32 %v4446_v6, %v2079_v38  ;;  %v1835_v61 = vadd.f32 %v4555_v21, %v1834_v57  ;;  %2181 = vst.msk [vmem:[%s4866_s3 + $0x60] sm:$0xff] %vm2168_vm4, %v2155_v18  ;;  %v1982_v15 = vmax.f32 %v1340_v42, 0.0 }
 0x18f   :  { %2513 = vst.msk [vmem:[%s4866_s3 + $0x128] sm:$0xff] %vm2168_vm4, %v2256_v5  ;;  %v2082_v36 = vmax.f32 %v1840_v62, 0.0  ;;  %2180 = vst.msk [vmem:[%s4866_s3 + $0x58] sm:$0xff] %vm2168_vm4, %v2154_v58  ;;  %v1981_v0 = vmax.f32 %v1335_v17, 0.0  ;;  %v2869_v27 = vpop.f32.mrb[90].mxu0 }
 0x190   :  { %2512 = vst.msk [vmem:[%s4866_s3 + $0x120] sm:$0xff] %vm2168_vm4, %v2255_v3  ;;  %v2081_v6 = vmax.f32 %v1835_v61, 0.0  ;;  %v3019_v19 = vpop.f32.mrb[90].mxu1  ;;  %v2157_v30 = vmax.f32 %v4483_v31, %v1982_v15  ;;  %v1350_v53 = vadd.f32 %v4555_v21, %v2869_v27  ;;  %v1344_v33 = vpop.f32.mrb[91].mxu0  ;;  %v4928_v27 = vld [vmem:[#allocation3_spill] sm:$0xff] }
 0x191   :  { %v2258_v56 = vmax.f32 %v4486_v12, %v2082_v36  ;;  %v1850_v32 = vadd.f32 %v4555_v21, %v3019_v19  ;;  %v1844_v43 = vpop.f32.mrb[91].mxu1  ;;  %v2156_v63 = vmax.f32 %v4459_v1, %v1981_v0  ;;  %v1345_v2 = vadd.f32 %v4555_v21, %v1344_v33 }
 0x192   :  { %v2257_v26 = vmax.f32 %v4462_v7, %v2081_v6  ;;  %v1845_v55 = vadd.f32 %v4555_v21, %v1844_v43  ;;  %2183 = vst.msk [vmem:[%s4866_s3 + $0x70] sm:$0xff] %vm2168_vm4, %v2157_v30  ;;  %v1984_v31 = vmax.f32 %v1350_v53, 0.0  ;;  %v4929_v30 = vld [vmem:[#allocation5_spill] sm:$0xff] }
 0x193   :  { %2515 = vst.msk [vmem:[%s4866_s3 + $0x138] sm:$0xff] %vm2168_vm4, %v2258_v56  ;;  %v2084_v12 = vmax.f32 %v1850_v32, 0.0  ;;  %2182 = vst.msk [vmem:[%s4866_s3 + $0x68] sm:$0xff] %vm2168_vm4, %v2156_v63  ;;  %v1983_v1 = vmax.f32 %v1345_v2, 0.0  ;;  %v2872_v11 = vpop.f32.mrb[92].mxu0 }
 0x194   :  { %2514 = vst.msk [vmem:[%s4866_s3 + $0x130] sm:$0xff] %vm2168_vm4, %v2257_v26  ;;  %v2083_v7 = vmax.f32 %v1845_v55, 0.0  ;;  %v3022_v60 = vpop.f32.mrb[92].mxu1  ;;  %v2159_v14 = vmax.f32 %v4499_v39, %v1984_v31  ;;  %v1360_v52 = vadd.f32 %v4555_v21, %v2872_v11  ;;  %v1354_v47 = vpop.f32.mrb[93].mxu0 }
 0x195   :  { %v2260_v44 = vmax.f32 %v4502_v4, %v2084_v12  ;;  %v1860_v22 = vadd.f32 %v4555_v21, %v3022_v60  ;;  %v1854_v23 = vpop.f32.mrb[93].mxu1  ;;  %v2158_v35 = vmax.f32 %v4475_v29, %v1983_v1  ;;  %v1355_v13 = vadd.f32 %v4555_v21, %v1354_v47  ;;  %v4930_v60 = vld [vmem:[#allocation6_spill] sm:$0xff] }
 0x196   :  { %v2259_v59 = vmax.f32 %v4478_v24, %v2083_v7  ;;  %v1855_v20 = vadd.f32 %v4555_v21, %v1854_v23  ;;  %2185 = vst.msk [vmem:[%s4866_s3 + $0x80] sm:$0xff] %vm2168_vm4, %v2159_v14  ;;  %v1986_v39 = vmax.f32 %v1360_v52, 0.0  ;;  %v4931_v23 = vld [vmem:[#allocation7_spill] sm:$0xff] }
 0x197   :  { %2517 = vst.msk [vmem:[%s4866_s3 + $0x148] sm:$0xff] %vm2168_vm4, %v2260_v44  ;;  %v2086_v4 = vmax.f32 %v1860_v22, 0.0  ;;  %2184 = vst.msk [vmem:[%s4866_s3 + $0x78] sm:$0xff] %vm2168_vm4, %v2158_v35  ;;  %v1985_v29 = vmax.f32 %v1355_v13, 0.0  ;;  %v2875_v9 = vpop.f32.mrb[94].mxu0 }
 0x198   :  { %2516 = vst.msk [vmem:[%s4866_s3 + $0x140] sm:$0xff] %vm2168_vm4, %v2259_v59  ;;  %v2085_v24 = vmax.f32 %v1855_v20, 0.0  ;;  %v3025_v16 = vpop.f32.mrb[94].mxu1  ;;  %v2161_v48 = vmax.f32 %v4515_v54, %v1986_v39  ;;  %v1370_v8 = vadd.f32 %v4555_v21, %v2875_v9  ;;  %v1364_v18 = vpop.f32.mrb[95].mxu0  ;;  %v4932_v59 = vld [vmem:[#allocation8_spill] sm:$0xff] }
 0x199   :  { %v2262_v38 = vmax.f32 %v4518_v45, %v2086_v4  ;;  %v1870_v10 = vadd.f32 %v4555_v21, %v3025_v16  ;;  %v1864_v5 = vpop.f32.mrb[95].mxu1  ;;  %v2160_v42 = vmax.f32 %v4491_v40, %v1985_v29  ;;  %v1365_v28 = vadd.f32 %v4555_v21, %v1364_v18 }
 0x19a   :  { %v2261_v62 = vmax.f32 %v4494_v25, %v2085_v24  ;;  %v1865_v57 = vadd.f32 %v4555_v21, %v1864_v5  ;;  %2187 = vst.msk [vmem:[%s4866_s3 + $0x90] sm:$0xff] %vm2168_vm4, %v2161_v48  ;;  %v1988_v54 = vmax.f32 %v1370_v8, 0.0 }
 0x19b   :  { %2519 = vst.msk [vmem:[%s4866_s3 + $0x158] sm:$0xff] %vm2168_vm4, %v2262_v38  ;;  %v2088_v45 = vmax.f32 %v1870_v10, 0.0  ;;  %2186 = vst.msk [vmem:[%s4866_s3 + $0x88] sm:$0xff] %vm2168_vm4, %v2160_v42  ;;  %v1987_v40 = vmax.f32 %v1365_v28, 0.0  ;;  %v2878_v58 = vpop.f32.mrb[96].mxu0 }
 0x19c   :  { %2518 = vst.msk [vmem:[%s4866_s3 + $0x150] sm:$0xff] %vm2168_vm4, %v2261_v62  ;;  %v2087_v25 = vmax.f32 %v1865_v57, 0.0  ;;  %v3028_v3 = vpop.f32.mrb[96].mxu1  ;;  %v2163_v17 = vmax.f32 %v4531_v46, %v1988_v54  ;;  %v1380_v15 = vadd.f32 %v4555_v21, %v2878_v58  ;;  %v1374_v0 = vpop.f32.mrb[97].mxu0 }
 0x19d   :  { %v2264_v61 = vmax.f32 %v4534_v51, %v2088_v45  ;;  %v1880_v36 = vadd.f32 %v4555_v21, %v3028_v3  ;;  %v1874_v6 = vpop.f32.mrb[97].mxu1  ;;  %v2162_v19 = vmax.f32 %v4928_v27, %v1987_v40  ;;  %v1375_v53 = vadd.f32 %v4555_v21, %v1374_v0 }
 0x19e   :  { %v2263_v56 = vmax.f32 %v4929_v30, %v2087_v25  ;;  %v1875_v32 = vadd.f32 %v4555_v21, %v1874_v6  ;;  %2189 = vst.msk [vmem:[%s4866_s3 + $0xa0] sm:$0xff] %vm2168_vm4, %v2163_v17  ;;  %v1990_v46 = vmax.f32 %v1380_v15, 0.0 }
 0x19f   :  { %2521 = vst.msk [vmem:[%s4866_s3 + $0x168] sm:$0xff] %vm2168_vm4, %v2264_v61  ;;  %v2090_v51 = vmax.f32 %v1880_v36, 0.0  ;;  %2188 = vst.msk [vmem:[%s4866_s3 + $0x98] sm:$0xff] %vm2168_vm4, %v2162_v19  ;;  %v1989_v33 = vmax.f32 %v1375_v53, 0.0  ;;  %v2881_v63 = vpop.f32.mrb[98].mxu0 }
 0x1a0   :  { %2520 = vst.msk [vmem:[%s4866_s3 + $0x160] sm:$0xff] %vm2168_vm4, %v2263_v56  ;;  %v2089_v43 = vmax.f32 %v1875_v32, 0.0  ;;  %v3031_v26 = vpop.f32.mrb[98].mxu1  ;;  %v2165_v2 = vmax.f32 %v4547_v50, %v1990_v46  ;;  %v1390_v31 = vadd.f32 %v4555_v21, %v2881_v63  ;;  %v1384_v1 = vpop.f32.mrb[99].mxu0 }
 0x1a1   :  { %v2266_v55 = vmax.f32 %v4550_v34, %v2090_v51  ;;  %v1890_v12 = vadd.f32 %v4555_v21, %v3031_v26  ;;  %v1884_v7 = vpop.f32.mrb[99].mxu1  ;;  %v2164_v11 = vmax.f32 %v4523_v37, %v1989_v33  ;;  %v1385_v44 = vadd.f32 %v4555_v21, %v1384_v1 }
 0x1a2   :  { %v2265_v14 = vmax.f32 %v4930_v60, %v2089_v43  ;;  %v1885_v52 = vadd.f32 %v4555_v21, %v1884_v7  ;;  %2191 = vst.msk [vmem:[%s4866_s3 + $0xb0] sm:$0xff] %vm2168_vm4, %v2165_v2  ;;  %v1992_v50 = vmax.f32 %v1390_v31, 0.0 }
 0x1a3   :  { %2523 = vst.msk [vmem:[%s4866_s3 + $0x178] sm:$0xff] %vm2168_vm4, %v2266_v55  ;;  %v2092_v34 = vmax.f32 %v1890_v12, 0.0  ;;  %2190 = vst.msk [vmem:[%s4866_s3 + $0xa8] sm:$0xff] %vm2168_vm4, %v2164_v11  ;;  %v1991_v37 = vmax.f32 %v1385_v44, 0.0 }
 0x1a4   :  { %2522 = vst.msk [vmem:[%s4866_s3 + $0x170] sm:$0xff] %vm2168_vm4, %v2265_v14  ;;  %v2091_v21 = vmax.f32 %v1885_v52, 0.0  ;;  %v2167_v22 = vmax.f32 %v4564_v41, %v1992_v50 }
 0x1a5   :  { %v2268_v47 = vmax.f32 %v4567_v49, %v2092_v34  ;;  %v2166_v35 = vmax.f32 %v4931_v23, %v1991_v37 }
 0x1a6   :  { %v2267_v13 = vmax.f32 %v4932_v59, %v2091_v21  ;;  %2193 = vst.msk [vmem:[%s4866_s3 + $0xc0] sm:$0xff] %vm2168_vm4, %v2167_v22 }
 0x1a7   :  { %2525 = vst.msk [vmem:[%s4866_s3 + $0x188] sm:$0xff] %vm2168_vm4, %v2268_v47  ;;  %2192 = vst.msk [vmem:[%s4866_s3 + $0xb8] sm:$0xff] %vm2168_vm4, %v2166_v35 }
 0x1a8   :  { %2524 = vst.msk [vmem:[%s4866_s3 + $0x180] sm:$0xff] %vm2168_vm4, %v2267_v13 }

// kernel: cnn_forward.5
= control target key start
LH: loop header
LB: loop body
LE: loop exit
PB: predicated region body
PF: predicated region fallthrough
CT: control target
= control target key end

     0   :  { %v1507_v0 = vmov 0.0|0.0   ;;  %vm225_vm0 = vcmask 261120   ;;  %vm1161_vm1 = vcmask 523264   ;;  %s2447_s1 = inlined_call_operand.vmem [shape: f32[288,64], index: 1, kind: input, shape index: {}]   ;;  %s2448_s0 = inlined_call_operand.vmem [shape: f32[448,288], index: 0, kind: input, shape index: {}]   ;;  %s2449_s2 = inlined_call_operand.vmem [shape: f32[1,64], index: 2, kind: input, shape index: {}]   ;;  %s2450_s3 = inlined_call_operand.vmem [shape: f32[2,56,64], index: 3, kind: output, shape index: {}]  }
   0x1   :  { %1418 = vmatprep.subr.bf16.mxu0 %v1507_v0  ;;  %1474 = vmatprep.subr.bf16.mxu1 %v1507_v0  ;;  %v182_v1 = vld [vmem:[%s2447_s1] sm:$0xff]  ;;  %v183_v2 = vld [vmem:[%s2447_s1 + $0x8] sm:$0xff]  ;;  %v184_v3 = vld [vmem:[%s2447_s1 + $0x10] sm:$0xff] }
   0x2   :  { %v1419_v4 = vpack.c.bf16 %v183_v2, %v182_v1  ;;  %v185_v5 = vld [vmem:[%s2447_s1 + $0x18] sm:$0xff]  ;;  %v186_v7 = vld [vmem:[%s2447_s1 + $0x20] sm:$0xff]  ;;  %v187_v8 = vld [vmem:[%s2447_s1 + $0x28] sm:$0xff] }
   0x3   :  { %v1422_v6 = vpack.c.bf16 %v185_v5, %v184_v3  ;;  %v1425_v9 = vpack.c.bf16 %v187_v8, %v186_v7  ;;  %v188_v10 = vld [vmem:[%s2447_s1 + $0x30] sm:$0xff]  ;;  %v189_v11 = vld [vmem:[%s2447_s1 + $0x38] sm:$0xff]  ;;  %v15_v12 = vld [vmem:[%s2448_s0 + $0x8] sm:$0xff] }
   0x4   :  { %1420 = vmatpush1.bf16.msra.mxu0 %v1419_v4  ;;  %1490 = vmatpush1.bf16.msra.mxu1 %v1419_v4  ;;  %v1428_v13 = vpack.c.bf16 %v189_v11, %v188_v10  ;;  %v141_v14 = vld [vmem:[%s2448_s0 + $0x3f8] sm:$0xff]  ;;  %v190_v15 = vld [vmem:[%s2447_s1 + $0x40] sm:$0xff]  ;;  %v191_v16 = vld [vmem:[%s2447_s1 + $0x48] sm:$0xff] }
   0x5   :  { %1421 = vmatprep.subr.bf16.mxu0 %v1507_v0  ;;  %1475 = vmatprep.subr.bf16.mxu1 %v1507_v0  ;;  %v1431_v17 = vpack.c.bf16 %v191_v16, %v190_v15  ;;  %v192_v18 = vld [vmem:[%s2447_s1 + $0x50] sm:$0xff]  ;;  %v193_v19 = vld [vmem:[%s2447_s1 + $0x58] sm:$0xff]  ;;  %v194_v21 = vld [vmem:[%s2447_s1 + $0x60] sm:$0xff] }
   0x6   :  { %458 = vmatprep.mubr.f32.mxu0 %v15_v12  ;;  %668 = vmatprep.mubr.f32.mxu1 %v141_v14  ;;  %v1434_v20 = vpack.c.bf16 %v193_v19, %v192_v18  ;;  %v195_v22 = vld [vmem:[%s2447_s1 + $0x68] sm:$0xff]  ;;  %v196_v24 = vld [vmem:[%s2447_s1 + $0x70] sm:$0xff]  ;;  %v197_v25 = vld [vmem:[%s2447_s1 + $0x78] sm:$0xff] }
   0x7   :  { %v1437_v23 = vpack.c.bf16 %v195_v22, %v194_v21  ;;  %v1440_v26 = vpack.c.bf16 %v197_v25, %v196_v24  ;;  %v198_v27 = vld [vmem:[%s2447_s1 + $0x80] sm:$0xff]  ;;  %v199_v28 = vld [vmem:[%s2447_s1 + $0x88] sm:$0xff]  ;;  %v200_v30 = vld [vmem:[%s2447_s1 + $0x90] sm:$0xff] }
   0x8   :  { %1423 = vmatpush1.bf16.msra.mxu0 %v1422_v6  ;;  %1491 = vmatpush1.bf16.msra.mxu1 %v1422_v6  ;;  %v1443_v29 = vpack.c.bf16 %v199_v28, %v198_v27  ;;  %v201_v31 = vld [vmem:[%s2447_s1 + $0x98] sm:$0xff]  ;;  %v202_v33 = vld [vmem:[%s2447_s1 + $0xa0] sm:$0xff]  ;;  %v203_v34 = vld [vmem:[%s2447_s1 + $0xa8] sm:$0xff] }
   0x9   :  { %1424 = vmatprep.subr.bf16.mxu0 %v1507_v0  ;;  %1476 = vmatprep.subr.bf16.mxu1 %v1507_v0  ;;  %v1446_v32 = vpack.c.bf16 %v201_v31, %v200_v30  ;;  %v1449_v35 = vpack.c.bf16 %v203_v34, %v202_v33  ;;  %v204_v36 = vld [vmem:[%s2447_s1 + $0xb0] sm:$0xff]  ;;  %v205_v37 = vld [vmem:[%s2447_s1 + $0xb8] sm:$0xff]  ;;  %v206_v39 = vld [vmem:[%s2447_s1 + $0xc0] sm:$0xff] }
   0xa   :  { %v1452_v38 = vpack.c.bf16 %v205_v37, %v204_v36  ;;  %v207_v40 = vld [vmem:[%s2447_s1 + $0xc8] sm:$0xff]  ;;  %v208_v42 = vld [vmem:[%s2447_s1 + $0xd0] sm:$0xff]  ;;  %v209_v43 = vld [vmem:[%s2447_s1 + $0xd8] sm:$0xff] }
   0xb   :  { %v1455_v41 = vpack.c.bf16 %v207_v40, %v206_v39  ;;  %v1458_v44 = vpack.c.bf16 %v209_v43, %v208_v42  ;;  %v210_v45 = vld [vmem:[%s2447_s1 + $0xe0] sm:$0xff]  ;;  %v211_v46 = vld [vmem:[%s2447_s1 + $0xe8] sm:$0xff]  ;;  %v212_v48 = vld [vmem:[%s2447_s1 + $0xf0] sm:$0xff] }
   0xc   :  { %1426 = vmatpush1.bf16.msra.mxu0 %v1425_v9  ;;  %1492 = vmatpush1.bf16.msra.mxu1 %v1425_v9  ;;  %v1461_v47 = vpack.c.bf16 %v211_v46, %v210_v45  ;;  %v213_v49 = vld [vmem:[%s2447_s1 + $0xf8] sm:$0xff]  ;;  %v214_v50 = vld [vmem:[%s2447_s1 + $0x100] sm:$0xff]  ;;  %v215_v51 = vld [vmem:[%s2447_s1 + $0x108] sm:$0xff] }
   0xd   :  { %1427 = vmatprep.subr.bf16.mxu0 %v1507_v0  ;;  %1477 = vmatprep.subr.bf16.mxu1 %v1507_v0  ;;  %v1464_v52 = vpack.c.bf16 %v213_v49, %v212_v48  ;;  %v1466_v53 = vpack.c.bf16 %v215_v51, %v214_v50  ;;  %v216_v54 = vld [vmem:[%s2447_s1 + $0x110] sm:$0xff]  ;;  %v217_v55 = vld [vmem:[%s2447_s1 + $0x118] sm:$0xff]  ;;  %v14_v56 = vld [vmem:[%s2448_s0] sm:$0xff] }
   0xe   :  { %v140_v57 = vld [vmem:[%s2448_s0 + $0x3f0] sm:$0xff]  ;;  %v18_v58 = vld [vmem:[%s2448_s0 + $0x20] sm:$0xff]  ;;  %v1470_v60 = vpack.c.bf16 %v217_v55, %v216_v54  ;;  %v17_v61 = vld [vmem:[%s2448_s0 + $0x18] sm:$0xff] }
   0xf   :  { %v144_v59 = vld [vmem:[%s2448_s0 + $0x410] sm:$0xff]  ;;  %v143_v62 = vld [vmem:[%s2448_s0 + $0x408] sm:$0xff]  ;;  %v21_v63 = vld [vmem:[%s2448_s0 + $0x38] sm:$0xff] }
  0x10   :  { %1429 = vmatpush1.bf16.msra.mxu0 %v1428_v13  ;;  %1493 = vmatpush1.bf16.msra.mxu1 %v1428_v13  ;;  %v20_v1 = vld [vmem:[%s2448_s0 + $0x30] sm:$0xff]  ;;  %v146_v2 = vld [vmem:[%s2448_s0 + $0x420] sm:$0xff]  ;;  %v23_v5 = vld [vmem:[%s2448_s0 + $0x48] sm:$0xff] }
  0x11   :  { %1430 = vmatprep.subr.bf16.mxu0 %v1507_v0  ;;  %1478 = vmatprep.subr.bf16.mxu1 %v1507_v0  ;;  %v24_v3 = vld [vmem:[%s2448_s0 + $0x50] sm:$0xff]  ;;  %v150_v4 = vld [vmem:[%s2448_s0 + $0x440] sm:$0xff]  ;;  %v149_v6 = vld [vmem:[%s2448_s0 + $0x438] sm:$0xff] }
  0x12   :  { %v27_v7 = vld [vmem:[%s2448_s0 + $0x68] sm:$0xff]  ;;  %v153_v8 = vld [vmem:[%s2448_s0 + $0x458] sm:$0xff]  ;;  %v26_v9 = vld [vmem:[%s2448_s0 + $0x60] sm:$0xff] }
  0x13   :  { %v152_v10 = vld [vmem:[%s2448_s0 + $0x450] sm:$0xff]  ;;  %v30_v11 = vld [vmem:[%s2448_s0 + $0x80] sm:$0xff]  ;;  %v29_v13 = vld [vmem:[%s2448_s0 + $0x78] sm:$0xff] }
  0x14   :  { %1432 = vmatpush1.bf16.msra.mxu0 %v1431_v17  ;;  %1494 = vmatpush1.bf16.msra.mxu1 %v1431_v17  ;;  %v156_v12 = vld [vmem:[%s2448_s0 + $0x470] sm:$0xff]  ;;  %v155_v14 = vld [vmem:[%s2448_s0 + $0x468] sm:$0xff]  ;;  %v33_v15 = vld [vmem:[%s2448_s0 + $0x98] sm:$0xff] }
  0x15   :  { %1433 = vmatprep.subr.bf16.mxu0 %v1507_v0  ;;  %1479 = vmatprep.subr.bf16.mxu1 %v1507_v0  ;;  %v159_v16 = vld [vmem:[%s2448_s0 + $0x488] sm:$0xff]  ;;  %v32_v17 = vld [vmem:[%s2448_s0 + $0x90] sm:$0xff]  ;;  %v158_v18 = vld [vmem:[%s2448_s0 + $0x480] sm:$0xff] }
  0x16   :  { %v36_v19 = vld [vmem:[%s2448_s0 + $0xb0] sm:$0xff]  ;;  %v35_v21 = vld [vmem:[%s2448_s0 + $0xa8] sm:$0xff]  ;;  %v161_v22 = vld [vmem:[%s2448_s0 + $0x498] sm:$0xff] }
  0x17   :  { %v165_v24 = vld [vmem:[%s2448_s0 + $0x4b8] sm:$0xff]  ;;  %v38_v25 = vld [vmem:[%s2448_s0 + $0xc0] sm:$0xff]  ;;  %v168_v28 = vld [vmem:[%s2448_s0 + $0x4d0] sm:$0xff] }
  0x18   :  { %1435 = vmatpush1.bf16.msra.mxu0 %v1434_v20  ;;  %1495 = vmatpush1.bf16.msra.mxu1 %v1434_v20  ;;  %v162_v20 = vld [vmem:[%s2448_s0 + $0x4a0] sm:$0xff]  ;;  %v167_v30 = vld [vmem:[%s2448_s0 + $0x4c8] sm:$0xff]  ;;  %v45_v31 = vld [vmem:[%s2448_s0 + $0xf8] sm:$0xff] }
  0x19   :  { %1436 = vmatprep.subr.bf16.mxu0 %v1507_v0  ;;  %1480 = vmatprep.subr.bf16.mxu1 %v1507_v0  ;;  %v42_v27 = vld [vmem:[%s2448_s0 + $0xe0] sm:$0xff]  ;;  %v44_v33 = vld [vmem:[%s2448_s0 + $0xf0] sm:$0xff]  ;;  %v47_v37 = vld [vmem:[%s2448_s0 + $0x108] sm:$0xff] }
  0x1a   :  { %v170_v34 = vld [vmem:[%s2448_s0 + $0x4e0] sm:$0xff]  ;;  %v51_v39 = vld [vmem:[%s2448_s0 + $0x128] sm:$0xff]  ;;  %v177_v40 = vld [vmem:[%s2448_s0 + $0x518] sm:$0xff] }
  0x1b   :  { %v174_v36 = vld [vmem:[%s2448_s0 + $0x500] sm:$0xff]  ;;  %v176_v42 = vld [vmem:[%s2448_s0 + $0x510] sm:$0xff]  ;;  %v53_v45 = vld [vmem:[%s2448_s0 + $0x138] sm:$0xff] }
  0x1c   :  { %1438 = vmatpush1.bf16.msra.mxu0 %v1437_v23  ;;  %1496 = vmatpush1.bf16.msra.mxu1 %v1437_v23  ;;  %v39_v23 = vld [vmem:[%s2448_s0 + $0xc8] sm:$0xff]  ;;  %v54_v43 = vld [vmem:[%s2448_s0 + $0x140] sm:$0xff]  ;;  %v16_v48 = vld [vmem:[%s2448_s0 + $0x10] sm:$0xff] }
  0x1d   :  { %1439 = vmatprep.subr.bf16.mxu0 %v1507_v0  ;;  %1481 = vmatprep.subr.bf16.mxu1 %v1507_v0  ;;  %v179_v46 = vld [vmem:[%s2448_s0 + $0x528] sm:$0xff]  ;;  %v56_v49 = vld [vmem:[%s2448_s0 + $0x150] sm:$0xff]  ;;  %v25_v54 = vld [vmem:[%s2448_s0 + $0x58] sm:$0xff] }
  0x1e   :  { %v19_v50 = vld [vmem:[%s2448_s0 + $0x28] sm:$0xff]  ;;  %v60_v51 = vld [vmem:[%s2448_s0 + $0x170] sm:$0xff] }
  0x1f   :  { %v63_v55 = vld [vmem:[%s2448_s0 + $0x188] sm:$0xff] }
  0x20   :  { %1441 = vmatpush1.bf16.msra.mxu0 %v1440_v26  ;;  %1497 = vmatpush1.bf16.msra.mxu1 %v1440_v26  ;;  %v164_v26 = vld [vmem:[%s2448_s0 + $0x4b0] sm:$0xff] }
  0x21   :  { %1442 = vmatprep.subr.bf16.mxu0 %v1507_v0  ;;  %1482 = vmatprep.subr.bf16.mxu1 %v1507_v0 }
  0x24   :  { %1444 = vmatpush1.bf16.msra.mxu0 %v1443_v29  ;;  %1498 = vmatpush1.bf16.msra.mxu1 %v1443_v29  ;;  %v41_v29 = vld [vmem:[%s2448_s0 + $0xd8] sm:$0xff] }
  0x25   :  { %1445 = vmatprep.subr.bf16.mxu0 %v1507_v0  ;;  %1483 = vmatprep.subr.bf16.mxu1 %v1507_v0 }
  0x28   :  { %1447 = vmatpush1.bf16.msra.mxu0 %v1446_v32  ;;  %1499 = vmatpush1.bf16.msra.mxu1 %v1446_v32  ;;  %v171_v32 = vld [vmem:[%s2448_s0 + $0x4e8] sm:$0xff] }
  0x29   :  { %1448 = vmatprep.subr.bf16.mxu0 %v1507_v0  ;;  %1484 = vmatprep.subr.bf16.mxu1 %v1507_v0 }
  0x2c   :  { %1450 = vmatpush1.bf16.msra.mxu0 %v1449_v35  ;;  %1500 = vmatpush1.bf16.msra.mxu1 %v1449_v35  ;;  %v48_v35 = vld [vmem:[%s2448_s0 + $0x110] sm:$0xff] }
  0x2d   :  { %1451 = vmatprep.subr.bf16.mxu0 %v1507_v0  ;;  %1485 = vmatprep.subr.bf16.mxu1 %v1507_v0 }
  0x30   :  { %1453 = vmatpush1.bf16.msra.mxu0 %v1452_v38  ;;  %1501 = vmatpush1.bf16.msra.mxu1 %v1452_v38  ;;  %v173_v38 = vld [vmem:[%s2448_s0 + $0x4f8] sm:$0xff] }
  0x31   :  { %1454 = vmatprep.subr.bf16.mxu0 %v1507_v0  ;;  %1486 = vmatprep.subr.bf16.mxu1 %v1507_v0 }
  0x34   :  { %1456 = vmatpush1.bf16.msra.mxu0 %v1455_v41  ;;  %1502 = vmatpush1.bf16.msra.mxu1 %v1455_v41  ;;  %v50_v41 = vld [vmem:[%s2448_s0 + $0x120] sm:$0xff] }
  0x35   :  { %1457 = vmatprep.subr.bf16.mxu0 %v1507_v0  ;;  %1487 = vmatprep.subr.bf16.mxu1 %v1507_v0 }
  0x38   :  { %1459 = vmatpush1.bf16.msra.mxu0 %v1458_v44  ;;  %1503 = vmatpush1.bf16.msra.mxu1 %v1458_v44  ;;  %v180_v44 = vld [vmem:[%s2448_s0 + $0x530] sm:$0xff] }
  0x39   :  { %1460 = vmatprep.subr.bf16.mxu0 %v1507_v0  ;;  %1488 = vmatprep.subr.bf16.mxu1 %v1507_v0 }
  0x3c   :  { %1462 = vmatpush1.bf16.msra.mxu0 %v1461_v47  ;;  %1504 = vmatpush1.bf16.msra.mxu1 %v1461_v47  ;;  %v57_v47 = vld [vmem:[%s2448_s0 + $0x158] sm:$0xff] }
  0x3d   :  { %1463 = vmatprep.subr.bf16.mxu0 %v1507_v0  ;;  %1489 = vmatprep.subr.bf16.mxu1 %v1507_v0  ;;  %v147_v0 = vld [vmem:[%s2448_s0 + $0x428] sm:$0xff] }
  0x40   :  { %1465 = vmatpush1.bf16.msra.mxu0 %v1464_v52  ;;  %1505 = vmatpush1.bf16.msra.mxu1 %v1464_v52  ;;  %v22_v52 = vld [vmem:[%s2448_s0 + $0x40] sm:$0xff] }
  0x41   :  { %1467 = vmatprep.subr.bf16.mxu1 %v1466_v53 }
  0x43   :  { %459 = vmatmul.mubr.f32.vlgmr.msra.gmra.mrb[0].mxu0 %v14_v56  ;;  %669 = vmatmul.mubr.f32.vlgmr.msra.gmra.mrb[0].mxu1 %v140_v57  ;;  %v28_v56 = vld [vmem:[%s2448_s0 + $0x70] sm:$0xff]  ;;  %v62_v57 = vld [vmem:[%s2448_s0 + $0x180] sm:$0xff] }
  0x44   :  { %463 = vmatprep.mubr.f32.mxu0 %v18_v58  ;;  %673 = vmatprep.mubr.f32.mxu1 %v144_v59  ;;  %v31_v58 = vld [vmem:[%s2448_s0 + $0x88] sm:$0xff]  ;;  %v66_v59 = vld [vmem:[%s2448_s0 + $0x1a0] sm:$0xff] }
  0x45   :  { %1469 = vmatpush3.bf16.msra.mxu1 %v1466_v53  ;;  %v59_v53 = vld [vmem:[%s2448_s0 + $0x168] sm:$0xff] }
  0x46   :  { %1471 = vmatprep.subr.bf16.mxu1 %v1470_v60 }
  0x47   :  { %464 = vmatmul.mubr.f32.gmra.mrb[2].mxu0 %v17_v61  ;;  %674 = vmatmul.mubr.f32.gmra.mrb[2].mxu1 %v143_v62  ;;  %v65_v61 = vld [vmem:[%s2448_s0 + $0x198] sm:$0xff] }
  0x48   :  { %468 = vmatprep.mubr.f32.mxu0 %v21_v63  ;;  %678 = vmatprep.mubr.f32.mxu1 %v147_v0  ;;  %v37_v62 = vld [vmem:[%s2448_s0 + $0xb8] sm:$0xff]  ;;  %v40_v0 = vld [vmem:[%s2448_s0 + $0xd0] sm:$0xff] }
  0x49   :  { %1473 = vmatpush3.bf16.msra.mxu1 %v1470_v60  ;;  %v34_v60 = vld [vmem:[%s2448_s0 + $0xa0] sm:$0xff]  ;;  %v69_v63 = vld [vmem:[%s2448_s0 + $0x1b8] sm:$0xff] }
  0x4b   :  { %469 = vmatmul.mubr.f32.gmra.mrb[4].mxu0 %v20_v1  ;;  %679 = vmatmul.mubr.f32.gmra.mrb[4].mxu1 %v146_v2  ;;  %v68_v1 = vld [vmem:[%s2448_s0 + $0x1b0] sm:$0xff]  ;;  %v43_v2 = vld [vmem:[%s2448_s0 + $0xe8] sm:$0xff] }
  0x4c   :  { %473 = vmatprep.mubr.f32.mxu0 %v24_v3  ;;  %683 = vmatprep.mubr.f32.mxu1 %v150_v4  ;;  %v72_v3 = vld [vmem:[%s2448_s0 + $0x1d0] sm:$0xff]  ;;  %v46_v4 = vld [vmem:[%s2448_s0 + $0x100] sm:$0xff] }
  0x4f   :  { %474 = vmatmul.mubr.f32.gmra.mrb[6].mxu0 %v23_v5  ;;  %684 = vmatmul.mubr.f32.gmra.mrb[6].mxu1 %v149_v6  ;;  %v71_v5 = vld [vmem:[%s2448_s0 + $0x1c8] sm:$0xff]  ;;  %v49_v6 = vld [vmem:[%s2448_s0 + $0x118] sm:$0xff] }
  0x50   :  { %478 = vmatprep.mubr.f32.mxu0 %v27_v7  ;;  %688 = vmatprep.mubr.f32.mxu1 %v153_v8  ;;  %v75_v7 = vld [vmem:[%s2448_s0 + $0x1e8] sm:$0xff]  ;;  %v52_v8 = vld [vmem:[%s2448_s0 + $0x130] sm:$0xff] }
  0x53   :  { %479 = vmatmul.mubr.f32.gmra.mrb[8].mxu0 %v26_v9  ;;  %689 = vmatmul.mubr.f32.gmra.mrb[8].mxu1 %v152_v10  ;;  %v74_v9 = vld [vmem:[%s2448_s0 + $0x1e0] sm:$0xff]  ;;  %v55_v10 = vld [vmem:[%s2448_s0 + $0x148] sm:$0xff] }
  0x54   :  { %483 = vmatprep.mubr.f32.mxu0 %v30_v11  ;;  %693 = vmatprep.mubr.f32.mxu1 %v156_v12  ;;  %v78_v11 = vld [vmem:[%s2448_s0 + $0x200] sm:$0xff] }
  0x55   :  { %v58_v12 = vld [vmem:[%s2448_s0 + $0x160] sm:$0xff] }
  0x57   :  { %484 = vmatmul.mubr.f32.gmra.mrb[10].mxu0 %v29_v13  ;;  %694 = vmatmul.mubr.f32.gmra.mrb[10].mxu1 %v155_v14  ;;  %v77_v13 = vld [vmem:[%s2448_s0 + $0x1f8] sm:$0xff] }
  0x58   :  { %488 = vmatprep.mubr.f32.mxu0 %v33_v15  ;;  %698 = vmatprep.mubr.f32.mxu1 %v159_v16  ;;  %v61_v14 = vld [vmem:[%s2448_s0 + $0x178] sm:$0xff]  ;;  %v64_v16 = vld [vmem:[%s2448_s0 + $0x190] sm:$0xff] }
  0x59   :  { %v81_v15 = vld [vmem:[%s2448_s0 + $0x218] sm:$0xff] }
  0x5b   :  { %489 = vmatmul.mubr.f32.gmra.mrb[12].mxu0 %v32_v17  ;;  %699 = vmatmul.mubr.f32.gmra.mrb[12].mxu1 %v158_v18  ;;  %v80_v17 = vld [vmem:[%s2448_s0 + $0x210] sm:$0xff]  ;;  %v67_v18 = vld [vmem:[%s2448_s0 + $0x1a8] sm:$0xff] }
  0x5c   :  { %493 = vmatprep.mubr.f32.mxu0 %v36_v19  ;;  %703 = vmatprep.mubr.f32.mxu1 %v162_v20  ;;  %v84_v19 = vld [vmem:[%s2448_s0 + $0x230] sm:$0xff]  ;;  %v70_v20 = vld [vmem:[%s2448_s0 + $0x1c0] sm:$0xff] }
  0x5f   :  { %494 = vmatmul.mubr.f32.gmra.mrb[14].mxu0 %v35_v21  ;;  %704 = vmatmul.mubr.f32.gmra.mrb[14].mxu1 %v161_v22  ;;  %v83_v21 = vld [vmem:[%s2448_s0 + $0x228] sm:$0xff]  ;;  %v73_v22 = vld [vmem:[%s2448_s0 + $0x1d8] sm:$0xff] }
  0x60   :  { %498 = vmatprep.mubr.f32.mxu0 %v39_v23  ;;  %708 = vmatprep.mubr.f32.mxu1 %v165_v24  ;;  %v87_v23 = vld [vmem:[%s2448_s0 + $0x248] sm:$0xff]  ;;  %v76_v24 = vld [vmem:[%s2448_s0 + $0x1f0] sm:$0xff] }
  0x63   :  { %499 = vmatmul.mubr.f32.gmra.mrb[16].mxu0 %v38_v25  ;;  %709 = vmatmul.mubr.f32.gmra.mrb[16].mxu1 %v164_v26  ;;  %v86_v25 = vld [vmem:[%s2448_s0 + $0x240] sm:$0xff]  ;;  %v79_v26 = vld [vmem:[%s2448_s0 + $0x208] sm:$0xff] }
  0x64   :  { %503 = vmatprep.mubr.f32.mxu0 %v42_v27  ;;  %713 = vmatprep.mubr.f32.mxu1 %v168_v28  ;;  %v90_v27 = vld [vmem:[%s2448_s0 + $0x260] sm:$0xff] }
  0x65   :  { %v82_v28 = vld [vmem:[%s2448_s0 + $0x220] sm:$0xff] }
  0x67   :  { %504 = vmatmul.mubr.f32.gmra.mrb[18].mxu0 %v41_v29  ;;  %714 = vmatmul.mubr.f32.gmra.mrb[18].mxu1 %v167_v30  ;;  %v89_v29 = vld [vmem:[%s2448_s0 + $0x258] sm:$0xff] }
  0x68   :  { %508 = vmatprep.mubr.f32.mxu0 %v45_v31  ;;  %718 = vmatprep.mubr.f32.mxu1 %v171_v32  ;;  %v85_v30 = vld [vmem:[%s2448_s0 + $0x238] sm:$0xff]  ;;  %v88_v32 = vld [vmem:[%s2448_s0 + $0x250] sm:$0xff] }
  0x69   :  { %v93_v31 = vld [vmem:[%s2448_s0 + $0x278] sm:$0xff] }
  0x6b   :  { %509 = vmatmul.mubr.f32.gmra.mrb[20].mxu0 %v44_v33  ;;  %719 = vmatmul.mubr.f32.gmra.mrb[20].mxu1 %v170_v34  ;;  %v92_v33 = vld [vmem:[%s2448_s0 + $0x270] sm:$0xff]  ;;  %v91_v34 = vld [vmem:[%s2448_s0 + $0x268] sm:$0xff] }
  0x6c   :  { %513 = vmatprep.mubr.f32.mxu0 %v48_v35  ;;  %723 = vmatprep.mubr.f32.mxu1 %v174_v36  ;;  %v96_v35 = vld [vmem:[%s2448_s0 + $0x290] sm:$0xff]  ;;  %v94_v36 = vld [vmem:[%s2448_s0 + $0x280] sm:$0xff] }
  0x6f   :  { %514 = vmatmul.mubr.f32.gmra.mrb[22].mxu0 %v47_v37  ;;  %724 = vmatmul.mubr.f32.gmra.mrb[22].mxu1 %v173_v38  ;;  %v95_v37 = vld [vmem:[%s2448_s0 + $0x288] sm:$0xff]  ;;  %v97_v38 = vld [vmem:[%s2448_s0 + $0x298] sm:$0xff] }
  0x70   :  { %518 = vmatprep.mubr.f32.mxu0 %v51_v39  ;;  %728 = vmatprep.mubr.f32.mxu1 %v177_v40  ;;  %v99_v39 = vld [vmem:[%s2448_s0 + $0x2a8] sm:$0xff]  ;;  %v100_v40 = vld [vmem:[%s2448_s0 + $0x2b0] sm:$0xff] }
  0x73   :  { %519 = vmatmul.mubr.f32.gmra.mrb[24].mxu0 %v50_v41  ;;  %729 = vmatmul.mubr.f32.gmra.mrb[24].mxu1 %v176_v42  ;;  %v98_v41 = vld [vmem:[%s2448_s0 + $0x2a0] sm:$0xff]  ;;  %v103_v42 = vld [vmem:[%s2448_s0 + $0x2c8] sm:$0xff] }
  0x74   :  { %523 = vmatprep.mubr.f32.mxu0 %v54_v43  ;;  %733 = vmatprep.mubr.f32.mxu1 %v180_v44  ;;  %v102_v43 = vld [vmem:[%s2448_s0 + $0x2c0] sm:$0xff] }
  0x75   :  { %v106_v44 = vld [vmem:[%s2448_s0 + $0x2e0] sm:$0xff] }
  0x77   :  { %524 = vmatmul.mubr.f32.gmra.mrb[26].mxu0 %v53_v45  ;;  %734 = vmatmul.mubr.f32.gmra.mrb[26].mxu1 %v179_v46  ;;  %v101_v45 = vld [vmem:[%s2448_s0 + $0x2b8] sm:$0xff] }
  0x78   :  { %528 = vmatprep.mubr.f32.mxu0 %v57_v47  ;;  %1334 = vmatprep.mubr.msk.f32.mxu1 %vm225_vm0, %v16_v48  ;;  %v109_v46 = vld [vmem:[%s2448_s0 + $0x2f8] sm:$0xff]  ;;  %v112_v48 = vld [vmem:[%s2448_s0 + $0x310] sm:$0xff] }
  0x79   :  { %v105_v47 = vld [vmem:[%s2448_s0 + $0x2d8] sm:$0xff] }
  0x7b   :  { %529 = vmatmul.mubr.f32.gmra.mrb[28].mxu0 %v56_v49  ;;  %1335 = vmatmul.mubr.msk.f32.vlgmr.msra.gmra.mrb[28].mxu1 %vm225_vm0, %v19_v50  ;;  %v104_v49 = vld [vmem:[%s2448_s0 + $0x2d0] sm:$0xff]  ;;  %v115_v50 = vld [vmem:[%s2448_s0 + $0x328] sm:$0xff] }
  0x7c   :  { %533 = vmatprep.mubr.f32.mxu0 %v60_v51  ;;  %1337 = vmatprep.mubr.msk.f32.mxu1 %vm225_vm0, %v22_v52  ;;  %v108_v51 = vld [vmem:[%s2448_s0 + $0x2f0] sm:$0xff]  ;;  %v118_v52 = vld [vmem:[%s2448_s0 + $0x340] sm:$0xff] }
  0x7f   :  { %534 = vmatmul.mubr.f32.gmra.mrb[30].mxu0 %v59_v53  ;;  %1338 = vmatmul.mubr.msk.f32.gmra.mrb[30].mxu1 %vm225_vm0, %v25_v54  ;;  %v107_v53 = vld [vmem:[%s2448_s0 + $0x2e8] sm:$0xff]  ;;  %v121_v54 = vld [vmem:[%s2448_s0 + $0x358] sm:$0xff] }
  0x80   :  { %538 = vmatprep.mubr.f32.mxu0 %v63_v55  ;;  %1340 = vmatprep.mubr.msk.f32.mxu1 %vm225_vm0, %v28_v56  ;;  %v111_v55 = vld [vmem:[%s2448_s0 + $0x308] sm:$0xff]  ;;  %v124_v56 = vld [vmem:[%s2448_s0 + $0x370] sm:$0xff] }
  0x83   :  { %539 = vmatmul.mubr.f32.gmra.mrb[32].mxu0 %v62_v57  ;;  %1341 = vmatmul.mubr.msk.f32.gmra.mrb[32].mxu1 %vm225_vm0, %v31_v58  ;;  %v110_v57 = vld [vmem:[%s2448_s0 + $0x300] sm:$0xff]  ;;  %v127_v58 = vld [vmem:[%s2448_s0 + $0x388] sm:$0xff] }
  0x84   :  { %543 = vmatprep.mubr.f32.mxu0 %v66_v59  ;;  %1343 = vmatprep.mubr.msk.f32.mxu1 %vm225_vm0, %v34_v60  ;;  %v114_v59 = vld [vmem:[%s2448_s0 + $0x320] sm:$0xff] }
  0x85   :  { %v130_v60 = vld [vmem:[%s2448_s0 + $0x3a0] sm:$0xff] }
  0x87   :  { %544 = vmatmul.mubr.f32.gmra.mrb[34].mxu0 %v65_v61  ;;  %1344 = vmatmul.mubr.msk.f32.gmra.mrb[34].mxu1 %vm225_vm0, %v37_v62  ;;  %v113_v61 = vld [vmem:[%s2448_s0 + $0x318] sm:$0xff] }
  0x88   :  { %548 = vmatprep.mubr.f32.mxu0 %v69_v63  ;;  %1346 = vmatprep.mubr.msk.f32.mxu1 %vm225_vm0, %v40_v0  ;;  %v133_v62 = vld [vmem:[%s2448_s0 + $0x3b8] sm:$0xff]  ;;  %v136_v0 = vld [vmem:[%s2448_s0 + $0x3d0] sm:$0xff] }
  0x89   :  { %v117_v63 = vld [vmem:[%s2448_s0 + $0x338] sm:$0xff] }
  0x8b   :  { %549 = vmatmul.mubr.f32.gmra.mrb[36].mxu0 %v68_v1  ;;  %1347 = vmatmul.mubr.msk.f32.gmra.mrb[36].mxu1 %vm225_vm0, %v43_v2  ;;  %v116_v1 = vld [vmem:[%s2448_s0 + $0x330] sm:$0xff]  ;;  %v139_v2 = vld [vmem:[%s2448_s0 + $0x3e8] sm:$0xff] }
  0x8c   :  { %553 = vmatprep.mubr.f32.mxu0 %v72_v3  ;;  %1349 = vmatprep.mubr.msk.f32.mxu1 %vm225_vm0, %v46_v4  ;;  %v120_v3 = vld [vmem:[%s2448_s0 + $0x350] sm:$0xff]  ;;  %v142_v4 = vld [vmem:[%s2448_s0 + $0x400] sm:$0xff] }
  0x8f   :  { %554 = vmatmul.mubr.f32.gmra.mrb[38].mxu0 %v71_v5  ;;  %1350 = vmatmul.mubr.msk.f32.gmra.mrb[38].mxu1 %vm225_vm0, %v49_v6  ;;  %v119_v5 = vld [vmem:[%s2448_s0 + $0x348] sm:$0xff]  ;;  %v145_v6 = vld [vmem:[%s2448_s0 + $0x418] sm:$0xff] }
  0x90   :  { %558 = vmatprep.mubr.f32.mxu0 %v75_v7  ;;  %1352 = vmatprep.mubr.msk.f32.mxu1 %vm225_vm0, %v52_v8  ;;  %v123_v7 = vld [vmem:[%s2448_s0 + $0x368] sm:$0xff]  ;;  %v148_v8 = vld [vmem:[%s2448_s0 + $0x430] sm:$0xff] }
  0x93   :  { %559 = vmatmul.mubr.f32.gmra.mrb[40].mxu0 %v74_v9  ;;  %1353 = vmatmul.mubr.msk.f32.gmra.mrb[40].mxu1 %vm225_vm0, %v55_v10  ;;  %v122_v9 = vld [vmem:[%s2448_s0 + $0x360] sm:$0xff]  ;;  %v151_v10 = vld [vmem:[%s2448_s0 + $0x448] sm:$0xff] }
  0x94   :  { %563 = vmatprep.mubr.f32.mxu0 %v78_v11  ;;  %1355 = vmatprep.mubr.msk.f32.mxu1 %vm225_vm0, %v58_v12  ;;  %v126_v11 = vld [vmem:[%s2448_s0 + $0x380] sm:$0xff] }
  0x95   :  { %v154_v12 = vld [vmem:[%s2448_s0 + $0x460] sm:$0xff] }
  0x97   :  { %564 = vmatmul.mubr.f32.gmra.mrb[42].mxu0 %v77_v13  ;;  %1356 = vmatmul.mubr.msk.f32.gmra.mrb[42].mxu1 %vm225_vm0, %v61_v14  ;;  %v125_v13 = vld [vmem:[%s2448_s0 + $0x378] sm:$0xff] }
  0x98   :  { %568 = vmatprep.mubr.f32.mxu0 %v81_v15  ;;  %1358 = vmatprep.mubr.msk.f32.mxu1 %vm225_vm0, %v64_v16  ;;  %v157_v14 = vld [vmem:[%s2448_s0 + $0x478] sm:$0xff]  ;;  %v160_v16 = vld [vmem:[%s2448_s0 + $0x490] sm:$0xff] }
  0x99   :  { %v129_v15 = vld [vmem:[%s2448_s0 + $0x398] sm:$0xff] }
  0x9b   :  { %569 = vmatmul.mubr.f32.gmra.mrb[44].mxu0 %v80_v17  ;;  %1359 = vmatmul.mubr.msk.f32.gmra.mrb[44].mxu1 %vm225_vm0, %v67_v18  ;;  %v128_v17 = vld [vmem:[%s2448_s0 + $0x390] sm:$0xff]  ;;  %v163_v18 = vld [vmem:[%s2448_s0 + $0x4a8] sm:$0xff] }
  0x9c   :  { %573 = vmatprep.mubr.f32.mxu0 %v84_v19  ;;  %1361 = vmatprep.mubr.msk.f32.mxu1 %vm225_vm0, %v70_v20  ;;  %v132_v19 = vld [vmem:[%s2448_s0 + $0x3b0] sm:$0xff]  ;;  %v166_v20 = vld [vmem:[%s2448_s0 + $0x4c0] sm:$0xff] }
  0x9f   :  { %574 = vmatmul.mubr.f32.gmra.mrb[46].mxu0 %v83_v21  ;;  %1362 = vmatmul.mubr.msk.f32.gmra.mrb[46].mxu1 %vm225_vm0, %v73_v22  ;;  %v131_v21 = vld [vmem:[%s2448_s0 + $0x3a8] sm:$0xff]  ;;  %v169_v22 = vld [vmem:[%s2448_s0 + $0x4d8] sm:$0xff] }
  0xa0   :  { %578 = vmatprep.mubr.f32.mxu0 %v87_v23  ;;  %1364 = vmatprep.mubr.msk.f32.mxu1 %vm225_vm0, %v76_v24  ;;  %v135_v23 = vld [vmem:[%s2448_s0 + $0x3c8] sm:$0xff]  ;;  %v172_v24 = vld [vmem:[%s2448_s0 + $0x4f0] sm:$0xff] }
  0xa3   :  { %579 = vmatmul.mubr.f32.gmra.mrb[48].mxu0 %v86_v25  ;;  %1365 = vmatmul.mubr.msk.f32.gmra.mrb[48].mxu1 %vm225_vm0, %v79_v26  ;;  %v134_v25 = vld [vmem:[%s2448_s0 + $0x3c0] sm:$0xff]  ;;  %v175_v26 = vld [vmem:[%s2448_s0 + $0x508] sm:$0xff] }
  0xa4   :  { %583 = vmatprep.mubr.f32.mxu0 %v90_v27  ;;  %1367 = vmatprep.mubr.msk.f32.mxu1 %vm225_vm0, %v82_v28  ;;  %v138_v27 = vld [vmem:[%s2448_s0 + $0x3e0] sm:$0xff] }
  0xa5   :  { %v178_v28 = vld [vmem:[%s2448_s0 + $0x520] sm:$0xff] }
  0xa7   :  { %584 = vmatmul.mubr.f32.gmra.mrb[50].mxu0 %v89_v29  ;;  %1368 = vmatmul.mubr.msk.f32.gmra.mrb[50].mxu1 %vm225_vm0, %v85_v30  ;;  %v137_v29 = vld [vmem:[%s2448_s0 + $0x3d8] sm:$0xff] }
  0xa8   :  { %588 = vmatprep.mubr.f32.mxu0 %v93_v31  ;;  %1370 = vmatprep.mubr.msk.f32.mxu1 %vm225_vm0, %v88_v32  ;;  %v181_v30 = vld [vmem:[%s2448_s0 + $0x538] sm:$0xff] }
  0xab   :  { %589 = vmatmul.mubr.f32.gmra.mrb[52].mxu0 %v92_v33  ;;  %1371 = vmatmul.mubr.msk.f32.gmra.mrb[52].mxu1 %vm225_vm0, %v91_v34 }
  0xac   :  { %593 = vmatprep.mubr.f32.mxu0 %v96_v35  ;;  %1373 = vmatprep.mubr.msk.f32.mxu1 %vm225_vm0, %v94_v36 }
  0xaf   :  { %594 = vmatmul.mubr.f32.gmra.mrb[54].mxu0 %v95_v37  ;;  %1374 = vmatmul.mubr.msk.f32.gmra.mrb[54].mxu1 %vm225_vm0, %v97_v38 }
  0xb0   :  { %598 = vmatprep.mubr.f32.mxu0 %v99_v39  ;;  %1376 = vmatprep.mubr.msk.f32.mxu1 %vm225_vm0, %v100_v40 }
  0xb3   :  { %599 = vmatmul.mubr.f32.gmra.mrb[56].mxu0 %v98_v41  ;;  %1377 = vmatmul.mubr.msk.f32.gmra.mrb[56].mxu1 %vm225_vm0, %v103_v42 }
  0xb4   :  { %603 = vmatprep.mubr.f32.mxu0 %v102_v43  ;;  %1379 = vmatprep.mubr.msk.f32.mxu1 %vm225_vm0, %v106_v44 }
  0xb7   :  { %604 = vmatmul.mubr.f32.gmra.mrb[58].mxu0 %v101_v45  ;;  %1380 = vmatmul.mubr.msk.f32.gmra.mrb[58].mxu1 %vm225_vm0, %v109_v46 }
  0xb8   :  { %608 = vmatprep.mubr.f32.mxu0 %v105_v47  ;;  %1382 = vmatprep.mubr.msk.f32.mxu1 %vm225_vm0, %v112_v48 }
  0xbb   :  { %609 = vmatmul.mubr.f32.gmra.mrb[60].mxu0 %v104_v49  ;;  %1383 = vmatmul.mubr.msk.f32.gmra.mrb[60].mxu1 %vm225_vm0, %v115_v50 }
  0xbc   :  { %613 = vmatprep.mubr.f32.mxu0 %v108_v51  ;;  %1385 = vmatprep.mubr.msk.f32.mxu1 %vm225_vm0, %v118_v52 }
  0xbf   :  { %614 = vmatmul.mubr.f32.gmra.mrb[62].mxu0 %v107_v53  ;;  %1386 = vmatmul.mubr.msk.f32.gmra.mrb[62].mxu1 %vm225_vm0, %v121_v54 }
  0xc0   :  { %618 = vmatprep.mubr.f32.mxu0 %v111_v55  ;;  %1388 = vmatprep.mubr.msk.f32.mxu1 %vm225_vm0, %v124_v56 }
  0xc3   :  { %619 = vmatmul.mubr.f32.gmra.mrb[64].mxu0 %v110_v57  ;;  %1389 = vmatmul.mubr.msk.f32.gmra.mrb[64].mxu1 %vm225_vm0, %v127_v58 }
  0xc4   :  { %623 = vmatprep.mubr.f32.mxu0 %v114_v59  ;;  %1391 = vmatprep.mubr.msk.f32.mxu1 %vm225_vm0, %v130_v60 }
  0xc7   :  { %624 = vmatmul.mubr.f32.gmra.mrb[66].mxu0 %v113_v61  ;;  %1392 = vmatmul.mubr.msk.f32.gmra.mrb[66].mxu1 %vm225_vm0, %v133_v62 }
  0xc8   :  { %628 = vmatprep.mubr.f32.mxu0 %v117_v63  ;;  %1394 = vmatprep.mubr.msk.f32.mxu1 %vm225_vm0, %v136_v0 }
  0xcb   :  { %629 = vmatmul.mubr.f32.gmra.mrb[68].mxu0 %v116_v1  ;;  %1395 = vmatmul.mubr.msk.f32.gmra.mrb[68].mxu1 %vm225_vm0, %v139_v2 }
  0xcc   :  { %633 = vmatprep.mubr.f32.mxu0 %v120_v3  ;;  %1397 = vmatprep.mubr.msk.f32.mxu1 %vm225_vm0, %v142_v4 }
  0xcf   :  { %634 = vmatmul.mubr.f32.gmra.mrb[70].mxu0 %v119_v5  ;;  %1398 = vmatmul.mubr.msk.f32.gmra.mrb[70].mxu1 %vm225_vm0, %v145_v6 }
  0xd0   :  { %638 = vmatprep.mubr.f32.mxu0 %v123_v7  ;;  %1400 = vmatprep.mubr.msk.f32.mxu1 %vm225_vm0, %v148_v8 }
  0xd3   :  { %639 = vmatmul.mubr.f32.gmra.mrb[72].mxu0 %v122_v9  ;;  %1401 = vmatmul.mubr.msk.f32.gmra.mrb[72].mxu1 %vm225_vm0, %v151_v10 }
  0xd4   :  { %643 = vmatprep.mubr.f32.mxu0 %v126_v11  ;;  %1403 = vmatprep.mubr.msk.f32.mxu1 %vm225_vm0, %v154_v12 }
  0xd7   :  { %644 = vmatmul.mubr.f32.gmra.mrb[74].mxu0 %v125_v13  ;;  %1404 = vmatmul.mubr.msk.f32.gmra.mrb[74].mxu1 %vm225_vm0, %v157_v14 }
  0xd8   :  { %648 = vmatprep.mubr.f32.mxu0 %v129_v15  ;;  %1406 = vmatprep.mubr.msk.f32.mxu1 %vm225_vm0, %v160_v16 }
  0xdb   :  { %649 = vmatmul.mubr.f32.gmra.mrb[76].mxu0 %v128_v17  ;;  %1407 = vmatmul.mubr.msk.f32.gmra.mrb[76].mxu1 %vm225_vm0, %v163_v18 }
  0xdc   :  { %653 = vmatprep.mubr.f32.mxu0 %v132_v19  ;;  %1409 = vmatprep.mubr.msk.f32.mxu1 %vm225_vm0, %v166_v20 }
  0xdf   :  { %654 = vmatmul.mubr.f32.gmra.mrb[78].mxu0 %v131_v21  ;;  %1410 = vmatmul.mubr.msk.f32.gmra.mrb[78].mxu1 %vm225_vm0, %v169_v22  ;;  %v2263_v21 = vld [vmem:[%s2449_s2] ss:$0 sm:$0xff] }
  0xe0   :  { %658 = vmatprep.mubr.f32.mxu0 %v135_v23  ;;  %1412 = vmatprep.mubr.msk.f32.mxu1 %vm225_vm0, %v172_v24 }
  0xe3   :  { %659 = vmatmul.mubr.f32.gmra.mrb[80].mxu0 %v134_v25  ;;  %1413 = vmatmul.mubr.msk.f32.gmra.mrb[80].mxu1 %vm225_vm0, %v175_v26 }
  0xe4   :  { %663 = vmatprep.mubr.f32.mxu0 %v138_v27  ;;  %1415 = vmatprep.mubr.msk.f32.mxu1 %vm225_vm0, %v178_v28 }
  0xe7   :  { %664 = vmatmul.mubr.f32.gmra.mrb[82].mxu0 %v137_v29  ;;  %1416 = vmatmul.mubr.msk.f32.gmra.mrb[82].mxu1 %vm225_vm0, %v181_v30 }
 0x116   :  { %v460_v31 = vpop.f32.mrb[0].mxu0  ;;  %v2228_v32 = vpop.f32.mrb[0].mxu1 }
 0x117   :  { %v462_v33 = vpop.f32.mrb[1].mxu0  ;;  %v672_v34 = vpop.f32.mrb[1].mxu1  ;;  %v461_v25 = vadd.f32 %v2263_v21, %v460_v31 }
 0x11a   :  { %v465_v35 = vpop.f32.mrb[2].mxu0  ;;  %v2230_v36 = vpop.f32.mrb[2].mxu1 }
 0x11b   :  { %v467_v37 = vpop.f32.mrb[3].mxu0  ;;  %v677_v38 = vpop.f32.mrb[3].mxu1  ;;  %v466_v24 = vadd.f32 %v2263_v21, %v465_v35 }
 0x11e   :  { %v470_v39 = vpop.f32.mrb[4].mxu0  ;;  %v2232_v40 = vpop.f32.mrb[4].mxu1 }
 0x11f   :  { %v472_v41 = vpop.f32.mrb[5].mxu0  ;;  %v682_v42 = vpop.f32.mrb[5].mxu1  ;;  %v471_v37 = vadd.f32 %v2263_v21, %v470_v39 }
 0x122   :  { %v475_v43 = vpop.f32.mrb[6].mxu0  ;;  %v2234_v44 = vpop.f32.mrb[6].mxu1 }
 0x123   :  { %v477_v45 = vpop.f32.mrb[7].mxu0  ;;  %v687_v46 = vpop.f32.mrb[7].mxu1  ;;  %v476_v34 = vadd.f32 %v2263_v21, %v475_v43 }
 0x126   :  { %v480_v47 = vpop.f32.mrb[8].mxu0  ;;  %v2236_v48 = vpop.f32.mrb[8].mxu1 }
 0x127   :  { %v482_v49 = vpop.f32.mrb[9].mxu0  ;;  %v692_v50 = vpop.f32.mrb[9].mxu1  ;;  %v481_v31 = vadd.f32 %v2263_v21, %v480_v47 }
 0x12a   :  { %v485_v51 = vpop.f32.mrb[10].mxu0  ;;  %v2238_v52 = vpop.f32.mrb[10].mxu1 }
 0x12b   :  { %v487_v53 = vpop.f32.mrb[11].mxu0  ;;  %v697_v54 = vpop.f32.mrb[11].mxu1  ;;  %v486_v35 = vadd.f32 %v2263_v21, %v485_v51 }
 0x12e   :  { %v490_v55 = vpop.f32.mrb[12].mxu0  ;;  %v2240_v56 = vpop.f32.mrb[12].mxu1 }
 0x12f   :  { %v492_v57 = vpop.f32.mrb[13].mxu0  ;;  %v702_v58 = vpop.f32.mrb[13].mxu1 }
 0x132   :  { %v495_v59 = vpop.f32.mrb[14].mxu0  ;;  %v2242_v60 = vpop.f32.mrb[14].mxu1 }
 0x133   :  { %v497_v61 = vpop.f32.mrb[15].mxu0  ;;  %v707_v62 = vpop.f32.mrb[15].mxu1  ;;  %v496_v39 = vadd.f32 %v2263_v21, %v495_v59 }
 0x134   :  { %v491_v61 = vadd.f32 %v2263_v21, %v490_v55 }
 0x136   :  { %v500_v63 = vpop.f32.mrb[16].mxu0  ;;  %v2244_v0 = vpop.f32.mrb[16].mxu1 }
 0x137   :  { %v502_v1 = vpop.f32.mrb[17].mxu0  ;;  %v712_v2 = vpop.f32.mrb[17].mxu1 }
 0x13a   :  { %v505_v3 = vpop.f32.mrb[18].mxu0  ;;  %v2246_v4 = vpop.f32.mrb[18].mxu1 }
 0x13b   :  { %v507_v5 = vpop.f32.mrb[19].mxu0  ;;  %v717_v6 = vpop.f32.mrb[19].mxu1  ;;  %v506_v47 = vadd.f32 %v2263_v21, %v505_v3 }
 0x13e   :  { %v2248_v7 = vpop.f32.mrb[20].mxu0  ;;  %v2250_v8 = vpop.f32.mrb[20].mxu1 }
 0x13f   :  { %v512_v9 = vpop.f32.mrb[21].mxu0  ;;  %v722_v10 = vpop.f32.mrb[21].mxu1 }
 0x142   :  { %v515_v11 = vpop.f32.mrb[22].mxu0  ;;  %v2252_v12 = vpop.f32.mrb[22].mxu1 }
 0x143   :  { %v517_v13 = vpop.f32.mrb[23].mxu0  ;;  %v727_v14 = vpop.f32.mrb[23].mxu1 }
 0x144   :  { %v501_v13 = vadd.f32 %v2263_v21, %v500_v63 }
 0x146   :  { %v2254_v15 = vpop.f32.mrb[24].mxu0  ;;  %v2256_v16 = vpop.f32.mrb[24].mxu1 }
 0x147   :  { %v522_v17 = vpop.f32.mrb[25].mxu0  ;;  %v732_v18 = vpop.f32.mrb[25].mxu1 }
 0x14a   :  { %v525_v19 = vpop.f32.mrb[26].mxu0  ;;  %v2258_v20 = vpop.f32.mrb[26].mxu1 }
 0x14b   :  { %v527_v22 = vpop.f32.mrb[27].mxu0  ;;  %v737_v23 = vpop.f32.mrb[27].mxu1 }
 0x14e   :  { %v2267_v26 = vpop.f32.mrb[28].mxu0  ;;  %v1336_v27 = vpop.f32.mrb[28].mxu1 }
 0x14f   :  { %v811_v28 = vadd.f32 %v1336_v27, %v466_v24  ;;  %v532_v29 = vpop.f32.mrb[29].mxu0  ;;  %v805_v30 = vpop.f32.mrb[29].mxu1  ;;  %v516_v24 = vadd.f32 %v2263_v21, %v515_v11  ;;  %v521_v11 = vadd.f32 %v2263_v21, %v2254_v15 }
 0x150   :  { %v806_v33 = vadd.f32 %v805_v30, %v461_v25  ;;  %v511_v29 = vadd.f32 %v2263_v21, %v2248_v7 }
 0x151   :  { %v1085_v3 = vmax.f32 %v811_v28, 0.0 }
 0x152   :  { %v535_v38 = vpop.f32.mrb[30].mxu0  ;;  %v1339_v41 = vpop.f32.mrb[30].mxu1  ;;  %v1084_v9 = vmax.f32 %v806_v33, 0.0 }
 0x153   :  { %v821_v42 = vadd.f32 %v1339_v41, %v476_v34  ;;  %v537_v45 = vpop.f32.mrb[31].mxu0  ;;  %v815_v46 = vpop.f32.mrb[31].mxu1 }
 0x154   :  { %v816_v49 = vadd.f32 %v815_v46, %v471_v37 }
 0x156   :  { %v2273_v50 = vpop.f32.mrb[32].mxu0  ;;  %v1342_v53 = vpop.f32.mrb[32].mxu1  ;;  %v1086_v25 = vmax.f32 %v816_v49, 0.0  ;;  %v1087_v49 = vmax.f32 %v821_v42, 0.0 }
 0x157   :  { %v2275_v54 = vadd.f32 %v1342_v53, %v486_v35  ;;  %v542_v57 = vpop.f32.mrb[33].mxu0  ;;  %v825_v58 = vpop.f32.mrb[33].mxu1 }
 0x158   :  { %v826_v43 = vadd.f32 %v825_v58, %v481_v31  ;;  %v526_v31 = vadd.f32 %v2263_v21, %v525_v19  ;;  %v531_v19 = vadd.f32 %v2263_v21, %v2267_v26 }
 0x15a   :  { %v545_v62 = vpop.f32.mrb[34].mxu0  ;;  %v1345_v1 = vpop.f32.mrb[34].mxu1  ;;  %v1088_v53 = vmax.f32 %v826_v43, 0.0  ;;  %v1089_v43 = vmax.f32 %v2275_v54, 0.0 }
 0x15b   :  { %v841_v2 = vadd.f32 %v1345_v1, %v496_v39  ;;  %v547_v5 = vpop.f32.mrb[35].mxu0  ;;  %v835_v6 = vpop.f32.mrb[35].mxu1 }
 0x15c   :  { %v836_v51 = vadd.f32 %v835_v6, %v491_v61 }
 0x15d   :  { %v1091_v10 = vmax.f32 %v841_v2, 0.0 }
 0x15e   :  { %v2281_v14 = vpop.f32.mrb[36].mxu0  ;;  %v1348_v17 = vpop.f32.mrb[36].mxu1 }
 0x15f   :  { %v1140_v18 = vmax.f32 %v1084_v9, %v1091_v10  ;;  %v851_v22 = vadd.f32 %v1348_v17, %v506_v47  ;;  %v552_v59 = vpop.f32.mrb[37].mxu0  ;;  %v845_v23 = vpop.f32.mrb[37].mxu1  ;;  %v536_v47 = vadd.f32 %v2263_v21, %v535_v38  ;;  %v1090_v9 = vmax.f32 %v836_v51, 0.0 }
 0x160   :  { %v846_v55 = vadd.f32 %v845_v23, %v501_v13  ;;  %v541_v38 = vadd.f32 %v2263_v21, %v2273_v50 }
 0x161   :  { %v1093_v27 = vmax.f32 %v851_v22, 0.0 }
 0x162   :  { %v1092_v30 = vmax.f32 %v846_v55, 0.0  ;;  %v555_v33 = vpop.f32.mrb[38].mxu0  ;;  %v1351_v34 = vpop.f32.mrb[38].mxu1 }
 0x163   :  { %v1142_v63 = vmax.f32 %v1086_v25, %v1093_v27  ;;  %v861_v37 = vadd.f32 %v1351_v34, %v516_v24  ;;  %v557_v41 = vpop.f32.mrb[39].mxu0  ;;  %v855_v45 = vpop.f32.mrb[39].mxu1  ;;  %v546_v25 = vadd.f32 %v2263_v21, %v545_v62 }
 0x164   :  { %v1141_v46 = vmax.f32 %v1085_v3, %v1092_v30  ;;  %v856_v35 = vadd.f32 %v855_v45, %v511_v29  ;;  %v556_v45 = vadd.f32 %v2263_v21, %v555_v33 }
 0x165   :  { %v1095_v57 = vmax.f32 %v861_v37, 0.0 }
 0x166   :  { %v1094_v58 = vmax.f32 %v856_v35, 0.0  ;;  %v560_v7 = vpop.f32.mrb[40].mxu0  ;;  %v1354_v28 = vpop.f32.mrb[40].mxu1 }
 0x167   :  { %v1144_v39 = vmax.f32 %v1088_v53, %v1095_v57  ;;  %v871_v61 = vadd.f32 %v1354_v28, %v526_v31  ;;  %v562_v1 = vpop.f32.mrb[41].mxu0  ;;  %v865_v2 = vpop.f32.mrb[41].mxu1  ;;  %v551_v31 = vadd.f32 %v2263_v21, %v2281_v14 }
 0x168   :  { %v1143_v5 = vmax.f32 %v1087_v49, %v1094_v58  ;;  %v866_v6 = vadd.f32 %v865_v2, %v521_v11 }
 0x169   :  { %v1097_v10 = vmax.f32 %v871_v61, 0.0 }
 0x16a   :  { %v1096_v15 = vmax.f32 %v866_v6, 0.0  ;;  %v565_v42 = vpop.f32.mrb[42].mxu0  ;;  %v1357_v13 = vpop.f32.mrb[42].mxu1 }
 0x16b   :  { %v1146_v17 = vmax.f32 %v1090_v9, %v1097_v10  ;;  %v881_v22 = vadd.f32 %v1357_v13, %v536_v47  ;;  %v567_v59 = vpop.f32.mrb[43].mxu0  ;;  %v875_v23 = vpop.f32.mrb[43].mxu1  ;;  %v566_v61 = vadd.f32 %v2263_v21, %v565_v42 }
 0x16c   :  { %v1145_v55 = vmax.f32 %v1089_v43, %v1096_v15  ;;  %v876_v24 = vadd.f32 %v875_v23, %v531_v19 }
 0x16d   :  { %v1099_v27 = vmax.f32 %v881_v22, 0.0 }
 0x16e   :  { %v1098_v51 = vmax.f32 %v876_v24, 0.0  ;;  %v570_v29 = vpop.f32.mrb[44].mxu0  ;;  %v1360_v26 = vpop.f32.mrb[44].mxu1 }
 0x16f   :  { %v1148_v3 = vmax.f32 %v1141_v46, %v1099_v27  ;;  %v891_v54 = vadd.f32 %v1360_v26, %v546_v25  ;;  %v572_v30 = vpop.f32.mrb[45].mxu0  ;;  %v885_v34 = vpop.f32.mrb[45].mxu1 }
 0x170   :  { %v1147_v37 = vmax.f32 %v1140_v18, %v1098_v51  ;;  %v886_v41 = vadd.f32 %v885_v34, %v541_v38  ;;  %v561_v18 = vadd.f32 %v2263_v21, %v560_v7 }
 0x171   :  { %v1101_v35 = vmax.f32 %v891_v54, 0.0 }
 0x172   :  { %v1100_v62 = vmax.f32 %v886_v41, 0.0  ;;  %v575_v53 = vpop.f32.mrb[46].mxu0  ;;  %v1363_v57 = vpop.f32.mrb[46].mxu1 }
 0x173   :  { %v1150_v11 = vmax.f32 %v1143_v5, %v1101_v35  ;;  %v901_v50 = vadd.f32 %v1363_v57, %v556_v45  ;;  %v577_v49 = vpop.f32.mrb[47].mxu0  ;;  %v895_v58 = vpop.f32.mrb[47].mxu1  ;;  %v576_v5 = vadd.f32 %v2263_v21, %v575_v53 }
 0x174   :  { %v1149_v28 = vmax.f32 %v1142_v63, %v1100_v62  ;;  %v896_v46 = vadd.f32 %v895_v58, %v551_v31  ;;  %v571_v63 = vadd.f32 %v2263_v21, %v570_v29 }
 0x175   :  { %v1103_v1 = vmax.f32 %v901_v50, 0.0 }
 0x176   :  { %v1102_v2 = vmax.f32 %v896_v46, 0.0  ;;  %v580_v33 = vpop.f32.mrb[48].mxu0  ;;  %v1366_v6 = vpop.f32.mrb[48].mxu1 }
 0x177   :  { %v1152_v47 = vmax.f32 %v1145_v55, %v1103_v1  ;;  %v911_v9 = vadd.f32 %v1366_v6, %v566_v61  ;;  %v582_v14 = vpop.f32.mrb[49].mxu0  ;;  %v905_v10 = vpop.f32.mrb[49].mxu1  ;;  %v581_v38 = vadd.f32 %v2263_v21, %v580_v33 }
 0x178   :  { %v1151_v19 = vmax.f32 %v1144_v39, %v1102_v2  ;;  %v906_v43 = vadd.f32 %v905_v10, %v561_v18 }
 0x179   :  { %v1105_v15 = vmax.f32 %v911_v9, 0.0 }
 0x17a   :  { %v1104_v13 = vmax.f32 %v906_v43, 0.0  ;;  %v585_v42 = vpop.f32.mrb[50].mxu0  ;;  %v1369_v22 = vpop.f32.mrb[50].mxu1 }
 0x17b   :  { %v1154_v59 = vmax.f32 %v1147_v37, %v1105_v15  ;;  %v921_v7 = vadd.f32 %v1369_v22, %v576_v5  ;;  %v587_v23 = vpop.f32.mrb[51].mxu0  ;;  %v915_v24 = vpop.f32.mrb[51].mxu1  ;;  %v586_v39 = vadd.f32 %v2263_v21, %v585_v42 }
 0x17c   :  { %v1153_v25 = vmax.f32 %v1146_v17, %v1104_v13  ;;  %v916_v55 = vadd.f32 %v915_v24, %v571_v63 }
 0x17d   :  { %1162 = vst.msk [vmem:[%s2450_s3] sm:$0xff] %vm1161_vm1, %v1154_v59  ;;  %v1107_v27 = vmax.f32 %v921_v7, 0.0 }
 0x17e   :  { %v1106_v51 = vmax.f32 %v916_v55, 0.0  ;;  %v590_v29 = vpop.f32.mrb[52].mxu0  ;;  %v1372_v26 = vpop.f32.mrb[52].mxu1 }
 0x17f   :  { %v1156_v54 = vmax.f32 %v1149_v28, %v1107_v27  ;;  %v931_v30 = vadd.f32 %v1372_v26, %v586_v39  ;;  %v592_v34 = vpop.f32.mrb[53].mxu0  ;;  %v925_v37 = vpop.f32.mrb[53].mxu1  ;;  %v591_v35 = vadd.f32 %v2263_v21, %v590_v29 }
 0x180   :  { %v1155_v41 = vmax.f32 %v1148_v3, %v1106_v51  ;;  %v926_v17 = vadd.f32 %v925_v37, %v581_v38 }
 0x181   :  { %1164 = vst.msk [vmem:[%s2450_s3 + $0x10] sm:$0xff] %vm1161_vm1, %v1156_v54  ;;  %v1109_v45 = vmax.f32 %v931_v30, 0.0 }
 0x182   :  { %1163 = vst.msk [vmem:[%s2450_s3 + $0x8] sm:$0xff] %vm1161_vm1, %v1155_v41  ;;  %v1108_v31 = vmax.f32 %v926_v17, 0.0  ;;  %v595_v62 = vpop.f32.mrb[54].mxu0  ;;  %v1375_v53 = vpop.f32.mrb[54].mxu1 }
 0x183   :  { %v1158_v57 = vmax.f32 %v1151_v19, %v1109_v45  ;;  %v596_v3 = vadd.f32 %v2263_v21, %v595_v62  ;;  %v597_v50 = vpop.f32.mrb[55].mxu0  ;;  %v935_v49 = vpop.f32.mrb[55].mxu1 }
 0x184   :  { %v1157_v58 = vmax.f32 %v1150_v11, %v1108_v31  ;;  %v936_v28 = vadd.f32 %v935_v49, %v591_v35  ;;  %v676_v49 = vadd.f32 %v2263_v21, %v2230_v36  ;;  %v681_v36 = vadd.f32 %v2263_v21, %v2232_v40 }
 0x185   :  { %1166 = vst.msk [vmem:[%s2450_s3 + $0x20] sm:$0xff] %vm1161_vm1, %v1158_v57  ;;  %v941_v46 = vadd.f32 %v1375_v53, %v596_v3  ;;  %v691_v40 = vadd.f32 %v2263_v21, %v2236_v48 }
 0x186   :  { %1165 = vst.msk [vmem:[%s2450_s3 + $0x18] sm:$0xff] %vm1161_vm1, %v1157_v58  ;;  %v1110_v61 = vmax.f32 %v936_v28, 0.0  ;;  %v600_v1 = vpop.f32.mrb[56].mxu0  ;;  %v1378_v18 = vpop.f32.mrb[56].mxu1  ;;  %v671_v28 = vadd.f32 %v2263_v21, %v2228_v32 }
 0x187   :  { %v1111_v2 = vmax.f32 %v941_v46, 0.0  ;;  %v601_v33 = vadd.f32 %v2263_v21, %v600_v1  ;;  %v602_v6 = vpop.f32.mrb[57].mxu0  ;;  %v945_v11 = vpop.f32.mrb[57].mxu1 }
 0x188   :  { %v1159_v9 = vmax.f32 %v1152_v47, %v1110_v61 }
 0x189   :  { %v1160_v14 = vmax.f32 %v1153_v25, %v1111_v2  ;;  %v2328_v10 = vadd.f32 %v945_v11, %v601_v33  ;;  %v686_v11 = vadd.f32 %v2263_v21, %v2234_v44 }
 0x18a   :  { %1167 = vst.msk [vmem:[%s2450_s3 + $0x28] sm:$0xff] %vm1161_vm1, %v1159_v9  ;;  %v605_v19 = vpop.f32.mrb[58].mxu0  ;;  %v1381_v43 = vpop.f32.mrb[58].mxu1 }
 0x18b   :  { %1168 = vst.msk [vmem:[%s2450_s3 + $0x30] sm:$0xff] %vm1161_vm1, %v1160_v14  ;;  %v606_v5 = vadd.f32 %v2263_v21, %v605_v19  ;;  %v607_v15 = vpop.f32.mrb[59].mxu0  ;;  %v955_v63 = vpop.f32.mrb[59].mxu1 }
 0x18d   :  { %v2339_v47 = vadd.f32 %v1378_v18, %v606_v5 }
 0x18e   :  { %v610_v13 = vpop.f32.mrb[60].mxu0  ;;  %v1384_v42 = vpop.f32.mrb[60].mxu1 }
 0x18f   :  { %v611_v22 = vadd.f32 %v2263_v21, %v610_v13  ;;  %v612_v59 = vpop.f32.mrb[61].mxu0  ;;  %v965_v7 = vpop.f32.mrb[61].mxu1 }
 0x191   :  { %v2342_v23 = vadd.f32 %v955_v63, %v611_v22  ;;  %v696_v22 = vadd.f32 %v2263_v21, %v2238_v52  ;;  %v706_v52 = vadd.f32 %v2263_v21, %v2242_v60  ;;  %v716_v60 = vadd.f32 %v2263_v21, %v2246_v4 }
 0x192   :  { %v615_v24 = vpop.f32.mrb[62].mxu0  ;;  %v1387_v25 = vpop.f32.mrb[62].mxu1 }
 0x193   :  { %v616_v55 = vadd.f32 %v2263_v21, %v615_v24  ;;  %v617_v39 = vpop.f32.mrb[63].mxu0  ;;  %v975_v27 = vpop.f32.mrb[63].mxu1  ;;  %v1113_v24 = vmax.f32 %v2339_v47, 0.0  ;;  %v701_v47 = vadd.f32 %v2263_v21, %v2240_v56  ;;  %v711_v56 = vadd.f32 %v2263_v21, %v2244_v0 }
 0x195   :  { %v2345_v38 = vadd.f32 %v1381_v43, %v616_v55  ;;  %v1112_v43 = vmax.f32 %v2328_v10, 0.0 }
 0x196   :  { %v620_v51 = vpop.f32.mrb[64].mxu0  ;;  %v1390_v29 = vpop.f32.mrb[64].mxu1 }
 0x197   :  { %v621_v26 = vadd.f32 %v2263_v21, %v620_v51  ;;  %v622_v54 = vpop.f32.mrb[65].mxu0  ;;  %v985_v30 = vpop.f32.mrb[65].mxu1 }
 0x199   :  { %v2348_v34 = vadd.f32 %v965_v7, %v621_v26 }
 0x19a   :  { %v625_v37 = vpop.f32.mrb[66].mxu0  ;;  %v2350_v41 = vpop.f32.mrb[66].mxu1 }
 0x19b   :  { %v626_v17 = vadd.f32 %v2263_v21, %v625_v37  ;;  %v627_v45 = vpop.f32.mrb[67].mxu0  ;;  %v995_v35 = vpop.f32.mrb[67].mxu1 }
 0x19c   :  { %v1114_v45 = vmax.f32 %v2342_v23, 0.0  ;;  %v1115_v23 = vmax.f32 %v2345_v38, 0.0 }
 0x19d   :  { %v2353_v31 = vadd.f32 %v1384_v42, %v626_v17 }
 0x19e   :  { %v630_v62 = vpop.f32.mrb[68].mxu0  ;;  %v2355_v53 = vpop.f32.mrb[68].mxu1 }
 0x19f   :  { %v631_v57 = vadd.f32 %v2263_v21, %v630_v62  ;;  %v632_v3 = vpop.f32.mrb[69].mxu0  ;;  %v2358_v50 = vpop.f32.mrb[69].mxu1 }
 0x1a1   :  { %v2362_v58 = vadd.f32 %v975_v27, %v631_v57 }
 0x1a2   :  { %v635_v46 = vpop.f32.mrb[70].mxu0  ;;  %v1399_v61 = vpop.f32.mrb[70].mxu1 }
 0x1a3   :  { %v636_v1 = vadd.f32 %v2263_v21, %v635_v46  ;;  %v1021_v18 = vadd.f32 %v1399_v61, %v676_v49  ;;  %v637_v2 = vpop.f32.mrb[71].mxu0  ;;  %v1015_v33 = vpop.f32.mrb[71].mxu1 }
 0x1a4   :  { %v1016_v6 = vadd.f32 %v1015_v33, %v671_v28 }
 0x1a5   :  { %v981_v9 = vadd.f32 %v1387_v25, %v636_v1 }
 0x1a6   :  { %v640_v14 = vpop.f32.mrb[72].mxu0  ;;  %v1402_v19 = vpop.f32.mrb[72].mxu1  ;;  %v1126_v44 = vmax.f32 %v1016_v6, 0.0 }
 0x1a7   :  { %v1119_v32 = vmax.f32 %v981_v9, 0.0  ;;  %v641_v5 = vadd.f32 %v2263_v21, %v640_v14  ;;  %v2373_v15 = vadd.f32 %v1402_v19, %v686_v11  ;;  %v642_v63 = vpop.f32.mrb[73].mxu0  ;;  %v1025_v13 = vpop.f32.mrb[73].mxu1 }
 0x1a8   :  { %v1026_v42 = vadd.f32 %v1025_v13, %v681_v36 }
 0x1a9   :  { %v1169_v59 = vmax.f32 %v1112_v43, %v1119_v32  ;;  %v986_v7 = vadd.f32 %v985_v30, %v641_v5  ;;  %v1127_v30 = vmax.f32 %v1021_v18, 0.0 }
 0x1aa   :  { %v645_v10 = vpop.f32.mrb[74].mxu0  ;;  %v1405_v25 = vpop.f32.mrb[74].mxu1  ;;  %v1128_v6 = vmax.f32 %v1026_v42, 0.0  ;;  %v721_v42 = vadd.f32 %v2263_v21, %v2250_v8  ;;  %v736_v8 = vadd.f32 %v2263_v21, %v2258_v20 }
 0x1ab   :  { %v1176_v55 = vmax.f32 %v1169_v59, %v1126_v44  ;;  %v1120_v39 = vmax.f32 %v986_v7, 0.0  ;;  %v646_v27 = vadd.f32 %v2263_v21, %v645_v10  ;;  %v2381_v51 = vadd.f32 %v1405_v25, %v696_v22  ;;  %v647_v26 = vpop.f32.mrb[75].mxu0  ;;  %v1035_v54 = vpop.f32.mrb[75].mxu1 }
 0x1ac   :  { %v2383_v37 = vadd.f32 %v1035_v54, %v691_v40  ;;  %v1116_v22 = vmax.f32 %v2348_v34, 0.0  ;;  %v1129_v44 = vmax.f32 %v2373_v15, 0.0 }
 0x1ad   :  { %v1170_v17 = vmax.f32 %v1113_v24, %v1120_v39  ;;  %v991_v48 = vadd.f32 %v1390_v29, %v646_v27 }
 0x1ae   :  { %v650_v62 = vpop.f32.mrb[76].mxu0  ;;  %v1408_v57 = vpop.f32.mrb[76].mxu1  ;;  %v1130_v34 = vmax.f32 %v2383_v37, 0.0 }
 0x1af   :  { %v1121_v3 = vmax.f32 %v991_v48, 0.0  ;;  %v651_v49 = vadd.f32 %v2263_v21, %v650_v62  ;;  %v1051_v28 = vadd.f32 %v1408_v57, %v706_v52  ;;  %v652_v46 = vpop.f32.mrb[77].mxu0  ;;  %v1045_v61 = vpop.f32.mrb[77].mxu1  ;;  %v1177_v1 = vmax.f32 %v1170_v17, %v1127_v30 }
 0x1b0   :  { %v2391_v2 = vadd.f32 %v1045_v61, %v701_v47  ;;  %v731_v52 = vadd.f32 %v2263_v21, %v2256_v16  ;;  %v1117_v30 = vmax.f32 %v2353_v31, 0.0  ;;  %v1131_v31 = vmax.f32 %v2381_v51, 0.0 }
 0x1b1   :  { %v1171_v29 = vmax.f32 %v1114_v45, %v1121_v3  ;;  %v996_v18 = vadd.f32 %v995_v35, %v651_v49  ;;  %v1133_v33 = vmax.f32 %v1051_v28, 0.0  ;;  %v726_v35 = vadd.f32 %v2263_v21, %v2252_v12 }
 0x1b2   :  { %v655_v11 = vpop.f32.mrb[78].mxu0  ;;  %v1411_v9 = vpop.f32.mrb[78].mxu1  ;;  %v1132_v51 = vmax.f32 %v2391_v2, 0.0 }
 0x1b3   :  { %v1122_v36 = vmax.f32 %v996_v18, 0.0  ;;  %v1183_v14 = vmax.f32 %v1176_v55, %v1133_v33  ;;  %v656_v19 = vadd.f32 %v2263_v21, %v655_v11  ;;  %v1061_v43 = vadd.f32 %v1411_v9, %v716_v60  ;;  %v657_v32 = vpop.f32.mrb[79].mxu0  ;;  %v1055_v5 = vpop.f32.mrb[79].mxu1 }
 0x1b4   :  { %v1178_v63 = vmax.f32 %v1171_v29, %v1128_v6  ;;  %v1056_v4 = vadd.f32 %v1055_v5, %v711_v56  ;;  %v1118_v60 = vmax.f32 %v2362_v58, 0.0 }
 0x1b5   :  { %v1172_v13 = vmax.f32 %v1115_v23, %v1122_v36  ;;  %1259 = vst.msk [vmem:[%s2450_s3 + $0x38] sm:$0xff] %vm1161_vm1, %v1183_v14  ;;  %v1001_v0 = vadd.f32 %v2350_v41, %v656_v19  ;;  %v1135_v38 = vmax.f32 %v1061_v43, 0.0 }
 0x1b6   :  { %v1134_v59 = vmax.f32 %v1056_v4, 0.0  ;;  %v660_v7 = vpop.f32.mrb[80].mxu0  ;;  %v1414_v40 = vpop.f32.mrb[80].mxu1 }
 0x1b7   :  { %v1123_v12 = vmax.f32 %v1001_v0, 0.0  ;;  %v1185_v24 = vmax.f32 %v1178_v63, %v1135_v38  ;;  %v661_v10 = vadd.f32 %v2263_v21, %v660_v7  ;;  %v1071_v25 = vadd.f32 %v1414_v40, %v726_v35  ;;  %v662_v55 = vpop.f32.mrb[81].mxu0  ;;  %v1065_v39 = vpop.f32.mrb[81].mxu1 }
 0x1b8   :  { %v1184_v27 = vmax.f32 %v1177_v1, %v1134_v59  ;;  %v1066_v41 = vadd.f32 %v1065_v39, %v721_v42  ;;  %v1179_v26 = vmax.f32 %v1172_v13, %v1129_v44 }
 0x1b9   :  { %v1173_v54 = vmax.f32 %v1116_v22, %v1123_v12  ;;  %1261 = vst.msk [vmem:[%s2450_s3 + $0x48] sm:$0xff] %vm1161_vm1, %v1185_v24  ;;  %v1006_v15 = vadd.f32 %v2358_v50, %v661_v10  ;;  %v1137_v20 = vmax.f32 %v1071_v25, 0.0 }
 0x1ba   :  { %1260 = vst.msk [vmem:[%s2450_s3 + $0x40] sm:$0xff] %vm1161_vm1, %v1184_v27  ;;  %v1136_v37 = vmax.f32 %v1066_v41, 0.0  ;;  %v665_v17 = vpop.f32.mrb[82].mxu0  ;;  %v1417_v48 = vpop.f32.mrb[82].mxu1 }
 0x1bb   :  { %v1124_v47 = vmax.f32 %v1006_v15, 0.0  ;;  %v1180_v45 = vmax.f32 %v1173_v54, %v1130_v34  ;;  %v666_v62 = vadd.f32 %v2263_v21, %v665_v17  ;;  %v1081_v57 = vadd.f32 %v1417_v48, %v736_v8  ;;  %v667_v50 = vpop.f32.mrb[83].mxu0  ;;  %v1075_v3 = vpop.f32.mrb[83].mxu1 }
 0x1bc   :  { %v1186_v49 = vmax.f32 %v1179_v26, %v1136_v37  ;;  %v1076_v16 = vadd.f32 %v1075_v3, %v731_v52 }
 0x1bd   :  { %v1174_v28 = vmax.f32 %v1117_v30, %v1124_v47  ;;  %v1187_v46 = vmax.f32 %v1180_v45, %v1137_v20  ;;  %v1011_v61 = vadd.f32 %v2355_v53, %v666_v62  ;;  %v1139_v53 = vmax.f32 %v1081_v57, 0.0 }
 0x1be   :  { %1262 = vst.msk [vmem:[%s2450_s3 + $0x50] sm:$0xff] %vm1161_vm1, %v1186_v49  ;;  %v1138_v1 = vmax.f32 %v1076_v16, 0.0 }
 0x1bf   :  { %1263 = vst.msk [vmem:[%s2450_s3 + $0x58] sm:$0xff] %vm1161_vm1, %v1187_v46  ;;  %v1125_v21 = vmax.f32 %v1011_v61, 0.0  ;;  %v1181_v29 = vmax.f32 %v1174_v28, %v1131_v31 }
 0x1c1   :  { %v1175_v18 = vmax.f32 %v1118_v60, %v1125_v21  ;;  %v1188_v33 = vmax.f32 %v1181_v29, %v1138_v1 }
 0x1c3   :  { %v1182_v56 = vmax.f32 %v1175_v18, %v1132_v51  ;;  %1264 = vst.msk [vmem:[%s2450_s3 + $0x60] sm:$0xff] %vm1161_vm1, %v1188_v33 }
 0x1c5   :  { %v1189_v23 = vmax.f32 %v1182_v56, %v1139_v53 }
 0x1c7   :  { %1265 = vst.msk [vmem:[%s2450_s3 + $0x68] sm:$0xff] %vm1161_vm1, %v1189_v23 }

// kernel: cnn_forward.7
= control target key start
LH: loop header
LB: loop body
LE: loop exit
PB: predicated region body
PF: predicated region fallthrough
CT: control target
= control target key end

     0   :  { %s3921_s0 = inlined_call_operand.vmem [shape: f32[2,1024], index: 0, kind: input, shape index: {}]   ;;  %s3922_s1 = inlined_call_operand.vmem [shape: f32[1024,512], index: 1, kind: input, shape index: {}]   ;;  %s3923_s2 = inlined_call_operand.vmem [shape: f32[1,512], index: 2, kind: input, shape index: {}]   ;;  %s3924_s3 = inlined_call_operand.vmem [shape: f32[512,128], index: 3, kind: input, shape index: {}]   ;;  %s3925_s4 = inlined_call_operand.vmem [shape: f32[1,128], index: 4, kind: input, shape index: {}]   ;;  %s3926_s5 = inlined_call_operand.hbm [shape: f32[2,128], index: 5, kind: output, shape index: {}]  }
   0x1   :  { %v24_v0 = vld [vmem:[%s3922_s1 + $0x8] sm:$0xff]  ;;  %v26_v2 = vld [vmem:[%s3922_s1 + $0x18] sm:$0xff]  ;;  %v23_v5 = vld [vmem:[%s3922_s1] sm:$0xff] }
   0x2   :  { %v28_v1 = vld [vmem:[%s3922_s1 + $0x28] sm:$0xff]  ;;  %v30_v4 = vld [vmem:[%s3922_s1 + $0x38] sm:$0xff]  ;;  %v27_v6 = vld [vmem:[%s3922_s1 + $0x20] sm:$0xff] }
   0x3   :  { %v1470_v3 = vpack.c.bf16 %v28_v1, %v24_v0  ;;  %v1726_v7 = vpack.c.bf16 %v30_v4, %v26_v2  ;;  %v1472_v8 = vpack.c.bf16 %v27_v6, %v23_v5  ;;  %v25_v9 = vld [vmem:[%s3922_s1 + $0x10] sm:$0xff]  ;;  %v32_v11 = vld [vmem:[%s3922_s1 + $0x48] sm:$0xff]  ;;  %v34_v14 = vld [vmem:[%s3922_s1 + $0x58] sm:$0xff] }
   0x4   :  { %v29_v10 = vld [vmem:[%s3922_s1 + $0x30] sm:$0xff]  ;;  %v36_v13 = vld [vmem:[%s3922_s1 + $0x68] sm:$0xff]  ;;  %v38_v15 = vld [vmem:[%s3922_s1 + $0x78] sm:$0xff] }
   0x5   :  { %1471 = vmatprep.subr.bf16.mxu0 %v1470_v3  ;;  %v1728_v12 = vpack.c.bf16 %v29_v10, %v25_v9  ;;  %1727 = vmatprep.subr.bf16.mxu1 %v1726_v7  ;;  %v1474_v16 = vpack.c.bf16 %v36_v13, %v32_v11  ;;  %v1730_v17 = vpack.c.bf16 %v38_v15, %v34_v14  ;;  %v31_v18 = vld [vmem:[%s3922_s1 + $0x40] sm:$0xff]  ;;  %v33_v20 = vld [vmem:[%s3922_s1 + $0x50] sm:$0xff]  ;;  %v40_v23 = vld [vmem:[%s3922_s1 + $0x88] sm:$0xff] }
   0x6   :  { %1473 = vmatpush1.bf16.msra.mxu0 %v1472_v8  ;;  %v35_v19 = vld [vmem:[%s3922_s1 + $0x60] sm:$0xff]  ;;  %v37_v22 = vld [vmem:[%s3922_s1 + $0x70] sm:$0xff]  ;;  %v44_v24 = vld [vmem:[%s3922_s1 + $0xa8] sm:$0xff] }
   0x7   :  { %1729 = vmatpush1.bf16.msra.mxu1 %v1728_v12  ;;  %v1476_v21 = vpack.c.bf16 %v35_v19, %v31_v18  ;;  %1475 = vmatprep.subr.bf16.mxu0 %v1474_v16  ;;  %v1732_v25 = vpack.c.bf16 %v37_v22, %v33_v20  ;;  %v1478_v26 = vpack.c.bf16 %v44_v24, %v40_v23  ;;  %v42_v27 = vld [vmem:[%s3922_s1 + $0x98] sm:$0xff]  ;;  %v39_v29 = vld [vmem:[%s3922_s1 + $0x80] sm:$0xff]  ;;  %v41_v32 = vld [vmem:[%s3922_s1 + $0x90] sm:$0xff] }
   0x8   :  { %1731 = vmatprep.subr.bf16.mxu1 %v1730_v17  ;;  %v46_v28 = vld [vmem:[%s3922_s1 + $0xb8] sm:$0xff]  ;;  %v43_v31 = vld [vmem:[%s3922_s1 + $0xa0] sm:$0xff]  ;;  %v45_v33 = vld [vmem:[%s3922_s1 + $0xb0] sm:$0xff] }
   0x9   :  { %v1734_v30 = vpack.c.bf16 %v46_v28, %v42_v27  ;;  %v1480_v34 = vpack.c.bf16 %v43_v31, %v39_v29  ;;  %v48_v35 = vld [vmem:[%s3922_s1 + $0xc8] sm:$0xff]  ;;  %v50_v37 = vld [vmem:[%s3922_s1 + $0xd8] sm:$0xff]  ;;  %v1736_v38 = vpack.c.bf16 %v45_v33, %v41_v32  ;;  %v47_v41 = vld [vmem:[%s3922_s1 + $0xc0] sm:$0xff] }
   0xa   :  { %1477 = vmatpush1.bf16.msra.mxu0 %v1476_v21  ;;  %v52_v36 = vld [vmem:[%s3922_s1 + $0xe8] sm:$0xff]  ;;  %v54_v40 = vld [vmem:[%s3922_s1 + $0xf8] sm:$0xff]  ;;  %v51_v42 = vld [vmem:[%s3922_s1 + $0xe0] sm:$0xff] }
   0xb   :  { %1733 = vmatpush1.bf16.msra.mxu1 %v1732_v25  ;;  %1479 = vmatprep.subr.bf16.mxu0 %v1478_v26  ;;  %v1482_v39 = vpack.c.bf16 %v52_v36, %v48_v35  ;;  %v1738_v43 = vpack.c.bf16 %v54_v40, %v50_v37  ;;  %v49_v44 = vld [vmem:[%s3922_s1 + $0xd0] sm:$0xff]  ;;  %v56_v46 = vld [vmem:[%s3922_s1 + $0x108] sm:$0xff]  ;;  %v58_v48 = vld [vmem:[%s3922_s1 + $0x118] sm:$0xff]  ;;  %v1484_v50 = vpack.c.bf16 %v51_v42, %v47_v41 }
   0xc   :  { %1735 = vmatprep.subr.bf16.mxu1 %v1734_v30  ;;  %v53_v45 = vld [vmem:[%s3922_s1 + $0xf0] sm:$0xff]  ;;  %v60_v47 = vld [vmem:[%s3922_s1 + $0x128] sm:$0xff]  ;;  %v62_v49 = vld [vmem:[%s3922_s1 + $0x138] sm:$0xff] }
   0xd   :  { %v1740_v51 = vpack.c.bf16 %v53_v45, %v49_v44  ;;  %v1486_v52 = vpack.c.bf16 %v60_v47, %v56_v46  ;;  %v55_v53 = vld [vmem:[%s3922_s1 + $0x100] sm:$0xff]  ;;  %v57_v55 = vld [vmem:[%s3922_s1 + $0x110] sm:$0xff]  ;;  %v1742_v56 = vpack.c.bf16 %v62_v49, %v58_v48  ;;  %v64_v58 = vld [vmem:[%s3922_s1 + $0x148] sm:$0xff]  ;;  %v537_v46 = vlaneseq }
   0xe   :  { %1481 = vmatpush1.bf16.msra.mxu0 %v1480_v34  ;;  %v59_v54 = vld [vmem:[%s3922_s1 + $0x120] sm:$0xff]  ;;  %v61_v57 = vld [vmem:[%s3922_s1 + $0x130] sm:$0xff]  ;;  %v68_v59 = vld [vmem:[%s3922_s1 + $0x168] sm:$0xff]  ;;  %v2090_v47 = vmov 1983009808  }
   0xf   :  { %1737 = vmatpush1.bf16.msra.mxu1 %v1736_v38  ;;  %1483 = vmatprep.subr.bf16.mxu0 %v1482_v39  ;;  %v66_v60 = vld [vmem:[%s3922_s1 + $0x158] sm:$0xff]  ;;  %v1488_v62 = vpack.c.bf16 %v59_v54, %v55_v53  ;;  %v1744_v63 = vpack.c.bf16 %v61_v57, %v57_v55  ;;  %v1490_v0 = vpack.c.bf16 %v68_v59, %v64_v58  ;;  %v63_v1 = vld [vmem:[%s3922_s1 + $0x140] sm:$0xff]  ;;  %v65_v3 = vld [vmem:[%s3922_s1 + $0x150] sm:$0xff]  ;;  %v561_v48 = vunpack.c.l.s4 %v2090_v47 }
  0x10   :  { %1739 = vmatprep.subr.bf16.mxu1 %v1738_v43  ;;  %v70_v61 = vld [vmem:[%s3922_s1 + $0x178] sm:$0xff]  ;;  %v67_v2 = vld [vmem:[%s3922_s1 + $0x160] sm:$0xff]  ;;  %v69_v5 = vld [vmem:[%s3922_s1 + $0x170] sm:$0xff] }
  0x11   :  { %v1746_v4 = vpack.c.bf16 %v70_v61, %v66_v60  ;;  %v72_v6 = vld [vmem:[%s3922_s1 + $0x188] sm:$0xff]  ;;  %v74_v8 = vld [vmem:[%s3922_s1 + $0x198] sm:$0xff]  ;;  %v1492_v10 = vpack.c.bf16 %v67_v2, %v63_v1  ;;  %v1748_v11 = vpack.c.bf16 %v69_v5, %v65_v3  ;;  %v71_v13 = vld [vmem:[%s3922_s1 + $0x180] sm:$0xff]  ;;  %v2374_v61 = vshrl.u32 %v537_v46, 7 }
  0x12   :  { %1485 = vmatpush1.bf16.msra.mxu0 %v1484_v50  ;;  %v76_v7 = vld [vmem:[%s3922_s1 + $0x1a8] sm:$0xff]  ;;  %v78_v9 = vld [vmem:[%s3922_s1 + $0x1b8] sm:$0xff]  ;;  %v75_v14 = vld [vmem:[%s3922_s1 + $0x1a0] sm:$0xff] }
  0x13   :  { %1741 = vmatpush1.bf16.msra.mxu1 %v1740_v51  ;;  %1487 = vmatprep.subr.bf16.mxu0 %v1486_v52  ;;  %v1494_v12 = vpack.c.bf16 %v76_v7, %v72_v6  ;;  %v73_v15 = vld [vmem:[%s3922_s1 + $0x190] sm:$0xff]  ;;  %v1750_v16 = vpack.c.bf16 %v78_v9, %v74_v8  ;;  %v80_v18 = vld [vmem:[%s3922_s1 + $0x1c8] sm:$0xff]  ;;  %v82_v20 = vld [vmem:[%s3922_s1 + $0x1d8] sm:$0xff]  ;;  %v1496_v22 = vpack.c.bf16 %v75_v14, %v71_v13 }
  0x14   :  { %1743 = vmatprep.subr.bf16.mxu1 %v1742_v56  ;;  %v77_v17 = vld [vmem:[%s3922_s1 + $0x1b0] sm:$0xff]  ;;  %v84_v19 = vld [vmem:[%s3922_s1 + $0x1e8] sm:$0xff]  ;;  %v86_v21 = vld [vmem:[%s3922_s1 + $0x1f8] sm:$0xff] }
  0x15   :  { %v1752_v23 = vpack.c.bf16 %v77_v17, %v73_v15  ;;  %v1498_v24 = vpack.c.bf16 %v84_v19, %v80_v18  ;;  %v79_v25 = vld [vmem:[%s3922_s1 + $0x1c0] sm:$0xff]  ;;  %v81_v27 = vld [vmem:[%s3922_s1 + $0x1d0] sm:$0xff]  ;;  %v1754_v28 = vpack.c.bf16 %v86_v21, %v82_v20  ;;  %v88_v30 = vld [vmem:[%s3922_s1 + $0x208] sm:$0xff] }
  0x16   :  { %1489 = vmatpush1.bf16.msra.mxu0 %v1488_v62  ;;  %v83_v26 = vld [vmem:[%s3922_s1 + $0x1e0] sm:$0xff]  ;;  %v85_v29 = vld [vmem:[%s3922_s1 + $0x1f0] sm:$0xff]  ;;  %v92_v31 = vld [vmem:[%s3922_s1 + $0x228] sm:$0xff]  ;;  %v562_v62 = vunpack.c.0.s8 %v561_v48 }
  0x17   :  { %1745 = vmatpush1.bf16.msra.mxu1 %v1744_v63  ;;  %1491 = vmatprep.subr.bf16.mxu0 %v1490_v0  ;;  %v90_v32 = vld [vmem:[%s3922_s1 + $0x218] sm:$0xff]  ;;  %v1500_v34 = vpack.c.bf16 %v83_v26, %v79_v25  ;;  %v1756_v35 = vpack.c.bf16 %v85_v29, %v81_v27  ;;  %v1502_v36 = vpack.c.bf16 %v92_v31, %v88_v30  ;;  %v87_v37 = vld [vmem:[%s3922_s1 + $0x200] sm:$0xff]  ;;  %v89_v39 = vld [vmem:[%s3922_s1 + $0x210] sm:$0xff] }
  0x18   :  { %1747 = vmatprep.subr.bf16.mxu1 %v1746_v4  ;;  %v94_v33 = vld [vmem:[%s3922_s1 + $0x238] sm:$0xff]  ;;  %v91_v38 = vld [vmem:[%s3922_s1 + $0x220] sm:$0xff]  ;;  %v93_v41 = vld [vmem:[%s3922_s1 + $0x230] sm:$0xff] }
  0x19   :  { %v1758_v40 = vpack.c.bf16 %v94_v33, %v90_v32  ;;  %v96_v42 = vld [vmem:[%s3922_s1 + $0x248] sm:$0xff]  ;;  %v98_v44 = vld [vmem:[%s3922_s1 + $0x258] sm:$0xff]  ;;  %v1504_v49 = vpack.c.bf16 %v91_v38, %v87_v37  ;;  %v1760_v50 = vpack.c.bf16 %v93_v41, %v89_v39  ;;  %v95_v52 = vld [vmem:[%s3922_s1 + $0x240] sm:$0xff] }
  0x1a   :  { %1493 = vmatpush1.bf16.msra.mxu0 %v1492_v10  ;;  %v100_v43 = vld [vmem:[%s3922_s1 + $0x268] sm:$0xff]  ;;  %v102_v45 = vld [vmem:[%s3922_s1 + $0x278] sm:$0xff]  ;;  %v99_v53 = vld [vmem:[%s3922_s1 + $0x260] sm:$0xff] }
  0x1b   :  { %1749 = vmatpush1.bf16.msra.mxu1 %v1748_v11  ;;  %1495 = vmatprep.subr.bf16.mxu0 %v1494_v12  ;;  %v1506_v51 = vpack.c.bf16 %v100_v43, %v96_v42  ;;  %v97_v54 = vld [vmem:[%s3922_s1 + $0x250] sm:$0xff]  ;;  %v1762_v55 = vpack.c.bf16 %v102_v45, %v98_v44  ;;  %v104_v57 = vld [vmem:[%s3922_s1 + $0x288] sm:$0xff]  ;;  %v106_v59 = vld [vmem:[%s3922_s1 + $0x298] sm:$0xff]  ;;  %v1508_v63 = vpack.c.bf16 %v99_v53, %v95_v52 }
  0x1c   :  { %1751 = vmatprep.subr.bf16.mxu1 %v1750_v16  ;;  %v101_v56 = vld [vmem:[%s3922_s1 + $0x270] sm:$0xff]  ;;  %v108_v58 = vld [vmem:[%s3922_s1 + $0x2a8] sm:$0xff]  ;;  %v110_v60 = vld [vmem:[%s3922_s1 + $0x2b8] sm:$0xff]  ;;  %v2401_v11 = vsub.s32 %v562_v62, %v2374_v61 }
  0x1d   :  { %v1764_v0 = vpack.c.bf16 %v101_v56, %v97_v54  ;;  %v1510_v1 = vpack.c.bf16 %v108_v58, %v104_v57  ;;  %v103_v2 = vld [vmem:[%s3922_s1 + $0x280] sm:$0xff]  ;;  %v105_v4 = vld [vmem:[%s3922_s1 + $0x290] sm:$0xff]  ;;  %v1766_v5 = vpack.c.bf16 %v110_v60, %v106_v59  ;;  %v112_v7 = vld [vmem:[%s3922_s1 + $0x2c8] sm:$0xff] }
  0x1e   :  { %1497 = vmatpush1.bf16.msra.mxu0 %v1496_v22  ;;  %v107_v3 = vld [vmem:[%s3922_s1 + $0x2a0] sm:$0xff]  ;;  %v109_v6 = vld [vmem:[%s3922_s1 + $0x2b0] sm:$0xff]  ;;  %v116_v8 = vld [vmem:[%s3922_s1 + $0x2e8] sm:$0xff] }
  0x1f   :  { %1753 = vmatpush1.bf16.msra.mxu1 %v1752_v23  ;;  %1499 = vmatprep.subr.bf16.mxu0 %v1498_v24  ;;  %v114_v9 = vld [vmem:[%s3922_s1 + $0x2d8] sm:$0xff]  ;;  %v1512_v12 = vpack.c.bf16 %v107_v3, %v103_v2  ;;  %v111_v13 = vld [vmem:[%s3922_s1 + $0x2c0] sm:$0xff]  ;;  %v1768_v14 = vpack.c.bf16 %v109_v6, %v105_v4  ;;  %v1514_v15 = vpack.c.bf16 %v116_v8, %v112_v7  ;;  %v113_v17 = vld [vmem:[%s3922_s1 + $0x2d0] sm:$0xff] }
  0x20   :  { %1755 = vmatprep.subr.bf16.mxu1 %v1754_v28  ;;  %v118_v10 = vld [vmem:[%s3922_s1 + $0x2f8] sm:$0xff]  ;;  %v115_v16 = vld [vmem:[%s3922_s1 + $0x2e0] sm:$0xff]  ;;  %v117_v18 = vld [vmem:[%s3922_s1 + $0x2f0] sm:$0xff] }
  0x21   :  { %v1770_v19 = vpack.c.bf16 %v118_v10, %v114_v9  ;;  %v120_v20 = vld [vmem:[%s3922_s1 + $0x308] sm:$0xff]  ;;  %v2424_v22 = vld [vmem:[%s3921_s0] sm:$0xff]  ;;  %v122_v23 = vld [vmem:[%s3922_s1 + $0x318] sm:$0xff]  ;;  %v1516_v26 = vpack.c.bf16 %v115_v16, %v111_v13  ;;  %v1772_v27 = vpack.c.bf16 %v117_v18, %v113_v17 }
  0x22   :  { %1501 = vmatpush1.bf16.msra.mxu0 %v1500_v34  ;;  %v124_v21 = vld [vmem:[%s3922_s1 + $0x328] sm:$0xff]  ;;  %v126_v24 = vld [vmem:[%s3922_s1 + $0x338] sm:$0xff]  ;;  %v2434_v25 = vrot.slane %v2424_v22, %v2401_v11  ;;  %v119_v29 = vld [vmem:[%s3922_s1 + $0x300] sm:$0xff]  ;;  %v559_v8 = vcombine.high %v2424_v22, %v2424_v22 }
  0x23   :  { %1757 = vmatpush1.bf16.msra.mxu1 %v1756_v35  ;;  %1503 = vmatprep.subr.bf16.mxu0 %v1502_v36  ;;  %v1518_v28 = vpack.c.bf16 %v124_v21, %v120_v20  ;;  %v123_v30 = vld [vmem:[%s3922_s1 + $0x320] sm:$0xff]  ;;  %v121_v31 = vld [vmem:[%s3922_s1 + $0x310] sm:$0xff]  ;;  %v1774_v33 = vpack.c.bf16 %v126_v24, %v122_v23  ;;  %v128_v35 = vld [vmem:[%s3922_s1 + $0x348] sm:$0xff] }
  0x24   :  { %1759 = vmatprep.subr.bf16.mxu1 %v1758_v40  ;;  %v574_v32 = vcombine.high %v2434_v25, %v2434_v25  ;;  %v125_v34 = vld [vmem:[%s3922_s1 + $0x330] sm:$0xff]  ;;  %v132_v36 = vld [vmem:[%s3922_s1 + $0x368] sm:$0xff]  ;;  %v130_v37 = vld [vmem:[%s3922_s1 + $0x358] sm:$0xff]  ;;  %v1520_v39 = vpack.c.bf16 %v123_v30, %v119_v29  ;;  %v2555_v24 = vrot.slane %v559_v8, %v2401_v11 }
  0x25   :  { %v134_v38 = vld [vmem:[%s3922_s1 + $0x378] sm:$0xff]  ;;  %v1776_v40 = vpack.c.bf16 %v125_v34, %v121_v31  ;;  %v1522_v41 = vpack.c.bf16 %v132_v36, %v128_v35  ;;  %v127_v42 = vld [vmem:[%s3922_s1 + $0x340] sm:$0xff]  ;;  %v129_v44 = vld [vmem:[%s3922_s1 + $0x350] sm:$0xff] }
  0x26   :  { %1505 = vmatpush1.bf16.msra.mxu0 %v1504_v49  ;;  %665 = vmatprep.mubr.f32.mxu0 %v574_v32  ;;  %v131_v43 = vld [vmem:[%s3922_s1 + $0x360] sm:$0xff]  ;;  %v1778_v45 = vpack.c.bf16 %v134_v38, %v130_v37  ;;  %v133_v46 = vld [vmem:[%s3922_s1 + $0x370] sm:$0xff]  ;;  %v136_v47 = vld [vmem:[%s3922_s1 + $0x388] sm:$0xff]  ;;  %v575_v38 = vcombine.high %v2555_v24, %v2555_v24 }
  0x27   :  { %1761 = vmatpush1.bf16.msra.mxu1 %v1760_v50  ;;  %1507 = vmatprep.subr.bf16.mxu0 %v1506_v51  ;;  %v140_v48 = vld [vmem:[%s3922_s1 + $0x3a8] sm:$0xff]  ;;  %v138_v49 = vld [vmem:[%s3922_s1 + $0x398] sm:$0xff]  ;;  %v1524_v51 = vpack.c.bf16 %v131_v43, %v127_v42  ;;  %v1780_v52 = vpack.c.bf16 %v133_v46, %v129_v44  ;;  %v135_v54 = vld [vmem:[%s3922_s1 + $0x380] sm:$0xff] }
  0x28   :  { %1763 = vmatprep.subr.bf16.mxu1 %v1762_v55  ;;  %949 = vmatprep.mubr.f32.mxu1 %v574_v32  ;;  %v142_v50 = vld [vmem:[%s3922_s1 + $0x3b8] sm:$0xff]  ;;  %v1526_v53 = vpack.c.bf16 %v140_v48, %v136_v47  ;;  %v139_v55 = vld [vmem:[%s3922_s1 + $0x3a0] sm:$0xff]  ;;  %v137_v56 = vld [vmem:[%s3922_s1 + $0x390] sm:$0xff] }
  0x29   :  { %v1782_v57 = vpack.c.bf16 %v142_v50, %v138_v49  ;;  %v141_v58 = vld [vmem:[%s3922_s1 + $0x3b0] sm:$0xff]  ;;  %v144_v59 = vld [vmem:[%s3922_s1 + $0x3c8] sm:$0xff]  ;;  %v146_v62 = vld [vmem:[%s3922_s1 + $0x3d8] sm:$0xff] }
  0x2a   :  { %1509 = vmatpush1.bf16.msra.mxu0 %v1508_v63  ;;  %v148_v60 = vld [vmem:[%s3922_s1 + $0x3e8] sm:$0xff]  ;;  %v150_v63 = vld [vmem:[%s3922_s1 + $0x3f8] sm:$0xff]  ;;  %v143_v3 = vld [vmem:[%s3922_s1 + $0x3c0] sm:$0xff] }
  0x2b   :  { %1765 = vmatpush1.bf16.msra.mxu1 %v1764_v0  ;;  %1511 = vmatprep.subr.bf16.mxu0 %v1510_v1  ;;  %v1528_v0 = vpack.c.bf16 %v139_v55, %v135_v54  ;;  %v1784_v1 = vpack.c.bf16 %v141_v58, %v137_v56  ;;  %v1530_v2 = vpack.c.bf16 %v148_v60, %v144_v59  ;;  %v147_v4 = vld [vmem:[%s3922_s1 + $0x3e0] sm:$0xff]  ;;  %v149_v7 = vld [vmem:[%s3922_s1 + $0x3f0] sm:$0xff]  ;;  %v152_v9 = vld [vmem:[%s3922_s1 + $0x408] sm:$0xff] }
  0x2c   :  { %1767 = vmatprep.subr.bf16.mxu1 %v1766_v5  ;;  %v145_v5 = vld [vmem:[%s3922_s1 + $0x3d0] sm:$0xff]  ;;  %v1786_v6 = vpack.c.bf16 %v150_v63, %v146_v62  ;;  %v156_v10 = vld [vmem:[%s3922_s1 + $0x428] sm:$0xff]  ;;  %v158_v13 = vld [vmem:[%s3922_s1 + $0x438] sm:$0xff] }
  0x2d   :  { %v1534_v16 = vpack.c.bf16 %v156_v10, %v152_v9  ;;  %v151_v17 = vld [vmem:[%s3922_s1 + $0x400] sm:$0xff]  ;;  %v157_v21 = vld [vmem:[%s3922_s1 + $0x430] sm:$0xff]  ;;  %v160_v22 = vld [vmem:[%s3922_s1 + $0x448] sm:$0xff] }
  0x2e   :  { %1513 = vmatpush1.bf16.msra.mxu0 %v1512_v12  ;;  %v154_v12 = vld [vmem:[%s3922_s1 + $0x418] sm:$0xff]  ;;  %v155_v18 = vld [vmem:[%s3922_s1 + $0x420] sm:$0xff]  ;;  %v164_v23 = vld [vmem:[%s3922_s1 + $0x468] sm:$0xff] }
  0x2f   :  { %1769 = vmatpush1.bf16.msra.mxu1 %v1768_v14  ;;  %1515 = vmatprep.subr.bf16.mxu0 %v1514_v15  ;;  %v1532_v14 = vpack.c.bf16 %v147_v4, %v143_v3  ;;  %v1788_v15 = vpack.c.bf16 %v149_v7, %v145_v5  ;;  %v1790_v20 = vpack.c.bf16 %v158_v13, %v154_v12  ;;  %v159_v31 = vld [vmem:[%s3922_s1 + $0x440] sm:$0xff]  ;;  %v165_v35 = vld [vmem:[%s3922_s1 + $0x470] sm:$0xff]  ;;  %v168_v36 = vld [vmem:[%s3922_s1 + $0x488] sm:$0xff] }
  0x30   :  { %1771 = vmatprep.subr.bf16.mxu1 %v1770_v19  ;;  %v153_v19 = vld [vmem:[%s3922_s1 + $0x410] sm:$0xff]  ;;  %v1538_v30 = vpack.c.bf16 %v164_v23, %v160_v22  ;;  %v163_v32 = vld [vmem:[%s3922_s1 + $0x460] sm:$0xff]  ;;  %v172_v37 = vld [vmem:[%s3922_s1 + $0x4a8] sm:$0xff] }
  0x31   :  { %v1792_v29 = vpack.c.bf16 %v157_v21, %v153_v19  ;;  %v1542_v43 = vpack.c.bf16 %v172_v37, %v168_v36  ;;  %v167_v44 = vld [vmem:[%s3922_s1 + $0x480] sm:$0xff]  ;;  %v169_v46 = vld [vmem:[%s3922_s1 + $0x490] sm:$0xff]  ;;  %v176_v48 = vld [vmem:[%s3922_s1 + $0x4c8] sm:$0xff] }
  0x32   :  { %1517 = vmatpush1.bf16.msra.mxu0 %v1516_v26  ;;  %v162_v26 = vld [vmem:[%s3922_s1 + $0x458] sm:$0xff]  ;;  %v180_v49 = vld [vmem:[%s3922_s1 + $0x4e8] sm:$0xff]  ;;  %v175_v55 = vld [vmem:[%s3922_s1 + $0x4c0] sm:$0xff] }
  0x33   :  { %1773 = vmatpush1.bf16.msra.mxu1 %v1772_v27  ;;  %1519 = vmatprep.subr.bf16.mxu0 %v1518_v28  ;;  %v166_v27 = vld [vmem:[%s3922_s1 + $0x478] sm:$0xff]  ;;  %v1536_v28 = vpack.c.bf16 %v155_v18, %v151_v17  ;;  %v1546_v54 = vpack.c.bf16 %v180_v49, %v176_v48  ;;  %v179_v56 = vld [vmem:[%s3922_s1 + $0x4e0] sm:$0xff]  ;;  %v181_v59 = vld [vmem:[%s3922_s1 + $0x4f0] sm:$0xff] }
  0x34   :  { %1775 = vmatprep.subr.bf16.mxu1 %v1774_v33  ;;  %v161_v33 = vld [vmem:[%s3922_s1 + $0x450] sm:$0xff]  ;;  %v1794_v34 = vpack.c.bf16 %v166_v27, %v162_v26  ;;  %v178_v50 = vld [vmem:[%s3922_s1 + $0x4d8] sm:$0xff]  ;;  %v184_v60 = vld [vmem:[%s3922_s1 + $0x508] sm:$0xff] }
  0x35   :  { %v1796_v42 = vpack.c.bf16 %v165_v35, %v161_v33  ;;  %v188_v62 = vld [vmem:[%s3922_s1 + $0x528] sm:$0xff]  ;;  %v186_v63 = vld [vmem:[%s3922_s1 + $0x518] sm:$0xff]  ;;  %v183_v4 = vld [vmem:[%s3922_s1 + $0x500] sm:$0xff] }
  0x36   :  { %1521 = vmatpush1.bf16.msra.mxu0 %v1520_v39  ;;  %v170_v39 = vld [vmem:[%s3922_s1 + $0x498] sm:$0xff]  ;;  %v1550_v3 = vpack.c.bf16 %v188_v62, %v184_v60  ;;  %v187_v5 = vld [vmem:[%s3922_s1 + $0x520] sm:$0xff]  ;;  %v189_v8 = vld [vmem:[%s3922_s1 + $0x530] sm:$0xff] }
  0x37   :  { %1777 = vmatpush1.bf16.msra.mxu1 %v1776_v40  ;;  %1523 = vmatprep.subr.bf16.mxu0 %v1522_v41  ;;  %v174_v40 = vld [vmem:[%s3922_s1 + $0x4b8] sm:$0xff]  ;;  %v1540_v41 = vpack.c.bf16 %v163_v32, %v159_v31  ;;  %v192_v9 = vld [vmem:[%s3922_s1 + $0x548] sm:$0xff]  ;;  %v191_v17 = vld [vmem:[%s3922_s1 + $0x540] sm:$0xff] }
  0x38   :  { %1779 = vmatprep.subr.bf16.mxu1 %v1778_v45  ;;  %v171_v45 = vld [vmem:[%s3922_s1 + $0x4a0] sm:$0xff]  ;;  %v1798_v47 = vpack.c.bf16 %v174_v40, %v170_v39  ;;  %v196_v10 = vld [vmem:[%s3922_s1 + $0x568] sm:$0xff]  ;;  %v194_v12 = vld [vmem:[%s3922_s1 + $0x558] sm:$0xff] }
  0x39   :  { %v198_v13 = vld [vmem:[%s3922_s1 + $0x578] sm:$0xff]  ;;  %v195_v18 = vld [vmem:[%s3922_s1 + $0x560] sm:$0xff]  ;;  %v193_v19 = vld [vmem:[%s3922_s1 + $0x550] sm:$0xff] }
  0x3a   :  { %1525 = vmatpush1.bf16.msra.mxu0 %v1524_v51  ;;  %v182_v51 = vld [vmem:[%s3922_s1 + $0x4f8] sm:$0xff]  ;;  %v197_v21 = vld [vmem:[%s3922_s1 + $0x570] sm:$0xff]  ;;  %v200_v22 = vld [vmem:[%s3922_s1 + $0x588] sm:$0xff] }
  0x3b   :  { %1781 = vmatpush1.bf16.msra.mxu1 %v1780_v52  ;;  %1527 = vmatprep.subr.bf16.mxu0 %v1526_v53  ;;  %v1544_v52 = vpack.c.bf16 %v171_v45, %v167_v44  ;;  %v1802_v58 = vpack.c.bf16 %v182_v51, %v178_v50  ;;  %v204_v23 = vld [vmem:[%s3922_s1 + $0x5a8] sm:$0xff]  ;;  %v202_v26 = vld [vmem:[%s3922_s1 + $0x598] sm:$0xff]  ;;  %v199_v31 = vld [vmem:[%s3922_s1 + $0x580] sm:$0xff] }
  0x3c   :  { %1783 = vmatprep.subr.bf16.mxu1 %v1782_v57  ;;  %v177_v57 = vld [vmem:[%s3922_s1 + $0x4d0] sm:$0xff]  ;;  %v206_v27 = vld [vmem:[%s3922_s1 + $0x5b8] sm:$0xff]  ;;  %v203_v32 = vld [vmem:[%s3922_s1 + $0x5a0] sm:$0xff] }
  0x3d   :  { %v201_v33 = vld [vmem:[%s3922_s1 + $0x590] sm:$0xff]  ;;  %v208_v36 = vld [vmem:[%s3922_s1 + $0x5c8] sm:$0xff]  ;;  %v214_v39 = vld [vmem:[%s3922_s1 + $0x5f8] sm:$0xff]  ;;  %v1560_v40 = vpack.c.bf16 %v203_v32, %v199_v31 }
  0x3e   :  { %1529 = vmatpush1.bf16.msra.mxu0 %v1528_v0  ;;  %v190_v0 = vld [vmem:[%s3922_s1 + $0x538] sm:$0xff]  ;;  %v205_v35 = vld [vmem:[%s3922_s1 + $0x5b0] sm:$0xff]  ;;  %v212_v37 = vld [vmem:[%s3922_s1 + $0x5e8] sm:$0xff] }
  0x3f   :  { %1785 = vmatpush1.bf16.msra.mxu1 %v1784_v1  ;;  %1531 = vmatprep.subr.bf16.mxu0 %v1530_v2  ;;  %v1548_v1 = vpack.c.bf16 %v179_v56, %v175_v55  ;;  %v1804_v2 = vpack.c.bf16 %v181_v59, %v177_v57  ;;  %v1806_v7 = vpack.c.bf16 %v190_v0, %v186_v63  ;;  %v211_v44 = vld [vmem:[%s3922_s1 + $0x5e0] sm:$0xff]  ;;  %v209_v45 = vld [vmem:[%s3922_s1 + $0x5d0] sm:$0xff]  ;;  %v220_v48 = vld [vmem:[%s3922_s1 + $0x628] sm:$0xff] }
  0x40   :  { %1787 = vmatprep.subr.bf16.mxu1 %v1786_v6  ;;  %v185_v6 = vld [vmem:[%s3922_s1 + $0x510] sm:$0xff]  ;;  %v218_v49 = vld [vmem:[%s3922_s1 + $0x618] sm:$0xff]  ;;  %v219_v55 = vld [vmem:[%s3922_s1 + $0x620] sm:$0xff] }
  0x41   :  { %v222_v50 = vld [vmem:[%s3922_s1 + $0x638] sm:$0xff]  ;;  %v217_v56 = vld [vmem:[%s3922_s1 + $0x610] sm:$0xff]  ;;  %v224_v59 = vld [vmem:[%s3922_s1 + $0x648] sm:$0xff] }
  0x42   :  { %1533 = vmatpush1.bf16.msra.mxu0 %v1532_v14  ;;  %v1552_v14 = vpack.c.bf16 %v187_v5, %v183_v4  ;;  %v1822_v57 = vpack.c.bf16 %v222_v50, %v218_v49  ;;  %v228_v60 = vld [vmem:[%s3922_s1 + $0x668] sm:$0xff]  ;;  %v226_v62 = vld [vmem:[%s3922_s1 + $0x658] sm:$0xff]  ;;  %v227_v4 = vld [vmem:[%s3922_s1 + $0x660] sm:$0xff] }
  0x43   :  { %1789 = vmatpush1.bf16.msra.mxu1 %v1788_v15  ;;  %1535 = vmatprep.subr.bf16.mxu0 %v1534_v16  ;;  %v1808_v15 = vpack.c.bf16 %v189_v8, %v185_v6  ;;  %v1554_v16 = vpack.c.bf16 %v196_v10, %v192_v9  ;;  %v230_v63 = vld [vmem:[%s3922_s1 + $0x678] sm:$0xff]  ;;  %v225_v5 = vld [vmem:[%s3922_s1 + $0x650] sm:$0xff]  ;;  %v232_v8 = vld [vmem:[%s3922_s1 + $0x688] sm:$0xff] }
  0x44   :  { %1791 = vmatprep.subr.bf16.mxu1 %v1790_v20  ;;  %v1810_v20 = vpack.c.bf16 %v198_v13, %v194_v12  ;;  %v1826_v6 = vpack.c.bf16 %v230_v63, %v226_v62  ;;  %v236_v9 = vld [vmem:[%s3922_s1 + $0x6a8] sm:$0xff]  ;;  %v234_v10 = vld [vmem:[%s3922_s1 + $0x698] sm:$0xff]  ;;  %v243_v31 = vld [vmem:[%s3922_s1 + $0x6e0] sm:$0xff] }
  0x45   :  { %666 = vmatmul.mubr.f32.vlgmr.msra.gmra.mrb[0].mxu0 %v2434_v25  ;;  %v238_v12 = vld [vmem:[%s3922_s1 + $0x6b8] sm:$0xff]  ;;  %v241_v32 = vld [vmem:[%s3922_s1 + $0x6d0] sm:$0xff] }
  0x46   :  { %1537 = vmatpush1.bf16.msra.mxu0 %v1536_v28  ;;  %950 = vmatmul.mubr.f32.vlgmr.msra.gmra.mrb[0].mxu1 %v2434_v25  ;;  %v173_v25 = vld [vmem:[%s3922_s1 + $0x4b0] sm:$0xff]  ;;  %v1556_v28 = vpack.c.bf16 %v195_v18, %v191_v17  ;;  %v235_v17 = vld [vmem:[%s3922_s1 + $0x6a0] sm:$0xff]  ;;  %v262_v49 = vld [vmem:[%s3922_s1 + $0x778] sm:$0xff] }
  0x47   :  { %1793 = vmatpush1.bf16.msra.mxu1 %v1792_v29  ;;  %1539 = vmatprep.subr.bf16.mxu0 %v1538_v30  ;;  %v1800_v53 = vpack.c.bf16 %v173_v25, %v169_v46  ;;  %v1812_v29 = vpack.c.bf16 %v197_v21, %v193_v19  ;;  %v1558_v30 = vpack.c.bf16 %v204_v23, %v200_v22  ;;  %v216_v25 = vld [vmem:[%s3922_s1 + $0x608] sm:$0xff]  ;;  %v233_v18 = vld [vmem:[%s3922_s1 + $0x690] sm:$0xff]  ;;  %v242_v23 = vld [vmem:[%s3922_s1 + $0x6d8] sm:$0xff] }
  0x48   :  { %1795 = vmatprep.subr.bf16.mxu1 %v1794_v34  ;;  %736 = vmatprep.mubr.f32.mxu0 %v575_v38  ;;  %v1814_v34 = vpack.c.bf16 %v206_v27, %v202_v26  ;;  %v1830_v19 = vpack.c.bf16 %v238_v12, %v234_v10  ;;  %v240_v21 = vld [vmem:[%s3922_s1 + $0x6c8] sm:$0xff]  ;;  %v246_v26 = vld [vmem:[%s3922_s1 + $0x6f8] sm:$0xff] }
  0x49   :  { %1020 = vmatprep.mubr.f32.mxu1 %v575_v38  ;;  %v210_v38 = vld [vmem:[%s3922_s1 + $0x5d8] sm:$0xff]  ;;  %v244_v22 = vld [vmem:[%s3922_s1 + $0x6e8] sm:$0xff] }
  0x4a   :  { %1541 = vmatpush1.bf16.msra.mxu0 %v1540_v41  ;;  %v1816_v41 = vpack.c.bf16 %v205_v35, %v201_v33  ;;  %v1818_v46 = vpack.c.bf16 %v214_v39, %v210_v38  ;;  %v1834_v33 = vpack.c.bf16 %v246_v26, %v242_v23  ;;  %v248_v35 = vld [vmem:[%s3922_s1 + $0x708] sm:$0xff]  ;;  %v254_v38 = vld [vmem:[%s3922_s1 + $0x738] sm:$0xff] }
  0x4b   :  { %1797 = vmatpush1.bf16.msra.mxu1 %v1796_v42  ;;  %1543 = vmatprep.subr.bf16.mxu0 %v1542_v43  ;;  %v1562_v42 = vpack.c.bf16 %v212_v37, %v208_v36  ;;  %v207_v43 = vld [vmem:[%s3922_s1 + $0x5c0] sm:$0xff]  ;;  %v252_v36 = vld [vmem:[%s3922_s1 + $0x728] sm:$0xff]  ;;  %v250_v37 = vld [vmem:[%s3922_s1 + $0x718] sm:$0xff] }
  0x4c   :  { %1799 = vmatprep.subr.bf16.mxu1 %v1798_v47  ;;  %v213_v47 = vld [vmem:[%s3922_s1 + $0x5f0] sm:$0xff]  ;;  %v1564_v51 = vpack.c.bf16 %v211_v44, %v207_v43  ;;  %v251_v43 = vld [vmem:[%s3922_s1 + $0x720] sm:$0xff]  ;;  %v270_v62 = vld [vmem:[%s3922_s1 + $0x7b8] sm:$0xff] }
  0x4d   :  { %v249_v44 = vld [vmem:[%s3922_s1 + $0x710] sm:$0xff]  ;;  %v278_v10 = vld [vmem:[%s3922_s1 + $0x7f8] sm:$0xff] }
  0x4e   :  { %1545 = vmatpush1.bf16.msra.mxu0 %v1544_v52  ;;  %v1820_v52 = vpack.c.bf16 %v213_v47, %v209_v45  ;;  %v1838_v45 = vpack.c.bf16 %v254_v38, %v250_v37  ;;  %v256_v47 = vld [vmem:[%s3922_s1 + $0x748] sm:$0xff]  ;;  %v286_v23 = vld [vmem:[%s3922_s1 + $0x838] sm:$0xff] }
  0x4f   :  { %1801 = vmatpush1.bf16.msra.mxu1 %v1800_v53  ;;  %1547 = vmatprep.subr.bf16.mxu0 %v1546_v54  ;;  %v1566_v53 = vpack.c.bf16 %v220_v48, %v216_v25  ;;  %v215_v54 = vld [vmem:[%s3922_s1 + $0x600] sm:$0xff]  ;;  %v260_v25 = vld [vmem:[%s3922_s1 + $0x768] sm:$0xff]  ;;  %v258_v48 = vld [vmem:[%s3922_s1 + $0x758] sm:$0xff] }
  0x50   :  { %1803 = vmatprep.subr.bf16.mxu1 %v1802_v58  ;;  %v221_v58 = vld [vmem:[%s3922_s1 + $0x630] sm:$0xff]  ;;  %v1568_v0 = vpack.c.bf16 %v219_v55, %v215_v54  ;;  %v259_v54 = vld [vmem:[%s3922_s1 + $0x760] sm:$0xff]  ;;  %v294_v37 = vld [vmem:[%s3922_s1 + $0x878] sm:$0xff] }
  0x51   :  { %v257_v55 = vld [vmem:[%s3922_s1 + $0x750] sm:$0xff] }
  0x52   :  { %1549 = vmatpush1.bf16.msra.mxu0 %v1548_v1  ;;  %v1824_v1 = vpack.c.bf16 %v221_v58, %v217_v56  ;;  %v1842_v56 = vpack.c.bf16 %v262_v49, %v258_v48  ;;  %v264_v58 = vld [vmem:[%s3922_s1 + $0x788] sm:$0xff]  ;;  %v298_v49 = vld [vmem:[%s3922_s1 + $0x898] sm:$0xff] }
  0x53   :  { %1805 = vmatpush1.bf16.msra.mxu1 %v1804_v2  ;;  %1551 = vmatprep.subr.bf16.mxu0 %v1550_v3  ;;  %v1570_v2 = vpack.c.bf16 %v228_v60, %v224_v59  ;;  %v223_v3 = vld [vmem:[%s3922_s1 + $0x640] sm:$0xff]  ;;  %v268_v59 = vld [vmem:[%s3922_s1 + $0x7a8] sm:$0xff]  ;;  %v266_v60 = vld [vmem:[%s3922_s1 + $0x798] sm:$0xff] }
  0x54   :  { %1807 = vmatprep.subr.bf16.mxu1 %v1806_v7  ;;  %v229_v7 = vld [vmem:[%s3922_s1 + $0x670] sm:$0xff]  ;;  %v1572_v13 = vpack.c.bf16 %v227_v4, %v223_v3  ;;  %v267_v3 = vld [vmem:[%s3922_s1 + $0x7a0] sm:$0xff]  ;;  %v300_v48 = vld [vmem:[%s3922_s1 + $0x8a8] sm:$0xff] }
  0x55   :  { %v265_v4 = vld [vmem:[%s3922_s1 + $0x790] sm:$0xff] }
  0x56   :  { %1553 = vmatpush1.bf16.msra.mxu0 %v1552_v14  ;;  %v1828_v14 = vpack.c.bf16 %v229_v7, %v225_v5  ;;  %v1846_v5 = vpack.c.bf16 %v270_v62, %v266_v60  ;;  %v272_v7 = vld [vmem:[%s3922_s1 + $0x7c8] sm:$0xff]  ;;  %v306_v62 = vld [vmem:[%s3922_s1 + $0x8d8] sm:$0xff] }
  0x57   :  { %1809 = vmatpush1.bf16.msra.mxu1 %v1808_v15  ;;  %1555 = vmatprep.subr.bf16.mxu0 %v1554_v16  ;;  %v1574_v15 = vpack.c.bf16 %v236_v9, %v232_v8  ;;  %v231_v16 = vld [vmem:[%s3922_s1 + $0x680] sm:$0xff]  ;;  %v276_v8 = vld [vmem:[%s3922_s1 + $0x7e8] sm:$0xff]  ;;  %v274_v9 = vld [vmem:[%s3922_s1 + $0x7d8] sm:$0xff] }
  0x58   :  { %1811 = vmatprep.subr.bf16.mxu1 %v1810_v20  ;;  %v237_v20 = vld [vmem:[%s3922_s1 + $0x6b0] sm:$0xff]  ;;  %v1576_v27 = vpack.c.bf16 %v235_v17, %v231_v16  ;;  %v275_v16 = vld [vmem:[%s3922_s1 + $0x7e0] sm:$0xff]  ;;  %v308_v60 = vld [vmem:[%s3922_s1 + $0x8e8] sm:$0xff] }
  0x59   :  { %v273_v17 = vld [vmem:[%s3922_s1 + $0x7d0] sm:$0xff] }
  0x5a   :  { %1557 = vmatpush1.bf16.msra.mxu0 %v1556_v28  ;;  %v1832_v28 = vpack.c.bf16 %v237_v20, %v233_v18  ;;  %v1850_v18 = vpack.c.bf16 %v278_v10, %v274_v9  ;;  %v280_v20 = vld [vmem:[%s3922_s1 + $0x808] sm:$0xff]  ;;  %v314_v10 = vld [vmem:[%s3922_s1 + $0x918] sm:$0xff] }
  0x5b   :  { %1813 = vmatpush1.bf16.msra.mxu1 %v1812_v29  ;;  %1559 = vmatprep.subr.bf16.mxu0 %v1558_v30  ;;  %v1578_v29 = vpack.c.bf16 %v244_v22, %v240_v21  ;;  %v239_v30 = vld [vmem:[%s3922_s1 + $0x6c0] sm:$0xff]  ;;  %v284_v21 = vld [vmem:[%s3922_s1 + $0x828] sm:$0xff]  ;;  %v282_v22 = vld [vmem:[%s3922_s1 + $0x818] sm:$0xff] }
  0x5c   :  { %1815 = vmatprep.subr.bf16.mxu1 %v1814_v34  ;;  %v245_v34 = vld [vmem:[%s3922_s1 + $0x6f0] sm:$0xff]  ;;  %v1580_v39 = vpack.c.bf16 %v243_v31, %v239_v30  ;;  %v283_v30 = vld [vmem:[%s3922_s1 + $0x820] sm:$0xff]  ;;  %v316_v9 = vld [vmem:[%s3922_s1 + $0x928] sm:$0xff] }
  0x5d   :  { %v281_v31 = vld [vmem:[%s3922_s1 + $0x810] sm:$0xff] }
  0x5e   :  { %1561 = vmatpush1.bf16.msra.mxu0 %v1560_v40  ;;  %v1836_v40 = vpack.c.bf16 %v245_v34, %v241_v32  ;;  %v1854_v32 = vpack.c.bf16 %v286_v23, %v282_v22  ;;  %v288_v34 = vld [vmem:[%s3922_s1 + $0x848] sm:$0xff]  ;;  %v322_v23 = vld [vmem:[%s3922_s1 + $0x958] sm:$0xff] }
  0x5f   :  { %1817 = vmatpush1.bf16.msra.mxu1 %v1816_v41  ;;  %1563 = vmatprep.subr.bf16.mxu0 %v1562_v42  ;;  %v1582_v41 = vpack.c.bf16 %v252_v36, %v248_v35  ;;  %v247_v42 = vld [vmem:[%s3922_s1 + $0x700] sm:$0xff]  ;;  %v292_v35 = vld [vmem:[%s3922_s1 + $0x868] sm:$0xff]  ;;  %v290_v36 = vld [vmem:[%s3922_s1 + $0x858] sm:$0xff] }
  0x60   :  { %1819 = vmatprep.subr.bf16.mxu1 %v1818_v46  ;;  %v253_v46 = vld [vmem:[%s3922_s1 + $0x730] sm:$0xff]  ;;  %v1584_v50 = vpack.c.bf16 %v251_v43, %v247_v42  ;;  %v287_v42 = vld [vmem:[%s3922_s1 + $0x840] sm:$0xff]  ;;  %v324_v22 = vld [vmem:[%s3922_s1 + $0x968] sm:$0xff] }
  0x61   :  { %v291_v43 = vld [vmem:[%s3922_s1 + $0x860] sm:$0xff] }
  0x62   :  { %1565 = vmatpush1.bf16.msra.mxu0 %v1564_v51  ;;  %v1840_v51 = vpack.c.bf16 %v253_v46, %v249_v44  ;;  %v289_v44 = vld [vmem:[%s3922_s1 + $0x850] sm:$0xff]  ;;  %v1858_v46 = vpack.c.bf16 %v294_v37, %v290_v36  ;;  %v332_v36 = vld [vmem:[%s3922_s1 + $0x9a8] sm:$0xff]  ;;  %v330_v37 = vld [vmem:[%s3922_s1 + $0x998] sm:$0xff] }
  0x63   :  { %1821 = vmatpush1.bf16.msra.mxu1 %v1820_v52  ;;  %1567 = vmatprep.subr.bf16.mxu0 %v1566_v53  ;;  %v1586_v52 = vpack.c.bf16 %v260_v25, %v256_v47  ;;  %v255_v53 = vld [vmem:[%s3922_s1 + $0x740] sm:$0xff]  ;;  %v293_v47 = vld [vmem:[%s3922_s1 + $0x870] sm:$0xff]  ;;  %v296_v25 = vld [vmem:[%s3922_s1 + $0x888] sm:$0xff] }
  0x64   :  { %1823 = vmatprep.subr.bf16.mxu1 %v1822_v57  ;;  %v261_v57 = vld [vmem:[%s3922_s1 + $0x770] sm:$0xff]  ;;  %v1588_v63 = vpack.c.bf16 %v259_v54, %v255_v53  ;;  %v1860_v53 = vpack.c.bf16 %v293_v47, %v289_v44  ;;  %v1606_v54 = vpack.c.bf16 %v300_v48, %v296_v25  ;;  %v331_v44 = vld [vmem:[%s3922_s1 + $0x9a0] sm:$0xff]  ;;  %v336_v48 = vld [vmem:[%s3922_s1 + $0x9c8] sm:$0xff] }
  0x65   :  { %v333_v25 = vld [vmem:[%s3922_s1 + $0x9b0] sm:$0xff] }
  0x66   :  { %1569 = vmatpush1.bf16.msra.mxu0 %v1568_v0  ;;  %v1844_v0 = vpack.c.bf16 %v261_v57, %v257_v55  ;;  %v295_v55 = vld [vmem:[%s3922_s1 + $0x880] sm:$0xff]  ;;  %v297_v57 = vld [vmem:[%s3922_s1 + $0x890] sm:$0xff] }
  0x67   :  { %1825 = vmatpush1.bf16.msra.mxu1 %v1824_v1  ;;  %1571 = vmatprep.subr.bf16.mxu0 %v1570_v2  ;;  %v1590_v1 = vpack.c.bf16 %v268_v59, %v264_v58  ;;  %v263_v2 = vld [vmem:[%s3922_s1 + $0x780] sm:$0xff]  ;;  %v304_v59 = vld [vmem:[%s3922_s1 + $0x8c8] sm:$0xff] }
  0x68   :  { %1827 = vmatprep.subr.bf16.mxu1 %v1826_v6  ;;  %v269_v6 = vld [vmem:[%s3922_s1 + $0x7b0] sm:$0xff]  ;;  %v1592_v12 = vpack.c.bf16 %v267_v3, %v263_v2  ;;  %v1610_v2 = vpack.c.bf16 %v308_v60, %v304_v59  ;;  %v303_v3 = vld [vmem:[%s3922_s1 + $0x8c0] sm:$0xff]  ;;  %v344_v59 = vld [vmem:[%s3922_s1 + $0xa08] sm:$0xff] }
  0x69   :  { %v348_v60 = vld [vmem:[%s3922_s1 + $0xa28] sm:$0xff] }
  0x6a   :  { %1573 = vmatpush1.bf16.msra.mxu0 %v1572_v13  ;;  %v1848_v13 = vpack.c.bf16 %v269_v6, %v265_v4  ;;  %v307_v4 = vld [vmem:[%s3922_s1 + $0x8e0] sm:$0xff] }
  0x6b   :  { %1829 = vmatpush1.bf16.msra.mxu1 %v1828_v14  ;;  %1575 = vmatprep.subr.bf16.mxu0 %v1574_v15  ;;  %v1594_v14 = vpack.c.bf16 %v276_v8, %v272_v7  ;;  %v271_v15 = vld [vmem:[%s3922_s1 + $0x7c0] sm:$0xff]  ;;  %v309_v7 = vld [vmem:[%s3922_s1 + $0x8f0] sm:$0xff]  ;;  %v312_v8 = vld [vmem:[%s3922_s1 + $0x908] sm:$0xff] }
  0x6c   :  { %1831 = vmatprep.subr.bf16.mxu1 %v1830_v19  ;;  %v277_v19 = vld [vmem:[%s3922_s1 + $0x7f0] sm:$0xff]  ;;  %v1596_v26 = vpack.c.bf16 %v275_v16, %v271_v15  ;;  %v1614_v15 = vpack.c.bf16 %v316_v9, %v312_v8  ;;  %v311_v16 = vld [vmem:[%s3922_s1 + $0x900] sm:$0xff]  ;;  %v352_v8 = vld [vmem:[%s3922_s1 + $0xa48] sm:$0xff] }
  0x6d   :  { %v356_v9 = vld [vmem:[%s3922_s1 + $0xa68] sm:$0xff] }
  0x6e   :  { %1577 = vmatpush1.bf16.msra.mxu0 %v1576_v27  ;;  %v1852_v27 = vpack.c.bf16 %v277_v19, %v273_v17  ;;  %v315_v17 = vld [vmem:[%s3922_s1 + $0x920] sm:$0xff] }
  0x6f   :  { %1833 = vmatpush1.bf16.msra.mxu1 %v1832_v28  ;;  %1579 = vmatprep.subr.bf16.mxu0 %v1578_v29  ;;  %v1598_v28 = vpack.c.bf16 %v284_v21, %v280_v20  ;;  %v279_v29 = vld [vmem:[%s3922_s1 + $0x800] sm:$0xff]  ;;  %v317_v20 = vld [vmem:[%s3922_s1 + $0x930] sm:$0xff]  ;;  %v320_v21 = vld [vmem:[%s3922_s1 + $0x948] sm:$0xff] }
  0x70   :  { %1835 = vmatprep.subr.bf16.mxu1 %v1834_v33  ;;  %v285_v33 = vld [vmem:[%s3922_s1 + $0x830] sm:$0xff]  ;;  %v1600_v38 = vpack.c.bf16 %v283_v30, %v279_v29  ;;  %v1618_v29 = vpack.c.bf16 %v324_v22, %v320_v21  ;;  %v319_v30 = vld [vmem:[%s3922_s1 + $0x940] sm:$0xff]  ;;  %v360_v21 = vld [vmem:[%s3922_s1 + $0xa88] sm:$0xff] }
  0x71   :  { %v364_v22 = vld [vmem:[%s3922_s1 + $0xaa8] sm:$0xff] }
  0x72   :  { %1581 = vmatpush1.bf16.msra.mxu0 %v1580_v39  ;;  %v2954_v39 = vld [vmem:[%s3921_s0 + $0x8] sm:$0xff] }
  0x73   :  { %1837 = vmatpush1.bf16.msra.mxu1 %v1836_v40  ;;  %1583 = vmatprep.subr.bf16.mxu0 %v1582_v41  ;;  %v1856_v40 = vpack.c.bf16 %v285_v33, %v281_v31  ;;  %v1602_v41 = vpack.c.bf16 %v292_v35, %v288_v34  ;;  %v323_v31 = vld [vmem:[%s3922_s1 + $0x960] sm:$0xff]  ;;  %v325_v34 = vld [vmem:[%s3922_s1 + $0x970] sm:$0xff]  ;;  %v328_v35 = vld [vmem:[%s3922_s1 + $0x988] sm:$0xff] }
  0x74   :  { %1839 = vmatprep.subr.bf16.mxu1 %v1838_v45  ;;  %v2967_v45 = vrot.slane %v2954_v39, %v2401_v11 }
  0x76   :  { %1585 = vmatpush1.bf16.msra.mxu0 %v1584_v50  ;;  %v302_v50 = vld [vmem:[%s3922_s1 + $0x8b8] sm:$0xff] }
  0x77   :  { %1841 = vmatpush1.bf16.msra.mxu1 %v1840_v51  ;;  %1587 = vmatprep.subr.bf16.mxu0 %v1586_v52  ;;  %v591_v51 = vcombine.high %v2967_v45, %v2967_v45  ;;  %v1604_v52 = vpack.c.bf16 %v291_v43, %v287_v42  ;;  %v1862_v58 = vpack.c.bf16 %v302_v50, %v298_v49  ;;  %v327_v43 = vld [vmem:[%s3922_s1 + $0x980] sm:$0xff]  ;;  %v340_v49 = vld [vmem:[%s3922_s1 + $0x9e8] sm:$0xff]  ;;  %v338_v50 = vld [vmem:[%s3922_s1 + $0x9d8] sm:$0xff] }
  0x78   :  { %1843 = vmatprep.subr.bf16.mxu1 %v1842_v56  ;;  %v299_v56 = vld [vmem:[%s3922_s1 + $0x8a0] sm:$0xff]  ;;  %v1622_v42 = vpack.c.bf16 %v332_v36, %v328_v35  ;;  %v368_v35 = vld [vmem:[%s3922_s1 + $0xac8] sm:$0xff] }
  0x79   :  { %v372_v36 = vld [vmem:[%s3922_s1 + $0xae8] sm:$0xff] }
  0x7a   :  { %1589 = vmatpush1.bf16.msra.mxu0 %v1588_v63  ;;  %v310_v63 = vld [vmem:[%s3922_s1 + $0x8f8] sm:$0xff] }
  0x7b   :  { %1845 = vmatpush1.bf16.msra.mxu1 %v1844_v0  ;;  %1591 = vmatprep.subr.bf16.mxu0 %v1590_v1  ;;  %v1608_v0 = vpack.c.bf16 %v299_v56, %v295_v55  ;;  %v1866_v6 = vpack.c.bf16 %v310_v63, %v306_v62  ;;  %v335_v55 = vld [vmem:[%s3922_s1 + $0x9c0] sm:$0xff]  ;;  %v346_v62 = vld [vmem:[%s3922_s1 + $0xa18] sm:$0xff] }
  0x7c   :  { %1847 = vmatprep.subr.bf16.mxu1 %v1846_v5  ;;  %v305_v5 = vld [vmem:[%s3922_s1 + $0x8d0] sm:$0xff]  ;;  %v339_v56 = vld [vmem:[%s3922_s1 + $0x9e0] sm:$0xff]  ;;  %v350_v63 = vld [vmem:[%s3922_s1 + $0xa38] sm:$0xff] }
  0x7e   :  { %1593 = vmatpush1.bf16.msra.mxu0 %v1592_v12  ;;  %v318_v12 = vld [vmem:[%s3922_s1 + $0x938] sm:$0xff] }
  0x7f   :  { %1849 = vmatpush1.bf16.msra.mxu1 %v1848_v13  ;;  %1595 = vmatprep.subr.bf16.mxu0 %v1594_v14  ;;  %v1612_v13 = vpack.c.bf16 %v307_v4, %v303_v3  ;;  %v1868_v14 = vpack.c.bf16 %v309_v7, %v305_v5  ;;  %v1870_v19 = vpack.c.bf16 %v318_v12, %v314_v10  ;;  %v343_v3 = vld [vmem:[%s3922_s1 + $0xa00] sm:$0xff]  ;;  %v345_v5 = vld [vmem:[%s3922_s1 + $0xa10] sm:$0xff]  ;;  %v354_v10 = vld [vmem:[%s3922_s1 + $0xa58] sm:$0xff] }
  0x80   :  { %1851 = vmatprep.subr.bf16.mxu1 %v1850_v18  ;;  %v313_v18 = vld [vmem:[%s3922_s1 + $0x910] sm:$0xff]  ;;  %v347_v4 = vld [vmem:[%s3922_s1 + $0xa20] sm:$0xff]  ;;  %v358_v12 = vld [vmem:[%s3922_s1 + $0xa78] sm:$0xff] }
  0x81   :  { %v349_v7 = vld [vmem:[%s3922_s1 + $0xa30] sm:$0xff] }
  0x82   :  { %1597 = vmatpush1.bf16.msra.mxu0 %v1596_v26  ;;  %v326_v26 = vld [vmem:[%s3922_s1 + $0x978] sm:$0xff] }
  0x83   :  { %1853 = vmatpush1.bf16.msra.mxu1 %v1852_v27  ;;  %1599 = vmatprep.subr.bf16.mxu0 %v1598_v28  ;;  %v1616_v27 = vpack.c.bf16 %v315_v17, %v311_v16  ;;  %v1872_v28 = vpack.c.bf16 %v317_v20, %v313_v18  ;;  %v1874_v33 = vpack.c.bf16 %v326_v26, %v322_v23  ;;  %v351_v16 = vld [vmem:[%s3922_s1 + $0xa40] sm:$0xff]  ;;  %v353_v18 = vld [vmem:[%s3922_s1 + $0xa50] sm:$0xff]  ;;  %v362_v23 = vld [vmem:[%s3922_s1 + $0xa98] sm:$0xff] }
  0x84   :  { %1855 = vmatprep.subr.bf16.mxu1 %v1854_v32  ;;  %v321_v32 = vld [vmem:[%s3922_s1 + $0x950] sm:$0xff]  ;;  %v355_v17 = vld [vmem:[%s3922_s1 + $0xa60] sm:$0xff]  ;;  %v366_v26 = vld [vmem:[%s3922_s1 + $0xab8] sm:$0xff] }
  0x85   :  { %737 = vmatmul.mubr.f32.vlgmr.msra.gmra.mrb[0].mxu0 %v2555_v24  ;;  %v357_v20 = vld [vmem:[%s3922_s1 + $0xa70] sm:$0xff] }
  0x86   :  { %1601 = vmatpush1.bf16.msra.mxu0 %v1600_v38  ;;  %1021 = vmatmul.mubr.f32.vlgmr.msra.gmra.mrb[0].mxu1 %v2555_v24  ;;  %v301_v24 = vld [vmem:[%s3922_s1 + $0x8b0] sm:$0xff]  ;;  %v334_v38 = vld [vmem:[%s3922_s1 + $0x9b8] sm:$0xff] }
  0x87   :  { %1857 = vmatpush1.bf16.msra.mxu1 %v1856_v40  ;;  %1603 = vmatprep.subr.bf16.mxu0 %v1602_v41  ;;  %v1864_v1 = vpack.c.bf16 %v301_v24, %v297_v57  ;;  %v1620_v40 = vpack.c.bf16 %v323_v31, %v319_v30  ;;  %v1876_v41 = vpack.c.bf16 %v325_v34, %v321_v32  ;;  %v337_v57 = vld [vmem:[%s3922_s1 + $0x9d0] sm:$0xff]  ;;  %v359_v30 = vld [vmem:[%s3922_s1 + $0xa80] sm:$0xff] }
  0x88   :  { %1859 = vmatprep.subr.bf16.mxu1 %v1858_v46  ;;  %807 = vmatprep.mubr.f32.mxu0 %v591_v51  ;;  %v329_v46 = vld [vmem:[%s3922_s1 + $0x990] sm:$0xff]  ;;  %v1878_v47 = vpack.c.bf16 %v334_v38, %v330_v37  ;;  %v363_v31 = vld [vmem:[%s3922_s1 + $0xaa0] sm:$0xff]  ;;  %v370_v37 = vld [vmem:[%s3922_s1 + $0xad8] sm:$0xff] }
  0x89   :  { %1091 = vmatprep.mubr.f32.mxu1 %v591_v51  ;;  %v342_v51 = vld [vmem:[%s3922_s1 + $0x9f8] sm:$0xff]  ;;  %v341_v24 = vld [vmem:[%s3922_s1 + $0x9f0] sm:$0xff] }
  0x8a   :  { %1605 = vmatpush1.bf16.msra.mxu0 %v1604_v52  ;;  %v1624_v52 = vpack.c.bf16 %v331_v44, %v327_v43  ;;  %v361_v32 = vld [vmem:[%s3922_s1 + $0xa90] sm:$0xff]  ;;  %v374_v38 = vld [vmem:[%s3922_s1 + $0xaf8] sm:$0xff]  ;;  %v367_v43 = vld [vmem:[%s3922_s1 + $0xac0] sm:$0xff] }
  0x8b   :  { %1861 = vmatpush1.bf16.msra.mxu1 %v1860_v53  ;;  %1607 = vmatprep.subr.bf16.mxu0 %v1606_v54  ;;  %v1880_v53 = vpack.c.bf16 %v333_v25, %v329_v46  ;;  %v1626_v54 = vpack.c.bf16 %v340_v49, %v336_v48  ;;  %v365_v34 = vld [vmem:[%s3922_s1 + $0xab0] sm:$0xff]  ;;  %v371_v44 = vld [vmem:[%s3922_s1 + $0xae0] sm:$0xff]  ;;  %v376_v48 = vld [vmem:[%s3922_s1 + $0xb08] sm:$0xff] }
  0x8c   :  { %1863 = vmatprep.subr.bf16.mxu1 %v1862_v58  ;;  %v1882_v58 = vpack.c.bf16 %v342_v51, %v338_v50  ;;  %v369_v46 = vld [vmem:[%s3922_s1 + $0xad0] sm:$0xff]  ;;  %v380_v49 = vld [vmem:[%s3922_s1 + $0xb28] sm:$0xff]  ;;  %v378_v50 = vld [vmem:[%s3922_s1 + $0xb18] sm:$0xff] }
  0x8d   :  { %v373_v25 = vld [vmem:[%s3922_s1 + $0xaf0] sm:$0xff]  ;;  %v382_v51 = vld [vmem:[%s3922_s1 + $0xb38] sm:$0xff] }
  0x8e   :  { %1609 = vmatpush1.bf16.msra.mxu0 %v1608_v0  ;;  %v1628_v0 = vpack.c.bf16 %v339_v56, %v335_v55  ;;  %v375_v55 = vld [vmem:[%s3922_s1 + $0xb00] sm:$0xff] }
  0x8f   :  { %1865 = vmatpush1.bf16.msra.mxu1 %v1864_v1  ;;  %1611 = vmatprep.subr.bf16.mxu0 %v1610_v2  ;;  %v1884_v1 = vpack.c.bf16 %v341_v24, %v337_v57  ;;  %v1630_v2 = vpack.c.bf16 %v348_v60, %v344_v59  ;;  %v379_v56 = vld [vmem:[%s3922_s1 + $0xb20] sm:$0xff]  ;;  %v377_v57 = vld [vmem:[%s3922_s1 + $0xb10] sm:$0xff]  ;;  %v384_v59 = vld [vmem:[%s3922_s1 + $0xb48] sm:$0xff] }
  0x90   :  { %1867 = vmatprep.subr.bf16.mxu1 %v1866_v6  ;;  %v1886_v6 = vpack.c.bf16 %v350_v63, %v346_v62  ;;  %v381_v24 = vld [vmem:[%s3922_s1 + $0xb30] sm:$0xff]  ;;  %v388_v60 = vld [vmem:[%s3922_s1 + $0xb68] sm:$0xff]  ;;  %v386_v62 = vld [vmem:[%s3922_s1 + $0xb58] sm:$0xff] }
  0x91   :  { %v390_v63 = vld [vmem:[%s3922_s1 + $0xb78] sm:$0xff] }
  0x92   :  { %1613 = vmatpush1.bf16.msra.mxu0 %v1612_v13  ;;  %v1632_v13 = vpack.c.bf16 %v347_v4, %v343_v3  ;;  %v383_v3 = vld [vmem:[%s3922_s1 + $0xb40] sm:$0xff] }
  0x93   :  { %1869 = vmatpush1.bf16.msra.mxu1 %v1868_v14  ;;  %1615 = vmatprep.subr.bf16.mxu0 %v1614_v15  ;;  %v1888_v14 = vpack.c.bf16 %v349_v7, %v345_v5  ;;  %v1634_v15 = vpack.c.bf16 %v356_v9, %v352_v8  ;;  %v387_v4 = vld [vmem:[%s3922_s1 + $0xb60] sm:$0xff]  ;;  %v385_v5 = vld [vmem:[%s3922_s1 + $0xb50] sm:$0xff]  ;;  %v392_v8 = vld [vmem:[%s3922_s1 + $0xb88] sm:$0xff] }
  0x94   :  { %1871 = vmatprep.subr.bf16.mxu1 %v1870_v19  ;;  %v1890_v19 = vpack.c.bf16 %v358_v12, %v354_v10  ;;  %v389_v7 = vld [vmem:[%s3922_s1 + $0xb70] sm:$0xff]  ;;  %v396_v9 = vld [vmem:[%s3922_s1 + $0xba8] sm:$0xff]  ;;  %v394_v10 = vld [vmem:[%s3922_s1 + $0xb98] sm:$0xff] }
  0x95   :  { %v398_v12 = vld [vmem:[%s3922_s1 + $0xbb8] sm:$0xff] }
  0x96   :  { %1617 = vmatpush1.bf16.msra.mxu0 %v1616_v27  ;;  %v1636_v27 = vpack.c.bf16 %v355_v17, %v351_v16  ;;  %v391_v16 = vld [vmem:[%s3922_s1 + $0xb80] sm:$0xff] }
  0x97   :  { %1873 = vmatpush1.bf16.msra.mxu1 %v1872_v28  ;;  %1619 = vmatprep.subr.bf16.mxu0 %v1618_v29  ;;  %v1892_v28 = vpack.c.bf16 %v357_v20, %v353_v18  ;;  %v1638_v29 = vpack.c.bf16 %v364_v22, %v360_v21  ;;  %v395_v17 = vld [vmem:[%s3922_s1 + $0xba0] sm:$0xff]  ;;  %v393_v18 = vld [vmem:[%s3922_s1 + $0xb90] sm:$0xff]  ;;  %v400_v21 = vld [vmem:[%s3922_s1 + $0xbc8] sm:$0xff] }
  0x98   :  { %1875 = vmatprep.subr.bf16.mxu1 %v1874_v33  ;;  %v1894_v33 = vpack.c.bf16 %v366_v26, %v362_v23  ;;  %v397_v20 = vld [vmem:[%s3922_s1 + $0xbb0] sm:$0xff]  ;;  %v404_v22 = vld [vmem:[%s3922_s1 + $0xbe8] sm:$0xff]  ;;  %v402_v23 = vld [vmem:[%s3922_s1 + $0xbd8] sm:$0xff] }
  0x99   :  { %v406_v26 = vld [vmem:[%s3922_s1 + $0xbf8] sm:$0xff] }
  0x9a   :  { %1621 = vmatpush1.bf16.msra.mxu0 %v1620_v40  ;;  %v1640_v40 = vpack.c.bf16 %v363_v31, %v359_v30  ;;  %v399_v30 = vld [vmem:[%s3922_s1 + $0xbc0] sm:$0xff] }
  0x9b   :  { %1877 = vmatpush1.bf16.msra.mxu1 %v1876_v41  ;;  %1623 = vmatprep.subr.bf16.mxu0 %v1622_v42  ;;  %v1896_v41 = vpack.c.bf16 %v365_v34, %v361_v32  ;;  %v1642_v42 = vpack.c.bf16 %v372_v36, %v368_v35  ;;  %v403_v31 = vld [vmem:[%s3922_s1 + $0xbe0] sm:$0xff]  ;;  %v401_v32 = vld [vmem:[%s3922_s1 + $0xbd0] sm:$0xff]  ;;  %v408_v35 = vld [vmem:[%s3922_s1 + $0xc08] sm:$0xff] }
  0x9c   :  { %1879 = vmatprep.subr.bf16.mxu1 %v1878_v47  ;;  %v1898_v47 = vpack.c.bf16 %v374_v38, %v370_v37  ;;  %v405_v34 = vld [vmem:[%s3922_s1 + $0xbf0] sm:$0xff]  ;;  %v412_v36 = vld [vmem:[%s3922_s1 + $0xc28] sm:$0xff]  ;;  %v576_v37 = vcombine.high %v2954_v39, %v2954_v39  ;;  %v410_v38 = vld [vmem:[%s3922_s1 + $0xc18] sm:$0xff] }
  0x9d   :  { %v411_v39 = vld [vmem:[%s3922_s1 + $0xc20] sm:$0xff] }
  0x9e   :  { %1625 = vmatpush1.bf16.msra.mxu0 %v1624_v52  ;;  %v1644_v52 = vpack.c.bf16 %v371_v44, %v367_v43  ;;  %v1916_v43 = vpack.c.bf16 %v405_v34, %v401_v32  ;;  %v1662_v44 = vpack.c.bf16 %v412_v36, %v408_v35 }
  0x9f   :  { %1881 = vmatpush1.bf16.msra.mxu1 %v1880_v53  ;;  %1627 = vmatprep.subr.bf16.mxu0 %v1626_v54  ;;  %v1900_v53 = vpack.c.bf16 %v373_v25, %v369_v46  ;;  %v1646_v54 = vpack.c.bf16 %v380_v49, %v376_v48  ;;  %v409_v46 = vld [vmem:[%s3922_s1 + $0xc10] sm:$0xff] }
  0xa0   :  { %1883 = vmatprep.subr.bf16.mxu1 %v1882_v58  ;;  %v1902_v58 = vpack.c.bf16 %v382_v51, %v378_v50 }
  0xa2   :  { %1629 = vmatpush1.bf16.msra.mxu0 %v1628_v0  ;;  %v1648_v0 = vpack.c.bf16 %v379_v56, %v375_v55 }
  0xa3   :  { %1885 = vmatpush1.bf16.msra.mxu1 %v1884_v1  ;;  %1631 = vmatprep.subr.bf16.mxu0 %v1630_v2  ;;  %v1904_v1 = vpack.c.bf16 %v381_v24, %v377_v57  ;;  %v1650_v2 = vpack.c.bf16 %v388_v60, %v384_v59 }
  0xa4   :  { %1887 = vmatprep.subr.bf16.mxu1 %v1886_v6  ;;  %v1906_v6 = vpack.c.bf16 %v390_v63, %v386_v62 }
  0xa6   :  { %1633 = vmatpush1.bf16.msra.mxu0 %v1632_v13  ;;  %v1652_v13 = vpack.c.bf16 %v387_v4, %v383_v3 }
  0xa7   :  { %1889 = vmatpush1.bf16.msra.mxu1 %v1888_v14  ;;  %1635 = vmatprep.subr.bf16.mxu0 %v1634_v15  ;;  %v1908_v14 = vpack.c.bf16 %v389_v7, %v385_v5  ;;  %v1654_v15 = vpack.c.bf16 %v396_v9, %v392_v8 }
  0xa8   :  { %1891 = vmatprep.subr.bf16.mxu1 %v1890_v19  ;;  %v1910_v19 = vpack.c.bf16 %v398_v12, %v394_v10 }
  0xaa   :  { %1637 = vmatpush1.bf16.msra.mxu0 %v1636_v27  ;;  %v1656_v27 = vpack.c.bf16 %v395_v17, %v391_v16 }
  0xab   :  { %1893 = vmatpush1.bf16.msra.mxu1 %v1892_v28  ;;  %1639 = vmatprep.subr.bf16.mxu0 %v1638_v29  ;;  %v1912_v28 = vpack.c.bf16 %v397_v20, %v393_v18  ;;  %v1658_v29 = vpack.c.bf16 %v404_v22, %v400_v21 }
  0xac   :  { %1895 = vmatprep.subr.bf16.mxu1 %v1894_v33  ;;  %v1914_v33 = vpack.c.bf16 %v406_v26, %v402_v23 }
  0xae   :  { %1641 = vmatpush1.bf16.msra.mxu0 %v1640_v40  ;;  %v414_v40 = vld [vmem:[%s3922_s1 + $0xc38] sm:$0xff] }
  0xaf   :  { %1897 = vmatpush1.bf16.msra.mxu1 %v1896_v41  ;;  %1643 = vmatprep.subr.bf16.mxu0 %v1642_v42  ;;  %v1660_v41 = vpack.c.bf16 %v403_v31, %v399_v30  ;;  %v407_v42 = vld [vmem:[%s3922_s1 + $0xc00] sm:$0xff] }
  0xb0   :  { %1899 = vmatprep.subr.bf16.mxu1 %v1898_v47 }
  0xb2   :  { %1645 = vmatpush1.bf16.msra.mxu0 %v1644_v52 }
  0xb3   :  { %1901 = vmatpush1.bf16.msra.mxu1 %v1900_v53  ;;  %1647 = vmatprep.subr.bf16.mxu0 %v1646_v54 }
  0xb4   :  { %1903 = vmatprep.subr.bf16.mxu1 %v1902_v58 }
  0xb6   :  { %1649 = vmatpush1.bf16.msra.mxu0 %v1648_v0 }
  0xb7   :  { %1905 = vmatpush1.bf16.msra.mxu1 %v1904_v1  ;;  %1651 = vmatprep.subr.bf16.mxu0 %v1650_v2 }
  0xb8   :  { %1907 = vmatprep.subr.bf16.mxu1 %v1906_v6 }
  0xba   :  { %1653 = vmatpush1.bf16.msra.mxu0 %v1652_v13 }
  0xbb   :  { %1909 = vmatpush1.bf16.msra.mxu1 %v1908_v14  ;;  %1655 = vmatprep.subr.bf16.mxu0 %v1654_v15 }
  0xbc   :  { %1911 = vmatprep.subr.bf16.mxu1 %v1910_v19 }
  0xbe   :  { %1657 = vmatpush1.bf16.msra.mxu0 %v1656_v27 }
  0xbf   :  { %1913 = vmatpush1.bf16.msra.mxu1 %v1912_v28  ;;  %1659 = vmatprep.subr.bf16.mxu0 %v1658_v29 }
  0xc0   :  { %10 = vsyncpa [#allocation3], 0  ;;  %1915 = vmatprep.subr.bf16.mxu1 %v1914_v33  ;;  %v1918_v47 = vpack.c.bf16 %v414_v40, %v410_v38  ;;  %v413_v25 = vld [vmem:[%s3922_s1 + $0xc30] sm:$0xff]  ;;  %v416_v48 = vld [vmem:[%s3922_s1 + $0xc48] sm:$0xff]  ;;  %v3345_v50 = vrot.slane %v576_v37, %v2401_v11  ;;  %v1664_v53 = vpack.c.bf16 %v411_v39, %v407_v42  ;;  %s2091_s22 = smov [#allocation2]  }
  0xc1   :  { %v420_v49 = vld [vmem:[%s3922_s1 + $0xc68] sm:$0xff]  ;;  %v418_v51 = vld [vmem:[%s3922_s1 + $0xc58] sm:$0xff]  ;;  %v1920_v54 = vpack.c.bf16 %v413_v25, %v409_v46  ;;  %v415_v56 = vld [vmem:[%s3922_s1 + $0xc40] sm:$0xff]  ;;  %s1391_s23 = sshll.u32 %s2091_s22, 4  ;;  %s1392_s23 = int_to_ptr.vmem [resolvable:$true] %s1391_s23 }
  0xc2   :  { %v422_v52 = vld [vmem:[%s3922_s1 + $0xc78] sm:$0xff]  ;;  %1661 = vmatpush1.bf16.msra.mxu0 %v1660_v41  ;;  %v1666_v55 = vpack.c.bf16 %v420_v49, %v416_v48  ;;  %v419_v11 = vld [vmem:[%s3922_s1 + $0xc60] sm:$0xff]  ;;  %v417_v57 = vld [vmem:[%s3922_s1 + $0xc50] sm:$0xff]  ;;  %v592_v62 = vcombine.high %v3345_v50, %v3345_v50  ;;  %s2066_s24 = scalar_lea.vmem %s1392_s23, 32  ;;  %p2071_p1 = scmp.lt.s32.totalorder %s1392_s23, %s1392_s23 }
  0xc3   :  { %1917 = vmatpush1.bf16.msra.mxu1 %v1916_v43  ;;  %1663 = vmatprep.subr.bf16.mxu0 %v1662_v44  ;;  %v1922_v58 = vpack.c.bf16 %v422_v52, %v418_v51  ;;  %v421_v24 = vld [vmem:[%s3922_s1 + $0xc70] sm:$0xff]  ;;  %v424_v59 = vld [vmem:[%s3922_s1 + $0xc88] sm:$0xff]  ;;  %v426_v63 = vld [vmem:[%s3922_s1 + $0xc98] sm:$0xff]  ;;  %v1668_v1 = vpack.c.bf16 %v419_v11, %v415_v56  ;;  %p2067_p0 = scmp.ne.s32.totalorder %s1392_s23, %s2066_s24  ;;  %p2072_p2 = scmp.lt.s32.totalorder %s2066_s24, %s2066_s24 }
  0xc4   :  { %1919 = vmatprep.subr.bf16.mxu1 %v1918_v47  ;;  %v428_v60 = vld [vmem:[%s3922_s1 + $0xca8] sm:$0xff]  ;;  %v430_v0 = vld [vmem:[%s3922_s1 + $0xcb8] sm:$0xff]  ;;  %v1924_v2 = vpack.c.bf16 %v421_v24, %v417_v57  ;;  %v423_v4 = vld [vmem:[%s3922_s1 + $0xc80] sm:$0xff] }
  0xc5   :  { %808 = vmatmul.mubr.f32.vlgmr.msra.gmra.mrb[0].mxu0 %v2967_v45  ;;  %v1670_v3 = vpack.c.bf16 %v428_v60, %v424_v59  ;;  %v427_v5 = vld [vmem:[%s3922_s1 + $0xca0] sm:$0xff]  ;;  %v425_v6 = vld [vmem:[%s3922_s1 + $0xc90] sm:$0xff]  ;;  %v1926_v7 = vpack.c.bf16 %v430_v0, %v426_v63  ;;  %v432_v8 = vld [vmem:[%s3922_s1 + $0xcc8] sm:$0xff]  ;;  %p2073_p3 = por %p2072_p2, %p2071_p1 }
  0xc6   :  { %1665 = vmatpush1.bf16.msra.mxu0 %v1664_v53  ;;  %1092 = vmatmul.mubr.f32.vlgmr.msra.gmra.mrb[0].mxu1 %v2967_v45  ;;  %v429_v45 = vld [vmem:[%s3922_s1 + $0xcb0] sm:$0xff]  ;;  %v436_v9 = vld [vmem:[%s3922_s1 + $0xce8] sm:$0xff]  ;;  %v434_v10 = vld [vmem:[%s3922_s1 + $0xcd8] sm:$0xff]  ;;  %v1672_v13 = vpack.c.bf16 %v427_v5, %v423_v4 }
  0xc7   :  { %1921 = vmatpush1.bf16.msra.mxu1 %v1920_v54  ;;  %1667 = vmatprep.subr.bf16.mxu0 %v1666_v55  ;;  %v438_v12 = vld [vmem:[%s3922_s1 + $0xcf8] sm:$0xff]  ;;  %v1928_v14 = vpack.c.bf16 %v429_v45, %v425_v6  ;;  %v1674_v15 = vpack.c.bf16 %v436_v9, %v432_v8  ;;  %v431_v16 = vld [vmem:[%s3922_s1 + $0xcc0] sm:$0xff]  ;;  %v433_v18 = vld [vmem:[%s3922_s1 + $0xcd0] sm:$0xff]  ;;  %p2074_p4 = pnand %p2073_p3, %p2067_p0 }
  0xc8   :  { %1923 = vmatprep.subr.bf16.mxu1 %v1922_v58  ;;  %878 = vmatprep.mubr.f32.mxu0 %v592_v62  ;;  %v435_v17 = vld [vmem:[%s3922_s1 + $0xce0] sm:$0xff]  ;;  %v1930_v19 = vpack.c.bf16 %v438_v12, %v434_v10  ;;  %v437_v20 = vld [vmem:[%s3922_s1 + $0xcf0] sm:$0xff]  ;;  %v440_v21 = vld [vmem:[%s3922_s1 + $0xd08] sm:$0xff] }
  0xc9   :  { %1162 = vmatprep.mubr.f32.mxu1 %v592_v62  ;;  %v444_v22 = vld [vmem:[%s3922_s1 + $0xd28] sm:$0xff]  ;;  %v442_v23 = vld [vmem:[%s3922_s1 + $0xd18] sm:$0xff]  ;;  %v1676_v27 = vpack.c.bf16 %v435_v17, %v431_v16  ;;  %v1932_v28 = vpack.c.bf16 %v437_v20, %v433_v18  ;;  %v439_v30 = vld [vmem:[%s3922_s1 + $0xd00] sm:$0xff] }
  0xca   :  { %1669 = vmatpush1.bf16.msra.mxu0 %v1668_v1  ;;  %v446_v26 = vld [vmem:[%s3922_s1 + $0xd38] sm:$0xff]  ;;  %v1678_v29 = vpack.c.bf16 %v444_v22, %v440_v21  ;;  %v443_v31 = vld [vmem:[%s3922_s1 + $0xd20] sm:$0xff]  ;;  %v441_v32 = vld [vmem:[%s3922_s1 + $0xd10] sm:$0xff] }
  0xcb   :  { %1925 = vmatpush1.bf16.msra.mxu1 %v1924_v2  ;;  %1671 = vmatprep.subr.bf16.mxu0 %v1670_v3  ;;  %v1934_v33 = vpack.c.bf16 %v446_v26, %v442_v23  ;;  %v445_v34 = vld [vmem:[%s3922_s1 + $0xd30] sm:$0xff]  ;;  %v448_v35 = vld [vmem:[%s3922_s1 + $0xd48] sm:$0xff]  ;;  %v450_v37 = vld [vmem:[%s3922_s1 + $0xd58] sm:$0xff]  ;;  %v1680_v40 = vpack.c.bf16 %v443_v31, %v439_v30 }
  0xcc   :  { %1927 = vmatprep.subr.bf16.mxu1 %v1926_v7  ;;  %v452_v36 = vld [vmem:[%s3922_s1 + $0xd68] sm:$0xff]  ;;  %v454_v38 = vld [vmem:[%s3922_s1 + $0xd78] sm:$0xff]  ;;  %v1936_v41 = vpack.c.bf16 %v445_v34, %v441_v32  ;;  %v447_v43 = vld [vmem:[%s3922_s1 + $0xd40] sm:$0xff] }
  0xcd   :  { %v1682_v42 = vpack.c.bf16 %v452_v36, %v448_v35  ;;  %v451_v44 = vld [vmem:[%s3922_s1 + $0xd60] sm:$0xff]  ;;  %v449_v39 = vld [vmem:[%s3922_s1 + $0xd50] sm:$0xff]  ;;  %v1938_v46 = vpack.c.bf16 %v454_v38, %v450_v37  ;;  %v456_v25 = vld [vmem:[%s3922_s1 + $0xd88] sm:$0xff] }
  0xce   :  { %1673 = vmatpush1.bf16.msra.mxu0 %v1672_v13  ;;  %v453_v47 = vld [vmem:[%s3922_s1 + $0xd70] sm:$0xff]  ;;  %v460_v48 = vld [vmem:[%s3922_s1 + $0xda8] sm:$0xff]  ;;  %v458_v49 = vld [vmem:[%s3922_s1 + $0xd98] sm:$0xff]  ;;  %v1684_v52 = vpack.c.bf16 %v451_v44, %v447_v43 }
  0xcf   :  { %1929 = vmatpush1.bf16.msra.mxu1 %v1928_v14  ;;  %1675 = vmatprep.subr.bf16.mxu0 %v1674_v15  ;;  %v462_v51 = vld [vmem:[%s3922_s1 + $0xdb8] sm:$0xff]  ;;  %v1940_v53 = vpack.c.bf16 %v453_v47, %v449_v39  ;;  %v1686_v54 = vpack.c.bf16 %v460_v48, %v456_v25  ;;  %v455_v55 = vld [vmem:[%s3922_s1 + $0xd80] sm:$0xff]  ;;  %v457_v11 = vld [vmem:[%s3922_s1 + $0xd90] sm:$0xff] }
  0xd0   :  { %1931 = vmatprep.subr.bf16.mxu1 %v1930_v19  ;;  %v459_v56 = vld [vmem:[%s3922_s1 + $0xda0] sm:$0xff]  ;;  %v1942_v57 = vpack.c.bf16 %v462_v51, %v458_v49  ;;  %v461_v58 = vld [vmem:[%s3922_s1 + $0xdb0] sm:$0xff]  ;;  %v464_v24 = vld [vmem:[%s3922_s1 + $0xdc8] sm:$0xff] }
  0xd1   :  { %v468_v59 = vld [vmem:[%s3922_s1 + $0xde8] sm:$0xff]  ;;  %v466_v60 = vld [vmem:[%s3922_s1 + $0xdd8] sm:$0xff]  ;;  %v1688_v63 = vpack.c.bf16 %v459_v56, %v455_v55  ;;  %v1944_v0 = vpack.c.bf16 %v461_v58, %v457_v11  ;;  %v463_v2 = vld [vmem:[%s3922_s1 + $0xdc0] sm:$0xff] }
  0xd2   :  { %1677 = vmatpush1.bf16.msra.mxu0 %v1676_v27  ;;  %v470_v62 = vld [vmem:[%s3922_s1 + $0xdf8] sm:$0xff]  ;;  %v1690_v1 = vpack.c.bf16 %v468_v59, %v464_v24  ;;  %v467_v3 = vld [vmem:[%s3922_s1 + $0xde0] sm:$0xff]  ;;  %v465_v4 = vld [vmem:[%s3922_s1 + $0xdd0] sm:$0xff] }
  0xd3   :  { %1933 = vmatpush1.bf16.msra.mxu1 %v1932_v28  ;;  %1679 = vmatprep.subr.bf16.mxu0 %v1678_v29  ;;  %v1946_v5 = vpack.c.bf16 %v470_v62, %v466_v60  ;;  %v469_v6 = vld [vmem:[%s3922_s1 + $0xdf0] sm:$0xff]  ;;  %v472_v7 = vld [vmem:[%s3922_s1 + $0xe08] sm:$0xff]  ;;  %v474_v8 = vld [vmem:[%s3922_s1 + $0xe18] sm:$0xff]  ;;  %v1692_v10 = vpack.c.bf16 %v467_v3, %v463_v2 }
  0xd4   :  { %1935 = vmatprep.subr.bf16.mxu1 %v1934_v33  ;;  %v476_v45 = vld [vmem:[%s3922_s1 + $0xe28] sm:$0xff]  ;;  %v478_v9 = vld [vmem:[%s3922_s1 + $0xe38] sm:$0xff]  ;;  %v1948_v12 = vpack.c.bf16 %v469_v6, %v465_v4  ;;  %v471_v14 = vld [vmem:[%s3922_s1 + $0xe00] sm:$0xff] }
  0xd5   :  { %v1694_v13 = vpack.c.bf16 %v476_v45, %v472_v7  ;;  %v475_v15 = vld [vmem:[%s3922_s1 + $0xe20] sm:$0xff]  ;;  %v473_v16 = vld [vmem:[%s3922_s1 + $0xe10] sm:$0xff]  ;;  %v1950_v17 = vpack.c.bf16 %v478_v9, %v474_v8  ;;  %v480_v19 = vld [vmem:[%s3922_s1 + $0xe48] sm:$0xff] }
  0xd6   :  { %1681 = vmatpush1.bf16.msra.mxu0 %v1680_v40  ;;  %v477_v18 = vld [vmem:[%s3922_s1 + $0xe30] sm:$0xff]  ;;  %v484_v20 = vld [vmem:[%s3922_s1 + $0xe68] sm:$0xff]  ;;  %v482_v21 = vld [vmem:[%s3922_s1 + $0xe58] sm:$0xff]  ;;  %v1696_v23 = vpack.c.bf16 %v475_v15, %v471_v14 }
  0xd7   :  { %1937 = vmatpush1.bf16.msra.mxu1 %v1936_v41  ;;  %1683 = vmatprep.subr.bf16.mxu0 %v1682_v42  ;;  %v486_v22 = vld [vmem:[%s3922_s1 + $0xe78] sm:$0xff]  ;;  %v1952_v26 = vpack.c.bf16 %v477_v18, %v473_v16  ;;  %v1698_v27 = vpack.c.bf16 %v484_v20, %v480_v19  ;;  %v479_v28 = vld [vmem:[%s3922_s1 + $0xe40] sm:$0xff]  ;;  %v481_v30 = vld [vmem:[%s3922_s1 + $0xe50] sm:$0xff] }
  0xd8   :  { %1939 = vmatprep.subr.bf16.mxu1 %v1938_v46  ;;  %v483_v29 = vld [vmem:[%s3922_s1 + $0xe60] sm:$0xff]  ;;  %v1954_v31 = vpack.c.bf16 %v486_v22, %v482_v21  ;;  %v485_v32 = vld [vmem:[%s3922_s1 + $0xe70] sm:$0xff]  ;;  %v488_v33 = vld [vmem:[%s3922_s1 + $0xe88] sm:$0xff] }
  0xd9   :  { %v492_v34 = vld [vmem:[%s3922_s1 + $0xea8] sm:$0xff]  ;;  %v490_v35 = vld [vmem:[%s3922_s1 + $0xe98] sm:$0xff]  ;;  %v1700_v37 = vpack.c.bf16 %v483_v29, %v479_v28  ;;  %v1956_v38 = vpack.c.bf16 %v485_v32, %v481_v30  ;;  %v487_v41 = vld [vmem:[%s3922_s1 + $0xe80] sm:$0xff] }
  0xda   :  { %1685 = vmatpush1.bf16.msra.mxu0 %v1684_v52  ;;  %v494_v36 = vld [vmem:[%s3922_s1 + $0xeb8] sm:$0xff]  ;;  %v1702_v40 = vpack.c.bf16 %v492_v34, %v488_v33  ;;  %v491_v42 = vld [vmem:[%s3922_s1 + $0xea0] sm:$0xff]  ;;  %v489_v43 = vld [vmem:[%s3922_s1 + $0xe90] sm:$0xff] }
  0xdb   :  { %1941 = vmatpush1.bf16.msra.mxu1 %v1940_v53  ;;  %1687 = vmatprep.subr.bf16.mxu0 %v1686_v54  ;;  %v1958_v44 = vpack.c.bf16 %v494_v36, %v490_v35  ;;  %v493_v39 = vld [vmem:[%s3922_s1 + $0xeb0] sm:$0xff]  ;;  %v496_v46 = vld [vmem:[%s3922_s1 + $0xec8] sm:$0xff]  ;;  %v498_v25 = vld [vmem:[%s3922_s1 + $0xed8] sm:$0xff]  ;;  %v1704_v49 = vpack.c.bf16 %v491_v42, %v487_v41 }
  0xdc   :  { %1943 = vmatprep.subr.bf16.mxu1 %v1942_v57  ;;  %v500_v47 = vld [vmem:[%s3922_s1 + $0xee8] sm:$0xff]  ;;  %v502_v48 = vld [vmem:[%s3922_s1 + $0xef8] sm:$0xff]  ;;  %v1960_v51 = vpack.c.bf16 %v493_v39, %v489_v43  ;;  %v495_v53 = vld [vmem:[%s3922_s1 + $0xec0] sm:$0xff] }
  0xdd   :  { %v1706_v52 = vpack.c.bf16 %v500_v47, %v496_v46  ;;  %v499_v54 = vld [vmem:[%s3922_s1 + $0xee0] sm:$0xff]  ;;  %v497_v55 = vld [vmem:[%s3922_s1 + $0xed0] sm:$0xff]  ;;  %v1962_v56 = vpack.c.bf16 %v502_v48, %v498_v25  ;;  %v504_v57 = vld [vmem:[%s3922_s1 + $0xf08] sm:$0xff] }
  0xde   :  { %1689 = vmatpush1.bf16.msra.mxu0 %v1688_v63  ;;  %v501_v11 = vld [vmem:[%s3922_s1 + $0xef0] sm:$0xff]  ;;  %v508_v58 = vld [vmem:[%s3922_s1 + $0xf28] sm:$0xff]  ;;  %v506_v24 = vld [vmem:[%s3922_s1 + $0xf18] sm:$0xff]  ;;  %v1708_v60 = vpack.c.bf16 %v499_v54, %v495_v53 }
  0xdf   :  { %1945 = vmatpush1.bf16.msra.mxu1 %v1944_v0  ;;  %1691 = vmatprep.subr.bf16.mxu0 %v1690_v1  ;;  %v510_v59 = vld [vmem:[%s3922_s1 + $0xf38] sm:$0xff]  ;;  %v1964_v62 = vpack.c.bf16 %v501_v11, %v497_v55  ;;  %v1710_v63 = vpack.c.bf16 %v508_v58, %v504_v57  ;;  %v503_v0 = vld [vmem:[%s3922_s1 + $0xf00] sm:$0xff]  ;;  %v505_v2 = vld [vmem:[%s3922_s1 + $0xf10] sm:$0xff] }
  0xe0   :  { %1947 = vmatprep.subr.bf16.mxu1 %v1946_v5  ;;  %v507_v1 = vld [vmem:[%s3922_s1 + $0xf20] sm:$0xff]  ;;  %v1966_v3 = vpack.c.bf16 %v510_v59, %v506_v24  ;;  %v509_v4 = vld [vmem:[%s3922_s1 + $0xf30] sm:$0xff]  ;;  %v512_v5 = vld [vmem:[%s3922_s1 + $0xf48] sm:$0xff] }
  0xe1   :  { %v516_v6 = vld [vmem:[%s3922_s1 + $0xf68] sm:$0xff]  ;;  %v514_v7 = vld [vmem:[%s3922_s1 + $0xf58] sm:$0xff]  ;;  %v1712_v8 = vpack.c.bf16 %v507_v1, %v503_v0  ;;  %v1968_v9 = vpack.c.bf16 %v509_v4, %v505_v2  ;;  %v513_v14 = vld [vmem:[%s3922_s1 + $0xf50] sm:$0xff] }
  0xe2   :  { %1693 = vmatpush1.bf16.msra.mxu0 %v1692_v10  ;;  %v518_v45 = vld [vmem:[%s3922_s1 + $0xf78] sm:$0xff]  ;;  %v1714_v10 = vpack.c.bf16 %v516_v6, %v512_v5  ;;  %v517_v16 = vld [vmem:[%s3922_s1 + $0xf70] sm:$0xff]  ;;  %v524_v18 = vld [vmem:[%s3922_s1 + $0xfa8] sm:$0xff] }
  0xe3   :  { %1949 = vmatpush1.bf16.msra.mxu1 %v1948_v12  ;;  %1695 = vmatprep.subr.bf16.mxu0 %v1694_v13  ;;  %v511_v12 = vld [vmem:[%s3922_s1 + $0xf40] sm:$0xff]  ;;  %v1970_v15 = vpack.c.bf16 %v518_v45, %v514_v7  ;;  %v522_v19 = vld [vmem:[%s3922_s1 + $0xf98] sm:$0xff]  ;;  %v1972_v22 = vpack.c.bf16 %v517_v16, %v513_v14  ;;  %v521_v28 = vld [vmem:[%s3922_s1 + $0xf90] sm:$0xff] }
  0xe4   :  { %1951 = vmatprep.subr.bf16.mxu1 %v1950_v17  ;;  %v515_v13 = vld [vmem:[%s3922_s1 + $0xf60] sm:$0xff]  ;;  %v520_v17 = vld [vmem:[%s3922_s1 + $0xf88] sm:$0xff]  ;;  %v526_v20 = vld [vmem:[%s3922_s1 + $0xfb8] sm:$0xff] }
  0xe5   :  { %v1716_v21 = vpack.c.bf16 %v515_v13, %v511_v12  ;;  %v1974_v29 = vpack.c.bf16 %v526_v20, %v522_v19  ;;  %v525_v30 = vld [vmem:[%s3922_s1 + $0xfb0] sm:$0xff]  ;;  %v532_v32 = vld [vmem:[%s3922_s1 + $0xfe8] sm:$0xff]  ;;  %v530_v33 = vld [vmem:[%s3922_s1 + $0xfd8] sm:$0xff] }
  0xe6   :  { %1697 = vmatpush1.bf16.msra.mxu0 %v1696_v23  ;;  %v1718_v23 = vpack.c.bf16 %v524_v18, %v520_v17  ;;  %v534_v34 = vld [vmem:[%s3922_s1 + $0xff8] sm:$0xff]  ;;  %v1976_v36 = vpack.c.bf16 %v525_v30, %v521_v28  ;;  %v529_v41 = vld [vmem:[%s3922_s1 + $0xfd0] sm:$0xff]  ;;  %v1190_v39 = vld [vmem:[%s3924_s3 + $0x88] sm:$0xff] }
  0xe7   :  { %1953 = vmatpush1.bf16.msra.mxu1 %v1952_v26  ;;  %1699 = vmatprep.subr.bf16.mxu0 %v1698_v27  ;;  %v519_v26 = vld [vmem:[%s3922_s1 + $0xf80] sm:$0xff]  ;;  %v1978_v42 = vpack.c.bf16 %v534_v34, %v530_v33  ;;  %v533_v43 = vld [vmem:[%s3922_s1 + $0xff0] sm:$0xff]  ;;  %v1222_v47 = vld [vmem:[%s3924_s3 + $0x188] sm:$0xff] }
  0xe8   :  { %1955 = vmatprep.subr.bf16.mxu1 %v1954_v31  ;;  %v523_v27 = vld [vmem:[%s3922_s1 + $0xfa0] sm:$0xff]  ;;  %v528_v31 = vld [vmem:[%s3922_s1 + $0xfc8] sm:$0xff]  ;;  %v1980_v48 = vpack.c.bf16 %v533_v43, %v529_v41  ;;  %v1192_v11 = vld [vmem:[%s3924_s3 + $0x98] sm:$0xff] }
  0xe9   :  { %v1720_v35 = vpack.c.bf16 %v523_v27, %v519_v26  ;;  %v1221_v46 = vld [vmem:[%s3924_s3 + $0x180] sm:$0xff]  ;;  %v1206_v55 = vld [vmem:[%s3924_s3 + $0x108] sm:$0xff]  ;;  %v1223_v57 = vld [vmem:[%s3924_s3 + $0x190] sm:$0xff] }
  0xea   :  { %1701 = vmatpush1.bf16.msra.mxu0 %v1700_v37  ;;  %v1722_v37 = vpack.c.bf16 %v532_v32, %v528_v31  ;;  %v1205_v53 = vld [vmem:[%s3924_s3 + $0x100] sm:$0xff]  ;;  %v2014_v54 = vpack.c.bf16 %v1222_v47, %v1221_v46  ;;  %v1224_v58 = vld [vmem:[%s3924_s3 + $0x198] sm:$0xff]  ;;  %v1207_v0 = vld [vmem:[%s3924_s3 + $0x110] sm:$0xff] }
  0xeb   :  { %1957 = vmatpush1.bf16.msra.mxu1 %v1956_v38  ;;  %1703 = vmatprep.subr.bf16.mxu0 %v1702_v40  ;;  %v527_v38 = vld [vmem:[%s3922_s1 + $0xfc0] sm:$0xff]  ;;  %v2016_v59 = vpack.c.bf16 %v1206_v55, %v1205_v53  ;;  %v2018_v1 = vpack.c.bf16 %v1224_v58, %v1223_v57  ;;  %v1208_v2 = vld [vmem:[%s3924_s3 + $0x118] sm:$0xff]  ;;  %v1194_v4 = vld [vmem:[%s3924_s3 + $0xa8] sm:$0xff] }
  0xec   :  { %1959 = vmatprep.subr.bf16.mxu1 %v1958_v44  ;;  %v531_v40 = vld [vmem:[%s3922_s1 + $0xfe0] sm:$0xff]  ;;  %v1226_v6 = vld [vmem:[%s3924_s3 + $0x1a8] sm:$0xff]  ;;  %v2020_v45 = vpack.c.bf16 %v1208_v2, %v1207_v0  ;;  %v1195_v14 = vld [vmem:[%s3924_s3 + $0xb0] sm:$0xff] }
  0xed   :  { %v1189_v44 = vld [vmem:[%s3924_s3 + $0x80] sm:$0xff]  ;;  %v1724_v25 = vpack.c.bf16 %v531_v40, %v527_v38  ;;  %v1210_v13 = vld [vmem:[%s3924_s3 + $0x128] sm:$0xff]  ;;  %v1227_v16 = vld [vmem:[%s3924_s3 + $0x1b0] sm:$0xff] }
  0xee   :  { %1705 = vmatpush1.bf16.msra.mxu0 %v1704_v49  ;;  %v1982_v49 = vpack.c.bf16 %v1190_v39, %v1189_v44  ;;  %v1225_v5 = vld [vmem:[%s3924_s3 + $0x1a0] sm:$0xff]  ;;  %v1228_v17 = vld [vmem:[%s3924_s3 + $0x1b8] sm:$0xff]  ;;  %v1230_v31 = vld [vmem:[%s3924_s3 + $0x1c8] sm:$0xff] }
  0xef   :  { %1961 = vmatpush1.bf16.msra.mxu1 %v1960_v51  ;;  %1707 = vmatprep.subr.bf16.mxu0 %v1706_v52  ;;  %v1173_v51 = vld [vmem:[%s3924_s3] sm:$0xff]  ;;  %v1174_v52 = vld [vmem:[%s3924_s3 + $0x8] sm:$0xff]  ;;  %v2026_v26 = vpack.c.bf16 %v1228_v17, %v1227_v16  ;;  %v1212_v27 = vld [vmem:[%s3924_s3 + $0x138] sm:$0xff]  ;;  %v543_v16 = vsub.s32 1, %v2374_v61  ;;  %v551_v17 = vsub.s32 3, %v2374_v61 }
  0xf0   :  { %1963 = vmatprep.subr.bf16.mxu1 %v1962_v56  ;;  %v1191_v56 = vld [vmem:[%s3924_s3 + $0x90] sm:$0xff]  ;;  %v1984_v24 = vpack.c.bf16 %v1174_v52, %v1173_v51  ;;  %v1209_v12 = vld [vmem:[%s3924_s3 + $0x120] sm:$0xff]  ;;  %v1214_v40 = vld [vmem:[%s3924_s3 + $0x148] sm:$0xff] }
  0xf1   :  { %v2024_v19 = vpack.c.bf16 %v1210_v13, %v1209_v12  ;;  %v1197_v28 = vld [vmem:[%s3924_s3 + $0xc0] sm:$0xff]  ;;  %v1199_v41 = vld [vmem:[%s3924_s3 + $0xd0] sm:$0xff]  ;;  %v1232_v44 = vld [vmem:[%s3924_s3 + $0x1d8] sm:$0xff]  ;;  %v539_v13 = vsub.s32 0, %v2374_v61 }
  0xf2   :  { %1709 = vmatpush1.bf16.msra.mxu0 %v1708_v60  ;;  %v1986_v60 = vpack.c.bf16 %v1192_v11, %v1191_v56  ;;  %v1229_v30 = vld [vmem:[%s3924_s3 + $0x1c0] sm:$0xff]  ;;  %v1231_v43 = vld [vmem:[%s3924_s3 + $0x1d0] sm:$0xff]  ;;  %v1216_v52 = vld [vmem:[%s3924_s3 + $0x158] sm:$0xff] }
  0xf3   :  { %1965 = vmatpush1.bf16.msra.mxu1 %v1964_v62  ;;  %1711 = vmatprep.subr.bf16.mxu0 %v1710_v63  ;;  %v1175_v62 = vld [vmem:[%s3924_s3 + $0x10] sm:$0xff]  ;;  %v1176_v63 = vld [vmem:[%s3924_s3 + $0x18] sm:$0xff]  ;;  %v2030_v38 = vpack.c.bf16 %v1230_v31, %v1229_v30  ;;  %v2034_v51 = vpack.c.bf16 %v1232_v44, %v1231_v43  ;;  %v1201_v53 = vld [vmem:[%s3924_s3 + $0xe0] sm:$0xff] }
  0xf4   :  { %1967 = vmatprep.subr.bf16.mxu1 %v1966_v3  ;;  %v1193_v3 = vld [vmem:[%s3924_s3 + $0xa0] sm:$0xff]  ;;  %v1988_v7 = vpack.c.bf16 %v1176_v63, %v1175_v62  ;;  %v1234_v56 = vld [vmem:[%s3924_s3 + $0x1e8] sm:$0xff]  ;;  %v1203_v2 = vld [vmem:[%s3924_s3 + $0xf0] sm:$0xff] }
  0xf5   :  { %v1233_v55 = vld [vmem:[%s3924_s3 + $0x1e0] sm:$0xff]  ;;  %v1218_v0 = vld [vmem:[%s3924_s3 + $0x168] sm:$0xff]  ;;  %v1220_v12 = vld [vmem:[%s3924_s3 + $0x178] sm:$0xff] }
  0xf6   :  { %1713 = vmatpush1.bf16.msra.mxu0 %v1712_v8  ;;  %v1990_v8 = vpack.c.bf16 %v1194_v4, %v1193_v3  ;;  %v1217_v62 = vld [vmem:[%s3924_s3 + $0x160] sm:$0xff]  ;;  %v1204_v3 = vld [vmem:[%s3924_s3 + $0xf8] sm:$0xff]  ;;  %v1235_v4 = vld [vmem:[%s3924_s3 + $0x1f0] sm:$0xff] }
  0xf7   :  { %1969 = vmatpush1.bf16.msra.mxu1 %v1968_v9  ;;  %1715 = vmatprep.subr.bf16.mxu0 %v1714_v10  ;;  %v1177_v9 = vld [vmem:[%s3924_s3 + $0x20] sm:$0xff]  ;;  %v1178_v10 = vld [vmem:[%s3924_s3 + $0x28] sm:$0xff] }
  0xf8   :  { %1971 = vmatprep.subr.bf16.mxu1 %v1970_v15  ;;  %v1196_v15 = vld [vmem:[%s3924_s3 + $0xb8] sm:$0xff]  ;;  %v1992_v18 = vpack.c.bf16 %v1178_v10, %v1177_v9  ;;  %v1219_v10 = vld [vmem:[%s3924_s3 + $0x170] sm:$0xff] }
  0xf9   :  { %v1994_v20 = vpack.c.bf16 %v1196_v15, %v1195_v14  ;;  %v535_v14 = vld [vmem:[%s3923_s2] sm:$0xf]  ;;  %v547_v15 = vsub.s32 2, %v2374_v61 }
  0xfa   :  { %1717 = vmatpush1.bf16.msra.mxu0 %v1716_v21  ;;  %v1179_v21 = vld [vmem:[%s3924_s3 + $0x30] sm:$0xff] }
  0xfb   :  { %1973 = vmatpush1.bf16.msra.mxu1 %v1972_v22  ;;  %1719 = vmatprep.subr.bf16.mxu0 %v1718_v23  ;;  %v1180_v22 = vld [vmem:[%s3924_s3 + $0x38] sm:$0xff]  ;;  %v1211_v23 = vld [vmem:[%s3924_s3 + $0x130] sm:$0xff] }
  0xfc   :  { %1975 = vmatprep.subr.bf16.mxu1 %v1974_v29  ;;  %v1198_v29 = vld [vmem:[%s3924_s3 + $0xc8] sm:$0xff]  ;;  %v1996_v32 = vpack.c.bf16 %v1180_v22, %v1179_v21  ;;  %v2028_v33 = vpack.c.bf16 %v1212_v27, %v1211_v23  ;;  %v552_v21 = vrot.slane %v535_v14, %v551_v17 }
  0xfd   :  { %v1998_v34 = vpack.c.bf16 %v1198_v29, %v1197_v28 }
  0xfe   :  { %1721 = vmatpush1.bf16.msra.mxu0 %v1720_v35  ;;  %v1181_v35 = vld [vmem:[%s3924_s3 + $0x40] sm:$0xff] }
  0xff   :  { %1977 = vmatpush1.bf16.msra.mxu1 %v1976_v36  ;;  %1723 = vmatprep.subr.bf16.mxu0 %v1722_v37  ;;  %v1182_v36 = vld [vmem:[%s3924_s3 + $0x48] sm:$0xff]  ;;  %v1213_v37 = vld [vmem:[%s3924_s3 + $0x140] sm:$0xff] }
 0x100   :  { %1979 = vmatprep.subr.bf16.mxu1 %v1978_v42  ;;  %v1200_v42 = vld [vmem:[%s3924_s3 + $0xd8] sm:$0xff]  ;;  %v2000_v39 = vpack.c.bf16 %v1182_v36, %v1181_v35  ;;  %v2032_v46 = vpack.c.bf16 %v1214_v40, %v1213_v37  ;;  %v1399_v37 = vld [vmem:[%s3925_s4] ss:$0 sm:$0xff] }
 0x101   :  { %v2002_v47 = vpack.c.bf16 %v1200_v42, %v1199_v41 }
 0x102   :  { %1725 = vmatpush1.bf16.msra.mxu0 %v1724_v25  ;;  %v1183_v25 = vld [vmem:[%s3924_s3 + $0x50] sm:$0xff] }
 0x103   :  { %1981 = vmatpush1.bf16.msra.mxu1 %v1980_v48  ;;  %1983 = vmatprep.subr.bf16.mxu0 %v1982_v49  ;;  %v1184_v48 = vld [vmem:[%s3924_s3 + $0x58] sm:$0xff]  ;;  %v1215_v49 = vld [vmem:[%s3924_s3 + $0x150] sm:$0xff] }
 0x104   :  { %2015 = vmatprep.subr.bf16.mxu1 %v2014_v54  ;;  %v1202_v54 = vld [vmem:[%s3924_s3 + $0xe8] sm:$0xff]  ;;  %v2004_v11 = vpack.c.bf16 %v1184_v48, %v1183_v25  ;;  %v2036_v57 = vpack.c.bf16 %v1216_v52, %v1215_v49 }
 0x105   :  { %879 = vmatmul.mubr.f32.vlgmr.msra.gmra.mrb[0].mxu0 %v3345_v50  ;;  %v2006_v58 = vpack.c.bf16 %v1202_v54, %v1201_v53 }
 0x106   :  { %1163 = vmatmul.mubr.f32.vlgmr.msra.gmra.mrb[0].mxu1 %v3345_v50  ;;  %1985 = vmatpush3.bf16.msra.mxu0 %v1984_v24  ;;  %v2022_v50 = vpack.c.bf16 %v1226_v6, %v1225_v5  ;;  %v2038_v24 = vpack.c.bf16 %v1234_v56, %v1233_v55  ;;  %v2010_v5 = vpack.c.bf16 %v1204_v3, %v1203_v2  ;;  %v1236_v6 = vld [vmem:[%s3924_s3 + $0x1f8] sm:$0xff] }
 0x107   :  { %2017 = vmatpush3.bf16.msra.mxu1 %v2016_v59  ;;  %1987 = vmatprep.subr.bf16.mxu0 %v1986_v60  ;;  %v1185_v59 = vld [vmem:[%s3924_s3 + $0x60] sm:$0xff]  ;;  %v1186_v60 = vld [vmem:[%s3924_s3 + $0x68] sm:$0xff] }
 0x108   :  { %2019 = vmatprep.subr.bf16.mxu1 %v2018_v1  ;;  %v2008_v63 = vpack.c.bf16 %v1186_v60, %v1185_v59  ;;  %v2040_v1 = vpack.c.bf16 %v1218_v0, %v1217_v62 }
 0x10a   :  { %1989 = vmatpush3.bf16.msra.mxu0 %v1988_v7  ;;  %v1187_v7 = vld [vmem:[%s3924_s3 + $0x70] sm:$0xff] }
 0x10b   :  { %2021 = vmatpush3.bf16.msra.mxu1 %v2020_v45  ;;  %1991 = vmatprep.subr.bf16.mxu0 %v1990_v8  ;;  %v1188_v45 = vld [vmem:[%s3924_s3 + $0x78] sm:$0xff]  ;;  %v2042_v8 = vpack.c.bf16 %v1236_v6, %v1235_v4 }
 0x10c   :  { %2023 = vmatprep.subr.bf16.mxu1 %v2022_v50  ;;  %v2012_v9 = vpack.c.bf16 %v1188_v45, %v1187_v7  ;;  %v2044_v50 = vpack.c.bf16 %v1220_v12, %v1219_v10 }
 0x10e   :  { %1993 = vmatpush3.bf16.msra.mxu0 %v1992_v18  ;;  %v540_v18 = vrot.slane %v535_v14, %v539_v13 }
 0x10f   :  { %2025 = vmatpush3.bf16.msra.mxu1 %v2024_v19  ;;  %1995 = vmatprep.subr.bf16.mxu0 %v1994_v20  ;;  %v548_v19 = vrot.slane %v535_v14, %v547_v15  ;;  %v544_v20 = vrot.slane %v535_v14, %v543_v16 }
 0x110   :  { %2027 = vmatprep.subr.bf16.mxu1 %v2026_v26 }
 0x112   :  { %1997 = vmatpush3.bf16.msra.mxu0 %v1996_v32 }
 0x113   :  { %2029 = vmatpush3.bf16.msra.mxu1 %v2028_v33  ;;  %1999 = vmatprep.subr.bf16.mxu0 %v1998_v34 }
 0x114   :  { %2031 = vmatprep.subr.bf16.mxu1 %v2030_v38 }
 0x116   :  { %2001 = vmatpush3.bf16.msra.mxu0 %v2000_v39 }
 0x117   :  { %2033 = vmatpush3.bf16.msra.mxu1 %v2032_v46  ;;  %2003 = vmatprep.subr.bf16.mxu0 %v2002_v47 }
 0x118   :  { %2035 = vmatprep.subr.bf16.mxu1 %v2034_v51 }
 0x11a   :  { %2005 = vmatpush3.bf16.msra.mxu0 %v2004_v11 }
 0x11b   :  { %2037 = vmatpush3.bf16.msra.mxu1 %v2036_v57  ;;  %2007 = vmatprep.subr.bf16.mxu0 %v2006_v58 }
 0x11c   :  { %2039 = vmatprep.subr.bf16.mxu1 %v2038_v24 }
 0x11e   :  { %2009 = vmatpush3.bf16.msra.mxu0 %v2008_v63 }
 0x11f   :  { %2041 = vmatpush3.bf16.msra.mxu1 %v2040_v1  ;;  %2011 = vmatprep.subr.bf16.mxu0 %v2010_v5 }
 0x120   :  { %2043 = vmatprep.subr.bf16.mxu1 %v2042_v8 }
 0x122   :  { %2013 = vmatpush3.bf16.msra.mxu0 %v2012_v9 }
 0x123   :  { %2045 = vmatpush3.bf16.msra.mxu1 %v2044_v50 }
 0x1d8   :  { %v880_v22 = vpop.f32.mrb[0].mxu0 }
 0x1d9   :  { %v2046_v23 = vadd.f32 %v880_v22, %v540_v18  ;;  %v1164_v26 = vpop.f32.mrb[0].mxu1  ;;  %v882_v27 = vpop.f32.mrb[1].mxu0 }
 0x1da   :  { %v2048_v28 = vadd.f32 %v1164_v26, %v548_v19  ;;  %v2047_v29 = vadd.f32 %v882_v27, %v544_v20  ;;  %v1166_v30 = vpop.f32.mrb[1].mxu1 }
 0x1db   :  { %v2049_v31 = vadd.f32 %v1166_v30, %v552_v21  ;;  %v1169_v33 = vmax.f32 %v2046_v23, 0.0 }
 0x1dc   :  { %v1170_v32 = vmax.f32 %v2047_v29, 0.0  ;;  %v1171_v35 = vmax.f32 %v2048_v28, 0.0 }
 0x1dd   :  { %v1172_v34 = vmax.f32 %v2049_v31, 0.0 }
 0x1de   :  { %1308 = vmatprep.mubr.f32.mxu0 %v1170_v32 }
 0x1df   :  { %1378 = vmatprep.mubr.f32.mxu1 %v1172_v34  ;;  %1309 = vmatmul.mubr.f32.vlgmr.msra.gmra.mrb[2].mxu0 %v1169_v33 }
 0x1e0   :  { %1379 = vmatmul.mubr.f32.vlgmr.msra.gmra.mrb[2].mxu1 %v1171_v35 }
 0x2b2   :  { %v1432_v61 = vpop.f32.mrb[2].mxu0 }
 0x2b3   :  { %v1467_v36 = vpop.f32.mrb[2].mxu1  ;;  %v1433_v38 = vpop.f32.mrb[3].mxu0 }
 0x2b4   :  { %v1434_v40 = vadd.f32 %v1433_v38, %v1432_v61  ;;  %v1468_v41 = vpop.f32.mrb[3].mxu1 }
 0x2b5   :  { %v1469_v42 = vadd.f32 %v1468_v41, %v1467_v36 }
 0x2b6   :  { %v1311_v43 = vadd.f32 %v1434_v40, %v1399_v37 }
 0x2b8   :  { %v1381_v44 = vadd.f32 %v1469_v42, %v1311_v43 }
 0x2ba   :  { %1384 = vst [vmem:[#allocation2] sm:$0x3] %v1381_v44 }
 0x2bb   :  { %2077 = shalt.err (!%p2074_p4)
}
 0x2bc   :  { %s2078_s4 = scalar_lea.hbm %s3926_s5, 32 }
 0x2bd   :  { %p2079_p5 = scmp.ne.s32.totalorder %s3926_s5, %s2078_s4  ;;  %p2082_p6 = scmp.lt.u32.totalorder %s2078_s4, %s3926_s5 }
 0x2bf   :  { %p2084_p7 = pnand %p2082_p6, %p2079_p5 }
 0x2c1   :  { %2087 = shalt.err (!%p2084_p7)
}
 0x2c2   :  { %1394 = dma.vmem_to_hbm [thread:$0]  %s1392_s23, 32, %s3926_s5, [#allocation3]  }
 0x2c3   :  { %2088 = dma.done.wait [#allocation3], 32  }
 0x2c4   :  { %2089 = vsyncadd [#allocation3], 4294967264 }
 0x2c5   :  { %1398 = vsyncpa [#allocation3], 1 }

// kernel: cnn_forward.6
= control target key start
LH: loop header
LB: loop body
LE: loop exit
PB: predicated region body
PF: predicated region fallthrough
CT: control target
= control target key end

     0   :  { %s4638_s12 = smov 0   ;;  %s4640_s13 = smov 0   ;;  %s7181_s0 = inlined_call_operand.vmem [shape: f32[2,3136], index: 0, kind: input, shape index: {}]   ;;  %s7182_s1 = inlined_call_operand.vmem [shape: f32[3136,1024], index: 1, kind: input, shape index: {}]   ;;  %s7183_s2 = inlined_call_operand.vmem [shape: f32[1,1024], index: 2, kind: input, shape index: {}]   ;;  %s7184_s3 = inlined_call_operand.vmem [shape: f32[2,1024], index: 3, kind: output, shape index: {}]  }
   0x1   :  { %s4642_s14 = smov 0  }
   0x2 LB: > { %s3732_s15 = sadd.s32 4294967295, %s4614_s14   ;;  %s4655_s16 = sadd.s32 1, %s4614_s14   ;;  %s4614_s14 = sphi %s4642_s14, %s7187_s14   ;;  %s4610_s13 = sphi %s4640_s13, %s7186_s13   ;;  %s4606_s12 = sphi %s4638_s12, %s7185_s12  }
   0x3   : > { %s38_s17 = ssub.s32 %s4614_s14, %s4655_s16  ;;  %s41_s18 = sadd.s32 1, %s4610_s13 }
   0x4   : > { %p39_p0 = scmp.eq.s32.totalorder %s38_s17, 0  ;;  %p48_p1 = scmp.ne.s32.totalorder %s4610_s13, %s4606_s12 }
   0x5   : > { %p49_p2 = scmp.eq.s32.totalorder %s4614_s14, 0  ;;  %p3735_p4 = scmp.ge.s32.totalorder %s4614_s14, 4 }
   0x6   : > { %s4664_s19 = scalar_select %p39_p0, %s4610_s13, %s41_s18  }
   0x7   : > { %p50_p3 = por %p49_p2, %p48_p1  ;;  %129 = sbr.rel (%p3735_p4) target bundleno = 410 (0x19a), region = 20 }
   0xe   : > { %132 = sbr.rel (!%p50_p3) target bundleno = 410 (0x19a), region = 24  ;;  %s134_s20 = sand.u32 (%p50_p3), 1, %s4610_s13  }
   0xf   : > { %s3747_s21 = sshll.u32 (%p50_p3), %s4614_s14, 4  ;;  %s4558_s22 = smul.u32 (%p50_p3), 6272, %s134_s20 }
  0x10   : > { %s4672_s25 = scalar_lea.vmem (%p50_p3), %s7182_s1, %s3747_s21 }
  0x11   : > { %v152_v0 = vld [vmem:[%s4672_s25] sm:$0xff] (%p50_p3)  ;;  %v154_v1 = vld [vmem:[%s4672_s25 + $0x8] sm:$0xff] (%p50_p3)  ;;  %s4680_s26 = scalar_lea.vmem (%p50_p3), [#allocation2], %s4558_s22 }
  0x12   : > { %v156_v2 = vld [vmem:[%s4672_s25 + $0x40] sm:$0xff] (%p50_p3)  ;;  %v158_v3 = vld [vmem:[%s4672_s25 + $0x48] sm:$0xff] (%p50_p3)  ;;  %153 = vst [vmem:[%s4680_s26] sm:$0xff] (%p50_p3), %v152_v0  ;;  %155 = vst [vmem:[%s4680_s26 + $0x8] sm:$0xff] (%p50_p3), %v154_v1 }
  0x13   : > { %v160_v4 = vld [vmem:[%s4672_s25 + $0x80] sm:$0xff] (%p50_p3)  ;;  %v162_v5 = vld [vmem:[%s4672_s25 + $0x88] sm:$0xff] (%p50_p3)  ;;  %157 = vst [vmem:[%s4680_s26 + $0x10] sm:$0xff] (%p50_p3), %v156_v2  ;;  %159 = vst [vmem:[%s4680_s26 + $0x18] sm:$0xff] (%p50_p3), %v158_v3 }
  0x14   : > { %161 = vst [vmem:[%s4680_s26 + $0x20] sm:$0xff] (%p50_p3), %v160_v4  ;;  %163 = vst [vmem:[%s4680_s26 + $0x28] sm:$0xff] (%p50_p3), %v162_v5  ;;  %v164_v6 = vld [vmem:[%s4672_s25 + $0xc0] sm:$0xff] (%p50_p3)  ;;  %v166_v7 = vld [vmem:[%s4672_s25 + $0xc8] sm:$0xff] (%p50_p3) }
  0x15   : > { %v168_v8 = vld [vmem:[%s4672_s25 + $0x100] sm:$0xff]  ;;  %165 = vst [vmem:[%s4680_s26 + $0x30] sm:$0xff] %v164_v6  ;;  %167 = vst [vmem:[%s4680_s26 + $0x38] sm:$0xff] %v166_v7  ;;  %v170_v9 = vld [vmem:[%s4672_s25 + $0x108] sm:$0xff] }
  0x16   : > { %169 = vst [vmem:[%s4680_s26 + $0x40] sm:$0xff] %v168_v8  ;;  %v172_v10 = vld [vmem:[%s4672_s25 + $0x140] sm:$0xff]  ;;  %v174_v11 = vld [vmem:[%s4672_s25 + $0x148] sm:$0xff]  ;;  %171 = vst [vmem:[%s4680_s26 + $0x48] sm:$0xff] %v170_v9 }
  0x17   : > { %173 = vst [vmem:[%s4680_s26 + $0x50] sm:$0xff] %v172_v10  ;;  %175 = vst [vmem:[%s4680_s26 + $0x58] sm:$0xff] %v174_v11  ;;  %v176_v12 = vld [vmem:[%s4672_s25 + $0x180] sm:$0xff]  ;;  %v178_v13 = vld [vmem:[%s4672_s25 + $0x188] sm:$0xff] }
  0x18   : > { %v180_v14 = vld [vmem:[%s4672_s25 + $0x1c0] sm:$0xff]  ;;  %177 = vst [vmem:[%s4680_s26 + $0x60] sm:$0xff] %v176_v12  ;;  %179 = vst [vmem:[%s4680_s26 + $0x68] sm:$0xff] %v178_v13  ;;  %v182_v15 = vld [vmem:[%s4672_s25 + $0x1c8] sm:$0xff] }
  0x19   : > { %181 = vst [vmem:[%s4680_s26 + $0x70] sm:$0xff] %v180_v14  ;;  %v184_v16 = vld [vmem:[%s4672_s25 + $0x200] sm:$0xff]  ;;  %v186_v17 = vld [vmem:[%s4672_s25 + $0x208] sm:$0xff]  ;;  %183 = vst [vmem:[%s4680_s26 + $0x78] sm:$0xff] %v182_v15 }
  0x1a   : > { %185 = vst [vmem:[%s4680_s26 + $0x80] sm:$0xff] %v184_v16  ;;  %187 = vst [vmem:[%s4680_s26 + $0x88] sm:$0xff] %v186_v17  ;;  %v188_v18 = vld [vmem:[%s4672_s25 + $0x240] sm:$0xff]  ;;  %v190_v19 = vld [vmem:[%s4672_s25 + $0x248] sm:$0xff] }
  0x1b   : > { %v192_v20 = vld [vmem:[%s4672_s25 + $0x280] sm:$0xff]  ;;  %189 = vst [vmem:[%s4680_s26 + $0x90] sm:$0xff] %v188_v18  ;;  %191 = vst [vmem:[%s4680_s26 + $0x98] sm:$0xff] %v190_v19  ;;  %v194_v21 = vld [vmem:[%s4672_s25 + $0x288] sm:$0xff] }
  0x1c   : > { %193 = vst [vmem:[%s4680_s26 + $0xa0] sm:$0xff] %v192_v20  ;;  %v196_v22 = vld [vmem:[%s4672_s25 + $0x2c0] sm:$0xff]  ;;  %v198_v23 = vld [vmem:[%s4672_s25 + $0x2c8] sm:$0xff]  ;;  %195 = vst [vmem:[%s4680_s26 + $0xa8] sm:$0xff] %v194_v21 }
  0x1d   : > { %197 = vst [vmem:[%s4680_s26 + $0xb0] sm:$0xff] %v196_v22  ;;  %199 = vst [vmem:[%s4680_s26 + $0xb8] sm:$0xff] %v198_v23  ;;  %v200_v24 = vld [vmem:[%s4672_s25 + $0x300] sm:$0xff]  ;;  %v202_v25 = vld [vmem:[%s4672_s25 + $0x308] sm:$0xff] }
  0x1e   : > { %v204_v26 = vld [vmem:[%s4672_s25 + $0x340] sm:$0xff]  ;;  %201 = vst [vmem:[%s4680_s26 + $0xc0] sm:$0xff] %v200_v24  ;;  %203 = vst [vmem:[%s4680_s26 + $0xc8] sm:$0xff] %v202_v25  ;;  %v206_v27 = vld [vmem:[%s4672_s25 + $0x348] sm:$0xff] }
  0x1f   : > { %205 = vst [vmem:[%s4680_s26 + $0xd0] sm:$0xff] %v204_v26  ;;  %v208_v28 = vld [vmem:[%s4672_s25 + $0x380] sm:$0xff]  ;;  %v210_v29 = vld [vmem:[%s4672_s25 + $0x388] sm:$0xff]  ;;  %207 = vst [vmem:[%s4680_s26 + $0xd8] sm:$0xff] %v206_v27 }
  0x20   : > { %209 = vst [vmem:[%s4680_s26 + $0xe0] sm:$0xff] %v208_v28  ;;  %211 = vst [vmem:[%s4680_s26 + $0xe8] sm:$0xff] %v210_v29  ;;  %v212_v30 = vld [vmem:[%s4672_s25 + $0x3c0] sm:$0xff]  ;;  %v214_v31 = vld [vmem:[%s4672_s25 + $0x3c8] sm:$0xff] }
  0x21   : > { %v216_v32 = vld [vmem:[%s4672_s25 + $0x400] sm:$0xff]  ;;  %213 = vst [vmem:[%s4680_s26 + $0xf0] sm:$0xff] %v212_v30  ;;  %215 = vst [vmem:[%s4680_s26 + $0xf8] sm:$0xff] %v214_v31  ;;  %v218_v33 = vld [vmem:[%s4672_s25 + $0x408] sm:$0xff] }
  0x22   : > { %217 = vst [vmem:[%s4680_s26 + $0x100] sm:$0xff] %v216_v32  ;;  %v220_v34 = vld [vmem:[%s4672_s25 + $0x440] sm:$0xff]  ;;  %v222_v35 = vld [vmem:[%s4672_s25 + $0x448] sm:$0xff]  ;;  %219 = vst [vmem:[%s4680_s26 + $0x108] sm:$0xff] %v218_v33 }
  0x23   : > { %221 = vst [vmem:[%s4680_s26 + $0x110] sm:$0xff] %v220_v34  ;;  %223 = vst [vmem:[%s4680_s26 + $0x118] sm:$0xff] %v222_v35  ;;  %v224_v36 = vld [vmem:[%s4672_s25 + $0x480] sm:$0xff]  ;;  %v226_v37 = vld [vmem:[%s4672_s25 + $0x488] sm:$0xff] }
  0x24   : > { %v228_v38 = vld [vmem:[%s4672_s25 + $0x4c0] sm:$0xff]  ;;  %225 = vst [vmem:[%s4680_s26 + $0x120] sm:$0xff] %v224_v36  ;;  %227 = vst [vmem:[%s4680_s26 + $0x128] sm:$0xff] %v226_v37  ;;  %v230_v39 = vld [vmem:[%s4672_s25 + $0x4c8] sm:$0xff] }
  0x25   : > { %229 = vst [vmem:[%s4680_s26 + $0x130] sm:$0xff] %v228_v38  ;;  %v232_v40 = vld [vmem:[%s4672_s25 + $0x500] sm:$0xff]  ;;  %v234_v41 = vld [vmem:[%s4672_s25 + $0x508] sm:$0xff]  ;;  %231 = vst [vmem:[%s4680_s26 + $0x138] sm:$0xff] %v230_v39 }
  0x26   : > { %233 = vst [vmem:[%s4680_s26 + $0x140] sm:$0xff] %v232_v40  ;;  %235 = vst [vmem:[%s4680_s26 + $0x148] sm:$0xff] %v234_v41  ;;  %v236_v42 = vld [vmem:[%s4672_s25 + $0x540] sm:$0xff]  ;;  %v238_v43 = vld [vmem:[%s4672_s25 + $0x548] sm:$0xff] }
  0x27   : > { %v240_v44 = vld [vmem:[%s4672_s25 + $0x580] sm:$0xff]  ;;  %237 = vst [vmem:[%s4680_s26 + $0x150] sm:$0xff] %v236_v42  ;;  %239 = vst [vmem:[%s4680_s26 + $0x158] sm:$0xff] %v238_v43  ;;  %v242_v45 = vld [vmem:[%s4672_s25 + $0x588] sm:$0xff] }
  0x28   : > { %241 = vst [vmem:[%s4680_s26 + $0x160] sm:$0xff] %v240_v44  ;;  %v244_v46 = vld [vmem:[%s4672_s25 + $0x5c0] sm:$0xff]  ;;  %v246_v47 = vld [vmem:[%s4672_s25 + $0x5c8] sm:$0xff]  ;;  %243 = vst [vmem:[%s4680_s26 + $0x168] sm:$0xff] %v242_v45 }
  0x29   : > { %245 = vst [vmem:[%s4680_s26 + $0x170] sm:$0xff] %v244_v46  ;;  %247 = vst [vmem:[%s4680_s26 + $0x178] sm:$0xff] %v246_v47  ;;  %v248_v48 = vld [vmem:[%s4672_s25 + $0x600] sm:$0xff]  ;;  %v250_v49 = vld [vmem:[%s4672_s25 + $0x608] sm:$0xff] }
  0x2a   : > { %v252_v50 = vld [vmem:[%s4672_s25 + $0x640] sm:$0xff]  ;;  %249 = vst [vmem:[%s4680_s26 + $0x180] sm:$0xff] %v248_v48  ;;  %251 = vst [vmem:[%s4680_s26 + $0x188] sm:$0xff] %v250_v49  ;;  %v254_v51 = vld [vmem:[%s4672_s25 + $0x648] sm:$0xff] }
  0x2b   : > { %253 = vst [vmem:[%s4680_s26 + $0x190] sm:$0xff] %v252_v50  ;;  %v256_v52 = vld [vmem:[%s4672_s25 + $0x680] sm:$0xff]  ;;  %v258_v53 = vld [vmem:[%s4672_s25 + $0x688] sm:$0xff]  ;;  %255 = vst [vmem:[%s4680_s26 + $0x198] sm:$0xff] %v254_v51 }
  0x2c   : > { %257 = vst [vmem:[%s4680_s26 + $0x1a0] sm:$0xff] %v256_v52  ;;  %259 = vst [vmem:[%s4680_s26 + $0x1a8] sm:$0xff] %v258_v53  ;;  %v260_v54 = vld [vmem:[%s4672_s25 + $0x6c0] sm:$0xff]  ;;  %v262_v55 = vld [vmem:[%s4672_s25 + $0x6c8] sm:$0xff] }
  0x2d   : > { %v264_v56 = vld [vmem:[%s4672_s25 + $0x700] sm:$0xff]  ;;  %261 = vst [vmem:[%s4680_s26 + $0x1b0] sm:$0xff] %v260_v54  ;;  %263 = vst [vmem:[%s4680_s26 + $0x1b8] sm:$0xff] %v262_v55  ;;  %v266_v57 = vld [vmem:[%s4672_s25 + $0x708] sm:$0xff] }
  0x2e   : > { %265 = vst [vmem:[%s4680_s26 + $0x1c0] sm:$0xff] %v264_v56  ;;  %v268_v58 = vld [vmem:[%s4672_s25 + $0x740] sm:$0xff]  ;;  %v270_v59 = vld [vmem:[%s4672_s25 + $0x748] sm:$0xff]  ;;  %267 = vst [vmem:[%s4680_s26 + $0x1c8] sm:$0xff] %v266_v57 }
  0x2f   : > { %269 = vst [vmem:[%s4680_s26 + $0x1d0] sm:$0xff] %v268_v58  ;;  %271 = vst [vmem:[%s4680_s26 + $0x1d8] sm:$0xff] %v270_v59  ;;  %v272_v60 = vld [vmem:[%s4672_s25 + $0x780] sm:$0xff]  ;;  %v274_v61 = vld [vmem:[%s4672_s25 + $0x788] sm:$0xff] }
  0x30   : > { %v276_v62 = vld [vmem:[%s4672_s25 + $0x7c0] sm:$0xff]  ;;  %273 = vst [vmem:[%s4680_s26 + $0x1e0] sm:$0xff] %v272_v60  ;;  %275 = vst [vmem:[%s4680_s26 + $0x1e8] sm:$0xff] %v274_v61  ;;  %v278_v63 = vld [vmem:[%s4672_s25 + $0x7c8] sm:$0xff] }
  0x31   : > { %277 = vst [vmem:[%s4680_s26 + $0x1f0] sm:$0xff] %v276_v62  ;;  %v280_v0 = vld [vmem:[%s4672_s25 + $0x800] sm:$0xff]  ;;  %v282_v1 = vld [vmem:[%s4672_s25 + $0x808] sm:$0xff]  ;;  %279 = vst [vmem:[%s4680_s26 + $0x1f8] sm:$0xff] %v278_v63 }
  0x32   : > { %281 = vst [vmem:[%s4680_s26 + $0x200] sm:$0xff] %v280_v0  ;;  %283 = vst [vmem:[%s4680_s26 + $0x208] sm:$0xff] %v282_v1  ;;  %v284_v2 = vld [vmem:[%s4672_s25 + $0x840] sm:$0xff]  ;;  %v286_v3 = vld [vmem:[%s4672_s25 + $0x848] sm:$0xff] }
  0x33   : > { %v288_v4 = vld [vmem:[%s4672_s25 + $0x880] sm:$0xff]  ;;  %285 = vst [vmem:[%s4680_s26 + $0x210] sm:$0xff] %v284_v2  ;;  %287 = vst [vmem:[%s4680_s26 + $0x218] sm:$0xff] %v286_v3  ;;  %v290_v5 = vld [vmem:[%s4672_s25 + $0x888] sm:$0xff] }
  0x34   : > { %289 = vst [vmem:[%s4680_s26 + $0x220] sm:$0xff] %v288_v4  ;;  %v292_v6 = vld [vmem:[%s4672_s25 + $0x8c0] sm:$0xff]  ;;  %v294_v7 = vld [vmem:[%s4672_s25 + $0x8c8] sm:$0xff]  ;;  %291 = vst [vmem:[%s4680_s26 + $0x228] sm:$0xff] %v290_v5 }
  0x35   : > { %293 = vst [vmem:[%s4680_s26 + $0x230] sm:$0xff] %v292_v6  ;;  %295 = vst [vmem:[%s4680_s26 + $0x238] sm:$0xff] %v294_v7  ;;  %v296_v8 = vld [vmem:[%s4672_s25 + $0x900] sm:$0xff]  ;;  %v298_v9 = vld [vmem:[%s4672_s25 + $0x908] sm:$0xff] }
  0x36   : > { %v300_v10 = vld [vmem:[%s4672_s25 + $0x940] sm:$0xff]  ;;  %297 = vst [vmem:[%s4680_s26 + $0x240] sm:$0xff] %v296_v8  ;;  %299 = vst [vmem:[%s4680_s26 + $0x248] sm:$0xff] %v298_v9  ;;  %v302_v11 = vld [vmem:[%s4672_s25 + $0x948] sm:$0xff] }
  0x37   : > { %301 = vst [vmem:[%s4680_s26 + $0x250] sm:$0xff] %v300_v10  ;;  %v304_v12 = vld [vmem:[%s4672_s25 + $0x980] sm:$0xff]  ;;  %v306_v13 = vld [vmem:[%s4672_s25 + $0x988] sm:$0xff]  ;;  %303 = vst [vmem:[%s4680_s26 + $0x258] sm:$0xff] %v302_v11 }
  0x38   : > { %305 = vst [vmem:[%s4680_s26 + $0x260] sm:$0xff] %v304_v12  ;;  %307 = vst [vmem:[%s4680_s26 + $0x268] sm:$0xff] %v306_v13  ;;  %v308_v14 = vld [vmem:[%s4672_s25 + $0x9c0] sm:$0xff]  ;;  %v310_v15 = vld [vmem:[%s4672_s25 + $0x9c8] sm:$0xff] }
  0x39   : > { %v312_v16 = vld [vmem:[%s4672_s25 + $0xa00] sm:$0xff]  ;;  %309 = vst [vmem:[%s4680_s26 + $0x270] sm:$0xff] %v308_v14  ;;  %311 = vst [vmem:[%s4680_s26 + $0x278] sm:$0xff] %v310_v15  ;;  %v314_v17 = vld [vmem:[%s4672_s25 + $0xa08] sm:$0xff] }
  0x3a   : > { %313 = vst [vmem:[%s4680_s26 + $0x280] sm:$0xff] %v312_v16  ;;  %v316_v18 = vld [vmem:[%s4672_s25 + $0xa40] sm:$0xff]  ;;  %v318_v19 = vld [vmem:[%s4672_s25 + $0xa48] sm:$0xff]  ;;  %315 = vst [vmem:[%s4680_s26 + $0x288] sm:$0xff] %v314_v17 }
  0x3b   : > { %317 = vst [vmem:[%s4680_s26 + $0x290] sm:$0xff] %v316_v18  ;;  %319 = vst [vmem:[%s4680_s26 + $0x298] sm:$0xff] %v318_v19  ;;  %v320_v20 = vld [vmem:[%s4672_s25 + $0xa80] sm:$0xff]  ;;  %v322_v21 = vld [vmem:[%s4672_s25 + $0xa88] sm:$0xff] }
  0x3c   : > { %v324_v22 = vld [vmem:[%s4672_s25 + $0xac0] sm:$0xff]  ;;  %321 = vst [vmem:[%s4680_s26 + $0x2a0] sm:$0xff] %v320_v20  ;;  %323 = vst [vmem:[%s4680_s26 + $0x2a8] sm:$0xff] %v322_v21  ;;  %v326_v23 = vld [vmem:[%s4672_s25 + $0xac8] sm:$0xff] }
  0x3d   : > { %325 = vst [vmem:[%s4680_s26 + $0x2b0] sm:$0xff] %v324_v22  ;;  %v328_v24 = vld [vmem:[%s4672_s25 + $0xb00] sm:$0xff]  ;;  %v330_v25 = vld [vmem:[%s4672_s25 + $0xb08] sm:$0xff]  ;;  %327 = vst [vmem:[%s4680_s26 + $0x2b8] sm:$0xff] %v326_v23 }
  0x3e   : > { %329 = vst [vmem:[%s4680_s26 + $0x2c0] sm:$0xff] %v328_v24  ;;  %331 = vst [vmem:[%s4680_s26 + $0x2c8] sm:$0xff] %v330_v25  ;;  %v332_v26 = vld [vmem:[%s4672_s25 + $0xb40] sm:$0xff]  ;;  %v334_v27 = vld [vmem:[%s4672_s25 + $0xb48] sm:$0xff] }
  0x3f   : > { %v336_v28 = vld [vmem:[%s4672_s25 + $0xb80] sm:$0xff]  ;;  %333 = vst [vmem:[%s4680_s26 + $0x2d0] sm:$0xff] %v332_v26  ;;  %335 = vst [vmem:[%s4680_s26 + $0x2d8] sm:$0xff] %v334_v27  ;;  %v338_v29 = vld [vmem:[%s4672_s25 + $0xb88] sm:$0xff] }
  0x40   : > { %337 = vst [vmem:[%s4680_s26 + $0x2e0] sm:$0xff] %v336_v28  ;;  %v340_v30 = vld [vmem:[%s4672_s25 + $0xbc0] sm:$0xff]  ;;  %v342_v31 = vld [vmem:[%s4672_s25 + $0xbc8] sm:$0xff]  ;;  %339 = vst [vmem:[%s4680_s26 + $0x2e8] sm:$0xff] %v338_v29 }
  0x41   : > { %341 = vst [vmem:[%s4680_s26 + $0x2f0] sm:$0xff] %v340_v30  ;;  %343 = vst [vmem:[%s4680_s26 + $0x2f8] sm:$0xff] %v342_v31  ;;  %v344_v32 = vld [vmem:[%s4672_s25 + $0xc00] sm:$0xff]  ;;  %v346_v33 = vld [vmem:[%s4672_s25 + $0xc08] sm:$0xff] }
  0x42   : > { %v348_v34 = vld [vmem:[%s4672_s25 + $0xc40] sm:$0xff]  ;;  %345 = vst [vmem:[%s4680_s26 + $0x300] sm:$0xff] %v344_v32  ;;  %347 = vst [vmem:[%s4680_s26 + $0x308] sm:$0xff] %v346_v33  ;;  %v350_v35 = vld [vmem:[%s4672_s25 + $0xc48] sm:$0xff] }
  0x43   : > { %349 = vst [vmem:[%s4680_s26 + $0x310] sm:$0xff] %v348_v34  ;;  %v352_v36 = vld [vmem:[%s4672_s25 + $0xc80] sm:$0xff]  ;;  %v354_v37 = vld [vmem:[%s4672_s25 + $0xc88] sm:$0xff]  ;;  %351 = vst [vmem:[%s4680_s26 + $0x318] sm:$0xff] %v350_v35 }
  0x44   : > { %353 = vst [vmem:[%s4680_s26 + $0x320] sm:$0xff] %v352_v36  ;;  %355 = vst [vmem:[%s4680_s26 + $0x328] sm:$0xff] %v354_v37  ;;  %v356_v38 = vld [vmem:[%s4672_s25 + $0xcc0] sm:$0xff]  ;;  %v358_v39 = vld [vmem:[%s4672_s25 + $0xcc8] sm:$0xff] }
  0x45   : > { %v360_v40 = vld [vmem:[%s4672_s25 + $0xd00] sm:$0xff]  ;;  %357 = vst [vmem:[%s4680_s26 + $0x330] sm:$0xff] %v356_v38  ;;  %359 = vst [vmem:[%s4680_s26 + $0x338] sm:$0xff] %v358_v39  ;;  %v362_v41 = vld [vmem:[%s4672_s25 + $0xd08] sm:$0xff] }
  0x46   : > { %361 = vst [vmem:[%s4680_s26 + $0x340] sm:$0xff] %v360_v40  ;;  %v364_v42 = vld [vmem:[%s4672_s25 + $0xd40] sm:$0xff]  ;;  %v366_v43 = vld [vmem:[%s4672_s25 + $0xd48] sm:$0xff]  ;;  %363 = vst [vmem:[%s4680_s26 + $0x348] sm:$0xff] %v362_v41 }
  0x47   : > { %365 = vst [vmem:[%s4680_s26 + $0x350] sm:$0xff] %v364_v42  ;;  %367 = vst [vmem:[%s4680_s26 + $0x358] sm:$0xff] %v366_v43  ;;  %v368_v44 = vld [vmem:[%s4672_s25 + $0xd80] sm:$0xff]  ;;  %v370_v45 = vld [vmem:[%s4672_s25 + $0xd88] sm:$0xff] }
  0x48   : > { %v372_v46 = vld [vmem:[%s4672_s25 + $0xdc0] sm:$0xff]  ;;  %369 = vst [vmem:[%s4680_s26 + $0x360] sm:$0xff] %v368_v44  ;;  %371 = vst [vmem:[%s4680_s26 + $0x368] sm:$0xff] %v370_v45  ;;  %v374_v47 = vld [vmem:[%s4672_s25 + $0xdc8] sm:$0xff] }
  0x49   : > { %373 = vst [vmem:[%s4680_s26 + $0x370] sm:$0xff] %v372_v46  ;;  %v376_v48 = vld [vmem:[%s4672_s25 + $0xe00] sm:$0xff]  ;;  %v378_v49 = vld [vmem:[%s4672_s25 + $0xe08] sm:$0xff]  ;;  %375 = vst [vmem:[%s4680_s26 + $0x378] sm:$0xff] %v374_v47 }
  0x4a   : > { %377 = vst [vmem:[%s4680_s26 + $0x380] sm:$0xff] %v376_v48  ;;  %379 = vst [vmem:[%s4680_s26 + $0x388] sm:$0xff] %v378_v49  ;;  %v380_v50 = vld [vmem:[%s4672_s25 + $0xe40] sm:$0xff]  ;;  %v382_v51 = vld [vmem:[%s4672_s25 + $0xe48] sm:$0xff] }
  0x4b   : > { %v384_v52 = vld [vmem:[%s4672_s25 + $0xe80] sm:$0xff]  ;;  %381 = vst [vmem:[%s4680_s26 + $0x390] sm:$0xff] %v380_v50  ;;  %383 = vst [vmem:[%s4680_s26 + $0x398] sm:$0xff] %v382_v51  ;;  %v386_v53 = vld [vmem:[%s4672_s25 + $0xe88] sm:$0xff] }
  0x4c   : > { %385 = vst [vmem:[%s4680_s26 + $0x3a0] sm:$0xff] %v384_v52  ;;  %v388_v54 = vld [vmem:[%s4672_s25 + $0xec0] sm:$0xff]  ;;  %v390_v55 = vld [vmem:[%s4672_s25 + $0xec8] sm:$0xff]  ;;  %387 = vst [vmem:[%s4680_s26 + $0x3a8] sm:$0xff] %v386_v53 }
  0x4d   : > { %389 = vst [vmem:[%s4680_s26 + $0x3b0] sm:$0xff] %v388_v54  ;;  %391 = vst [vmem:[%s4680_s26 + $0x3b8] sm:$0xff] %v390_v55  ;;  %v392_v56 = vld [vmem:[%s4672_s25 + $0xf00] sm:$0xff]  ;;  %v394_v57 = vld [vmem:[%s4672_s25 + $0xf08] sm:$0xff] }
  0x4e   : > { %v396_v58 = vld [vmem:[%s4672_s25 + $0xf40] sm:$0xff]  ;;  %393 = vst [vmem:[%s4680_s26 + $0x3c0] sm:$0xff] %v392_v56  ;;  %395 = vst [vmem:[%s4680_s26 + $0x3c8] sm:$0xff] %v394_v57  ;;  %v398_v59 = vld [vmem:[%s4672_s25 + $0xf48] sm:$0xff] }
  0x4f   : > { %397 = vst [vmem:[%s4680_s26 + $0x3d0] sm:$0xff] %v396_v58  ;;  %v400_v60 = vld [vmem:[%s4672_s25 + $0xf80] sm:$0xff]  ;;  %v402_v61 = vld [vmem:[%s4672_s25 + $0xf88] sm:$0xff]  ;;  %399 = vst [vmem:[%s4680_s26 + $0x3d8] sm:$0xff] %v398_v59 }
  0x50   : > { %401 = vst [vmem:[%s4680_s26 + $0x3e0] sm:$0xff] %v400_v60  ;;  %403 = vst [vmem:[%s4680_s26 + $0x3e8] sm:$0xff] %v402_v61  ;;  %v404_v62 = vld [vmem:[%s4672_s25 + $0xfc0] sm:$0xff]  ;;  %v406_v63 = vld [vmem:[%s4672_s25 + $0xfc8] sm:$0xff] }
  0x51   : > { %v408_v0 = vld [vmem:[%s4672_s25 + $0x1000] sm:$0xff]  ;;  %405 = vst [vmem:[%s4680_s26 + $0x3f0] sm:$0xff] %v404_v62  ;;  %407 = vst [vmem:[%s4680_s26 + $0x3f8] sm:$0xff] %v406_v63  ;;  %v410_v1 = vld [vmem:[%s4672_s25 + $0x1008] sm:$0xff] }
  0x52   : > { %409 = vst [vmem:[%s4680_s26 + $0x400] sm:$0xff] %v408_v0  ;;  %v412_v2 = vld [vmem:[%s4672_s25 + $0x1040] sm:$0xff]  ;;  %v414_v3 = vld [vmem:[%s4672_s25 + $0x1048] sm:$0xff]  ;;  %411 = vst [vmem:[%s4680_s26 + $0x408] sm:$0xff] %v410_v1 }
  0x53   : > { %413 = vst [vmem:[%s4680_s26 + $0x410] sm:$0xff] %v412_v2  ;;  %415 = vst [vmem:[%s4680_s26 + $0x418] sm:$0xff] %v414_v3  ;;  %v416_v4 = vld [vmem:[%s4672_s25 + $0x1080] sm:$0xff]  ;;  %v418_v5 = vld [vmem:[%s4672_s25 + $0x1088] sm:$0xff] }
  0x54   : > { %v420_v6 = vld [vmem:[%s4672_s25 + $0x10c0] sm:$0xff]  ;;  %417 = vst [vmem:[%s4680_s26 + $0x420] sm:$0xff] %v416_v4  ;;  %419 = vst [vmem:[%s4680_s26 + $0x428] sm:$0xff] %v418_v5  ;;  %v422_v7 = vld [vmem:[%s4672_s25 + $0x10c8] sm:$0xff] }
  0x55   : > { %421 = vst [vmem:[%s4680_s26 + $0x430] sm:$0xff] %v420_v6  ;;  %v424_v8 = vld [vmem:[%s4672_s25 + $0x1100] sm:$0xff]  ;;  %v426_v9 = vld [vmem:[%s4672_s25 + $0x1108] sm:$0xff]  ;;  %423 = vst [vmem:[%s4680_s26 + $0x438] sm:$0xff] %v422_v7 }
  0x56   : > { %425 = vst [vmem:[%s4680_s26 + $0x440] sm:$0xff] %v424_v8  ;;  %427 = vst [vmem:[%s4680_s26 + $0x448] sm:$0xff] %v426_v9  ;;  %v428_v10 = vld [vmem:[%s4672_s25 + $0x1140] sm:$0xff]  ;;  %v430_v11 = vld [vmem:[%s4672_s25 + $0x1148] sm:$0xff] }
  0x57   : > { %v432_v12 = vld [vmem:[%s4672_s25 + $0x1180] sm:$0xff]  ;;  %429 = vst [vmem:[%s4680_s26 + $0x450] sm:$0xff] %v428_v10  ;;  %431 = vst [vmem:[%s4680_s26 + $0x458] sm:$0xff] %v430_v11  ;;  %v434_v13 = vld [vmem:[%s4672_s25 + $0x1188] sm:$0xff] }
  0x58   : > { %433 = vst [vmem:[%s4680_s26 + $0x460] sm:$0xff] %v432_v12  ;;  %v436_v14 = vld [vmem:[%s4672_s25 + $0x11c0] sm:$0xff]  ;;  %v438_v15 = vld [vmem:[%s4672_s25 + $0x11c8] sm:$0xff]  ;;  %435 = vst [vmem:[%s4680_s26 + $0x468] sm:$0xff] %v434_v13 }
  0x59   : > { %437 = vst [vmem:[%s4680_s26 + $0x470] sm:$0xff] %v436_v14  ;;  %439 = vst [vmem:[%s4680_s26 + $0x478] sm:$0xff] %v438_v15  ;;  %v440_v16 = vld [vmem:[%s4672_s25 + $0x1200] sm:$0xff]  ;;  %v442_v17 = vld [vmem:[%s4672_s25 + $0x1208] sm:$0xff] }
  0x5a   : > { %v444_v18 = vld [vmem:[%s4672_s25 + $0x1240] sm:$0xff]  ;;  %441 = vst [vmem:[%s4680_s26 + $0x480] sm:$0xff] %v440_v16  ;;  %443 = vst [vmem:[%s4680_s26 + $0x488] sm:$0xff] %v442_v17  ;;  %v446_v19 = vld [vmem:[%s4672_s25 + $0x1248] sm:$0xff] }
  0x5b   : > { %445 = vst [vmem:[%s4680_s26 + $0x490] sm:$0xff] %v444_v18  ;;  %v448_v20 = vld [vmem:[%s4672_s25 + $0x1280] sm:$0xff]  ;;  %v450_v21 = vld [vmem:[%s4672_s25 + $0x1288] sm:$0xff]  ;;  %447 = vst [vmem:[%s4680_s26 + $0x498] sm:$0xff] %v446_v19 }
  0x5c   : > { %449 = vst [vmem:[%s4680_s26 + $0x4a0] sm:$0xff] %v448_v20  ;;  %451 = vst [vmem:[%s4680_s26 + $0x4a8] sm:$0xff] %v450_v21  ;;  %v452_v22 = vld [vmem:[%s4672_s25 + $0x12c0] sm:$0xff]  ;;  %v454_v23 = vld [vmem:[%s4672_s25 + $0x12c8] sm:$0xff] }
  0x5d   : > { %v456_v24 = vld [vmem:[%s4672_s25 + $0x1300] sm:$0xff]  ;;  %453 = vst [vmem:[%s4680_s26 + $0x4b0] sm:$0xff] %v452_v22  ;;  %455 = vst [vmem:[%s4680_s26 + $0x4b8] sm:$0xff] %v454_v23  ;;  %v458_v25 = vld [vmem:[%s4672_s25 + $0x1308] sm:$0xff] }
  0x5e   : > { %457 = vst [vmem:[%s4680_s26 + $0x4c0] sm:$0xff] %v456_v24  ;;  %v460_v26 = vld [vmem:[%s4672_s25 + $0x1340] sm:$0xff]  ;;  %v462_v27 = vld [vmem:[%s4672_s25 + $0x1348] sm:$0xff]  ;;  %459 = vst [vmem:[%s4680_s26 + $0x4c8] sm:$0xff] %v458_v25 }
  0x5f   : > { %461 = vst [vmem:[%s4680_s26 + $0x4d0] sm:$0xff] %v460_v26  ;;  %463 = vst [vmem:[%s4680_s26 + $0x4d8] sm:$0xff] %v462_v27  ;;  %v464_v28 = vld [vmem:[%s4672_s25 + $0x1380] sm:$0xff]  ;;  %v466_v29 = vld [vmem:[%s4672_s25 + $0x1388] sm:$0xff] }
  0x60   : > { %v468_v30 = vld [vmem:[%s4672_s25 + $0x13c0] sm:$0xff]  ;;  %465 = vst [vmem:[%s4680_s26 + $0x4e0] sm:$0xff] %v464_v28  ;;  %467 = vst [vmem:[%s4680_s26 + $0x4e8] sm:$0xff] %v466_v29  ;;  %v470_v31 = vld [vmem:[%s4672_s25 + $0x13c8] sm:$0xff] }
  0x61   : > { %469 = vst [vmem:[%s4680_s26 + $0x4f0] sm:$0xff] %v468_v30  ;;  %v472_v32 = vld [vmem:[%s4672_s25 + $0x1400] sm:$0xff]  ;;  %v474_v33 = vld [vmem:[%s4672_s25 + $0x1408] sm:$0xff]  ;;  %471 = vst [vmem:[%s4680_s26 + $0x4f8] sm:$0xff] %v470_v31 }
  0x62   : > { %473 = vst [vmem:[%s4680_s26 + $0x500] sm:$0xff] %v472_v32  ;;  %475 = vst [vmem:[%s4680_s26 + $0x508] sm:$0xff] %v474_v33  ;;  %v476_v34 = vld [vmem:[%s4672_s25 + $0x1440] sm:$0xff]  ;;  %v478_v35 = vld [vmem:[%s4672_s25 + $0x1448] sm:$0xff] }
  0x63   : > { %v480_v36 = vld [vmem:[%s4672_s25 + $0x1480] sm:$0xff]  ;;  %477 = vst [vmem:[%s4680_s26 + $0x510] sm:$0xff] %v476_v34  ;;  %479 = vst [vmem:[%s4680_s26 + $0x518] sm:$0xff] %v478_v35  ;;  %v482_v37 = vld [vmem:[%s4672_s25 + $0x1488] sm:$0xff] }
  0x64   : > { %481 = vst [vmem:[%s4680_s26 + $0x520] sm:$0xff] %v480_v36  ;;  %v484_v38 = vld [vmem:[%s4672_s25 + $0x14c0] sm:$0xff]  ;;  %v486_v39 = vld [vmem:[%s4672_s25 + $0x14c8] sm:$0xff]  ;;  %483 = vst [vmem:[%s4680_s26 + $0x528] sm:$0xff] %v482_v37 }
  0x65   : > { %485 = vst [vmem:[%s4680_s26 + $0x530] sm:$0xff] %v484_v38  ;;  %487 = vst [vmem:[%s4680_s26 + $0x538] sm:$0xff] %v486_v39  ;;  %v488_v40 = vld [vmem:[%s4672_s25 + $0x1500] sm:$0xff]  ;;  %v490_v41 = vld [vmem:[%s4672_s25 + $0x1508] sm:$0xff] }
  0x66   : > { %v492_v42 = vld [vmem:[%s4672_s25 + $0x1540] sm:$0xff]  ;;  %489 = vst [vmem:[%s4680_s26 + $0x540] sm:$0xff] %v488_v40  ;;  %491 = vst [vmem:[%s4680_s26 + $0x548] sm:$0xff] %v490_v41  ;;  %v494_v43 = vld [vmem:[%s4672_s25 + $0x1548] sm:$0xff] }
  0x67   : > { %493 = vst [vmem:[%s4680_s26 + $0x550] sm:$0xff] %v492_v42  ;;  %v496_v44 = vld [vmem:[%s4672_s25 + $0x1580] sm:$0xff]  ;;  %v498_v45 = vld [vmem:[%s4672_s25 + $0x1588] sm:$0xff]  ;;  %495 = vst [vmem:[%s4680_s26 + $0x558] sm:$0xff] %v494_v43 }
  0x68   : > { %497 = vst [vmem:[%s4680_s26 + $0x560] sm:$0xff] %v496_v44  ;;  %499 = vst [vmem:[%s4680_s26 + $0x568] sm:$0xff] %v498_v45  ;;  %v500_v46 = vld [vmem:[%s4672_s25 + $0x15c0] sm:$0xff]  ;;  %v502_v47 = vld [vmem:[%s4672_s25 + $0x15c8] sm:$0xff] }
  0x69   : > { %v504_v48 = vld [vmem:[%s4672_s25 + $0x1600] sm:$0xff]  ;;  %501 = vst [vmem:[%s4680_s26 + $0x570] sm:$0xff] %v500_v46  ;;  %503 = vst [vmem:[%s4680_s26 + $0x578] sm:$0xff] %v502_v47  ;;  %v506_v49 = vld [vmem:[%s4672_s25 + $0x1608] sm:$0xff] }
  0x6a   : > { %505 = vst [vmem:[%s4680_s26 + $0x580] sm:$0xff] %v504_v48  ;;  %v508_v50 = vld [vmem:[%s4672_s25 + $0x1640] sm:$0xff]  ;;  %v510_v51 = vld [vmem:[%s4672_s25 + $0x1648] sm:$0xff]  ;;  %507 = vst [vmem:[%s4680_s26 + $0x588] sm:$0xff] %v506_v49 }
  0x6b   : > { %509 = vst [vmem:[%s4680_s26 + $0x590] sm:$0xff] %v508_v50  ;;  %511 = vst [vmem:[%s4680_s26 + $0x598] sm:$0xff] %v510_v51  ;;  %v512_v52 = vld [vmem:[%s4672_s25 + $0x1680] sm:$0xff]  ;;  %v514_v53 = vld [vmem:[%s4672_s25 + $0x1688] sm:$0xff] }
  0x6c   : > { %v516_v54 = vld [vmem:[%s4672_s25 + $0x16c0] sm:$0xff]  ;;  %513 = vst [vmem:[%s4680_s26 + $0x5a0] sm:$0xff] %v512_v52  ;;  %515 = vst [vmem:[%s4680_s26 + $0x5a8] sm:$0xff] %v514_v53  ;;  %v518_v55 = vld [vmem:[%s4672_s25 + $0x16c8] sm:$0xff] }
  0x6d   : > { %517 = vst [vmem:[%s4680_s26 + $0x5b0] sm:$0xff] %v516_v54  ;;  %v520_v56 = vld [vmem:[%s4672_s25 + $0x1700] sm:$0xff]  ;;  %v522_v57 = vld [vmem:[%s4672_s25 + $0x1708] sm:$0xff]  ;;  %519 = vst [vmem:[%s4680_s26 + $0x5b8] sm:$0xff] %v518_v55 }
  0x6e   : > { %521 = vst [vmem:[%s4680_s26 + $0x5c0] sm:$0xff] %v520_v56  ;;  %523 = vst [vmem:[%s4680_s26 + $0x5c8] sm:$0xff] %v522_v57  ;;  %v524_v58 = vld [vmem:[%s4672_s25 + $0x1740] sm:$0xff]  ;;  %v526_v59 = vld [vmem:[%s4672_s25 + $0x1748] sm:$0xff] }
  0x6f   : > { %v528_v60 = vld [vmem:[%s4672_s25 + $0x1780] sm:$0xff]  ;;  %525 = vst [vmem:[%s4680_s26 + $0x5d0] sm:$0xff] %v524_v58  ;;  %527 = vst [vmem:[%s4680_s26 + $0x5d8] sm:$0xff] %v526_v59  ;;  %v530_v61 = vld [vmem:[%s4672_s25 + $0x1788] sm:$0xff] }
  0x70   : > { %529 = vst [vmem:[%s4680_s26 + $0x5e0] sm:$0xff] %v528_v60  ;;  %v532_v62 = vld [vmem:[%s4672_s25 + $0x17c0] sm:$0xff]  ;;  %v534_v63 = vld [vmem:[%s4672_s25 + $0x17c8] sm:$0xff]  ;;  %531 = vst [vmem:[%s4680_s26 + $0x5e8] sm:$0xff] %v530_v61 }
  0x71   : > { %533 = vst [vmem:[%s4680_s26 + $0x5f0] sm:$0xff] %v532_v62  ;;  %535 = vst [vmem:[%s4680_s26 + $0x5f8] sm:$0xff] %v534_v63  ;;  %v536_v0 = vld [vmem:[%s4672_s25 + $0x1800] sm:$0xff]  ;;  %v538_v1 = vld [vmem:[%s4672_s25 + $0x1808] sm:$0xff] }
  0x72   : > { %v540_v2 = vld [vmem:[%s4672_s25 + $0x1840] sm:$0xff]  ;;  %537 = vst [vmem:[%s4680_s26 + $0x600] sm:$0xff] %v536_v0  ;;  %539 = vst [vmem:[%s4680_s26 + $0x608] sm:$0xff] %v538_v1  ;;  %v542_v3 = vld [vmem:[%s4672_s25 + $0x1848] sm:$0xff] }
  0x73   : > { %541 = vst [vmem:[%s4680_s26 + $0x610] sm:$0xff] %v540_v2  ;;  %v544_v4 = vld [vmem:[%s4672_s25 + $0x1880] sm:$0xff]  ;;  %v546_v5 = vld [vmem:[%s4672_s25 + $0x1888] sm:$0xff]  ;;  %543 = vst [vmem:[%s4680_s26 + $0x618] sm:$0xff] %v542_v3 }
  0x74   : > { %545 = vst [vmem:[%s4680_s26 + $0x620] sm:$0xff] %v544_v4  ;;  %547 = vst [vmem:[%s4680_s26 + $0x628] sm:$0xff] %v546_v5  ;;  %v548_v6 = vld [vmem:[%s4672_s25 + $0x18c0] sm:$0xff]  ;;  %v550_v7 = vld [vmem:[%s4672_s25 + $0x18c8] sm:$0xff] }
  0x75   : > { %v552_v8 = vld [vmem:[%s4672_s25 + $0x1900] sm:$0xff]  ;;  %549 = vst [vmem:[%s4680_s26 + $0x630] sm:$0xff] %v548_v6  ;;  %551 = vst [vmem:[%s4680_s26 + $0x638] sm:$0xff] %v550_v7  ;;  %v554_v9 = vld [vmem:[%s4672_s25 + $0x1908] sm:$0xff] }
  0x76   : > { %553 = vst [vmem:[%s4680_s26 + $0x640] sm:$0xff] %v552_v8  ;;  %v556_v10 = vld [vmem:[%s4672_s25 + $0x1940] sm:$0xff]  ;;  %v558_v11 = vld [vmem:[%s4672_s25 + $0x1948] sm:$0xff]  ;;  %555 = vst [vmem:[%s4680_s26 + $0x648] sm:$0xff] %v554_v9 }
  0x77   : > { %557 = vst [vmem:[%s4680_s26 + $0x650] sm:$0xff] %v556_v10  ;;  %559 = vst [vmem:[%s4680_s26 + $0x658] sm:$0xff] %v558_v11  ;;  %v560_v12 = vld [vmem:[%s4672_s25 + $0x1980] sm:$0xff]  ;;  %v562_v13 = vld [vmem:[%s4672_s25 + $0x1988] sm:$0xff] }
  0x78   : > { %v564_v14 = vld [vmem:[%s4672_s25 + $0x19c0] sm:$0xff]  ;;  %561 = vst [vmem:[%s4680_s26 + $0x660] sm:$0xff] %v560_v12  ;;  %563 = vst [vmem:[%s4680_s26 + $0x668] sm:$0xff] %v562_v13  ;;  %v566_v15 = vld [vmem:[%s4672_s25 + $0x19c8] sm:$0xff] }
  0x79   : > { %565 = vst [vmem:[%s4680_s26 + $0x670] sm:$0xff] %v564_v14  ;;  %v568_v16 = vld [vmem:[%s4672_s25 + $0x1a00] sm:$0xff]  ;;  %v570_v17 = vld [vmem:[%s4672_s25 + $0x1a08] sm:$0xff]  ;;  %567 = vst [vmem:[%s4680_s26 + $0x678] sm:$0xff] %v566_v15 }
  0x7a   : > { %569 = vst [vmem:[%s4680_s26 + $0x680] sm:$0xff] %v568_v16  ;;  %571 = vst [vmem:[%s4680_s26 + $0x688] sm:$0xff] %v570_v17  ;;  %v572_v18 = vld [vmem:[%s4672_s25 + $0x1a40] sm:$0xff]  ;;  %v574_v19 = vld [vmem:[%s4672_s25 + $0x1a48] sm:$0xff] }
  0x7b   : > { %v576_v20 = vld [vmem:[%s4672_s25 + $0x1a80] sm:$0xff]  ;;  %573 = vst [vmem:[%s4680_s26 + $0x690] sm:$0xff] %v572_v18  ;;  %575 = vst [vmem:[%s4680_s26 + $0x698] sm:$0xff] %v574_v19  ;;  %v578_v21 = vld [vmem:[%s4672_s25 + $0x1a88] sm:$0xff] }
  0x7c   : > { %577 = vst [vmem:[%s4680_s26 + $0x6a0] sm:$0xff] %v576_v20  ;;  %v580_v22 = vld [vmem:[%s4672_s25 + $0x1ac0] sm:$0xff]  ;;  %v582_v23 = vld [vmem:[%s4672_s25 + $0x1ac8] sm:$0xff]  ;;  %579 = vst [vmem:[%s4680_s26 + $0x6a8] sm:$0xff] %v578_v21 }
  0x7d   : > { %581 = vst [vmem:[%s4680_s26 + $0x6b0] sm:$0xff] %v580_v22  ;;  %583 = vst [vmem:[%s4680_s26 + $0x6b8] sm:$0xff] %v582_v23  ;;  %v584_v24 = vld [vmem:[%s4672_s25 + $0x1b00] sm:$0xff]  ;;  %v586_v25 = vld [vmem:[%s4672_s25 + $0x1b08] sm:$0xff] }
  0x7e   : > { %v588_v26 = vld [vmem:[%s4672_s25 + $0x1b40] sm:$0xff]  ;;  %585 = vst [vmem:[%s4680_s26 + $0x6c0] sm:$0xff] %v584_v24  ;;  %587 = vst [vmem:[%s4680_s26 + $0x6c8] sm:$0xff] %v586_v25  ;;  %v590_v27 = vld [vmem:[%s4672_s25 + $0x1b48] sm:$0xff] }
  0x7f   : > { %589 = vst [vmem:[%s4680_s26 + $0x6d0] sm:$0xff] %v588_v26  ;;  %v592_v28 = vld [vmem:[%s4672_s25 + $0x1b80] sm:$0xff]  ;;  %v594_v29 = vld [vmem:[%s4672_s25 + $0x1b88] sm:$0xff]  ;;  %591 = vst [vmem:[%s4680_s26 + $0x6d8] sm:$0xff] %v590_v27 }
  0x80   : > { %593 = vst [vmem:[%s4680_s26 + $0x6e0] sm:$0xff] %v592_v28  ;;  %595 = vst [vmem:[%s4680_s26 + $0x6e8] sm:$0xff] %v594_v29  ;;  %v596_v30 = vld [vmem:[%s4672_s25 + $0x1bc0] sm:$0xff]  ;;  %v598_v31 = vld [vmem:[%s4672_s25 + $0x1bc8] sm:$0xff] }
  0x81   : > { %v600_v32 = vld [vmem:[%s4672_s25 + $0x1c00] sm:$0xff]  ;;  %597 = vst [vmem:[%s4680_s26 + $0x6f0] sm:$0xff] %v596_v30  ;;  %599 = vst [vmem:[%s4680_s26 + $0x6f8] sm:$0xff] %v598_v31  ;;  %v602_v33 = vld [vmem:[%s4672_s25 + $0x1c08] sm:$0xff] }
  0x82   : > { %601 = vst [vmem:[%s4680_s26 + $0x700] sm:$0xff] %v600_v32  ;;  %v604_v34 = vld [vmem:[%s4672_s25 + $0x1c40] sm:$0xff]  ;;  %v606_v35 = vld [vmem:[%s4672_s25 + $0x1c48] sm:$0xff]  ;;  %603 = vst [vmem:[%s4680_s26 + $0x708] sm:$0xff] %v602_v33 }
  0x83   : > { %605 = vst [vmem:[%s4680_s26 + $0x710] sm:$0xff] %v604_v34  ;;  %607 = vst [vmem:[%s4680_s26 + $0x718] sm:$0xff] %v606_v35  ;;  %v608_v36 = vld [vmem:[%s4672_s25 + $0x1c80] sm:$0xff]  ;;  %v610_v37 = vld [vmem:[%s4672_s25 + $0x1c88] sm:$0xff] }
  0x84   : > { %v612_v38 = vld [vmem:[%s4672_s25 + $0x1cc0] sm:$0xff]  ;;  %609 = vst [vmem:[%s4680_s26 + $0x720] sm:$0xff] %v608_v36  ;;  %611 = vst [vmem:[%s4680_s26 + $0x728] sm:$0xff] %v610_v37  ;;  %v614_v39 = vld [vmem:[%s4672_s25 + $0x1cc8] sm:$0xff] }
  0x85   : > { %613 = vst [vmem:[%s4680_s26 + $0x730] sm:$0xff] %v612_v38  ;;  %v616_v40 = vld [vmem:[%s4672_s25 + $0x1d00] sm:$0xff]  ;;  %v618_v41 = vld [vmem:[%s4672_s25 + $0x1d08] sm:$0xff]  ;;  %615 = vst [vmem:[%s4680_s26 + $0x738] sm:$0xff] %v614_v39 }
  0x86   : > { %617 = vst [vmem:[%s4680_s26 + $0x740] sm:$0xff] %v616_v40  ;;  %619 = vst [vmem:[%s4680_s26 + $0x748] sm:$0xff] %v618_v41  ;;  %v620_v42 = vld [vmem:[%s4672_s25 + $0x1d40] sm:$0xff]  ;;  %v622_v43 = vld [vmem:[%s4672_s25 + $0x1d48] sm:$0xff] }
  0x87   : > { %v624_v44 = vld [vmem:[%s4672_s25 + $0x1d80] sm:$0xff]  ;;  %621 = vst [vmem:[%s4680_s26 + $0x750] sm:$0xff] %v620_v42  ;;  %623 = vst [vmem:[%s4680_s26 + $0x758] sm:$0xff] %v622_v43  ;;  %v626_v45 = vld [vmem:[%s4672_s25 + $0x1d88] sm:$0xff] }
  0x88   : > { %625 = vst [vmem:[%s4680_s26 + $0x760] sm:$0xff] %v624_v44  ;;  %v628_v46 = vld [vmem:[%s4672_s25 + $0x1dc0] sm:$0xff]  ;;  %v630_v47 = vld [vmem:[%s4672_s25 + $0x1dc8] sm:$0xff]  ;;  %627 = vst [vmem:[%s4680_s26 + $0x768] sm:$0xff] %v626_v45 }
  0x89   : > { %629 = vst [vmem:[%s4680_s26 + $0x770] sm:$0xff] %v628_v46  ;;  %631 = vst [vmem:[%s4680_s26 + $0x778] sm:$0xff] %v630_v47  ;;  %v632_v48 = vld [vmem:[%s4672_s25 + $0x1e00] sm:$0xff]  ;;  %v634_v49 = vld [vmem:[%s4672_s25 + $0x1e08] sm:$0xff] }
  0x8a   : > { %v636_v50 = vld [vmem:[%s4672_s25 + $0x1e40] sm:$0xff]  ;;  %633 = vst [vmem:[%s4680_s26 + $0x780] sm:$0xff] %v632_v48  ;;  %635 = vst [vmem:[%s4680_s26 + $0x788] sm:$0xff] %v634_v49  ;;  %v638_v51 = vld [vmem:[%s4672_s25 + $0x1e48] sm:$0xff] }
  0x8b   : > { %637 = vst [vmem:[%s4680_s26 + $0x790] sm:$0xff] %v636_v50  ;;  %v640_v52 = vld [vmem:[%s4672_s25 + $0x1e80] sm:$0xff]  ;;  %v642_v53 = vld [vmem:[%s4672_s25 + $0x1e88] sm:$0xff]  ;;  %639 = vst [vmem:[%s4680_s26 + $0x798] sm:$0xff] %v638_v51 }
  0x8c   : > { %641 = vst [vmem:[%s4680_s26 + $0x7a0] sm:$0xff] %v640_v52  ;;  %643 = vst [vmem:[%s4680_s26 + $0x7a8] sm:$0xff] %v642_v53  ;;  %v644_v54 = vld [vmem:[%s4672_s25 + $0x1ec0] sm:$0xff]  ;;  %v646_v55 = vld [vmem:[%s4672_s25 + $0x1ec8] sm:$0xff] }
  0x8d   : > { %v648_v56 = vld [vmem:[%s4672_s25 + $0x1f00] sm:$0xff]  ;;  %645 = vst [vmem:[%s4680_s26 + $0x7b0] sm:$0xff] %v644_v54  ;;  %647 = vst [vmem:[%s4680_s26 + $0x7b8] sm:$0xff] %v646_v55  ;;  %v650_v57 = vld [vmem:[%s4672_s25 + $0x1f08] sm:$0xff] }
  0x8e   : > { %649 = vst [vmem:[%s4680_s26 + $0x7c0] sm:$0xff] %v648_v56  ;;  %v652_v58 = vld [vmem:[%s4672_s25 + $0x1f40] sm:$0xff]  ;;  %v654_v59 = vld [vmem:[%s4672_s25 + $0x1f48] sm:$0xff]  ;;  %651 = vst [vmem:[%s4680_s26 + $0x7c8] sm:$0xff] %v650_v57 }
  0x8f   : > { %653 = vst [vmem:[%s4680_s26 + $0x7d0] sm:$0xff] %v652_v58  ;;  %655 = vst [vmem:[%s4680_s26 + $0x7d8] sm:$0xff] %v654_v59  ;;  %v656_v60 = vld [vmem:[%s4672_s25 + $0x1f80] sm:$0xff]  ;;  %v658_v61 = vld [vmem:[%s4672_s25 + $0x1f88] sm:$0xff] }
  0x90   : > { %v660_v62 = vld [vmem:[%s4672_s25 + $0x1fc0] sm:$0xff]  ;;  %657 = vst [vmem:[%s4680_s26 + $0x7e0] sm:$0xff] %v656_v60  ;;  %659 = vst [vmem:[%s4680_s26 + $0x7e8] sm:$0xff] %v658_v61  ;;  %v662_v63 = vld [vmem:[%s4672_s25 + $0x1fc8] sm:$0xff] }
  0x91   : > { %661 = vst [vmem:[%s4680_s26 + $0x7f0] sm:$0xff] %v660_v62  ;;  %v664_v0 = vld [vmem:[%s4672_s25 + $0x2000] sm:$0xff]  ;;  %v666_v1 = vld [vmem:[%s4672_s25 + $0x2008] sm:$0xff]  ;;  %663 = vst [vmem:[%s4680_s26 + $0x7f8] sm:$0xff] %v662_v63 }
  0x92   : > { %665 = vst [vmem:[%s4680_s26 + $0x800] sm:$0xff] %v664_v0  ;;  %667 = vst [vmem:[%s4680_s26 + $0x808] sm:$0xff] %v666_v1  ;;  %v668_v2 = vld [vmem:[%s4672_s25 + $0x2040] sm:$0xff]  ;;  %v670_v3 = vld [vmem:[%s4672_s25 + $0x2048] sm:$0xff] }
  0x93   : > { %v672_v4 = vld [vmem:[%s4672_s25 + $0x2080] sm:$0xff]  ;;  %669 = vst [vmem:[%s4680_s26 + $0x810] sm:$0xff] %v668_v2  ;;  %671 = vst [vmem:[%s4680_s26 + $0x818] sm:$0xff] %v670_v3  ;;  %v674_v5 = vld [vmem:[%s4672_s25 + $0x2088] sm:$0xff] }
  0x94   : > { %673 = vst [vmem:[%s4680_s26 + $0x820] sm:$0xff] %v672_v4  ;;  %v676_v6 = vld [vmem:[%s4672_s25 + $0x20c0] sm:$0xff]  ;;  %v678_v7 = vld [vmem:[%s4672_s25 + $0x20c8] sm:$0xff]  ;;  %675 = vst [vmem:[%s4680_s26 + $0x828] sm:$0xff] %v674_v5 }
  0x95   : > { %677 = vst [vmem:[%s4680_s26 + $0x830] sm:$0xff] %v676_v6  ;;  %679 = vst [vmem:[%s4680_s26 + $0x838] sm:$0xff] %v678_v7  ;;  %v680_v8 = vld [vmem:[%s4672_s25 + $0x2100] sm:$0xff]  ;;  %v682_v9 = vld [vmem:[%s4672_s25 + $0x2108] sm:$0xff] }
  0x96   : > { %v684_v10 = vld [vmem:[%s4672_s25 + $0x2140] sm:$0xff]  ;;  %681 = vst [vmem:[%s4680_s26 + $0x840] sm:$0xff] %v680_v8  ;;  %683 = vst [vmem:[%s4680_s26 + $0x848] sm:$0xff] %v682_v9  ;;  %v686_v11 = vld [vmem:[%s4672_s25 + $0x2148] sm:$0xff] }
  0x97   : > { %685 = vst [vmem:[%s4680_s26 + $0x850] sm:$0xff] %v684_v10  ;;  %v688_v12 = vld [vmem:[%s4672_s25 + $0x2180] sm:$0xff]  ;;  %v690_v13 = vld [vmem:[%s4672_s25 + $0x2188] sm:$0xff]  ;;  %687 = vst [vmem:[%s4680_s26 + $0x858] sm:$0xff] %v686_v11 }
  0x98   : > { %689 = vst [vmem:[%s4680_s26 + $0x860] sm:$0xff] %v688_v12  ;;  %691 = vst [vmem:[%s4680_s26 + $0x868] sm:$0xff] %v690_v13  ;;  %v692_v14 = vld [vmem:[%s4672_s25 + $0x21c0] sm:$0xff]  ;;  %v694_v15 = vld [vmem:[%s4672_s25 + $0x21c8] sm:$0xff] }
  0x99   : > { %v696_v16 = vld [vmem:[%s4672_s25 + $0x2200] sm:$0xff]  ;;  %693 = vst [vmem:[%s4680_s26 + $0x870] sm:$0xff] %v692_v14  ;;  %695 = vst [vmem:[%s4680_s26 + $0x878] sm:$0xff] %v694_v15  ;;  %v698_v17 = vld [vmem:[%s4672_s25 + $0x2208] sm:$0xff] }
  0x9a   : > { %697 = vst [vmem:[%s4680_s26 + $0x880] sm:$0xff] %v696_v16  ;;  %v700_v18 = vld [vmem:[%s4672_s25 + $0x2240] sm:$0xff]  ;;  %v702_v19 = vld [vmem:[%s4672_s25 + $0x2248] sm:$0xff]  ;;  %699 = vst [vmem:[%s4680_s26 + $0x888] sm:$0xff] %v698_v17 }
  0x9b   : > { %701 = vst [vmem:[%s4680_s26 + $0x890] sm:$0xff] %v700_v18  ;;  %703 = vst [vmem:[%s4680_s26 + $0x898] sm:$0xff] %v702_v19  ;;  %v704_v20 = vld [vmem:[%s4672_s25 + $0x2280] sm:$0xff]  ;;  %v706_v21 = vld [vmem:[%s4672_s25 + $0x2288] sm:$0xff] }
  0x9c   : > { %v708_v22 = vld [vmem:[%s4672_s25 + $0x22c0] sm:$0xff]  ;;  %705 = vst [vmem:[%s4680_s26 + $0x8a0] sm:$0xff] %v704_v20  ;;  %707 = vst [vmem:[%s4680_s26 + $0x8a8] sm:$0xff] %v706_v21  ;;  %v710_v23 = vld [vmem:[%s4672_s25 + $0x22c8] sm:$0xff] }
  0x9d   : > { %709 = vst [vmem:[%s4680_s26 + $0x8b0] sm:$0xff] %v708_v22  ;;  %v712_v24 = vld [vmem:[%s4672_s25 + $0x2300] sm:$0xff]  ;;  %v714_v25 = vld [vmem:[%s4672_s25 + $0x2308] sm:$0xff]  ;;  %711 = vst [vmem:[%s4680_s26 + $0x8b8] sm:$0xff] %v710_v23 }
  0x9e   : > { %713 = vst [vmem:[%s4680_s26 + $0x8c0] sm:$0xff] %v712_v24  ;;  %715 = vst [vmem:[%s4680_s26 + $0x8c8] sm:$0xff] %v714_v25  ;;  %v716_v26 = vld [vmem:[%s4672_s25 + $0x2340] sm:$0xff]  ;;  %v718_v27 = vld [vmem:[%s4672_s25 + $0x2348] sm:$0xff] }
  0x9f   : > { %v720_v28 = vld [vmem:[%s4672_s25 + $0x2380] sm:$0xff]  ;;  %717 = vst [vmem:[%s4680_s26 + $0x8d0] sm:$0xff] %v716_v26  ;;  %719 = vst [vmem:[%s4680_s26 + $0x8d8] sm:$0xff] %v718_v27  ;;  %v722_v29 = vld [vmem:[%s4672_s25 + $0x2388] sm:$0xff] }
  0xa0   : > { %721 = vst [vmem:[%s4680_s26 + $0x8e0] sm:$0xff] %v720_v28  ;;  %v724_v30 = vld [vmem:[%s4672_s25 + $0x23c0] sm:$0xff]  ;;  %v726_v31 = vld [vmem:[%s4672_s25 + $0x23c8] sm:$0xff]  ;;  %723 = vst [vmem:[%s4680_s26 + $0x8e8] sm:$0xff] %v722_v29 }
  0xa1   : > { %725 = vst [vmem:[%s4680_s26 + $0x8f0] sm:$0xff] %v724_v30  ;;  %727 = vst [vmem:[%s4680_s26 + $0x8f8] sm:$0xff] %v726_v31  ;;  %v728_v32 = vld [vmem:[%s4672_s25 + $0x2400] sm:$0xff]  ;;  %v730_v33 = vld [vmem:[%s4672_s25 + $0x2408] sm:$0xff] }
  0xa2   : > { %v732_v34 = vld [vmem:[%s4672_s25 + $0x2440] sm:$0xff]  ;;  %729 = vst [vmem:[%s4680_s26 + $0x900] sm:$0xff] %v728_v32  ;;  %731 = vst [vmem:[%s4680_s26 + $0x908] sm:$0xff] %v730_v33  ;;  %v734_v35 = vld [vmem:[%s4672_s25 + $0x2448] sm:$0xff] }
  0xa3   : > { %733 = vst [vmem:[%s4680_s26 + $0x910] sm:$0xff] %v732_v34  ;;  %v736_v36 = vld [vmem:[%s4672_s25 + $0x2480] sm:$0xff]  ;;  %v738_v37 = vld [vmem:[%s4672_s25 + $0x2488] sm:$0xff]  ;;  %735 = vst [vmem:[%s4680_s26 + $0x918] sm:$0xff] %v734_v35 }
  0xa4   : > { %737 = vst [vmem:[%s4680_s26 + $0x920] sm:$0xff] %v736_v36  ;;  %739 = vst [vmem:[%s4680_s26 + $0x928] sm:$0xff] %v738_v37  ;;  %v740_v38 = vld [vmem:[%s4672_s25 + $0x24c0] sm:$0xff]  ;;  %v742_v39 = vld [vmem:[%s4672_s25 + $0x24c8] sm:$0xff] }
  0xa5   : > { %v744_v40 = vld [vmem:[%s4672_s25 + $0x2500] sm:$0xff]  ;;  %741 = vst [vmem:[%s4680_s26 + $0x930] sm:$0xff] %v740_v38  ;;  %743 = vst [vmem:[%s4680_s26 + $0x938] sm:$0xff] %v742_v39  ;;  %v746_v41 = vld [vmem:[%s4672_s25 + $0x2508] sm:$0xff] }
  0xa6   : > { %745 = vst [vmem:[%s4680_s26 + $0x940] sm:$0xff] %v744_v40  ;;  %v748_v42 = vld [vmem:[%s4672_s25 + $0x2540] sm:$0xff]  ;;  %v750_v43 = vld [vmem:[%s4672_s25 + $0x2548] sm:$0xff]  ;;  %747 = vst [vmem:[%s4680_s26 + $0x948] sm:$0xff] %v746_v41 }
  0xa7   : > { %749 = vst [vmem:[%s4680_s26 + $0x950] sm:$0xff] %v748_v42  ;;  %751 = vst [vmem:[%s4680_s26 + $0x958] sm:$0xff] %v750_v43  ;;  %v752_v44 = vld [vmem:[%s4672_s25 + $0x2580] sm:$0xff]  ;;  %v754_v45 = vld [vmem:[%s4672_s25 + $0x2588] sm:$0xff] }
  0xa8   : > { %v756_v46 = vld [vmem:[%s4672_s25 + $0x25c0] sm:$0xff]  ;;  %753 = vst [vmem:[%s4680_s26 + $0x960] sm:$0xff] %v752_v44  ;;  %755 = vst [vmem:[%s4680_s26 + $0x968] sm:$0xff] %v754_v45  ;;  %v758_v47 = vld [vmem:[%s4672_s25 + $0x25c8] sm:$0xff] }
  0xa9   : > { %757 = vst [vmem:[%s4680_s26 + $0x970] sm:$0xff] %v756_v46  ;;  %v760_v48 = vld [vmem:[%s4672_s25 + $0x2600] sm:$0xff]  ;;  %v762_v49 = vld [vmem:[%s4672_s25 + $0x2608] sm:$0xff]  ;;  %759 = vst [vmem:[%s4680_s26 + $0x978] sm:$0xff] %v758_v47 }
  0xaa   : > { %761 = vst [vmem:[%s4680_s26 + $0x980] sm:$0xff] %v760_v48  ;;  %763 = vst [vmem:[%s4680_s26 + $0x988] sm:$0xff] %v762_v49  ;;  %v764_v50 = vld [vmem:[%s4672_s25 + $0x2640] sm:$0xff]  ;;  %v766_v51 = vld [vmem:[%s4672_s25 + $0x2648] sm:$0xff] }
  0xab   : > { %v768_v52 = vld [vmem:[%s4672_s25 + $0x2680] sm:$0xff]  ;;  %765 = vst [vmem:[%s4680_s26 + $0x990] sm:$0xff] %v764_v50  ;;  %767 = vst [vmem:[%s4680_s26 + $0x998] sm:$0xff] %v766_v51  ;;  %v770_v53 = vld [vmem:[%s4672_s25 + $0x2688] sm:$0xff] }
  0xac   : > { %769 = vst [vmem:[%s4680_s26 + $0x9a0] sm:$0xff] %v768_v52  ;;  %v772_v54 = vld [vmem:[%s4672_s25 + $0x26c0] sm:$0xff]  ;;  %v774_v55 = vld [vmem:[%s4672_s25 + $0x26c8] sm:$0xff]  ;;  %771 = vst [vmem:[%s4680_s26 + $0x9a8] sm:$0xff] %v770_v53 }
  0xad   : > { %773 = vst [vmem:[%s4680_s26 + $0x9b0] sm:$0xff] %v772_v54  ;;  %775 = vst [vmem:[%s4680_s26 + $0x9b8] sm:$0xff] %v774_v55  ;;  %v776_v56 = vld [vmem:[%s4672_s25 + $0x2700] sm:$0xff]  ;;  %v778_v57 = vld [vmem:[%s4672_s25 + $0x2708] sm:$0xff] }
  0xae   : > { %v780_v58 = vld [vmem:[%s4672_s25 + $0x2740] sm:$0xff]  ;;  %777 = vst [vmem:[%s4680_s26 + $0x9c0] sm:$0xff] %v776_v56  ;;  %779 = vst [vmem:[%s4680_s26 + $0x9c8] sm:$0xff] %v778_v57  ;;  %v782_v59 = vld [vmem:[%s4672_s25 + $0x2748] sm:$0xff] }
  0xaf   : > { %781 = vst [vmem:[%s4680_s26 + $0x9d0] sm:$0xff] %v780_v58  ;;  %v784_v60 = vld [vmem:[%s4672_s25 + $0x2780] sm:$0xff]  ;;  %v786_v61 = vld [vmem:[%s4672_s25 + $0x2788] sm:$0xff]  ;;  %783 = vst [vmem:[%s4680_s26 + $0x9d8] sm:$0xff] %v782_v59 }
  0xb0   : > { %785 = vst [vmem:[%s4680_s26 + $0x9e0] sm:$0xff] %v784_v60  ;;  %787 = vst [vmem:[%s4680_s26 + $0x9e8] sm:$0xff] %v786_v61  ;;  %v788_v62 = vld [vmem:[%s4672_s25 + $0x27c0] sm:$0xff]  ;;  %v790_v63 = vld [vmem:[%s4672_s25 + $0x27c8] sm:$0xff] }
  0xb1   : > { %v792_v0 = vld [vmem:[%s4672_s25 + $0x2800] sm:$0xff]  ;;  %789 = vst [vmem:[%s4680_s26 + $0x9f0] sm:$0xff] %v788_v62  ;;  %791 = vst [vmem:[%s4680_s26 + $0x9f8] sm:$0xff] %v790_v63  ;;  %v794_v1 = vld [vmem:[%s4672_s25 + $0x2808] sm:$0xff] }
  0xb2   : > { %793 = vst [vmem:[%s4680_s26 + $0xa00] sm:$0xff] %v792_v0  ;;  %v796_v2 = vld [vmem:[%s4672_s25 + $0x2840] sm:$0xff]  ;;  %v798_v3 = vld [vmem:[%s4672_s25 + $0x2848] sm:$0xff]  ;;  %795 = vst [vmem:[%s4680_s26 + $0xa08] sm:$0xff] %v794_v1 }
  0xb3   : > { %797 = vst [vmem:[%s4680_s26 + $0xa10] sm:$0xff] %v796_v2  ;;  %799 = vst [vmem:[%s4680_s26 + $0xa18] sm:$0xff] %v798_v3  ;;  %v800_v4 = vld [vmem:[%s4672_s25 + $0x2880] sm:$0xff]  ;;  %v802_v5 = vld [vmem:[%s4672_s25 + $0x2888] sm:$0xff] }
  0xb4   : > { %v804_v6 = vld [vmem:[%s4672_s25 + $0x28c0] sm:$0xff]  ;;  %801 = vst [vmem:[%s4680_s26 + $0xa20] sm:$0xff] %v800_v4  ;;  %803 = vst [vmem:[%s4680_s26 + $0xa28] sm:$0xff] %v802_v5  ;;  %v806_v7 = vld [vmem:[%s4672_s25 + $0x28c8] sm:$0xff] }
  0xb5   : > { %805 = vst [vmem:[%s4680_s26 + $0xa30] sm:$0xff] %v804_v6  ;;  %v808_v8 = vld [vmem:[%s4672_s25 + $0x2900] sm:$0xff]  ;;  %v810_v9 = vld [vmem:[%s4672_s25 + $0x2908] sm:$0xff]  ;;  %807 = vst [vmem:[%s4680_s26 + $0xa38] sm:$0xff] %v806_v7 }
  0xb6   : > { %809 = vst [vmem:[%s4680_s26 + $0xa40] sm:$0xff] %v808_v8  ;;  %811 = vst [vmem:[%s4680_s26 + $0xa48] sm:$0xff] %v810_v9  ;;  %v812_v10 = vld [vmem:[%s4672_s25 + $0x2940] sm:$0xff]  ;;  %v814_v11 = vld [vmem:[%s4672_s25 + $0x2948] sm:$0xff] }
  0xb7   : > { %v816_v12 = vld [vmem:[%s4672_s25 + $0x2980] sm:$0xff]  ;;  %813 = vst [vmem:[%s4680_s26 + $0xa50] sm:$0xff] %v812_v10  ;;  %815 = vst [vmem:[%s4680_s26 + $0xa58] sm:$0xff] %v814_v11  ;;  %v818_v13 = vld [vmem:[%s4672_s25 + $0x2988] sm:$0xff] }
  0xb8   : > { %817 = vst [vmem:[%s4680_s26 + $0xa60] sm:$0xff] %v816_v12  ;;  %v820_v14 = vld [vmem:[%s4672_s25 + $0x29c0] sm:$0xff]  ;;  %v822_v15 = vld [vmem:[%s4672_s25 + $0x29c8] sm:$0xff]  ;;  %819 = vst [vmem:[%s4680_s26 + $0xa68] sm:$0xff] %v818_v13 }
  0xb9   : > { %821 = vst [vmem:[%s4680_s26 + $0xa70] sm:$0xff] %v820_v14  ;;  %823 = vst [vmem:[%s4680_s26 + $0xa78] sm:$0xff] %v822_v15  ;;  %v824_v16 = vld [vmem:[%s4672_s25 + $0x2a00] sm:$0xff]  ;;  %v826_v17 = vld [vmem:[%s4672_s25 + $0x2a08] sm:$0xff] }
  0xba   : > { %v828_v18 = vld [vmem:[%s4672_s25 + $0x2a40] sm:$0xff]  ;;  %825 = vst [vmem:[%s4680_s26 + $0xa80] sm:$0xff] %v824_v16  ;;  %827 = vst [vmem:[%s4680_s26 + $0xa88] sm:$0xff] %v826_v17  ;;  %v830_v19 = vld [vmem:[%s4672_s25 + $0x2a48] sm:$0xff] }
  0xbb   : > { %829 = vst [vmem:[%s4680_s26 + $0xa90] sm:$0xff] %v828_v18  ;;  %v832_v20 = vld [vmem:[%s4672_s25 + $0x2a80] sm:$0xff]  ;;  %v834_v21 = vld [vmem:[%s4672_s25 + $0x2a88] sm:$0xff]  ;;  %831 = vst [vmem:[%s4680_s26 + $0xa98] sm:$0xff] %v830_v19 }
  0xbc   : > { %833 = vst [vmem:[%s4680_s26 + $0xaa0] sm:$0xff] %v832_v20  ;;  %835 = vst [vmem:[%s4680_s26 + $0xaa8] sm:$0xff] %v834_v21  ;;  %v836_v22 = vld [vmem:[%s4672_s25 + $0x2ac0] sm:$0xff]  ;;  %v838_v23 = vld [vmem:[%s4672_s25 + $0x2ac8] sm:$0xff] }
  0xbd   : > { %v840_v24 = vld [vmem:[%s4672_s25 + $0x2b00] sm:$0xff]  ;;  %837 = vst [vmem:[%s4680_s26 + $0xab0] sm:$0xff] %v836_v22  ;;  %839 = vst [vmem:[%s4680_s26 + $0xab8] sm:$0xff] %v838_v23  ;;  %v842_v25 = vld [vmem:[%s4672_s25 + $0x2b08] sm:$0xff] }
  0xbe   : > { %841 = vst [vmem:[%s4680_s26 + $0xac0] sm:$0xff] %v840_v24  ;;  %v844_v26 = vld [vmem:[%s4672_s25 + $0x2b40] sm:$0xff]  ;;  %v846_v27 = vld [vmem:[%s4672_s25 + $0x2b48] sm:$0xff]  ;;  %843 = vst [vmem:[%s4680_s26 + $0xac8] sm:$0xff] %v842_v25 }
  0xbf   : > { %845 = vst [vmem:[%s4680_s26 + $0xad0] sm:$0xff] %v844_v26  ;;  %847 = vst [vmem:[%s4680_s26 + $0xad8] sm:$0xff] %v846_v27  ;;  %v848_v28 = vld [vmem:[%s4672_s25 + $0x2b80] sm:$0xff]  ;;  %v850_v29 = vld [vmem:[%s4672_s25 + $0x2b88] sm:$0xff] }
  0xc0   : > { %v852_v30 = vld [vmem:[%s4672_s25 + $0x2bc0] sm:$0xff]  ;;  %849 = vst [vmem:[%s4680_s26 + $0xae0] sm:$0xff] %v848_v28  ;;  %851 = vst [vmem:[%s4680_s26 + $0xae8] sm:$0xff] %v850_v29  ;;  %v854_v31 = vld [vmem:[%s4672_s25 + $0x2bc8] sm:$0xff] }
  0xc1   : > { %853 = vst [vmem:[%s4680_s26 + $0xaf0] sm:$0xff] %v852_v30  ;;  %v856_v32 = vld [vmem:[%s4672_s25 + $0x2c00] sm:$0xff]  ;;  %v858_v33 = vld [vmem:[%s4672_s25 + $0x2c08] sm:$0xff]  ;;  %855 = vst [vmem:[%s4680_s26 + $0xaf8] sm:$0xff] %v854_v31 }
  0xc2   : > { %857 = vst [vmem:[%s4680_s26 + $0xb00] sm:$0xff] %v856_v32  ;;  %859 = vst [vmem:[%s4680_s26 + $0xb08] sm:$0xff] %v858_v33  ;;  %v860_v34 = vld [vmem:[%s4672_s25 + $0x2c40] sm:$0xff]  ;;  %v862_v35 = vld [vmem:[%s4672_s25 + $0x2c48] sm:$0xff] }
  0xc3   : > { %v864_v36 = vld [vmem:[%s4672_s25 + $0x2c80] sm:$0xff]  ;;  %861 = vst [vmem:[%s4680_s26 + $0xb10] sm:$0xff] %v860_v34  ;;  %863 = vst [vmem:[%s4680_s26 + $0xb18] sm:$0xff] %v862_v35  ;;  %v866_v37 = vld [vmem:[%s4672_s25 + $0x2c88] sm:$0xff] }
  0xc4   : > { %865 = vst [vmem:[%s4680_s26 + $0xb20] sm:$0xff] %v864_v36  ;;  %v868_v38 = vld [vmem:[%s4672_s25 + $0x2cc0] sm:$0xff]  ;;  %v870_v39 = vld [vmem:[%s4672_s25 + $0x2cc8] sm:$0xff]  ;;  %867 = vst [vmem:[%s4680_s26 + $0xb28] sm:$0xff] %v866_v37 }
  0xc5   : > { %869 = vst [vmem:[%s4680_s26 + $0xb30] sm:$0xff] %v868_v38  ;;  %871 = vst [vmem:[%s4680_s26 + $0xb38] sm:$0xff] %v870_v39  ;;  %v872_v40 = vld [vmem:[%s4672_s25 + $0x2d00] sm:$0xff]  ;;  %v874_v41 = vld [vmem:[%s4672_s25 + $0x2d08] sm:$0xff] }
  0xc6   : > { %v876_v42 = vld [vmem:[%s4672_s25 + $0x2d40] sm:$0xff]  ;;  %873 = vst [vmem:[%s4680_s26 + $0xb40] sm:$0xff] %v872_v40  ;;  %875 = vst [vmem:[%s4680_s26 + $0xb48] sm:$0xff] %v874_v41  ;;  %v878_v43 = vld [vmem:[%s4672_s25 + $0x2d48] sm:$0xff] }
  0xc7   : > { %877 = vst [vmem:[%s4680_s26 + $0xb50] sm:$0xff] %v876_v42  ;;  %v880_v44 = vld [vmem:[%s4672_s25 + $0x2d80] sm:$0xff]  ;;  %v882_v45 = vld [vmem:[%s4672_s25 + $0x2d88] sm:$0xff]  ;;  %879 = vst [vmem:[%s4680_s26 + $0xb58] sm:$0xff] %v878_v43 }
  0xc8   : > { %881 = vst [vmem:[%s4680_s26 + $0xb60] sm:$0xff] %v880_v44  ;;  %883 = vst [vmem:[%s4680_s26 + $0xb68] sm:$0xff] %v882_v45  ;;  %v884_v46 = vld [vmem:[%s4672_s25 + $0x2dc0] sm:$0xff]  ;;  %v886_v47 = vld [vmem:[%s4672_s25 + $0x2dc8] sm:$0xff] }
  0xc9   : > { %v888_v48 = vld [vmem:[%s4672_s25 + $0x2e00] sm:$0xff]  ;;  %885 = vst [vmem:[%s4680_s26 + $0xb70] sm:$0xff] %v884_v46  ;;  %887 = vst [vmem:[%s4680_s26 + $0xb78] sm:$0xff] %v886_v47  ;;  %v890_v49 = vld [vmem:[%s4672_s25 + $0x2e08] sm:$0xff] }
  0xca   : > { %889 = vst [vmem:[%s4680_s26 + $0xb80] sm:$0xff] %v888_v48  ;;  %v892_v50 = vld [vmem:[%s4672_s25 + $0x2e40] sm:$0xff]  ;;  %v894_v51 = vld [vmem:[%s4672_s25 + $0x2e48] sm:$0xff]  ;;  %891 = vst [vmem:[%s4680_s26 + $0xb88] sm:$0xff] %v890_v49 }
  0xcb   : > { %893 = vst [vmem:[%s4680_s26 + $0xb90] sm:$0xff] %v892_v50  ;;  %895 = vst [vmem:[%s4680_s26 + $0xb98] sm:$0xff] %v894_v51  ;;  %v896_v52 = vld [vmem:[%s4672_s25 + $0x2e80] sm:$0xff]  ;;  %v898_v53 = vld [vmem:[%s4672_s25 + $0x2e88] sm:$0xff] }
  0xcc   : > { %v900_v54 = vld [vmem:[%s4672_s25 + $0x2ec0] sm:$0xff]  ;;  %897 = vst [vmem:[%s4680_s26 + $0xba0] sm:$0xff] %v896_v52  ;;  %899 = vst [vmem:[%s4680_s26 + $0xba8] sm:$0xff] %v898_v53  ;;  %v902_v55 = vld [vmem:[%s4672_s25 + $0x2ec8] sm:$0xff] }
  0xcd   : > { %901 = vst [vmem:[%s4680_s26 + $0xbb0] sm:$0xff] %v900_v54  ;;  %v904_v56 = vld [vmem:[%s4672_s25 + $0x2f00] sm:$0xff]  ;;  %v906_v57 = vld [vmem:[%s4672_s25 + $0x2f08] sm:$0xff]  ;;  %903 = vst [vmem:[%s4680_s26 + $0xbb8] sm:$0xff] %v902_v55 }
  0xce   : > { %905 = vst [vmem:[%s4680_s26 + $0xbc0] sm:$0xff] %v904_v56  ;;  %907 = vst [vmem:[%s4680_s26 + $0xbc8] sm:$0xff] %v906_v57  ;;  %v908_v58 = vld [vmem:[%s4672_s25 + $0x2f40] sm:$0xff]  ;;  %v910_v59 = vld [vmem:[%s4672_s25 + $0x2f48] sm:$0xff] }
  0xcf   : > { %v912_v60 = vld [vmem:[%s4672_s25 + $0x2f80] sm:$0xff]  ;;  %909 = vst [vmem:[%s4680_s26 + $0xbd0] sm:$0xff] %v908_v58  ;;  %911 = vst [vmem:[%s4680_s26 + $0xbd8] sm:$0xff] %v910_v59  ;;  %v914_v61 = vld [vmem:[%s4672_s25 + $0x2f88] sm:$0xff] }
  0xd0   : > { %913 = vst [vmem:[%s4680_s26 + $0xbe0] sm:$0xff] %v912_v60  ;;  %v916_v62 = vld [vmem:[%s4672_s25 + $0x2fc0] sm:$0xff]  ;;  %v918_v63 = vld [vmem:[%s4672_s25 + $0x2fc8] sm:$0xff]  ;;  %915 = vst [vmem:[%s4680_s26 + $0xbe8] sm:$0xff] %v914_v61 }
  0xd1   : > { %917 = vst [vmem:[%s4680_s26 + $0xbf0] sm:$0xff] %v916_v62  ;;  %919 = vst [vmem:[%s4680_s26 + $0xbf8] sm:$0xff] %v918_v63  ;;  %v920_v0 = vld [vmem:[%s4672_s25 + $0x3000] sm:$0xff]  ;;  %v922_v1 = vld [vmem:[%s4672_s25 + $0x3008] sm:$0xff] }
  0xd2   : > { %v924_v2 = vld [vmem:[%s4672_s25 + $0x3040] sm:$0xff]  ;;  %921 = vst [vmem:[%s4680_s26 + $0xc00] sm:$0xff] %v920_v0  ;;  %923 = vst [vmem:[%s4680_s26 + $0xc08] sm:$0xff] %v922_v1  ;;  %v926_v3 = vld [vmem:[%s4672_s25 + $0x3048] sm:$0xff] }
  0xd3   : > { %925 = vst [vmem:[%s4680_s26 + $0xc10] sm:$0xff] %v924_v2  ;;  %v928_v4 = vld [vmem:[%s4672_s25 + $0x3080] sm:$0xff]  ;;  %v930_v5 = vld [vmem:[%s4672_s25 + $0x3088] sm:$0xff]  ;;  %927 = vst [vmem:[%s4680_s26 + $0xc18] sm:$0xff] %v926_v3 }
  0xd4   : > { %929 = vst [vmem:[%s4680_s26 + $0xc20] sm:$0xff] %v928_v4  ;;  %931 = vst [vmem:[%s4680_s26 + $0xc28] sm:$0xff] %v930_v5  ;;  %v932_v6 = vld [vmem:[%s4672_s25 + $0x30c0] sm:$0xff]  ;;  %v934_v7 = vld [vmem:[%s4672_s25 + $0x30c8] sm:$0xff] }
  0xd5   : > { %v936_v8 = vld [vmem:[%s4672_s25 + $0x3100] sm:$0xff]  ;;  %933 = vst [vmem:[%s4680_s26 + $0xc30] sm:$0xff] %v932_v6  ;;  %935 = vst [vmem:[%s4680_s26 + $0xc38] sm:$0xff] %v934_v7  ;;  %v938_v9 = vld [vmem:[%s4672_s25 + $0x3108] sm:$0xff] }
  0xd6   : > { %937 = vst [vmem:[%s4680_s26 + $0xc40] sm:$0xff] %v936_v8  ;;  %v940_v10 = vld [vmem:[%s4672_s25 + $0x3140] sm:$0xff]  ;;  %v942_v11 = vld [vmem:[%s4672_s25 + $0x3148] sm:$0xff]  ;;  %939 = vst [vmem:[%s4680_s26 + $0xc48] sm:$0xff] %v938_v9 }
  0xd7   : > { %941 = vst [vmem:[%s4680_s26 + $0xc50] sm:$0xff] %v940_v10  ;;  %943 = vst [vmem:[%s4680_s26 + $0xc58] sm:$0xff] %v942_v11  ;;  %v944_v12 = vld [vmem:[%s4672_s25 + $0x3180] sm:$0xff]  ;;  %v946_v13 = vld [vmem:[%s4672_s25 + $0x3188] sm:$0xff] }
  0xd8   : > { %v948_v14 = vld [vmem:[%s4672_s25 + $0x31c0] sm:$0xff]  ;;  %945 = vst [vmem:[%s4680_s26 + $0xc60] sm:$0xff] %v944_v12  ;;  %947 = vst [vmem:[%s4680_s26 + $0xc68] sm:$0xff] %v946_v13  ;;  %v950_v15 = vld [vmem:[%s4672_s25 + $0x31c8] sm:$0xff] }
  0xd9   : > { %949 = vst [vmem:[%s4680_s26 + $0xc70] sm:$0xff] %v948_v14  ;;  %v952_v16 = vld [vmem:[%s4672_s25 + $0x3200] sm:$0xff]  ;;  %v954_v17 = vld [vmem:[%s4672_s25 + $0x3208] sm:$0xff]  ;;  %951 = vst [vmem:[%s4680_s26 + $0xc78] sm:$0xff] %v950_v15 }
  0xda   : > { %953 = vst [vmem:[%s4680_s26 + $0xc80] sm:$0xff] %v952_v16  ;;  %955 = vst [vmem:[%s4680_s26 + $0xc88] sm:$0xff] %v954_v17  ;;  %v956_v18 = vld [vmem:[%s4672_s25 + $0x3240] sm:$0xff]  ;;  %v958_v19 = vld [vmem:[%s4672_s25 + $0x3248] sm:$0xff] }
  0xdb   : > { %v960_v20 = vld [vmem:[%s4672_s25 + $0x3280] sm:$0xff]  ;;  %957 = vst [vmem:[%s4680_s26 + $0xc90] sm:$0xff] %v956_v18  ;;  %959 = vst [vmem:[%s4680_s26 + $0xc98] sm:$0xff] %v958_v19  ;;  %v962_v21 = vld [vmem:[%s4672_s25 + $0x3288] sm:$0xff] }
  0xdc   : > { %961 = vst [vmem:[%s4680_s26 + $0xca0] sm:$0xff] %v960_v20  ;;  %v964_v22 = vld [vmem:[%s4672_s25 + $0x32c0] sm:$0xff]  ;;  %v966_v23 = vld [vmem:[%s4672_s25 + $0x32c8] sm:$0xff]  ;;  %963 = vst [vmem:[%s4680_s26 + $0xca8] sm:$0xff] %v962_v21 }
  0xdd   : > { %965 = vst [vmem:[%s4680_s26 + $0xcb0] sm:$0xff] %v964_v22  ;;  %967 = vst [vmem:[%s4680_s26 + $0xcb8] sm:$0xff] %v966_v23  ;;  %v968_v24 = vld [vmem:[%s4672_s25 + $0x3300] sm:$0xff]  ;;  %v970_v25 = vld [vmem:[%s4672_s25 + $0x3308] sm:$0xff] }
  0xde   : > { %v972_v26 = vld [vmem:[%s4672_s25 + $0x3340] sm:$0xff]  ;;  %969 = vst [vmem:[%s4680_s26 + $0xcc0] sm:$0xff] %v968_v24  ;;  %971 = vst [vmem:[%s4680_s26 + $0xcc8] sm:$0xff] %v970_v25  ;;  %v974_v27 = vld [vmem:[%s4672_s25 + $0x3348] sm:$0xff] }
  0xdf   : > { %973 = vst [vmem:[%s4680_s26 + $0xcd0] sm:$0xff] %v972_v26  ;;  %v976_v28 = vld [vmem:[%s4672_s25 + $0x3380] sm:$0xff]  ;;  %v978_v29 = vld [vmem:[%s4672_s25 + $0x3388] sm:$0xff]  ;;  %975 = vst [vmem:[%s4680_s26 + $0xcd8] sm:$0xff] %v974_v27 }
  0xe0   : > { %977 = vst [vmem:[%s4680_s26 + $0xce0] sm:$0xff] %v976_v28  ;;  %979 = vst [vmem:[%s4680_s26 + $0xce8] sm:$0xff] %v978_v29  ;;  %v980_v30 = vld [vmem:[%s4672_s25 + $0x33c0] sm:$0xff]  ;;  %v982_v31 = vld [vmem:[%s4672_s25 + $0x33c8] sm:$0xff] }
  0xe1   : > { %v984_v32 = vld [vmem:[%s4672_s25 + $0x3400] sm:$0xff]  ;;  %981 = vst [vmem:[%s4680_s26 + $0xcf0] sm:$0xff] %v980_v30  ;;  %983 = vst [vmem:[%s4680_s26 + $0xcf8] sm:$0xff] %v982_v31  ;;  %v986_v33 = vld [vmem:[%s4672_s25 + $0x3408] sm:$0xff] }
  0xe2   : > { %985 = vst [vmem:[%s4680_s26 + $0xd00] sm:$0xff] %v984_v32  ;;  %v988_v34 = vld [vmem:[%s4672_s25 + $0x3440] sm:$0xff]  ;;  %v990_v35 = vld [vmem:[%s4672_s25 + $0x3448] sm:$0xff]  ;;  %987 = vst [vmem:[%s4680_s26 + $0xd08] sm:$0xff] %v986_v33 }
  0xe3   : > { %989 = vst [vmem:[%s4680_s26 + $0xd10] sm:$0xff] %v988_v34  ;;  %991 = vst [vmem:[%s4680_s26 + $0xd18] sm:$0xff] %v990_v35  ;;  %v992_v36 = vld [vmem:[%s4672_s25 + $0x3480] sm:$0xff]  ;;  %v994_v37 = vld [vmem:[%s4672_s25 + $0x3488] sm:$0xff] }
  0xe4   : > { %v996_v38 = vld [vmem:[%s4672_s25 + $0x34c0] sm:$0xff]  ;;  %993 = vst [vmem:[%s4680_s26 + $0xd20] sm:$0xff] %v992_v36  ;;  %995 = vst [vmem:[%s4680_s26 + $0xd28] sm:$0xff] %v994_v37  ;;  %v998_v39 = vld [vmem:[%s4672_s25 + $0x34c8] sm:$0xff] }
  0xe5   : > { %997 = vst [vmem:[%s4680_s26 + $0xd30] sm:$0xff] %v996_v38  ;;  %v1000_v40 = vld [vmem:[%s4672_s25 + $0x3500] sm:$0xff]  ;;  %v1002_v41 = vld [vmem:[%s4672_s25 + $0x3508] sm:$0xff]  ;;  %999 = vst [vmem:[%s4680_s26 + $0xd38] sm:$0xff] %v998_v39 }
  0xe6   : > { %1001 = vst [vmem:[%s4680_s26 + $0xd40] sm:$0xff] %v1000_v40  ;;  %1003 = vst [vmem:[%s4680_s26 + $0xd48] sm:$0xff] %v1002_v41  ;;  %v1004_v42 = vld [vmem:[%s4672_s25 + $0x3540] sm:$0xff]  ;;  %v1006_v43 = vld [vmem:[%s4672_s25 + $0x3548] sm:$0xff] }
  0xe7   : > { %v1008_v44 = vld [vmem:[%s4672_s25 + $0x3580] sm:$0xff]  ;;  %1005 = vst [vmem:[%s4680_s26 + $0xd50] sm:$0xff] %v1004_v42  ;;  %1007 = vst [vmem:[%s4680_s26 + $0xd58] sm:$0xff] %v1006_v43  ;;  %v1010_v45 = vld [vmem:[%s4672_s25 + $0x3588] sm:$0xff] }
  0xe8   : > { %1009 = vst [vmem:[%s4680_s26 + $0xd60] sm:$0xff] %v1008_v44  ;;  %v1012_v46 = vld [vmem:[%s4672_s25 + $0x35c0] sm:$0xff]  ;;  %v1014_v47 = vld [vmem:[%s4672_s25 + $0x35c8] sm:$0xff]  ;;  %1011 = vst [vmem:[%s4680_s26 + $0xd68] sm:$0xff] %v1010_v45 }
  0xe9   : > { %1013 = vst [vmem:[%s4680_s26 + $0xd70] sm:$0xff] %v1012_v46  ;;  %1015 = vst [vmem:[%s4680_s26 + $0xd78] sm:$0xff] %v1014_v47  ;;  %v1016_v48 = vld [vmem:[%s4672_s25 + $0x3600] sm:$0xff]  ;;  %v1018_v49 = vld [vmem:[%s4672_s25 + $0x3608] sm:$0xff] }
  0xea   : > { %v1020_v50 = vld [vmem:[%s4672_s25 + $0x3640] sm:$0xff]  ;;  %1017 = vst [vmem:[%s4680_s26 + $0xd80] sm:$0xff] %v1016_v48  ;;  %1019 = vst [vmem:[%s4680_s26 + $0xd88] sm:$0xff] %v1018_v49  ;;  %v1022_v51 = vld [vmem:[%s4672_s25 + $0x3648] sm:$0xff] }
  0xeb   : > { %1021 = vst [vmem:[%s4680_s26 + $0xd90] sm:$0xff] %v1020_v50  ;;  %v1024_v52 = vld [vmem:[%s4672_s25 + $0x3680] sm:$0xff]  ;;  %v1026_v53 = vld [vmem:[%s4672_s25 + $0x3688] sm:$0xff]  ;;  %1023 = vst [vmem:[%s4680_s26 + $0xd98] sm:$0xff] %v1022_v51 }
  0xec   : > { %1025 = vst [vmem:[%s4680_s26 + $0xda0] sm:$0xff] %v1024_v52  ;;  %1027 = vst [vmem:[%s4680_s26 + $0xda8] sm:$0xff] %v1026_v53  ;;  %v1028_v54 = vld [vmem:[%s4672_s25 + $0x36c0] sm:$0xff]  ;;  %v1030_v55 = vld [vmem:[%s4672_s25 + $0x36c8] sm:$0xff] }
  0xed   : > { %v1032_v56 = vld [vmem:[%s4672_s25 + $0x3700] sm:$0xff]  ;;  %1029 = vst [vmem:[%s4680_s26 + $0xdb0] sm:$0xff] %v1028_v54  ;;  %1031 = vst [vmem:[%s4680_s26 + $0xdb8] sm:$0xff] %v1030_v55  ;;  %v1034_v57 = vld [vmem:[%s4672_s25 + $0x3708] sm:$0xff] }
  0xee   : > { %1033 = vst [vmem:[%s4680_s26 + $0xdc0] sm:$0xff] %v1032_v56  ;;  %v1036_v58 = vld [vmem:[%s4672_s25 + $0x3740] sm:$0xff]  ;;  %v1038_v59 = vld [vmem:[%s4672_s25 + $0x3748] sm:$0xff]  ;;  %1035 = vst [vmem:[%s4680_s26 + $0xdc8] sm:$0xff] %v1034_v57 }
  0xef   : > { %1037 = vst [vmem:[%s4680_s26 + $0xdd0] sm:$0xff] %v1036_v58  ;;  %1039 = vst [vmem:[%s4680_s26 + $0xdd8] sm:$0xff] %v1038_v59  ;;  %v1040_v60 = vld [vmem:[%s4672_s25 + $0x3780] sm:$0xff]  ;;  %v1042_v61 = vld [vmem:[%s4672_s25 + $0x3788] sm:$0xff] }
  0xf0   : > { %v1044_v62 = vld [vmem:[%s4672_s25 + $0x37c0] sm:$0xff]  ;;  %1041 = vst [vmem:[%s4680_s26 + $0xde0] sm:$0xff] %v1040_v60  ;;  %1043 = vst [vmem:[%s4680_s26 + $0xde8] sm:$0xff] %v1042_v61  ;;  %v1046_v63 = vld [vmem:[%s4672_s25 + $0x37c8] sm:$0xff] }
  0xf1   : > { %1045 = vst [vmem:[%s4680_s26 + $0xdf0] sm:$0xff] %v1044_v62  ;;  %v1048_v0 = vld [vmem:[%s4672_s25 + $0x3800] sm:$0xff]  ;;  %v1050_v1 = vld [vmem:[%s4672_s25 + $0x3808] sm:$0xff]  ;;  %1047 = vst [vmem:[%s4680_s26 + $0xdf8] sm:$0xff] %v1046_v63 }
  0xf2   : > { %1049 = vst [vmem:[%s4680_s26 + $0xe00] sm:$0xff] %v1048_v0  ;;  %1051 = vst [vmem:[%s4680_s26 + $0xe08] sm:$0xff] %v1050_v1  ;;  %v1052_v2 = vld [vmem:[%s4672_s25 + $0x3840] sm:$0xff]  ;;  %v1054_v3 = vld [vmem:[%s4672_s25 + $0x3848] sm:$0xff] }
  0xf3   : > { %v1056_v4 = vld [vmem:[%s4672_s25 + $0x3880] sm:$0xff]  ;;  %1053 = vst [vmem:[%s4680_s26 + $0xe10] sm:$0xff] %v1052_v2  ;;  %1055 = vst [vmem:[%s4680_s26 + $0xe18] sm:$0xff] %v1054_v3  ;;  %v1058_v5 = vld [vmem:[%s4672_s25 + $0x3888] sm:$0xff] }
  0xf4   : > { %1057 = vst [vmem:[%s4680_s26 + $0xe20] sm:$0xff] %v1056_v4  ;;  %v1060_v6 = vld [vmem:[%s4672_s25 + $0x38c0] sm:$0xff]  ;;  %v1062_v7 = vld [vmem:[%s4672_s25 + $0x38c8] sm:$0xff]  ;;  %1059 = vst [vmem:[%s4680_s26 + $0xe28] sm:$0xff] %v1058_v5 }
  0xf5   : > { %1061 = vst [vmem:[%s4680_s26 + $0xe30] sm:$0xff] %v1060_v6  ;;  %1063 = vst [vmem:[%s4680_s26 + $0xe38] sm:$0xff] %v1062_v7  ;;  %v1064_v8 = vld [vmem:[%s4672_s25 + $0x3900] sm:$0xff]  ;;  %v1066_v9 = vld [vmem:[%s4672_s25 + $0x3908] sm:$0xff] }
  0xf6   : > { %v1068_v10 = vld [vmem:[%s4672_s25 + $0x3940] sm:$0xff]  ;;  %1065 = vst [vmem:[%s4680_s26 + $0xe40] sm:$0xff] %v1064_v8  ;;  %1067 = vst [vmem:[%s4680_s26 + $0xe48] sm:$0xff] %v1066_v9  ;;  %v1070_v11 = vld [vmem:[%s4672_s25 + $0x3948] sm:$0xff] }
  0xf7   : > { %1069 = vst [vmem:[%s4680_s26 + $0xe50] sm:$0xff] %v1068_v10  ;;  %v1072_v12 = vld [vmem:[%s4672_s25 + $0x3980] sm:$0xff]  ;;  %v1074_v13 = vld [vmem:[%s4672_s25 + $0x3988] sm:$0xff]  ;;  %1071 = vst [vmem:[%s4680_s26 + $0xe58] sm:$0xff] %v1070_v11 }
  0xf8   : > { %1073 = vst [vmem:[%s4680_s26 + $0xe60] sm:$0xff] %v1072_v12  ;;  %1075 = vst [vmem:[%s4680_s26 + $0xe68] sm:$0xff] %v1074_v13  ;;  %v1076_v14 = vld [vmem:[%s4672_s25 + $0x39c0] sm:$0xff]  ;;  %v1078_v15 = vld [vmem:[%s4672_s25 + $0x39c8] sm:$0xff] }
  0xf9   : > { %v1080_v16 = vld [vmem:[%s4672_s25 + $0x3a00] sm:$0xff]  ;;  %1077 = vst [vmem:[%s4680_s26 + $0xe70] sm:$0xff] %v1076_v14  ;;  %1079 = vst [vmem:[%s4680_s26 + $0xe78] sm:$0xff] %v1078_v15  ;;  %v1082_v17 = vld [vmem:[%s4672_s25 + $0x3a08] sm:$0xff] }
  0xfa   : > { %1081 = vst [vmem:[%s4680_s26 + $0xe80] sm:$0xff] %v1080_v16  ;;  %v1084_v18 = vld [vmem:[%s4672_s25 + $0x3a40] sm:$0xff]  ;;  %v1086_v19 = vld [vmem:[%s4672_s25 + $0x3a48] sm:$0xff]  ;;  %1083 = vst [vmem:[%s4680_s26 + $0xe88] sm:$0xff] %v1082_v17 }
  0xfb   : > { %1085 = vst [vmem:[%s4680_s26 + $0xe90] sm:$0xff] %v1084_v18  ;;  %1087 = vst [vmem:[%s4680_s26 + $0xe98] sm:$0xff] %v1086_v19  ;;  %v1088_v20 = vld [vmem:[%s4672_s25 + $0x3a80] sm:$0xff]  ;;  %v1090_v21 = vld [vmem:[%s4672_s25 + $0x3a88] sm:$0xff] }
  0xfc   : > { %v1092_v22 = vld [vmem:[%s4672_s25 + $0x3ac0] sm:$0xff]  ;;  %1089 = vst [vmem:[%s4680_s26 + $0xea0] sm:$0xff] %v1088_v20  ;;  %1091 = vst [vmem:[%s4680_s26 + $0xea8] sm:$0xff] %v1090_v21  ;;  %v1094_v23 = vld [vmem:[%s4672_s25 + $0x3ac8] sm:$0xff] }
  0xfd   : > { %1093 = vst [vmem:[%s4680_s26 + $0xeb0] sm:$0xff] %v1092_v22  ;;  %v1096_v24 = vld [vmem:[%s4672_s25 + $0x3b00] sm:$0xff]  ;;  %v1098_v25 = vld [vmem:[%s4672_s25 + $0x3b08] sm:$0xff]  ;;  %1095 = vst [vmem:[%s4680_s26 + $0xeb8] sm:$0xff] %v1094_v23 }
  0xfe   : > { %1097 = vst [vmem:[%s4680_s26 + $0xec0] sm:$0xff] %v1096_v24  ;;  %1099 = vst [vmem:[%s4680_s26 + $0xec8] sm:$0xff] %v1098_v25  ;;  %v1100_v26 = vld [vmem:[%s4672_s25 + $0x3b40] sm:$0xff]  ;;  %v1102_v27 = vld [vmem:[%s4672_s25 + $0x3b48] sm:$0xff] }
  0xff   : > { %v1104_v28 = vld [vmem:[%s4672_s25 + $0x3b80] sm:$0xff]  ;;  %1101 = vst [vmem:[%s4680_s26 + $0xed0] sm:$0xff] %v1100_v26  ;;  %1103 = vst [vmem:[%s4680_s26 + $0xed8] sm:$0xff] %v1102_v27  ;;  %v1106_v29 = vld [vmem:[%s4672_s25 + $0x3b88] sm:$0xff] }
 0x100   : > { %1105 = vst [vmem:[%s4680_s26 + $0xee0] sm:$0xff] %v1104_v28  ;;  %v1108_v30 = vld [vmem:[%s4672_s25 + $0x3bc0] sm:$0xff]  ;;  %v1110_v31 = vld [vmem:[%s4672_s25 + $0x3bc8] sm:$0xff]  ;;  %1107 = vst [vmem:[%s4680_s26 + $0xee8] sm:$0xff] %v1106_v29 }
 0x101   : > { %1109 = vst [vmem:[%s4680_s26 + $0xef0] sm:$0xff] %v1108_v30  ;;  %1111 = vst [vmem:[%s4680_s26 + $0xef8] sm:$0xff] %v1110_v31  ;;  %v1112_v32 = vld [vmem:[%s4672_s25 + $0x3c00] sm:$0xff]  ;;  %v1114_v33 = vld [vmem:[%s4672_s25 + $0x3c08] sm:$0xff] }
 0x102   : > { %v1116_v34 = vld [vmem:[%s4672_s25 + $0x3c40] sm:$0xff]  ;;  %1113 = vst [vmem:[%s4680_s26 + $0xf00] sm:$0xff] %v1112_v32  ;;  %1115 = vst [vmem:[%s4680_s26 + $0xf08] sm:$0xff] %v1114_v33  ;;  %v1118_v35 = vld [vmem:[%s4672_s25 + $0x3c48] sm:$0xff] }
 0x103   : > { %1117 = vst [vmem:[%s4680_s26 + $0xf10] sm:$0xff] %v1116_v34  ;;  %v1120_v36 = vld [vmem:[%s4672_s25 + $0x3c80] sm:$0xff]  ;;  %v1122_v37 = vld [vmem:[%s4672_s25 + $0x3c88] sm:$0xff]  ;;  %1119 = vst [vmem:[%s4680_s26 + $0xf18] sm:$0xff] %v1118_v35 }
 0x104   : > { %1121 = vst [vmem:[%s4680_s26 + $0xf20] sm:$0xff] %v1120_v36  ;;  %1123 = vst [vmem:[%s4680_s26 + $0xf28] sm:$0xff] %v1122_v37  ;;  %v1124_v38 = vld [vmem:[%s4672_s25 + $0x3cc0] sm:$0xff]  ;;  %v1126_v39 = vld [vmem:[%s4672_s25 + $0x3cc8] sm:$0xff] }
 0x105   : > { %v1128_v40 = vld [vmem:[%s4672_s25 + $0x3d00] sm:$0xff]  ;;  %1125 = vst [vmem:[%s4680_s26 + $0xf30] sm:$0xff] %v1124_v38  ;;  %1127 = vst [vmem:[%s4680_s26 + $0xf38] sm:$0xff] %v1126_v39  ;;  %v1130_v41 = vld [vmem:[%s4672_s25 + $0x3d08] sm:$0xff] }
 0x106   : > { %1129 = vst [vmem:[%s4680_s26 + $0xf40] sm:$0xff] %v1128_v40  ;;  %v1132_v42 = vld [vmem:[%s4672_s25 + $0x3d40] sm:$0xff]  ;;  %v1134_v43 = vld [vmem:[%s4672_s25 + $0x3d48] sm:$0xff]  ;;  %1131 = vst [vmem:[%s4680_s26 + $0xf48] sm:$0xff] %v1130_v41 }
 0x107   : > { %1133 = vst [vmem:[%s4680_s26 + $0xf50] sm:$0xff] %v1132_v42  ;;  %1135 = vst [vmem:[%s4680_s26 + $0xf58] sm:$0xff] %v1134_v43  ;;  %v1136_v44 = vld [vmem:[%s4672_s25 + $0x3d80] sm:$0xff]  ;;  %v1138_v45 = vld [vmem:[%s4672_s25 + $0x3d88] sm:$0xff] }
 0x108   : > { %v1140_v46 = vld [vmem:[%s4672_s25 + $0x3dc0] sm:$0xff]  ;;  %1137 = vst [vmem:[%s4680_s26 + $0xf60] sm:$0xff] %v1136_v44  ;;  %1139 = vst [vmem:[%s4680_s26 + $0xf68] sm:$0xff] %v1138_v45  ;;  %v1142_v47 = vld [vmem:[%s4672_s25 + $0x3dc8] sm:$0xff] }
 0x109   : > { %1141 = vst [vmem:[%s4680_s26 + $0xf70] sm:$0xff] %v1140_v46  ;;  %v1144_v48 = vld [vmem:[%s4672_s25 + $0x3e00] sm:$0xff]  ;;  %v1146_v49 = vld [vmem:[%s4672_s25 + $0x3e08] sm:$0xff]  ;;  %1143 = vst [vmem:[%s4680_s26 + $0xf78] sm:$0xff] %v1142_v47 }
 0x10a   : > { %1145 = vst [vmem:[%s4680_s26 + $0xf80] sm:$0xff] %v1144_v48  ;;  %1147 = vst [vmem:[%s4680_s26 + $0xf88] sm:$0xff] %v1146_v49  ;;  %v1148_v50 = vld [vmem:[%s4672_s25 + $0x3e40] sm:$0xff]  ;;  %v1150_v51 = vld [vmem:[%s4672_s25 + $0x3e48] sm:$0xff] }
 0x10b   : > { %v1152_v52 = vld [vmem:[%s4672_s25 + $0x3e80] sm:$0xff]  ;;  %1149 = vst [vmem:[%s4680_s26 + $0xf90] sm:$0xff] %v1148_v50  ;;  %1151 = vst [vmem:[%s4680_s26 + $0xf98] sm:$0xff] %v1150_v51  ;;  %v1154_v53 = vld [vmem:[%s4672_s25 + $0x3e88] sm:$0xff] }
 0x10c   : > { %1153 = vst [vmem:[%s4680_s26 + $0xfa0] sm:$0xff] %v1152_v52  ;;  %v1156_v54 = vld [vmem:[%s4672_s25 + $0x3ec0] sm:$0xff]  ;;  %v1158_v55 = vld [vmem:[%s4672_s25 + $0x3ec8] sm:$0xff]  ;;  %1155 = vst [vmem:[%s4680_s26 + $0xfa8] sm:$0xff] %v1154_v53 }
 0x10d   : > { %1157 = vst [vmem:[%s4680_s26 + $0xfb0] sm:$0xff] %v1156_v54  ;;  %1159 = vst [vmem:[%s4680_s26 + $0xfb8] sm:$0xff] %v1158_v55  ;;  %v1160_v56 = vld [vmem:[%s4672_s25 + $0x3f00] sm:$0xff]  ;;  %v1162_v57 = vld [vmem:[%s4672_s25 + $0x3f08] sm:$0xff] }
 0x10e   : > { %v1164_v58 = vld [vmem:[%s4672_s25 + $0x3f40] sm:$0xff]  ;;  %1161 = vst [vmem:[%s4680_s26 + $0xfc0] sm:$0xff] %v1160_v56  ;;  %1163 = vst [vmem:[%s4680_s26 + $0xfc8] sm:$0xff] %v1162_v57  ;;  %v1166_v59 = vld [vmem:[%s4672_s25 + $0x3f48] sm:$0xff] }
 0x10f   : > { %1165 = vst [vmem:[%s4680_s26 + $0xfd0] sm:$0xff] %v1164_v58  ;;  %v1168_v60 = vld [vmem:[%s4672_s25 + $0x3f80] sm:$0xff]  ;;  %v1170_v61 = vld [vmem:[%s4672_s25 + $0x3f88] sm:$0xff]  ;;  %1167 = vst [vmem:[%s4680_s26 + $0xfd8] sm:$0xff] %v1166_v59 }
 0x110   : > { %1169 = vst [vmem:[%s4680_s26 + $0xfe0] sm:$0xff] %v1168_v60  ;;  %1171 = vst [vmem:[%s4680_s26 + $0xfe8] sm:$0xff] %v1170_v61  ;;  %v1172_v62 = vld [vmem:[%s4672_s25 + $0x3fc0] sm:$0xff]  ;;  %v1174_v63 = vld [vmem:[%s4672_s25 + $0x3fc8] sm:$0xff] }
 0x111   : > { %v1176_v0 = vld [vmem:[%s4672_s25 + $0x4000] sm:$0xff]  ;;  %1173 = vst [vmem:[%s4680_s26 + $0xff0] sm:$0xff] %v1172_v62  ;;  %1175 = vst [vmem:[%s4680_s26 + $0xff8] sm:$0xff] %v1174_v63  ;;  %v1178_v1 = vld [vmem:[%s4672_s25 + $0x4008] sm:$0xff] }
 0x112   : > { %1177 = vst [vmem:[%s4680_s26 + $0x1000] sm:$0xff] %v1176_v0  ;;  %v1180_v2 = vld [vmem:[%s4672_s25 + $0x4040] sm:$0xff]  ;;  %v1182_v3 = vld [vmem:[%s4672_s25 + $0x4048] sm:$0xff]  ;;  %1179 = vst [vmem:[%s4680_s26 + $0x1008] sm:$0xff] %v1178_v1 }
 0x113   : > { %1181 = vst [vmem:[%s4680_s26 + $0x1010] sm:$0xff] %v1180_v2  ;;  %1183 = vst [vmem:[%s4680_s26 + $0x1018] sm:$0xff] %v1182_v3  ;;  %v1184_v4 = vld [vmem:[%s4672_s25 + $0x4080] sm:$0xff]  ;;  %v1186_v5 = vld [vmem:[%s4672_s25 + $0x4088] sm:$0xff] }
 0x114   : > { %v1188_v6 = vld [vmem:[%s4672_s25 + $0x40c0] sm:$0xff]  ;;  %1185 = vst [vmem:[%s4680_s26 + $0x1020] sm:$0xff] %v1184_v4  ;;  %1187 = vst [vmem:[%s4680_s26 + $0x1028] sm:$0xff] %v1186_v5  ;;  %v1190_v7 = vld [vmem:[%s4672_s25 + $0x40c8] sm:$0xff] }
 0x115   : > { %1189 = vst [vmem:[%s4680_s26 + $0x1030] sm:$0xff] %v1188_v6  ;;  %v1192_v8 = vld [vmem:[%s4672_s25 + $0x4100] sm:$0xff]  ;;  %v1194_v9 = vld [vmem:[%s4672_s25 + $0x4108] sm:$0xff]  ;;  %1191 = vst [vmem:[%s4680_s26 + $0x1038] sm:$0xff] %v1190_v7 }
 0x116   : > { %1193 = vst [vmem:[%s4680_s26 + $0x1040] sm:$0xff] %v1192_v8  ;;  %1195 = vst [vmem:[%s4680_s26 + $0x1048] sm:$0xff] %v1194_v9  ;;  %v1196_v10 = vld [vmem:[%s4672_s25 + $0x4140] sm:$0xff]  ;;  %v1198_v11 = vld [vmem:[%s4672_s25 + $0x4148] sm:$0xff] }
 0x117   : > { %v1200_v12 = vld [vmem:[%s4672_s25 + $0x4180] sm:$0xff]  ;;  %1197 = vst [vmem:[%s4680_s26 + $0x1050] sm:$0xff] %v1196_v10  ;;  %1199 = vst [vmem:[%s4680_s26 + $0x1058] sm:$0xff] %v1198_v11  ;;  %v1202_v13 = vld [vmem:[%s4672_s25 + $0x4188] sm:$0xff] }
 0x118   : > { %1201 = vst [vmem:[%s4680_s26 + $0x1060] sm:$0xff] %v1200_v12  ;;  %v1204_v14 = vld [vmem:[%s4672_s25 + $0x41c0] sm:$0xff]  ;;  %v1206_v15 = vld [vmem:[%s4672_s25 + $0x41c8] sm:$0xff]  ;;  %1203 = vst [vmem:[%s4680_s26 + $0x1068] sm:$0xff] %v1202_v13 }
 0x119   : > { %1205 = vst [vmem:[%s4680_s26 + $0x1070] sm:$0xff] %v1204_v14  ;;  %1207 = vst [vmem:[%s4680_s26 + $0x1078] sm:$0xff] %v1206_v15  ;;  %v1208_v16 = vld [vmem:[%s4672_s25 + $0x4200] sm:$0xff]  ;;  %v1210_v17 = vld [vmem:[%s4672_s25 + $0x4208] sm:$0xff] }
 0x11a   : > { %v1212_v18 = vld [vmem:[%s4672_s25 + $0x4240] sm:$0xff]  ;;  %1209 = vst [vmem:[%s4680_s26 + $0x1080] sm:$0xff] %v1208_v16  ;;  %1211 = vst [vmem:[%s4680_s26 + $0x1088] sm:$0xff] %v1210_v17  ;;  %v1214_v19 = vld [vmem:[%s4672_s25 + $0x4248] sm:$0xff] }
 0x11b   : > { %1213 = vst [vmem:[%s4680_s26 + $0x1090] sm:$0xff] %v1212_v18  ;;  %v1216_v20 = vld [vmem:[%s4672_s25 + $0x4280] sm:$0xff]  ;;  %v1218_v21 = vld [vmem:[%s4672_s25 + $0x4288] sm:$0xff]  ;;  %1215 = vst [vmem:[%s4680_s26 + $0x1098] sm:$0xff] %v1214_v19 }
 0x11c   : > { %1217 = vst [vmem:[%s4680_s26 + $0x10a0] sm:$0xff] %v1216_v20  ;;  %1219 = vst [vmem:[%s4680_s26 + $0x10a8] sm:$0xff] %v1218_v21  ;;  %v1220_v22 = vld [vmem:[%s4672_s25 + $0x42c0] sm:$0xff]  ;;  %v1222_v23 = vld [vmem:[%s4672_s25 + $0x42c8] sm:$0xff] }
 0x11d   : > { %v1224_v24 = vld [vmem:[%s4672_s25 + $0x4300] sm:$0xff]  ;;  %1221 = vst [vmem:[%s4680_s26 + $0x10b0] sm:$0xff] %v1220_v22  ;;  %1223 = vst [vmem:[%s4680_s26 + $0x10b8] sm:$0xff] %v1222_v23  ;;  %v1226_v25 = vld [vmem:[%s4672_s25 + $0x4308] sm:$0xff] }
 0x11e   : > { %1225 = vst [vmem:[%s4680_s26 + $0x10c0] sm:$0xff] %v1224_v24  ;;  %v1228_v26 = vld [vmem:[%s4672_s25 + $0x4340] sm:$0xff]  ;;  %v1230_v27 = vld [vmem:[%s4672_s25 + $0x4348] sm:$0xff]  ;;  %1227 = vst [vmem:[%s4680_s26 + $0x10c8] sm:$0xff] %v1226_v25 }
 0x11f   : > { %1229 = vst [vmem:[%s4680_s26 + $0x10d0] sm:$0xff] %v1228_v26  ;;  %1231 = vst [vmem:[%s4680_s26 + $0x10d8] sm:$0xff] %v1230_v27  ;;  %v1232_v28 = vld [vmem:[%s4672_s25 + $0x4380] sm:$0xff]  ;;  %v1234_v29 = vld [vmem:[%s4672_s25 + $0x4388] sm:$0xff] }
 0x120   : > { %v1236_v30 = vld [vmem:[%s4672_s25 + $0x43c0] sm:$0xff]  ;;  %1233 = vst [vmem:[%s4680_s26 + $0x10e0] sm:$0xff] %v1232_v28  ;;  %1235 = vst [vmem:[%s4680_s26 + $0x10e8] sm:$0xff] %v1234_v29  ;;  %v1238_v31 = vld [vmem:[%s4672_s25 + $0x43c8] sm:$0xff] }
 0x121   : > { %1237 = vst [vmem:[%s4680_s26 + $0x10f0] sm:$0xff] %v1236_v30  ;;  %v1240_v32 = vld [vmem:[%s4672_s25 + $0x4400] sm:$0xff]  ;;  %v1242_v33 = vld [vmem:[%s4672_s25 + $0x4408] sm:$0xff]  ;;  %1239 = vst [vmem:[%s4680_s26 + $0x10f8] sm:$0xff] %v1238_v31 }
 0x122   : > { %1241 = vst [vmem:[%s4680_s26 + $0x1100] sm:$0xff] %v1240_v32  ;;  %1243 = vst [vmem:[%s4680_s26 + $0x1108] sm:$0xff] %v1242_v33  ;;  %v1244_v34 = vld [vmem:[%s4672_s25 + $0x4440] sm:$0xff]  ;;  %v1246_v35 = vld [vmem:[%s4672_s25 + $0x4448] sm:$0xff] }
 0x123   : > { %v1248_v36 = vld [vmem:[%s4672_s25 + $0x4480] sm:$0xff]  ;;  %1245 = vst [vmem:[%s4680_s26 + $0x1110] sm:$0xff] %v1244_v34  ;;  %1247 = vst [vmem:[%s4680_s26 + $0x1118] sm:$0xff] %v1246_v35  ;;  %v1250_v37 = vld [vmem:[%s4672_s25 + $0x4488] sm:$0xff] }
 0x124   : > { %1249 = vst [vmem:[%s4680_s26 + $0x1120] sm:$0xff] %v1248_v36  ;;  %v1252_v38 = vld [vmem:[%s4672_s25 + $0x44c0] sm:$0xff]  ;;  %v1254_v39 = vld [vmem:[%s4672_s25 + $0x44c8] sm:$0xff]  ;;  %1251 = vst [vmem:[%s4680_s26 + $0x1128] sm:$0xff] %v1250_v37 }
 0x125   : > { %1253 = vst [vmem:[%s4680_s26 + $0x1130] sm:$0xff] %v1252_v38  ;;  %1255 = vst [vmem:[%s4680_s26 + $0x1138] sm:$0xff] %v1254_v39  ;;  %v1256_v40 = vld [vmem:[%s4672_s25 + $0x4500] sm:$0xff]  ;;  %v1258_v41 = vld [vmem:[%s4672_s25 + $0x4508] sm:$0xff] }
 0x126   : > { %v1260_v42 = vld [vmem:[%s4672_s25 + $0x4540] sm:$0xff]  ;;  %1257 = vst [vmem:[%s4680_s26 + $0x1140] sm:$0xff] %v1256_v40  ;;  %1259 = vst [vmem:[%s4680_s26 + $0x1148] sm:$0xff] %v1258_v41  ;;  %v1262_v43 = vld [vmem:[%s4672_s25 + $0x4548] sm:$0xff] }
 0x127   : > { %1261 = vst [vmem:[%s4680_s26 + $0x1150] sm:$0xff] %v1260_v42  ;;  %v1264_v44 = vld [vmem:[%s4672_s25 + $0x4580] sm:$0xff]  ;;  %v1266_v45 = vld [vmem:[%s4672_s25 + $0x4588] sm:$0xff]  ;;  %1263 = vst [vmem:[%s4680_s26 + $0x1158] sm:$0xff] %v1262_v43 }
 0x128   : > { %1265 = vst [vmem:[%s4680_s26 + $0x1160] sm:$0xff] %v1264_v44  ;;  %1267 = vst [vmem:[%s4680_s26 + $0x1168] sm:$0xff] %v1266_v45  ;;  %v1268_v46 = vld [vmem:[%s4672_s25 + $0x45c0] sm:$0xff]  ;;  %v1270_v47 = vld [vmem:[%s4672_s25 + $0x45c8] sm:$0xff] }
 0x129   : > { %v1272_v48 = vld [vmem:[%s4672_s25 + $0x4600] sm:$0xff]  ;;  %1269 = vst [vmem:[%s4680_s26 + $0x1170] sm:$0xff] %v1268_v46  ;;  %1271 = vst [vmem:[%s4680_s26 + $0x1178] sm:$0xff] %v1270_v47  ;;  %v1274_v49 = vld [vmem:[%s4672_s25 + $0x4608] sm:$0xff] }
 0x12a   : > { %1273 = vst [vmem:[%s4680_s26 + $0x1180] sm:$0xff] %v1272_v48  ;;  %v1276_v50 = vld [vmem:[%s4672_s25 + $0x4640] sm:$0xff]  ;;  %v1278_v51 = vld [vmem:[%s4672_s25 + $0x4648] sm:$0xff]  ;;  %1275 = vst [vmem:[%s4680_s26 + $0x1188] sm:$0xff] %v1274_v49 }
 0x12b   : > { %1277 = vst [vmem:[%s4680_s26 + $0x1190] sm:$0xff] %v1276_v50  ;;  %1279 = vst [vmem:[%s4680_s26 + $0x1198] sm:$0xff] %v1278_v51  ;;  %v1280_v52 = vld [vmem:[%s4672_s25 + $0x4680] sm:$0xff]  ;;  %v1282_v53 = vld [vmem:[%s4672_s25 + $0x4688] sm:$0xff] }
 0x12c   : > { %v1284_v54 = vld [vmem:[%s4672_s25 + $0x46c0] sm:$0xff]  ;;  %1281 = vst [vmem:[%s4680_s26 + $0x11a0] sm:$0xff] %v1280_v52  ;;  %1283 = vst [vmem:[%s4680_s26 + $0x11a8] sm:$0xff] %v1282_v53  ;;  %v1286_v55 = vld [vmem:[%s4672_s25 + $0x46c8] sm:$0xff] }
 0x12d   : > { %1285 = vst [vmem:[%s4680_s26 + $0x11b0] sm:$0xff] %v1284_v54  ;;  %v1288_v56 = vld [vmem:[%s4672_s25 + $0x4700] sm:$0xff]  ;;  %v1290_v57 = vld [vmem:[%s4672_s25 + $0x4708] sm:$0xff]  ;;  %1287 = vst [vmem:[%s4680_s26 + $0x11b8] sm:$0xff] %v1286_v55 }
 0x12e   : > { %1289 = vst [vmem:[%s4680_s26 + $0x11c0] sm:$0xff] %v1288_v56  ;;  %1291 = vst [vmem:[%s4680_s26 + $0x11c8] sm:$0xff] %v1290_v57  ;;  %v1292_v58 = vld [vmem:[%s4672_s25 + $0x4740] sm:$0xff]  ;;  %v1294_v59 = vld [vmem:[%s4672_s25 + $0x4748] sm:$0xff] }
 0x12f   : > { %v1296_v60 = vld [vmem:[%s4672_s25 + $0x4780] sm:$0xff]  ;;  %1293 = vst [vmem:[%s4680_s26 + $0x11d0] sm:$0xff] %v1292_v58  ;;  %1295 = vst [vmem:[%s4680_s26 + $0x11d8] sm:$0xff] %v1294_v59  ;;  %v1298_v61 = vld [vmem:[%s4672_s25 + $0x4788] sm:$0xff] }
 0x130   : > { %1297 = vst [vmem:[%s4680_s26 + $0x11e0] sm:$0xff] %v1296_v60  ;;  %v1300_v62 = vld [vmem:[%s4672_s25 + $0x47c0] sm:$0xff]  ;;  %v1302_v63 = vld [vmem:[%s4672_s25 + $0x47c8] sm:$0xff]  ;;  %1299 = vst [vmem:[%s4680_s26 + $0x11e8] sm:$0xff] %v1298_v61 }
 0x131   : > { %1301 = vst [vmem:[%s4680_s26 + $0x11f0] sm:$0xff] %v1300_v62  ;;  %1303 = vst [vmem:[%s4680_s26 + $0x11f8] sm:$0xff] %v1302_v63  ;;  %v1304_v0 = vld [vmem:[%s4672_s25 + $0x4800] sm:$0xff]  ;;  %v1306_v1 = vld [vmem:[%s4672_s25 + $0x4808] sm:$0xff] }
 0x132   : > { %v1308_v2 = vld [vmem:[%s4672_s25 + $0x4840] sm:$0xff]  ;;  %1305 = vst [vmem:[%s4680_s26 + $0x1200] sm:$0xff] %v1304_v0  ;;  %1307 = vst [vmem:[%s4680_s26 + $0x1208] sm:$0xff] %v1306_v1  ;;  %v1310_v3 = vld [vmem:[%s4672_s25 + $0x4848] sm:$0xff] }
 0x133   : > { %1309 = vst [vmem:[%s4680_s26 + $0x1210] sm:$0xff] %v1308_v2  ;;  %v1312_v4 = vld [vmem:[%s4672_s25 + $0x4880] sm:$0xff]  ;;  %v1314_v5 = vld [vmem:[%s4672_s25 + $0x4888] sm:$0xff]  ;;  %1311 = vst [vmem:[%s4680_s26 + $0x1218] sm:$0xff] %v1310_v3 }
 0x134   : > { %1313 = vst [vmem:[%s4680_s26 + $0x1220] sm:$0xff] %v1312_v4  ;;  %1315 = vst [vmem:[%s4680_s26 + $0x1228] sm:$0xff] %v1314_v5  ;;  %v1316_v6 = vld [vmem:[%s4672_s25 + $0x48c0] sm:$0xff]  ;;  %v1318_v7 = vld [vmem:[%s4672_s25 + $0x48c8] sm:$0xff] }
 0x135   : > { %v1320_v8 = vld [vmem:[%s4672_s25 + $0x4900] sm:$0xff]  ;;  %1317 = vst [vmem:[%s4680_s26 + $0x1230] sm:$0xff] %v1316_v6  ;;  %1319 = vst [vmem:[%s4680_s26 + $0x1238] sm:$0xff] %v1318_v7  ;;  %v1322_v9 = vld [vmem:[%s4672_s25 + $0x4908] sm:$0xff] }
 0x136   : > { %1321 = vst [vmem:[%s4680_s26 + $0x1240] sm:$0xff] %v1320_v8  ;;  %v1324_v10 = vld [vmem:[%s4672_s25 + $0x4940] sm:$0xff]  ;;  %v1326_v11 = vld [vmem:[%s4672_s25 + $0x4948] sm:$0xff]  ;;  %1323 = vst [vmem:[%s4680_s26 + $0x1248] sm:$0xff] %v1322_v9 }
 0x137   : > { %1325 = vst [vmem:[%s4680_s26 + $0x1250] sm:$0xff] %v1324_v10  ;;  %1327 = vst [vmem:[%s4680_s26 + $0x1258] sm:$0xff] %v1326_v11  ;;  %v1328_v12 = vld [vmem:[%s4672_s25 + $0x4980] sm:$0xff]  ;;  %v1330_v13 = vld [vmem:[%s4672_s25 + $0x4988] sm:$0xff] }
 0x138   : > { %v1332_v14 = vld [vmem:[%s4672_s25 + $0x49c0] sm:$0xff]  ;;  %1329 = vst [vmem:[%s4680_s26 + $0x1260] sm:$0xff] %v1328_v12  ;;  %1331 = vst [vmem:[%s4680_s26 + $0x1268] sm:$0xff] %v1330_v13  ;;  %v1334_v15 = vld [vmem:[%s4672_s25 + $0x49c8] sm:$0xff] }
 0x139   : > { %1333 = vst [vmem:[%s4680_s26 + $0x1270] sm:$0xff] %v1332_v14  ;;  %v1336_v16 = vld [vmem:[%s4672_s25 + $0x4a00] sm:$0xff]  ;;  %v1338_v17 = vld [vmem:[%s4672_s25 + $0x4a08] sm:$0xff]  ;;  %1335 = vst [vmem:[%s4680_s26 + $0x1278] sm:$0xff] %v1334_v15 }
 0x13a   : > { %1337 = vst [vmem:[%s4680_s26 + $0x1280] sm:$0xff] %v1336_v16  ;;  %1339 = vst [vmem:[%s4680_s26 + $0x1288] sm:$0xff] %v1338_v17  ;;  %v1340_v18 = vld [vmem:[%s4672_s25 + $0x4a40] sm:$0xff]  ;;  %v1342_v19 = vld [vmem:[%s4672_s25 + $0x4a48] sm:$0xff] }
 0x13b   : > { %v1344_v20 = vld [vmem:[%s4672_s25 + $0x4a80] sm:$0xff]  ;;  %1341 = vst [vmem:[%s4680_s26 + $0x1290] sm:$0xff] %v1340_v18  ;;  %1343 = vst [vmem:[%s4680_s26 + $0x1298] sm:$0xff] %v1342_v19  ;;  %v1346_v21 = vld [vmem:[%s4672_s25 + $0x4a88] sm:$0xff] }
 0x13c   : > { %1345 = vst [vmem:[%s4680_s26 + $0x12a0] sm:$0xff] %v1344_v20  ;;  %v1348_v22 = vld [vmem:[%s4672_s25 + $0x4ac0] sm:$0xff]  ;;  %v1350_v23 = vld [vmem:[%s4672_s25 + $0x4ac8] sm:$0xff]  ;;  %1347 = vst [vmem:[%s4680_s26 + $0x12a8] sm:$0xff] %v1346_v21 }
 0x13d   : > { %1349 = vst [vmem:[%s4680_s26 + $0x12b0] sm:$0xff] %v1348_v22  ;;  %1351 = vst [vmem:[%s4680_s26 + $0x12b8] sm:$0xff] %v1350_v23  ;;  %v1352_v24 = vld [vmem:[%s4672_s25 + $0x4b00] sm:$0xff]  ;;  %v1354_v25 = vld [vmem:[%s4672_s25 + $0x4b08] sm:$0xff] }
 0x13e   : > { %v1356_v26 = vld [vmem:[%s4672_s25 + $0x4b40] sm:$0xff]  ;;  %1353 = vst [vmem:[%s4680_s26 + $0x12c0] sm:$0xff] %v1352_v24  ;;  %1355 = vst [vmem:[%s4680_s26 + $0x12c8] sm:$0xff] %v1354_v25  ;;  %v1358_v27 = vld [vmem:[%s4672_s25 + $0x4b48] sm:$0xff] }
 0x13f   : > { %1357 = vst [vmem:[%s4680_s26 + $0x12d0] sm:$0xff] %v1356_v26  ;;  %v1360_v28 = vld [vmem:[%s4672_s25 + $0x4b80] sm:$0xff]  ;;  %v1362_v29 = vld [vmem:[%s4672_s25 + $0x4b88] sm:$0xff]  ;;  %1359 = vst [vmem:[%s4680_s26 + $0x12d8] sm:$0xff] %v1358_v27 }
 0x140   : > { %1361 = vst [vmem:[%s4680_s26 + $0x12e0] sm:$0xff] %v1360_v28  ;;  %1363 = vst [vmem:[%s4680_s26 + $0x12e8] sm:$0xff] %v1362_v29  ;;  %v1364_v30 = vld [vmem:[%s4672_s25 + $0x4bc0] sm:$0xff]  ;;  %v1366_v31 = vld [vmem:[%s4672_s25 + $0x4bc8] sm:$0xff] }
 0x141   : > { %v1368_v32 = vld [vmem:[%s4672_s25 + $0x4c00] sm:$0xff]  ;;  %1365 = vst [vmem:[%s4680_s26 + $0x12f0] sm:$0xff] %v1364_v30  ;;  %1367 = vst [vmem:[%s4680_s26 + $0x12f8] sm:$0xff] %v1366_v31  ;;  %v1370_v33 = vld [vmem:[%s4672_s25 + $0x4c08] sm:$0xff] }
 0x142   : > { %1369 = vst [vmem:[%s4680_s26 + $0x1300] sm:$0xff] %v1368_v32  ;;  %v1372_v34 = vld [vmem:[%s4672_s25 + $0x4c40] sm:$0xff]  ;;  %v1374_v35 = vld [vmem:[%s4672_s25 + $0x4c48] sm:$0xff]  ;;  %1371 = vst [vmem:[%s4680_s26 + $0x1308] sm:$0xff] %v1370_v33 }
 0x143   : > { %1373 = vst [vmem:[%s4680_s26 + $0x1310] sm:$0xff] %v1372_v34  ;;  %1375 = vst [vmem:[%s4680_s26 + $0x1318] sm:$0xff] %v1374_v35  ;;  %v1376_v36 = vld [vmem:[%s4672_s25 + $0x4c80] sm:$0xff]  ;;  %v1378_v37 = vld [vmem:[%s4672_s25 + $0x4c88] sm:$0xff] }
 0x144   : > { %v1380_v38 = vld [vmem:[%s4672_s25 + $0x4cc0] sm:$0xff]  ;;  %1377 = vst [vmem:[%s4680_s26 + $0x1320] sm:$0xff] %v1376_v36  ;;  %1379 = vst [vmem:[%s4680_s26 + $0x1328] sm:$0xff] %v1378_v37  ;;  %v1382_v39 = vld [vmem:[%s4672_s25 + $0x4cc8] sm:$0xff] }
 0x145   : > { %1381 = vst [vmem:[%s4680_s26 + $0x1330] sm:$0xff] %v1380_v38  ;;  %v1384_v40 = vld [vmem:[%s4672_s25 + $0x4d00] sm:$0xff]  ;;  %v1386_v41 = vld [vmem:[%s4672_s25 + $0x4d08] sm:$0xff]  ;;  %1383 = vst [vmem:[%s4680_s26 + $0x1338] sm:$0xff] %v1382_v39 }
 0x146   : > { %1385 = vst [vmem:[%s4680_s26 + $0x1340] sm:$0xff] %v1384_v40  ;;  %1387 = vst [vmem:[%s4680_s26 + $0x1348] sm:$0xff] %v1386_v41  ;;  %v1388_v42 = vld [vmem:[%s4672_s25 + $0x4d40] sm:$0xff]  ;;  %v1390_v43 = vld [vmem:[%s4672_s25 + $0x4d48] sm:$0xff] }
 0x147   : > { %v1392_v44 = vld [vmem:[%s4672_s25 + $0x4d80] sm:$0xff]  ;;  %1389 = vst [vmem:[%s4680_s26 + $0x1350] sm:$0xff] %v1388_v42  ;;  %1391 = vst [vmem:[%s4680_s26 + $0x1358] sm:$0xff] %v1390_v43  ;;  %v1394_v45 = vld [vmem:[%s4672_s25 + $0x4d88] sm:$0xff] }
 0x148   : > { %1393 = vst [vmem:[%s4680_s26 + $0x1360] sm:$0xff] %v1392_v44  ;;  %v1396_v46 = vld [vmem:[%s4672_s25 + $0x4dc0] sm:$0xff]  ;;  %v1398_v47 = vld [vmem:[%s4672_s25 + $0x4dc8] sm:$0xff]  ;;  %1395 = vst [vmem:[%s4680_s26 + $0x1368] sm:$0xff] %v1394_v45 }
 0x149   : > { %1397 = vst [vmem:[%s4680_s26 + $0x1370] sm:$0xff] %v1396_v46  ;;  %1399 = vst [vmem:[%s4680_s26 + $0x1378] sm:$0xff] %v1398_v47  ;;  %v1400_v48 = vld [vmem:[%s4672_s25 + $0x4e00] sm:$0xff]  ;;  %v1402_v49 = vld [vmem:[%s4672_s25 + $0x4e08] sm:$0xff] }
 0x14a   : > { %v1404_v50 = vld [vmem:[%s4672_s25 + $0x4e40] sm:$0xff]  ;;  %1401 = vst [vmem:[%s4680_s26 + $0x1380] sm:$0xff] %v1400_v48  ;;  %1403 = vst [vmem:[%s4680_s26 + $0x1388] sm:$0xff] %v1402_v49  ;;  %v1406_v51 = vld [vmem:[%s4672_s25 + $0x4e48] sm:$0xff] }
 0x14b   : > { %1405 = vst [vmem:[%s4680_s26 + $0x1390] sm:$0xff] %v1404_v50  ;;  %v1408_v52 = vld [vmem:[%s4672_s25 + $0x4e80] sm:$0xff]  ;;  %v1410_v53 = vld [vmem:[%s4672_s25 + $0x4e88] sm:$0xff]  ;;  %1407 = vst [vmem:[%s4680_s26 + $0x1398] sm:$0xff] %v1406_v51 }
 0x14c   : > { %1409 = vst [vmem:[%s4680_s26 + $0x13a0] sm:$0xff] %v1408_v52  ;;  %1411 = vst [vmem:[%s4680_s26 + $0x13a8] sm:$0xff] %v1410_v53  ;;  %v1412_v54 = vld [vmem:[%s4672_s25 + $0x4ec0] sm:$0xff]  ;;  %v1414_v55 = vld [vmem:[%s4672_s25 + $0x4ec8] sm:$0xff] }
 0x14d   : > { %v1416_v56 = vld [vmem:[%s4672_s25 + $0x4f00] sm:$0xff]  ;;  %1413 = vst [vmem:[%s4680_s26 + $0x13b0] sm:$0xff] %v1412_v54  ;;  %1415 = vst [vmem:[%s4680_s26 + $0x13b8] sm:$0xff] %v1414_v55  ;;  %v1418_v57 = vld [vmem:[%s4672_s25 + $0x4f08] sm:$0xff] }
 0x14e   : > { %1417 = vst [vmem:[%s4680_s26 + $0x13c0] sm:$0xff] %v1416_v56  ;;  %v1420_v58 = vld [vmem:[%s4672_s25 + $0x4f40] sm:$0xff]  ;;  %v1422_v59 = vld [vmem:[%s4672_s25 + $0x4f48] sm:$0xff]  ;;  %1419 = vst [vmem:[%s4680_s26 + $0x13c8] sm:$0xff] %v1418_v57 }
 0x14f   : > { %1421 = vst [vmem:[%s4680_s26 + $0x13d0] sm:$0xff] %v1420_v58  ;;  %1423 = vst [vmem:[%s4680_s26 + $0x13d8] sm:$0xff] %v1422_v59  ;;  %v1424_v60 = vld [vmem:[%s4672_s25 + $0x4f80] sm:$0xff]  ;;  %v1426_v61 = vld [vmem:[%s4672_s25 + $0x4f88] sm:$0xff] }
 0x150   : > { %v1428_v62 = vld [vmem:[%s4672_s25 + $0x4fc0] sm:$0xff]  ;;  %1425 = vst [vmem:[%s4680_s26 + $0x13e0] sm:$0xff] %v1424_v60  ;;  %1427 = vst [vmem:[%s4680_s26 + $0x13e8] sm:$0xff] %v1426_v61  ;;  %v1430_v63 = vld [vmem:[%s4672_s25 + $0x4fc8] sm:$0xff] }
 0x151   : > { %1429 = vst [vmem:[%s4680_s26 + $0x13f0] sm:$0xff] %v1428_v62  ;;  %v1432_v0 = vld [vmem:[%s4672_s25 + $0x5000] sm:$0xff]  ;;  %v1434_v1 = vld [vmem:[%s4672_s25 + $0x5008] sm:$0xff]  ;;  %1431 = vst [vmem:[%s4680_s26 + $0x13f8] sm:$0xff] %v1430_v63 }
 0x152   : > { %1433 = vst [vmem:[%s4680_s26 + $0x1400] sm:$0xff] %v1432_v0  ;;  %1435 = vst [vmem:[%s4680_s26 + $0x1408] sm:$0xff] %v1434_v1  ;;  %v1436_v2 = vld [vmem:[%s4672_s25 + $0x5040] sm:$0xff]  ;;  %v1438_v3 = vld [vmem:[%s4672_s25 + $0x5048] sm:$0xff] }
 0x153   : > { %v1440_v4 = vld [vmem:[%s4672_s25 + $0x5080] sm:$0xff]  ;;  %1437 = vst [vmem:[%s4680_s26 + $0x1410] sm:$0xff] %v1436_v2  ;;  %1439 = vst [vmem:[%s4680_s26 + $0x1418] sm:$0xff] %v1438_v3  ;;  %v1442_v5 = vld [vmem:[%s4672_s25 + $0x5088] sm:$0xff] }
 0x154   : > { %1441 = vst [vmem:[%s4680_s26 + $0x1420] sm:$0xff] %v1440_v4  ;;  %v1444_v6 = vld [vmem:[%s4672_s25 + $0x50c0] sm:$0xff]  ;;  %v1446_v7 = vld [vmem:[%s4672_s25 + $0x50c8] sm:$0xff]  ;;  %1443 = vst [vmem:[%s4680_s26 + $0x1428] sm:$0xff] %v1442_v5 }
 0x155   : > { %1445 = vst [vmem:[%s4680_s26 + $0x1430] sm:$0xff] %v1444_v6  ;;  %1447 = vst [vmem:[%s4680_s26 + $0x1438] sm:$0xff] %v1446_v7  ;;  %v1448_v8 = vld [vmem:[%s4672_s25 + $0x5100] sm:$0xff]  ;;  %v1450_v9 = vld [vmem:[%s4672_s25 + $0x5108] sm:$0xff] }
 0x156   : > { %v1452_v10 = vld [vmem:[%s4672_s25 + $0x5140] sm:$0xff]  ;;  %1449 = vst [vmem:[%s4680_s26 + $0x1440] sm:$0xff] %v1448_v8  ;;  %1451 = vst [vmem:[%s4680_s26 + $0x1448] sm:$0xff] %v1450_v9  ;;  %v1454_v11 = vld [vmem:[%s4672_s25 + $0x5148] sm:$0xff] }
 0x157   : > { %1453 = vst [vmem:[%s4680_s26 + $0x1450] sm:$0xff] %v1452_v10  ;;  %v1456_v12 = vld [vmem:[%s4672_s25 + $0x5180] sm:$0xff]  ;;  %v1458_v13 = vld [vmem:[%s4672_s25 + $0x5188] sm:$0xff]  ;;  %1455 = vst [vmem:[%s4680_s26 + $0x1458] sm:$0xff] %v1454_v11 }
 0x158   : > { %1457 = vst [vmem:[%s4680_s26 + $0x1460] sm:$0xff] %v1456_v12  ;;  %1459 = vst [vmem:[%s4680_s26 + $0x1468] sm:$0xff] %v1458_v13  ;;  %v1460_v14 = vld [vmem:[%s4672_s25 + $0x51c0] sm:$0xff]  ;;  %v1462_v15 = vld [vmem:[%s4672_s25 + $0x51c8] sm:$0xff] }
 0x159   : > { %v1464_v16 = vld [vmem:[%s4672_s25 + $0x5200] sm:$0xff]  ;;  %1461 = vst [vmem:[%s4680_s26 + $0x1470] sm:$0xff] %v1460_v14  ;;  %1463 = vst [vmem:[%s4680_s26 + $0x1478] sm:$0xff] %v1462_v15  ;;  %v1466_v17 = vld [vmem:[%s4672_s25 + $0x5208] sm:$0xff] }
 0x15a   : > { %1465 = vst [vmem:[%s4680_s26 + $0x1480] sm:$0xff] %v1464_v16  ;;  %v1468_v18 = vld [vmem:[%s4672_s25 + $0x5240] sm:$0xff]  ;;  %v1470_v19 = vld [vmem:[%s4672_s25 + $0x5248] sm:$0xff]  ;;  %1467 = vst [vmem:[%s4680_s26 + $0x1488] sm:$0xff] %v1466_v17 }
 0x15b   : > { %1469 = vst [vmem:[%s4680_s26 + $0x1490] sm:$0xff] %v1468_v18  ;;  %1471 = vst [vmem:[%s4680_s26 + $0x1498] sm:$0xff] %v1470_v19  ;;  %v1472_v20 = vld [vmem:[%s4672_s25 + $0x5280] sm:$0xff]  ;;  %v1474_v21 = vld [vmem:[%s4672_s25 + $0x5288] sm:$0xff] }
 0x15c   : > { %v1476_v22 = vld [vmem:[%s4672_s25 + $0x52c0] sm:$0xff]  ;;  %1473 = vst [vmem:[%s4680_s26 + $0x14a0] sm:$0xff] %v1472_v20  ;;  %1475 = vst [vmem:[%s4680_s26 + $0x14a8] sm:$0xff] %v1474_v21  ;;  %v1478_v23 = vld [vmem:[%s4672_s25 + $0x52c8] sm:$0xff] }
 0x15d   : > { %1477 = vst [vmem:[%s4680_s26 + $0x14b0] sm:$0xff] %v1476_v22  ;;  %v1480_v24 = vld [vmem:[%s4672_s25 + $0x5300] sm:$0xff]  ;;  %v1482_v25 = vld [vmem:[%s4672_s25 + $0x5308] sm:$0xff]  ;;  %1479 = vst [vmem:[%s4680_s26 + $0x14b8] sm:$0xff] %v1478_v23 }
 0x15e   : > { %1481 = vst [vmem:[%s4680_s26 + $0x14c0] sm:$0xff] %v1480_v24  ;;  %1483 = vst [vmem:[%s4680_s26 + $0x14c8] sm:$0xff] %v1482_v25  ;;  %v1484_v26 = vld [vmem:[%s4672_s25 + $0x5340] sm:$0xff]  ;;  %v1486_v27 = vld [vmem:[%s4672_s25 + $0x5348] sm:$0xff] }
 0x15f   : > { %v1488_v28 = vld [vmem:[%s4672_s25 + $0x5380] sm:$0xff]  ;;  %1485 = vst [vmem:[%s4680_s26 + $0x14d0] sm:$0xff] %v1484_v26  ;;  %1487 = vst [vmem:[%s4680_s26 + $0x14d8] sm:$0xff] %v1486_v27  ;;  %v1490_v29 = vld [vmem:[%s4672_s25 + $0x5388] sm:$0xff] }
 0x160   : > { %1489 = vst [vmem:[%s4680_s26 + $0x14e0] sm:$0xff] %v1488_v28  ;;  %v1492_v30 = vld [vmem:[%s4672_s25 + $0x53c0] sm:$0xff]  ;;  %v1494_v31 = vld [vmem:[%s4672_s25 + $0x53c8] sm:$0xff]  ;;  %1491 = vst [vmem:[%s4680_s26 + $0x14e8] sm:$0xff] %v1490_v29 }
 0x161   : > { %1493 = vst [vmem:[%s4680_s26 + $0x14f0] sm:$0xff] %v1492_v30  ;;  %1495 = vst [vmem:[%s4680_s26 + $0x14f8] sm:$0xff] %v1494_v31  ;;  %v1496_v32 = vld [vmem:[%s4672_s25 + $0x5400] sm:$0xff]  ;;  %v1498_v33 = vld [vmem:[%s4672_s25 + $0x5408] sm:$0xff] }
 0x162   : > { %v1500_v34 = vld [vmem:[%s4672_s25 + $0x5440] sm:$0xff]  ;;  %1497 = vst [vmem:[%s4680_s26 + $0x1500] sm:$0xff] %v1496_v32  ;;  %1499 = vst [vmem:[%s4680_s26 + $0x1508] sm:$0xff] %v1498_v33  ;;  %v1502_v35 = vld [vmem:[%s4672_s25 + $0x5448] sm:$0xff] }
 0x163   : > { %1501 = vst [vmem:[%s4680_s26 + $0x1510] sm:$0xff] %v1500_v34  ;;  %v1504_v36 = vld [vmem:[%s4672_s25 + $0x5480] sm:$0xff]  ;;  %v1506_v37 = vld [vmem:[%s4672_s25 + $0x5488] sm:$0xff]  ;;  %1503 = vst [vmem:[%s4680_s26 + $0x1518] sm:$0xff] %v1502_v35 }
 0x164   : > { %1505 = vst [vmem:[%s4680_s26 + $0x1520] sm:$0xff] %v1504_v36  ;;  %1507 = vst [vmem:[%s4680_s26 + $0x1528] sm:$0xff] %v1506_v37  ;;  %v1508_v38 = vld [vmem:[%s4672_s25 + $0x54c0] sm:$0xff]  ;;  %v1510_v39 = vld [vmem:[%s4672_s25 + $0x54c8] sm:$0xff] }
 0x165   : > { %v1512_v40 = vld [vmem:[%s4672_s25 + $0x5500] sm:$0xff]  ;;  %1509 = vst [vmem:[%s4680_s26 + $0x1530] sm:$0xff] %v1508_v38  ;;  %1511 = vst [vmem:[%s4680_s26 + $0x1538] sm:$0xff] %v1510_v39  ;;  %v1514_v41 = vld [vmem:[%s4672_s25 + $0x5508] sm:$0xff] }
 0x166   : > { %1513 = vst [vmem:[%s4680_s26 + $0x1540] sm:$0xff] %v1512_v40  ;;  %v1516_v42 = vld [vmem:[%s4672_s25 + $0x5540] sm:$0xff]  ;;  %v1518_v43 = vld [vmem:[%s4672_s25 + $0x5548] sm:$0xff]  ;;  %1515 = vst [vmem:[%s4680_s26 + $0x1548] sm:$0xff] %v1514_v41 }
 0x167   : > { %1517 = vst [vmem:[%s4680_s26 + $0x1550] sm:$0xff] %v1516_v42  ;;  %1519 = vst [vmem:[%s4680_s26 + $0x1558] sm:$0xff] %v1518_v43  ;;  %v1520_v44 = vld [vmem:[%s4672_s25 + $0x5580] sm:$0xff]  ;;  %v1522_v45 = vld [vmem:[%s4672_s25 + $0x5588] sm:$0xff] }
 0x168   : > { %v1524_v46 = vld [vmem:[%s4672_s25 + $0x55c0] sm:$0xff]  ;;  %1521 = vst [vmem:[%s4680_s26 + $0x1560] sm:$0xff] %v1520_v44  ;;  %1523 = vst [vmem:[%s4680_s26 + $0x1568] sm:$0xff] %v1522_v45  ;;  %v1526_v47 = vld [vmem:[%s4672_s25 + $0x55c8] sm:$0xff] }
 0x169   : > { %1525 = vst [vmem:[%s4680_s26 + $0x1570] sm:$0xff] %v1524_v46  ;;  %v1528_v48 = vld [vmem:[%s4672_s25 + $0x5600] sm:$0xff]  ;;  %v1530_v49 = vld [vmem:[%s4672_s25 + $0x5608] sm:$0xff]  ;;  %1527 = vst [vmem:[%s4680_s26 + $0x1578] sm:$0xff] %v1526_v47 }
 0x16a   : > { %1529 = vst [vmem:[%s4680_s26 + $0x1580] sm:$0xff] %v1528_v48  ;;  %1531 = vst [vmem:[%s4680_s26 + $0x1588] sm:$0xff] %v1530_v49  ;;  %v1532_v50 = vld [vmem:[%s4672_s25 + $0x5640] sm:$0xff]  ;;  %v1534_v51 = vld [vmem:[%s4672_s25 + $0x5648] sm:$0xff] }
 0x16b   : > { %v1536_v52 = vld [vmem:[%s4672_s25 + $0x5680] sm:$0xff]  ;;  %1533 = vst [vmem:[%s4680_s26 + $0x1590] sm:$0xff] %v1532_v50  ;;  %1535 = vst [vmem:[%s4680_s26 + $0x1598] sm:$0xff] %v1534_v51  ;;  %v1538_v53 = vld [vmem:[%s4672_s25 + $0x5688] sm:$0xff] }
 0x16c   : > { %1537 = vst [vmem:[%s4680_s26 + $0x15a0] sm:$0xff] %v1536_v52  ;;  %v1540_v54 = vld [vmem:[%s4672_s25 + $0x56c0] sm:$0xff]  ;;  %v1542_v55 = vld [vmem:[%s4672_s25 + $0x56c8] sm:$0xff]  ;;  %1539 = vst [vmem:[%s4680_s26 + $0x15a8] sm:$0xff] %v1538_v53 }
 0x16d   : > { %1541 = vst [vmem:[%s4680_s26 + $0x15b0] sm:$0xff] %v1540_v54  ;;  %1543 = vst [vmem:[%s4680_s26 + $0x15b8] sm:$0xff] %v1542_v55  ;;  %v1544_v56 = vld [vmem:[%s4672_s25 + $0x5700] sm:$0xff]  ;;  %v1546_v57 = vld [vmem:[%s4672_s25 + $0x5708] sm:$0xff] }
 0x16e   : > { %v1548_v58 = vld [vmem:[%s4672_s25 + $0x5740] sm:$0xff]  ;;  %1545 = vst [vmem:[%s4680_s26 + $0x15c0] sm:$0xff] %v1544_v56  ;;  %1547 = vst [vmem:[%s4680_s26 + $0x15c8] sm:$0xff] %v1546_v57  ;;  %v1550_v59 = vld [vmem:[%s4672_s25 + $0x5748] sm:$0xff] }
 0x16f   : > { %1549 = vst [vmem:[%s4680_s26 + $0x15d0] sm:$0xff] %v1548_v58  ;;  %v1552_v60 = vld [vmem:[%s4672_s25 + $0x5780] sm:$0xff]  ;;  %v1554_v61 = vld [vmem:[%s4672_s25 + $0x5788] sm:$0xff]  ;;  %1551 = vst [vmem:[%s4680_s26 + $0x15d8] sm:$0xff] %v1550_v59 }
 0x170   : > { %1553 = vst [vmem:[%s4680_s26 + $0x15e0] sm:$0xff] %v1552_v60  ;;  %1555 = vst [vmem:[%s4680_s26 + $0x15e8] sm:$0xff] %v1554_v61  ;;  %v1556_v62 = vld [vmem:[%s4672_s25 + $0x57c0] sm:$0xff]  ;;  %v1558_v63 = vld [vmem:[%s4672_s25 + $0x57c8] sm:$0xff] }
 0x171   : > { %v1560_v0 = vld [vmem:[%s4672_s25 + $0x5800] sm:$0xff]  ;;  %1557 = vst [vmem:[%s4680_s26 + $0x15f0] sm:$0xff] %v1556_v62  ;;  %1559 = vst [vmem:[%s4680_s26 + $0x15f8] sm:$0xff] %v1558_v63  ;;  %v1562_v1 = vld [vmem:[%s4672_s25 + $0x5808] sm:$0xff] }
 0x172   : > { %1561 = vst [vmem:[%s4680_s26 + $0x1600] sm:$0xff] %v1560_v0  ;;  %v1564_v2 = vld [vmem:[%s4672_s25 + $0x5840] sm:$0xff]  ;;  %v1566_v3 = vld [vmem:[%s4672_s25 + $0x5848] sm:$0xff]  ;;  %1563 = vst [vmem:[%s4680_s26 + $0x1608] sm:$0xff] %v1562_v1 }
 0x173   : > { %1565 = vst [vmem:[%s4680_s26 + $0x1610] sm:$0xff] %v1564_v2  ;;  %1567 = vst [vmem:[%s4680_s26 + $0x1618] sm:$0xff] %v1566_v3  ;;  %v1568_v4 = vld [vmem:[%s4672_s25 + $0x5880] sm:$0xff]  ;;  %v1570_v5 = vld [vmem:[%s4672_s25 + $0x5888] sm:$0xff] }
 0x174   : > { %v1572_v6 = vld [vmem:[%s4672_s25 + $0x58c0] sm:$0xff]  ;;  %1569 = vst [vmem:[%s4680_s26 + $0x1620] sm:$0xff] %v1568_v4  ;;  %1571 = vst [vmem:[%s4680_s26 + $0x1628] sm:$0xff] %v1570_v5  ;;  %v1574_v7 = vld [vmem:[%s4672_s25 + $0x58c8] sm:$0xff] }
 0x175   : > { %1573 = vst [vmem:[%s4680_s26 + $0x1630] sm:$0xff] %v1572_v6  ;;  %v1576_v8 = vld [vmem:[%s4672_s25 + $0x5900] sm:$0xff]  ;;  %v1578_v9 = vld [vmem:[%s4672_s25 + $0x5908] sm:$0xff]  ;;  %1575 = vst [vmem:[%s4680_s26 + $0x1638] sm:$0xff] %v1574_v7 }
 0x176   : > { %1577 = vst [vmem:[%s4680_s26 + $0x1640] sm:$0xff] %v1576_v8  ;;  %1579 = vst [vmem:[%s4680_s26 + $0x1648] sm:$0xff] %v1578_v9  ;;  %v1580_v10 = vld [vmem:[%s4672_s25 + $0x5940] sm:$0xff]  ;;  %v1582_v11 = vld [vmem:[%s4672_s25 + $0x5948] sm:$0xff] }
 0x177   : > { %v1584_v12 = vld [vmem:[%s4672_s25 + $0x5980] sm:$0xff]  ;;  %1581 = vst [vmem:[%s4680_s26 + $0x1650] sm:$0xff] %v1580_v10  ;;  %1583 = vst [vmem:[%s4680_s26 + $0x1658] sm:$0xff] %v1582_v11  ;;  %v1586_v13 = vld [vmem:[%s4672_s25 + $0x5988] sm:$0xff] }
 0x178   : > { %1585 = vst [vmem:[%s4680_s26 + $0x1660] sm:$0xff] %v1584_v12  ;;  %v1588_v14 = vld [vmem:[%s4672_s25 + $0x59c0] sm:$0xff]  ;;  %v1590_v15 = vld [vmem:[%s4672_s25 + $0x59c8] sm:$0xff]  ;;  %1587 = vst [vmem:[%s4680_s26 + $0x1668] sm:$0xff] %v1586_v13 }
 0x179   : > { %1589 = vst [vmem:[%s4680_s26 + $0x1670] sm:$0xff] %v1588_v14  ;;  %1591 = vst [vmem:[%s4680_s26 + $0x1678] sm:$0xff] %v1590_v15  ;;  %v1592_v16 = vld [vmem:[%s4672_s25 + $0x5a00] sm:$0xff]  ;;  %v1594_v17 = vld [vmem:[%s4672_s25 + $0x5a08] sm:$0xff] }
 0x17a   : > { %v1596_v18 = vld [vmem:[%s4672_s25 + $0x5a40] sm:$0xff]  ;;  %1593 = vst [vmem:[%s4680_s26 + $0x1680] sm:$0xff] %v1592_v16  ;;  %1595 = vst [vmem:[%s4680_s26 + $0x1688] sm:$0xff] %v1594_v17  ;;  %v1598_v19 = vld [vmem:[%s4672_s25 + $0x5a48] sm:$0xff] }
 0x17b   : > { %1597 = vst [vmem:[%s4680_s26 + $0x1690] sm:$0xff] %v1596_v18  ;;  %v1600_v20 = vld [vmem:[%s4672_s25 + $0x5a80] sm:$0xff]  ;;  %v1602_v21 = vld [vmem:[%s4672_s25 + $0x5a88] sm:$0xff]  ;;  %1599 = vst [vmem:[%s4680_s26 + $0x1698] sm:$0xff] %v1598_v19 }
 0x17c   : > { %1601 = vst [vmem:[%s4680_s26 + $0x16a0] sm:$0xff] %v1600_v20  ;;  %1603 = vst [vmem:[%s4680_s26 + $0x16a8] sm:$0xff] %v1602_v21  ;;  %v1604_v22 = vld [vmem:[%s4672_s25 + $0x5ac0] sm:$0xff]  ;;  %v1606_v23 = vld [vmem:[%s4672_s25 + $0x5ac8] sm:$0xff] }
 0x17d   : > { %v1608_v24 = vld [vmem:[%s4672_s25 + $0x5b00] sm:$0xff]  ;;  %1605 = vst [vmem:[%s4680_s26 + $0x16b0] sm:$0xff] %v1604_v22  ;;  %1607 = vst [vmem:[%s4680_s26 + $0x16b8] sm:$0xff] %v1606_v23  ;;  %v1610_v25 = vld [vmem:[%s4672_s25 + $0x5b08] sm:$0xff] }
 0x17e   : > { %1609 = vst [vmem:[%s4680_s26 + $0x16c0] sm:$0xff] %v1608_v24  ;;  %v1612_v26 = vld [vmem:[%s4672_s25 + $0x5b40] sm:$0xff]  ;;  %v1614_v27 = vld [vmem:[%s4672_s25 + $0x5b48] sm:$0xff]  ;;  %1611 = vst [vmem:[%s4680_s26 + $0x16c8] sm:$0xff] %v1610_v25 }
 0x17f   : > { %1613 = vst [vmem:[%s4680_s26 + $0x16d0] sm:$0xff] %v1612_v26  ;;  %1615 = vst [vmem:[%s4680_s26 + $0x16d8] sm:$0xff] %v1614_v27  ;;  %v1616_v28 = vld [vmem:[%s4672_s25 + $0x5b80] sm:$0xff]  ;;  %v1618_v29 = vld [vmem:[%s4672_s25 + $0x5b88] sm:$0xff] }
 0x180   : > { %v1620_v30 = vld [vmem:[%s4672_s25 + $0x5bc0] sm:$0xff]  ;;  %1617 = vst [vmem:[%s4680_s26 + $0x16e0] sm:$0xff] %v1616_v28  ;;  %1619 = vst [vmem:[%s4680_s26 + $0x16e8] sm:$0xff] %v1618_v29  ;;  %v1622_v31 = vld [vmem:[%s4672_s25 + $0x5bc8] sm:$0xff] }
 0x181   : > { %1621 = vst [vmem:[%s4680_s26 + $0x16f0] sm:$0xff] %v1620_v30  ;;  %v1624_v32 = vld [vmem:[%s4672_s25 + $0x5c00] sm:$0xff]  ;;  %v1626_v33 = vld [vmem:[%s4672_s25 + $0x5c08] sm:$0xff]  ;;  %1623 = vst [vmem:[%s4680_s26 + $0x16f8] sm:$0xff] %v1622_v31 }
 0x182   : > { %1625 = vst [vmem:[%s4680_s26 + $0x1700] sm:$0xff] %v1624_v32  ;;  %1627 = vst [vmem:[%s4680_s26 + $0x1708] sm:$0xff] %v1626_v33  ;;  %v1628_v34 = vld [vmem:[%s4672_s25 + $0x5c40] sm:$0xff]  ;;  %v1630_v35 = vld [vmem:[%s4672_s25 + $0x5c48] sm:$0xff] }
 0x183   : > { %v1632_v36 = vld [vmem:[%s4672_s25 + $0x5c80] sm:$0xff]  ;;  %1629 = vst [vmem:[%s4680_s26 + $0x1710] sm:$0xff] %v1628_v34  ;;  %1631 = vst [vmem:[%s4680_s26 + $0x1718] sm:$0xff] %v1630_v35  ;;  %v1634_v37 = vld [vmem:[%s4672_s25 + $0x5c88] sm:$0xff] }
 0x184   : > { %1633 = vst [vmem:[%s4680_s26 + $0x1720] sm:$0xff] %v1632_v36  ;;  %v1636_v38 = vld [vmem:[%s4672_s25 + $0x5cc0] sm:$0xff]  ;;  %v1638_v39 = vld [vmem:[%s4672_s25 + $0x5cc8] sm:$0xff]  ;;  %1635 = vst [vmem:[%s4680_s26 + $0x1728] sm:$0xff] %v1634_v37 }
 0x185   : > { %1637 = vst [vmem:[%s4680_s26 + $0x1730] sm:$0xff] %v1636_v38  ;;  %1639 = vst [vmem:[%s4680_s26 + $0x1738] sm:$0xff] %v1638_v39  ;;  %v1640_v40 = vld [vmem:[%s4672_s25 + $0x5d00] sm:$0xff]  ;;  %v1642_v41 = vld [vmem:[%s4672_s25 + $0x5d08] sm:$0xff] }
 0x186   : > { %v1644_v42 = vld [vmem:[%s4672_s25 + $0x5d40] sm:$0xff]  ;;  %1641 = vst [vmem:[%s4680_s26 + $0x1740] sm:$0xff] %v1640_v40  ;;  %1643 = vst [vmem:[%s4680_s26 + $0x1748] sm:$0xff] %v1642_v41  ;;  %v1646_v43 = vld [vmem:[%s4672_s25 + $0x5d48] sm:$0xff] }
 0x187   : > { %1645 = vst [vmem:[%s4680_s26 + $0x1750] sm:$0xff] %v1644_v42  ;;  %v1648_v44 = vld [vmem:[%s4672_s25 + $0x5d80] sm:$0xff]  ;;  %v1650_v45 = vld [vmem:[%s4672_s25 + $0x5d88] sm:$0xff]  ;;  %1647 = vst [vmem:[%s4680_s26 + $0x1758] sm:$0xff] %v1646_v43 }
 0x188   : > { %1649 = vst [vmem:[%s4680_s26 + $0x1760] sm:$0xff] %v1648_v44  ;;  %1651 = vst [vmem:[%s4680_s26 + $0x1768] sm:$0xff] %v1650_v45  ;;  %v1652_v46 = vld [vmem:[%s4672_s25 + $0x5dc0] sm:$0xff]  ;;  %v1654_v47 = vld [vmem:[%s4672_s25 + $0x5dc8] sm:$0xff] }
 0x189   : > { %v1656_v48 = vld [vmem:[%s4672_s25 + $0x5e00] sm:$0xff]  ;;  %1653 = vst [vmem:[%s4680_s26 + $0x1770] sm:$0xff] %v1652_v46  ;;  %1655 = vst [vmem:[%s4680_s26 + $0x1778] sm:$0xff] %v1654_v47  ;;  %v1658_v49 = vld [vmem:[%s4672_s25 + $0x5e08] sm:$0xff] }
 0x18a   : > { %1657 = vst [vmem:[%s4680_s26 + $0x1780] sm:$0xff] %v1656_v48  ;;  %v1660_v50 = vld [vmem:[%s4672_s25 + $0x5e40] sm:$0xff]  ;;  %v1662_v51 = vld [vmem:[%s4672_s25 + $0x5e48] sm:$0xff]  ;;  %1659 = vst [vmem:[%s4680_s26 + $0x1788] sm:$0xff] %v1658_v49 }
 0x18b   : > { %1661 = vst [vmem:[%s4680_s26 + $0x1790] sm:$0xff] %v1660_v50  ;;  %1663 = vst [vmem:[%s4680_s26 + $0x1798] sm:$0xff] %v1662_v51  ;;  %v1664_v52 = vld [vmem:[%s4672_s25 + $0x5e80] sm:$0xff]  ;;  %v1666_v53 = vld [vmem:[%s4672_s25 + $0x5e88] sm:$0xff] }
 0x18c   : > { %v1668_v54 = vld [vmem:[%s4672_s25 + $0x5ec0] sm:$0xff]  ;;  %1665 = vst [vmem:[%s4680_s26 + $0x17a0] sm:$0xff] %v1664_v52  ;;  %1667 = vst [vmem:[%s4680_s26 + $0x17a8] sm:$0xff] %v1666_v53  ;;  %v1670_v55 = vld [vmem:[%s4672_s25 + $0x5ec8] sm:$0xff] }
 0x18d   : > { %1669 = vst [vmem:[%s4680_s26 + $0x17b0] sm:$0xff] %v1668_v54  ;;  %v1672_v56 = vld [vmem:[%s4672_s25 + $0x5f00] sm:$0xff]  ;;  %v1674_v57 = vld [vmem:[%s4672_s25 + $0x5f08] sm:$0xff]  ;;  %1671 = vst [vmem:[%s4680_s26 + $0x17b8] sm:$0xff] %v1670_v55 }
 0x18e   : > { %1673 = vst [vmem:[%s4680_s26 + $0x17c0] sm:$0xff] %v1672_v56  ;;  %1675 = vst [vmem:[%s4680_s26 + $0x17c8] sm:$0xff] %v1674_v57  ;;  %v1676_v58 = vld [vmem:[%s4672_s25 + $0x5f40] sm:$0xff]  ;;  %v1678_v59 = vld [vmem:[%s4672_s25 + $0x5f48] sm:$0xff] }
 0x18f   : > { %v1680_v60 = vld [vmem:[%s4672_s25 + $0x5f80] sm:$0xff]  ;;  %1677 = vst [vmem:[%s4680_s26 + $0x17d0] sm:$0xff] %v1676_v58  ;;  %1679 = vst [vmem:[%s4680_s26 + $0x17d8] sm:$0xff] %v1678_v59  ;;  %v1682_v61 = vld [vmem:[%s4672_s25 + $0x5f88] sm:$0xff] }
 0x190   : > { %1681 = vst [vmem:[%s4680_s26 + $0x17e0] sm:$0xff] %v1680_v60  ;;  %v1684_v62 = vld [vmem:[%s4672_s25 + $0x5fc0] sm:$0xff]  ;;  %v1686_v63 = vld [vmem:[%s4672_s25 + $0x5fc8] sm:$0xff]  ;;  %1683 = vst [vmem:[%s4680_s26 + $0x17e8] sm:$0xff] %v1682_v61 }
 0x191   : > { %1685 = vst [vmem:[%s4680_s26 + $0x17f0] sm:$0xff] %v1684_v62  ;;  %1687 = vst [vmem:[%s4680_s26 + $0x17f8] sm:$0xff] %v1686_v63  ;;  %v1688_v0 = vld [vmem:[%s4672_s25 + $0x6000] sm:$0xff]  ;;  %v1690_v1 = vld [vmem:[%s4672_s25 + $0x6008] sm:$0xff] }
 0x192   : > { %v1692_v2 = vld [vmem:[%s4672_s25 + $0x6040] sm:$0xff]  ;;  %1689 = vst [vmem:[%s4680_s26 + $0x1800] sm:$0xff] %v1688_v0  ;;  %1691 = vst [vmem:[%s4680_s26 + $0x1808] sm:$0xff] %v1690_v1  ;;  %v1694_v3 = vld [vmem:[%s4672_s25 + $0x6048] sm:$0xff] }
 0x193   : > { %1693 = vst [vmem:[%s4680_s26 + $0x1810] sm:$0xff] %v1692_v2  ;;  %v1696_v4 = vld [vmem:[%s4672_s25 + $0x6080] sm:$0xff]  ;;  %v1698_v5 = vld [vmem:[%s4672_s25 + $0x6088] sm:$0xff]  ;;  %1695 = vst [vmem:[%s4680_s26 + $0x1818] sm:$0xff] %v1694_v3 }
 0x194   : > { %1697 = vst [vmem:[%s4680_s26 + $0x1820] sm:$0xff] %v1696_v4  ;;  %1699 = vst [vmem:[%s4680_s26 + $0x1828] sm:$0xff] %v1698_v5  ;;  %v1700_v6 = vld [vmem:[%s4672_s25 + $0x60c0] sm:$0xff]  ;;  %v1702_v7 = vld [vmem:[%s4672_s25 + $0x60c8] sm:$0xff] }
 0x195   : > { %v1704_v8 = vld [vmem:[%s4672_s25 + $0x6100] sm:$0xff]  ;;  %1701 = vst [vmem:[%s4680_s26 + $0x1830] sm:$0xff] %v1700_v6  ;;  %1703 = vst [vmem:[%s4680_s26 + $0x1838] sm:$0xff] %v1702_v7  ;;  %v1706_v9 = vld [vmem:[%s4672_s25 + $0x6108] sm:$0xff] }
 0x196   : > { %1705 = vst [vmem:[%s4680_s26 + $0x1840] sm:$0xff] %v1704_v8  ;;  %v1708_v10 = vld [vmem:[%s4672_s25 + $0x6140] sm:$0xff]  ;;  %v1710_v11 = vld [vmem:[%s4672_s25 + $0x6148] sm:$0xff]  ;;  %1707 = vst [vmem:[%s4680_s26 + $0x1848] sm:$0xff] %v1706_v9 }
 0x197   : > { %1709 = vst [vmem:[%s4680_s26 + $0x1850] sm:$0xff] %v1708_v10  ;;  %1711 = vst [vmem:[%s4680_s26 + $0x1858] sm:$0xff] %v1710_v11  ;;  %v1712_v12 = vld [vmem:[%s4672_s25 + $0x6180] sm:$0xff]  ;;  %v1714_v13 = vld [vmem:[%s4672_s25 + $0x6188] sm:$0xff] }
 0x198   : > { %v1716_v14 = vld [vmem:[%s4672_s25 + $0x61c0] sm:$0xff]  ;;  %1713 = vst [vmem:[%s4680_s26 + $0x1860] sm:$0xff] %v1712_v12  ;;  %1715 = vst [vmem:[%s4680_s26 + $0x1868] sm:$0xff] %v1714_v13  ;;  %v1718_v15 = vld [vmem:[%s4672_s25 + $0x61c8] sm:$0xff] }
 0x199   : > { %1717 = vst [vmem:[%s4680_s26 + $0x1870] sm:$0xff] %v1716_v14  ;;  %1719 = vst [vmem:[%s4680_s26 + $0x1878] sm:$0xff] %v1718_v15 }
 0x19a PF: > { %p3738_p5 = scmp.ge.s32.totalorder %s4614_s14, 1  ;;  %p1732_p6 = scmp.lt.s32.totalorder %s4614_s14, 5 }
 0x19c   : > { %p1733_p7 = pnand %p3738_p5, %p1732_p6 }
 0x19d   : > { %s1739_s27 = sand.u32 (!%p1733_p7), 1, %s4606_s12   ;;  %v2571_v16 = vlaneseq (!%p1733_p7)  ;;  %v4616_v17 = vmov (!%p1733_p7), 1983009808   ;;  %v6252_v20 = vld [vmem:[%s7181_s0] sm:$0xff] (!%p1733_p7)  ;;  %v6257_v22 = vld [vmem:[%s7181_s0 + $0x18] sm:$0xff] (!%p1733_p7)  ;;  %vm2721_vm0 = vcmask (!%p1733_p7), 523264  }
 0x19e   : > { %1736 = sbr.rel (%p1733_p7) target bundleno = 1042 (0x412), region = 51  ;;  %v2590_v18 = vunpack.c.l.s4 (!%p1733_p7), %v4616_v17  ;;  %s3739_s22 = sshll.u32 (!%p1733_p7), %s3732_s15, 1 }
 0x19f   : > { %s4559_s28 = smul.u32 (!%p1733_p7), 6272, %s1739_s27  ;;  %v6247_v19 = vshrl.u32 (!%p1733_p7), %v2571_v16, 7  ;;  %p1768_p8 = scmp.lt.s32.totalorder (!%p1733_p7), %s3739_s22, 7 }
 0x1a0   : > { %v2591_v21 = vunpack.c.0.s8 (!%p1733_p7), %v2590_v18 }
 0x1a1   : > { %s6259_s6 = scalar_lea.vmem (!%p1733_p7), [#allocation2], %s4559_s28 }
 0x1a2   : > { %v1786_v23 = vld [vmem:[%s6259_s6 + $0x8] sm:$0xff] (!%p1733_p7)  ;;  %v1788_v24 = vld [vmem:[%s6259_s6 + $0x18] sm:$0xff] (!%p1733_p7)  ;;  %v1785_v28 = vld [vmem:[%s6259_s6] sm:$0xff] (!%p1733_p7)  ;;  %v6268_v30 = vsub.s32 (!%p1733_p7), %v2591_v21, %v6247_v19 }
 0x1a3   : > { %v2170_v25 = vld [vmem:[%s6259_s6 + $0xc08] sm:$0xff] (!%p1733_p7)  ;;  %v3748_v26 = vpack.c.bf16 (!%p1733_p7), %v1788_v24, %v1786_v23  ;;  %v2172_v27 = vld [vmem:[%s6259_s6 + $0xc18] sm:$0xff] (!%p1733_p7)  ;;  %v1787_v29 = vld [vmem:[%s6259_s6 + $0x10] sm:$0xff] (!%p1733_p7) }
 0x1a4   : > { %v4132_v31 = vpack.c.bf16 (!%p1733_p7), %v2172_v27, %v2170_v25  ;;  %v3750_v32 = vpack.c.bf16 (!%p1733_p7), %v1787_v29, %v1785_v28  ;;  %v2169_v33 = vld [vmem:[%s6259_s6 + $0xc00] sm:$0xff] (!%p1733_p7)  ;;  %v2171_v34 = vld [vmem:[%s6259_s6 + $0xc10] sm:$0xff] (!%p1733_p7)  ;;  %v1790_v35 = vld [vmem:[%s6259_s6 + $0x28] sm:$0xff] (!%p1733_p7)  ;;  %v6278_v40 = vrot.slane (!%p1733_p7), %v6252_v20, %v6268_v30  ;;  %v6282_v41 = vrot.slane (!%p1733_p7), %v6257_v22, %v6268_v30 }
 0x1a5   : > { %3749 = vmatprep.subr.bf16.mxu1 %v3748_v26  ;;  %v4134_v36 = vpack.c.bf16 %v2171_v34, %v2169_v33  ;;  %v1792_v37 = vld [vmem:[%s6259_s6 + $0x38] sm:$0xff]  ;;  %v2174_v38 = vld [vmem:[%s6259_s6 + $0xc28] sm:$0xff]  ;;  %v1789_v44 = vld [vmem:[%s6259_s6 + $0x20] sm:$0xff]  ;;  %s7189_s22 = smov (!%p1768_p8, %s3739_s22), 7 }
 0x1a6   : > { %v2176_v39 = vld [vmem:[%s6259_s6 + $0xc38] sm:$0xff]  ;;  %4133 = vmatprep.subr.bf16.mxu0 %v4132_v31  ;;  %3751 = vmatpush1.bf16.msra.mxu1 %v3750_v32  ;;  %v3752_v42 = vpack.c.bf16 %v1792_v37, %v1790_v35  ;;  %v1791_v45 = vld [vmem:[%s6259_s6 + $0x30] sm:$0xff]  ;;  %v2173_v46 = vld [vmem:[%s6259_s6 + $0xc20] sm:$0xff]  ;;  %v2603_v51 = vcombine.high %v6278_v40, %v6278_v40  ;;  %v2654_v52 = vcombine.high %v6282_v41, %v6282_v41  ;;  %s1770_s25 = scalar_lea.vmem %s7183_s2, %s7189_s22  ;;  %s3741_s14 = sshll.u32 %s7189_s22, 1 }
 0x1a7   : > { %v4136_v43 = vpack.c.bf16 %v2176_v39, %v2174_v38  ;;  %4135 = vmatpush1.bf16.msra.mxu0 %v4134_v36  ;;  %v3754_v47 = vpack.c.bf16 %v1791_v45, %v1789_v44  ;;  %v2175_v48 = vld [vmem:[%s6259_s6 + $0xc30] sm:$0xff]  ;;  %v1794_v49 = vld [vmem:[%s6259_s6 + $0x48] sm:$0xff]  ;;  %v1796_v50 = vld [vmem:[%s6259_s6 + $0x58] sm:$0xff]  ;;  %s1776_s27 = scalar_lea.vmem %s7184_s3, %s3741_s14 }
 0x1a8   : > { %3753 = vmatprep.subr.bf16.mxu1 %v3752_v42  ;;  %v4138_v53 = vpack.c.bf16 %v2175_v48, %v2173_v46  ;;  %v3756_v54 = vpack.c.bf16 %v1796_v50, %v1794_v49  ;;  %v2178_v55 = vld [vmem:[%s6259_s6 + $0xc48] sm:$0xff]  ;;  %v2180_v56 = vld [vmem:[%s6259_s6 + $0xc58] sm:$0xff]  ;;  %v1793_v57 = vld [vmem:[%s6259_s6 + $0x40] sm:$0xff]  ;;  %2788 = vmatprep.mubr.f32.mxu1 %v2603_v51 }
 0x1a9   : > { %4137 = vmatprep.subr.bf16.mxu0 %v4136_v43  ;;  %v4140_v58 = vpack.c.bf16 %v2180_v56, %v2178_v55  ;;  %v1795_v59 = vld [vmem:[%s6259_s6 + $0x50] sm:$0xff]  ;;  %v2177_v60 = vld [vmem:[%s6259_s6 + $0xc40] sm:$0xff]  ;;  %3214 = vmatprep.mubr.f32.mxu0 %v2654_v52  ;;  %v1798_v63 = vld [vmem:[%s6259_s6 + $0x68] sm:$0xff] }
 0x1aa   : > { %v2179_v61 = vld [vmem:[%s6259_s6 + $0xc50] sm:$0xff]  ;;  %3755 = vmatpush1.bf16.msra.mxu1 %v3754_v47  ;;  %v3758_v62 = vpack.c.bf16 %v1795_v59, %v1793_v57  ;;  %v1800_v0 = vld [vmem:[%s6259_s6 + $0x78] sm:$0xff]  ;;  %v2182_v1 = vld [vmem:[%s6259_s6 + $0xc68] sm:$0xff] }
 0x1ab   : > { %4139 = vmatpush1.bf16.msra.mxu0 %v4138_v53  ;;  %3757 = vmatprep.subr.bf16.mxu1 %v3756_v54  ;;  %v4142_v2 = vpack.c.bf16 %v2179_v61, %v2177_v60  ;;  %v3760_v3 = vpack.c.bf16 %v1800_v0, %v1798_v63  ;;  %v2184_v4 = vld [vmem:[%s6259_s6 + $0xc78] sm:$0xff]  ;;  %v1797_v5 = vld [vmem:[%s6259_s6 + $0x60] sm:$0xff]  ;;  %v1799_v6 = vld [vmem:[%s6259_s6 + $0x70] sm:$0xff] }
 0x1ac   : > { %4141 = vmatprep.subr.bf16.mxu0 %v4140_v58  ;;  %v4144_v7 = vpack.c.bf16 %v2184_v4, %v2182_v1  ;;  %v2181_v8 = vld [vmem:[%s6259_s6 + $0xc60] sm:$0xff]  ;;  %v2183_v9 = vld [vmem:[%s6259_s6 + $0xc70] sm:$0xff]  ;;  %v1802_v10 = vld [vmem:[%s6259_s6 + $0x88] sm:$0xff]  ;;  %v3762_v14 = vpack.c.bf16 %v1799_v6, %v1797_v5 }
 0x1ad   : > { %v1804_v11 = vld [vmem:[%s6259_s6 + $0x98] sm:$0xff]  ;;  %v2186_v12 = vld [vmem:[%s6259_s6 + $0xc88] sm:$0xff]  ;;  %v4146_v15 = vpack.c.bf16 %v2183_v9, %v2181_v8  ;;  %v1801_v17 = vld [vmem:[%s6259_s6 + $0x80] sm:$0xff] }
 0x1ae   : > { %v2188_v13 = vld [vmem:[%s6259_s6 + $0xc98] sm:$0xff]  ;;  %3759 = vmatpush1.bf16.msra.mxu1 %v3758_v62  ;;  %v3764_v16 = vpack.c.bf16 %v1804_v11, %v1802_v10  ;;  %v1803_v18 = vld [vmem:[%s6259_s6 + $0x90] sm:$0xff]  ;;  %v2185_v21 = vld [vmem:[%s6259_s6 + $0xc80] sm:$0xff] }
 0x1af   : > { %4143 = vmatpush1.bf16.msra.mxu0 %v4142_v2  ;;  %3761 = vmatprep.subr.bf16.mxu1 %v3760_v3  ;;  %v4148_v23 = vpack.c.bf16 %v2188_v13, %v2186_v12  ;;  %v2187_v24 = vld [vmem:[%s6259_s6 + $0xc90] sm:$0xff]  ;;  %v1806_v25 = vld [vmem:[%s6259_s6 + $0xa8] sm:$0xff]  ;;  %v1808_v26 = vld [vmem:[%s6259_s6 + $0xb8] sm:$0xff]  ;;  %v3766_v29 = vpack.c.bf16 %v1803_v18, %v1801_v17 }
 0x1b0   : > { %4145 = vmatprep.subr.bf16.mxu0 %v4144_v7  ;;  %v2190_v27 = vld [vmem:[%s6259_s6 + $0xca8] sm:$0xff]  ;;  %v2192_v28 = vld [vmem:[%s6259_s6 + $0xcb8] sm:$0xff]  ;;  %v4150_v31 = vpack.c.bf16 %v2187_v24, %v2185_v21  ;;  %v3768_v32 = vpack.c.bf16 %v1808_v26, %v1806_v25  ;;  %v1805_v33 = vld [vmem:[%s6259_s6 + $0xa0] sm:$0xff] }
 0x1b1   : > { %v1807_v34 = vld [vmem:[%s6259_s6 + $0xb0] sm:$0xff]  ;;  %v2189_v35 = vld [vmem:[%s6259_s6 + $0xca0] sm:$0xff]  ;;  %v4152_v36 = vpack.c.bf16 %v2192_v28, %v2190_v27  ;;  %v1810_v38 = vld [vmem:[%s6259_s6 + $0xc8] sm:$0xff] }
 0x1b2   : > { %3763 = vmatpush1.bf16.msra.mxu1 %v3762_v14  ;;  %v2191_v37 = vld [vmem:[%s6259_s6 + $0xcb0] sm:$0xff]  ;;  %v1812_v39 = vld [vmem:[%s6259_s6 + $0xd8] sm:$0xff]  ;;  %v2194_v42 = vld [vmem:[%s6259_s6 + $0xcc8] sm:$0xff]  ;;  %v3770_v44 = vpack.c.bf16 %v1807_v34, %v1805_v33 }
 0x1b3   : > { %4147 = vmatpush1.bf16.msra.mxu0 %v4146_v15  ;;  %3765 = vmatprep.subr.bf16.mxu1 %v3764_v16  ;;  %v2196_v43 = vld [vmem:[%s6259_s6 + $0xcd8] sm:$0xff]  ;;  %v4154_v45 = vpack.c.bf16 %v2191_v37, %v2189_v35  ;;  %v3772_v46 = vpack.c.bf16 %v1812_v39, %v1810_v38  ;;  %v1809_v47 = vld [vmem:[%s6259_s6 + $0xc0] sm:$0xff]  ;;  %v1811_v48 = vld [vmem:[%s6259_s6 + $0xd0] sm:$0xff] }
 0x1b4   : > { %4149 = vmatprep.subr.bf16.mxu0 %v4148_v23  ;;  %v2193_v49 = vld [vmem:[%s6259_s6 + $0xcc0] sm:$0xff]  ;;  %v4156_v50 = vpack.c.bf16 %v2196_v43, %v2194_v42  ;;  %v2195_v51 = vld [vmem:[%s6259_s6 + $0xcd0] sm:$0xff]  ;;  %v1814_v52 = vld [vmem:[%s6259_s6 + $0xe8] sm:$0xff]  ;;  %v3774_v56 = vpack.c.bf16 %v1811_v48, %v1809_v47 }
 0x1b5   : > { %v1816_v53 = vld [vmem:[%s6259_s6 + $0xf8] sm:$0xff]  ;;  %v2198_v54 = vld [vmem:[%s6259_s6 + $0xce8] sm:$0xff]  ;;  %v4158_v57 = vpack.c.bf16 %v2195_v51, %v2193_v49  ;;  %v1813_v59 = vld [vmem:[%s6259_s6 + $0xe0] sm:$0xff] }
 0x1b6   : > { %3767 = vmatpush1.bf16.msra.mxu1 %v3766_v29  ;;  %v2200_v55 = vld [vmem:[%s6259_s6 + $0xcf8] sm:$0xff]  ;;  %v3776_v58 = vpack.c.bf16 %v1816_v53, %v1814_v52  ;;  %v1815_v60 = vld [vmem:[%s6259_s6 + $0xf0] sm:$0xff]  ;;  %v2197_v61 = vld [vmem:[%s6259_s6 + $0xce0] sm:$0xff] }
 0x1b7   : > { %4151 = vmatpush1.bf16.msra.mxu0 %v4150_v31  ;;  %3769 = vmatprep.subr.bf16.mxu1 %v3768_v32  ;;  %v4160_v62 = vpack.c.bf16 %v2200_v55, %v2198_v54  ;;  %v2199_v63 = vld [vmem:[%s6259_s6 + $0xcf0] sm:$0xff]  ;;  %v1818_v0 = vld [vmem:[%s6259_s6 + $0x108] sm:$0xff]  ;;  %v1820_v1 = vld [vmem:[%s6259_s6 + $0x118] sm:$0xff]  ;;  %v3778_v4 = vpack.c.bf16 %v1815_v60, %v1813_v59 }
 0x1b8   : > { %4153 = vmatprep.subr.bf16.mxu0 %v4152_v36  ;;  %v2202_v2 = vld [vmem:[%s6259_s6 + $0xd08] sm:$0xff]  ;;  %v2204_v3 = vld [vmem:[%s6259_s6 + $0xd18] sm:$0xff]  ;;  %v4162_v5 = vpack.c.bf16 %v2199_v63, %v2197_v61  ;;  %v3780_v6 = vpack.c.bf16 %v1820_v1, %v1818_v0  ;;  %v1817_v7 = vld [vmem:[%s6259_s6 + $0x100] sm:$0xff] }
 0x1b9   : > { %v1819_v8 = vld [vmem:[%s6259_s6 + $0x110] sm:$0xff]  ;;  %v2201_v9 = vld [vmem:[%s6259_s6 + $0xd00] sm:$0xff]  ;;  %v4164_v10 = vpack.c.bf16 %v2204_v3, %v2202_v2  ;;  %v1822_v12 = vld [vmem:[%s6259_s6 + $0x128] sm:$0xff] }
 0x1ba   : > { %3771 = vmatpush1.bf16.msra.mxu1 %v3770_v44  ;;  %v2203_v11 = vld [vmem:[%s6259_s6 + $0xd10] sm:$0xff]  ;;  %v1824_v13 = vld [vmem:[%s6259_s6 + $0x138] sm:$0xff]  ;;  %v2206_v14 = vld [vmem:[%s6259_s6 + $0xd28] sm:$0xff]  ;;  %v3782_v16 = vpack.c.bf16 %v1819_v8, %v1817_v7 }
 0x1bb   : > { %4155 = vmatpush1.bf16.msra.mxu0 %v4154_v45  ;;  %3773 = vmatprep.subr.bf16.mxu1 %v3772_v46  ;;  %v2208_v15 = vld [vmem:[%s6259_s6 + $0xd38] sm:$0xff]  ;;  %v4166_v17 = vpack.c.bf16 %v2203_v11, %v2201_v9  ;;  %v3784_v18 = vpack.c.bf16 %v1824_v13, %v1822_v12  ;;  %v1821_v21 = vld [vmem:[%s6259_s6 + $0x120] sm:$0xff]  ;;  %v1823_v23 = vld [vmem:[%s6259_s6 + $0x130] sm:$0xff] }
 0x1bc   : > { %4157 = vmatprep.subr.bf16.mxu0 %v4156_v50  ;;  %v2205_v24 = vld [vmem:[%s6259_s6 + $0xd20] sm:$0xff]  ;;  %v4168_v25 = vpack.c.bf16 %v2208_v15, %v2206_v14  ;;  %v2207_v26 = vld [vmem:[%s6259_s6 + $0xd30] sm:$0xff]  ;;  %v1826_v27 = vld [vmem:[%s6259_s6 + $0x148] sm:$0xff]  ;;  %v3786_v32 = vpack.c.bf16 %v1823_v23, %v1821_v21 }
 0x1bd   : > { %v1828_v28 = vld [vmem:[%s6259_s6 + $0x158] sm:$0xff]  ;;  %v2210_v29 = vld [vmem:[%s6259_s6 + $0xd48] sm:$0xff]  ;;  %v4170_v33 = vpack.c.bf16 %v2207_v26, %v2205_v24  ;;  %v1825_v35 = vld [vmem:[%s6259_s6 + $0x140] sm:$0xff] }
 0x1be   : > { %3775 = vmatpush1.bf16.msra.mxu1 %v3774_v56  ;;  %v2212_v31 = vld [vmem:[%s6259_s6 + $0xd58] sm:$0xff]  ;;  %v3788_v34 = vpack.c.bf16 %v1828_v28, %v1826_v27  ;;  %v1827_v36 = vld [vmem:[%s6259_s6 + $0x150] sm:$0xff]  ;;  %v2209_v37 = vld [vmem:[%s6259_s6 + $0xd40] sm:$0xff] }
 0x1bf   : > { %4159 = vmatpush1.bf16.msra.mxu0 %v4158_v57  ;;  %3777 = vmatprep.subr.bf16.mxu1 %v3776_v58  ;;  %v4172_v38 = vpack.c.bf16 %v2212_v31, %v2210_v29  ;;  %v2211_v39 = vld [vmem:[%s6259_s6 + $0xd50] sm:$0xff]  ;;  %v1830_v42 = vld [vmem:[%s6259_s6 + $0x168] sm:$0xff]  ;;  %v1832_v43 = vld [vmem:[%s6259_s6 + $0x178] sm:$0xff]  ;;  %v3790_v46 = vpack.c.bf16 %v1827_v36, %v1825_v35 }
 0x1c0   : > { %4161 = vmatprep.subr.bf16.mxu0 %v4160_v62  ;;  %v2214_v44 = vld [vmem:[%s6259_s6 + $0xd68] sm:$0xff]  ;;  %v2216_v45 = vld [vmem:[%s6259_s6 + $0xd78] sm:$0xff]  ;;  %v4174_v47 = vpack.c.bf16 %v2211_v39, %v2209_v37  ;;  %v3792_v48 = vpack.c.bf16 %v1832_v43, %v1830_v42  ;;  %v1829_v49 = vld [vmem:[%s6259_s6 + $0x160] sm:$0xff] }
 0x1c1   : > { %v1831_v50 = vld [vmem:[%s6259_s6 + $0x170] sm:$0xff]  ;;  %v2213_v51 = vld [vmem:[%s6259_s6 + $0xd60] sm:$0xff]  ;;  %v4176_v52 = vpack.c.bf16 %v2216_v45, %v2214_v44  ;;  %v1834_v54 = vld [vmem:[%s6259_s6 + $0x188] sm:$0xff]  ;;  %v2588_v44 = vcombine.high %v6252_v20, %v6252_v20 }
 0x1c2   : > { %3779 = vmatpush1.bf16.msra.mxu1 %v3778_v4  ;;  %v2215_v53 = vld [vmem:[%s6259_s6 + $0xd70] sm:$0xff]  ;;  %v1836_v55 = vld [vmem:[%s6259_s6 + $0x198] sm:$0xff]  ;;  %v2218_v56 = vld [vmem:[%s6259_s6 + $0xd88] sm:$0xff]  ;;  %v3794_v58 = vpack.c.bf16 %v1831_v50, %v1829_v49 }
 0x1c3   : > { %4163 = vmatpush1.bf16.msra.mxu0 %v4162_v5  ;;  %3781 = vmatprep.subr.bf16.mxu1 %v3780_v6  ;;  %v2220_v57 = vld [vmem:[%s6259_s6 + $0xd98] sm:$0xff]  ;;  %v4178_v59 = vpack.c.bf16 %v2215_v53, %v2213_v51  ;;  %v3796_v60 = vpack.c.bf16 %v1836_v55, %v1834_v54  ;;  %v1833_v61 = vld [vmem:[%s6259_s6 + $0x180] sm:$0xff]  ;;  %v1835_v62 = vld [vmem:[%s6259_s6 + $0x190] sm:$0xff] }
 0x1c4   : > { %4165 = vmatprep.subr.bf16.mxu0 %v4164_v10  ;;  %v2217_v63 = vld [vmem:[%s6259_s6 + $0xd80] sm:$0xff]  ;;  %v4180_v0 = vpack.c.bf16 %v2220_v57, %v2218_v56  ;;  %v2219_v1 = vld [vmem:[%s6259_s6 + $0xd90] sm:$0xff]  ;;  %v1838_v2 = vld [vmem:[%s6259_s6 + $0x1a8] sm:$0xff]  ;;  %v3798_v6 = vpack.c.bf16 %v1835_v62, %v1833_v61 }
 0x1c5   : > { %v1840_v3 = vld [vmem:[%s6259_s6 + $0x1b8] sm:$0xff]  ;;  %v2222_v4 = vld [vmem:[%s6259_s6 + $0xda8] sm:$0xff]  ;;  %v4182_v7 = vpack.c.bf16 %v2219_v1, %v2217_v63  ;;  %v1837_v9 = vld [vmem:[%s6259_s6 + $0x1a0] sm:$0xff] }
 0x1c6   : > { %3783 = vmatpush1.bf16.msra.mxu1 %v3782_v16  ;;  %v2224_v5 = vld [vmem:[%s6259_s6 + $0xdb8] sm:$0xff]  ;;  %v3800_v8 = vpack.c.bf16 %v1840_v3, %v1838_v2  ;;  %v1839_v10 = vld [vmem:[%s6259_s6 + $0x1b0] sm:$0xff]  ;;  %v2221_v11 = vld [vmem:[%s6259_s6 + $0xda0] sm:$0xff] }
 0x1c7   : > { %4167 = vmatpush1.bf16.msra.mxu0 %v4166_v17  ;;  %3785 = vmatprep.subr.bf16.mxu1 %v3784_v18  ;;  %v4184_v12 = vpack.c.bf16 %v2224_v5, %v2222_v4  ;;  %v2223_v13 = vld [vmem:[%s6259_s6 + $0xdb0] sm:$0xff]  ;;  %v1842_v14 = vld [vmem:[%s6259_s6 + $0x1c8] sm:$0xff]  ;;  %v1844_v15 = vld [vmem:[%s6259_s6 + $0x1d8] sm:$0xff]  ;;  %v3802_v18 = vpack.c.bf16 %v1839_v10, %v1837_v9 }
 0x1c8   : > { %4169 = vmatprep.subr.bf16.mxu0 %v4168_v25  ;;  %v2226_v16 = vld [vmem:[%s6259_s6 + $0xdc8] sm:$0xff]  ;;  %v2228_v17 = vld [vmem:[%s6259_s6 + $0xdd8] sm:$0xff]  ;;  %v4186_v21 = vpack.c.bf16 %v2223_v13, %v2221_v11  ;;  %v3804_v23 = vpack.c.bf16 %v1844_v15, %v1842_v14  ;;  %v1841_v24 = vld [vmem:[%s6259_s6 + $0x1c0] sm:$0xff] }
 0x1c9   : > { %v1843_v25 = vld [vmem:[%s6259_s6 + $0x1d0] sm:$0xff]  ;;  %v2225_v26 = vld [vmem:[%s6259_s6 + $0xdc0] sm:$0xff]  ;;  %v4188_v27 = vpack.c.bf16 %v2228_v17, %v2226_v16  ;;  %v1846_v29 = vld [vmem:[%s6259_s6 + $0x1e8] sm:$0xff] }
 0x1ca   : > { %3787 = vmatpush1.bf16.msra.mxu1 %v3786_v32  ;;  %v2227_v28 = vld [vmem:[%s6259_s6 + $0xdd0] sm:$0xff]  ;;  %v1848_v31 = vld [vmem:[%s6259_s6 + $0x1f8] sm:$0xff]  ;;  %v2230_v32 = vld [vmem:[%s6259_s6 + $0xde8] sm:$0xff] }
 0x1cb   : > { %4171 = vmatpush1.bf16.msra.mxu0 %v4170_v33  ;;  %3789 = vmatprep.subr.bf16.mxu1 %v3788_v34  ;;  %v2232_v33 = vld [vmem:[%s6259_s6 + $0xdf8] sm:$0xff]  ;;  %v3806_v34 = vpack.c.bf16 %v1843_v25, %v1841_v24  ;;  %v4190_v35 = vpack.c.bf16 %v2227_v28, %v2225_v26  ;;  %v3808_v36 = vpack.c.bf16 %v1848_v31, %v1846_v29  ;;  %v1845_v37 = vld [vmem:[%s6259_s6 + $0x1e0] sm:$0xff]  ;;  %v2231_v43 = vld [vmem:[%s6259_s6 + $0xdf0] sm:$0xff] }
 0x1cc   : > { %4173 = vmatprep.subr.bf16.mxu0 %v4172_v38  ;;  %v1847_v38 = vld [vmem:[%s6259_s6 + $0x1f0] sm:$0xff]  ;;  %v2229_v39 = vld [vmem:[%s6259_s6 + $0xde0] sm:$0xff]  ;;  %v4192_v42 = vpack.c.bf16 %v2232_v33, %v2230_v32  ;;  %v1850_v45 = vld [vmem:[%s6259_s6 + $0x208] sm:$0xff] }
 0x1cd   : > { %v2236_v49 = vld [vmem:[%s6259_s6 + $0xe18] sm:$0xff]  ;;  %v3810_v50 = vpack.c.bf16 %v1847_v38, %v1845_v37  ;;  %v4194_v51 = vpack.c.bf16 %v2231_v43, %v2229_v39  ;;  %v1849_v53 = vld [vmem:[%s6259_s6 + $0x200] sm:$0xff]  ;;  %v1851_v20 = vld [vmem:[%s6259_s6 + $0x210] sm:$0xff] }
 0x1ce   : > { %3791 = vmatpush1.bf16.msra.mxu1 %v3790_v46  ;;  %v1852_v46 = vld [vmem:[%s6259_s6 + $0x218] sm:$0xff]  ;;  %v2233_v54 = vld [vmem:[%s6259_s6 + $0xe00] sm:$0xff]  ;;  %v1854_v56 = vld [vmem:[%s6259_s6 + $0x228] sm:$0xff]  ;;  %v3814_v62 = vpack.c.bf16 %v1851_v20, %v1849_v53 }
 0x1cf   : > { %4175 = vmatpush1.bf16.msra.mxu0 %v4174_v47  ;;  %3793 = vmatprep.subr.bf16.mxu1 %v3792_v48  ;;  %v2639_v47 = vcombine.high %v6257_v22, %v6257_v22  ;;  %v2234_v48 = vld [vmem:[%s6259_s6 + $0xe08] sm:$0xff]  ;;  %v2235_v22 = vld [vmem:[%s6259_s6 + $0xe10] sm:$0xff]  ;;  %v1856_v57 = vld [vmem:[%s6259_s6 + $0x238] sm:$0xff] }
 0x1d0   : > { %4177 = vmatprep.subr.bf16.mxu0 %v4176_v52  ;;  %v3812_v52 = vpack.c.bf16 %v1852_v46, %v1850_v45  ;;  %v4196_v55 = vpack.c.bf16 %v2236_v49, %v2234_v48  ;;  %v4198_v63 = vpack.c.bf16 %v2235_v22, %v2233_v54  ;;  %v1853_v1 = vld [vmem:[%s6259_s6 + $0x220] sm:$0xff]  ;;  %v1855_v2 = vld [vmem:[%s6259_s6 + $0x230] sm:$0xff]  ;;  %v2242_v9 = vld [vmem:[%s6259_s6 + $0xe48] sm:$0xff] }
 0x1d1   : > { %v6424_v61 = vrot.slane %v2639_v47, %v6268_v30  ;;  %v2237_v3 = vld [vmem:[%s6259_s6 + $0xe20] sm:$0xff]  ;;  %v2239_v5 = vld [vmem:[%s6259_s6 + $0xe30] sm:$0xff]  ;;  %v2244_v10 = vld [vmem:[%s6259_s6 + $0xe58] sm:$0xff] }
 0x1d2   : > { %3795 = vmatpush1.bf16.msra.mxu1 %v3794_v58  ;;  %v6419_v58 = vrot.slane %v2588_v44, %v6268_v30  ;;  %v4202_v13 = vpack.c.bf16 %v2239_v5, %v2237_v3  ;;  %v1857_v15 = vld [vmem:[%s6259_s6 + $0x240] sm:$0xff]  ;;  %v4204_v17 = vpack.c.bf16 %v2244_v10, %v2242_v9  ;;  %v2248_v24 = vld [vmem:[%s6259_s6 + $0xe78] sm:$0xff]  ;;  %v1863_v29 = vld [vmem:[%s6259_s6 + $0x270] sm:$0xff] }
 0x1d3   : > { %4179 = vmatpush1.bf16.msra.mxu0 %v4178_v59  ;;  %3797 = vmatprep.subr.bf16.mxu1 %v3796_v60  ;;  %v2238_v59 = vld [vmem:[%s6259_s6 + $0xe28] sm:$0xff]  ;;  %v2240_v60 = vld [vmem:[%s6259_s6 + $0xe38] sm:$0xff]  ;;  %v2655_v11 = vcombine.high %v6424_v61, %v6424_v61  ;;  %v2241_v16 = vld [vmem:[%s6259_s6 + $0xe40] sm:$0xff] }
 0x1d4   : > { %4181 = vmatprep.subr.bf16.mxu0 %v4180_v0  ;;  %v3816_v0 = vpack.c.bf16 %v1856_v57, %v1854_v56  ;;  %v4200_v4 = vpack.c.bf16 %v2240_v60, %v2238_v59  ;;  %v1861_v28 = vld [vmem:[%s6259_s6 + $0x260] sm:$0xff]  ;;  %v2247_v33 = vld [vmem:[%s6259_s6 + $0xe70] sm:$0xff]  ;;  %v2252_v37 = vld [vmem:[%s6259_s6 + $0xe98] sm:$0xff] }
 0x1d5   : > { %v2245_v31 = vld [vmem:[%s6259_s6 + $0xe60] sm:$0xff]  ;;  %v3826_v38 = vpack.c.bf16 %v1863_v29, %v1861_v28  ;;  %v1867_v44 = vld [vmem:[%s6259_s6 + $0x290] sm:$0xff]  ;;  %v1870_v48 = vld [vmem:[%s6259_s6 + $0x2a8] sm:$0xff] }
 0x1d6   : > { %3799 = vmatpush1.bf16.msra.mxu1 %v3798_v6  ;;  %v1858_v6 = vld [vmem:[%s6259_s6 + $0x248] sm:$0xff]  ;;  %v4210_v39 = vpack.c.bf16 %v2247_v33, %v2245_v31  ;;  %v1865_v43 = vld [vmem:[%s6259_s6 + $0x280] sm:$0xff]  ;;  %v2251_v47 = vld [vmem:[%s6259_s6 + $0xe90] sm:$0xff] }
 0x1d7   : > { %4183 = vmatpush1.bf16.msra.mxu0 %v4182_v7  ;;  %3801 = vmatprep.subr.bf16.mxu1 %v3800_v8  ;;  %v1860_v7 = vld [vmem:[%s6259_s6 + $0x258] sm:$0xff]  ;;  %v2604_v8 = vcombine.high %v6419_v58, %v6419_v58  ;;  %v2249_v45 = vld [vmem:[%s6259_s6 + $0xe80] sm:$0xff]  ;;  %v2255_v57 = vld [vmem:[%s6259_s6 + $0xeb0] sm:$0xff] }
 0x1d8   : > { %4185 = vmatprep.subr.bf16.mxu0 %v4184_v12  ;;  %v3818_v12 = vpack.c.bf16 %v1855_v2, %v1853_v1  ;;  %v3820_v14 = vpack.c.bf16 %v1860_v7, %v1858_v6  ;;  %v1872_v49 = vld [vmem:[%s6259_s6 + $0x2b8] sm:$0xff]  ;;  %v4214_v53 = vpack.c.bf16 %v2251_v47, %v2249_v45  ;;  %v1869_v54 = vld [vmem:[%s6259_s6 + $0x2a0] sm:$0xff]  ;;  %v1874_v59 = vld [vmem:[%s6259_s6 + $0x2c8] sm:$0xff] }
 0x1d9   : > { %v3832_v20 = vpack.c.bf16 %v1872_v49, %v1870_v48  ;;  %v2253_v22 = vld [vmem:[%s6259_s6 + $0xea0] sm:$0xff]  ;;  %v1876_v60 = vld [vmem:[%s6259_s6 + $0x2d8] sm:$0xff]  ;;  %v2259_v7 = vld [vmem:[%s6259_s6 + $0xed0] sm:$0xff] }
 0x1da   : > { %3803 = vmatpush1.bf16.msra.mxu1 %v3802_v18  ;;  %v2243_v18 = vld [vmem:[%s6259_s6 + $0xe50] sm:$0xff]  ;;  %v4218_v1 = vpack.c.bf16 %v2255_v57, %v2253_v22  ;;  %v3836_v2 = vpack.c.bf16 %v1876_v60, %v1874_v59  ;;  %v1873_v3 = vld [vmem:[%s6259_s6 + $0x2c0] sm:$0xff]  ;;  %v1880_v9 = vld [vmem:[%s6259_s6 + $0x2f8] sm:$0xff] }
 0x1db   : > { %4187 = vmatpush1.bf16.msra.mxu0 %v4186_v21  ;;  %3805 = vmatprep.subr.bf16.mxu1 %v3804_v23  ;;  %v1862_v21 = vld [vmem:[%s6259_s6 + $0x268] sm:$0xff]  ;;  %v1864_v23 = vld [vmem:[%s6259_s6 + $0x278] sm:$0xff]  ;;  %v4206_v26 = vpack.c.bf16 %v2243_v18, %v2241_v16  ;;  %v2257_v5 = vld [vmem:[%s6259_s6 + $0xec0] sm:$0xff] }
 0x1dc   : > { %4189 = vmatprep.subr.bf16.mxu0 %v4188_v27  ;;  %v3824_v27 = vpack.c.bf16 %v1864_v23, %v1862_v21  ;;  %v2262_v10 = vld [vmem:[%s6259_s6 + $0xee8] sm:$0xff]  ;;  %v2261_v16 = vld [vmem:[%s6259_s6 + $0xee0] sm:$0xff]  ;;  %v2263_v18 = vld [vmem:[%s6259_s6 + $0xef0] sm:$0xff] }
 0x1dd   : > { %v1882_v21 = vld [vmem:[%s6259_s6 + $0x308] sm:$0xff]  ;;  %v1884_v23 = vld [vmem:[%s6259_s6 + $0x318] sm:$0xff]  ;;  %v1881_v28 = vld [vmem:[%s6259_s6 + $0x300] sm:$0xff] }
 0x1de   : > { %3807 = vmatpush1.bf16.msra.mxu1 %v3806_v34  ;;  %v1866_v34 = vld [vmem:[%s6259_s6 + $0x288] sm:$0xff]  ;;  %v1883_v29 = vld [vmem:[%s6259_s6 + $0x310] sm:$0xff]  ;;  %v2265_v31 = vld [vmem:[%s6259_s6 + $0xf00] sm:$0xff] }
 0x1df   : > { %4191 = vmatpush1.bf16.msra.mxu0 %v4190_v35  ;;  %3809 = vmatprep.subr.bf16.mxu1 %v3808_v36  ;;  %v1868_v35 = vld [vmem:[%s6259_s6 + $0x298] sm:$0xff]  ;;  %v2250_v36 = vld [vmem:[%s6259_s6 + $0xe88] sm:$0xff]  ;;  %v2267_v33 = vld [vmem:[%s6259_s6 + $0xf10] sm:$0xff] }
 0x1e0   : > { %4193 = vmatprep.subr.bf16.mxu0 %v4192_v42  ;;  %v3828_v42 = vpack.c.bf16 %v1868_v35, %v1866_v34  ;;  %v4212_v46 = vpack.c.bf16 %v2252_v37, %v2250_v36  ;;  %v1886_v34 = vld [vmem:[%s6259_s6 + $0x328] sm:$0xff]  ;;  %v1888_v35 = vld [vmem:[%s6259_s6 + $0x338] sm:$0xff]  ;;  %v2269_v45 = vld [vmem:[%s6259_s6 + $0xf20] sm:$0xff] }
 0x1e1   : > { %v2270_v36 = vld [vmem:[%s6259_s6 + $0xf28] sm:$0xff]  ;;  %v2272_v37 = vld [vmem:[%s6259_s6 + $0xf38] sm:$0xff]  ;;  %v2271_v47 = vld [vmem:[%s6259_s6 + $0xf30] sm:$0xff] }
 0x1e2   : > { %3811 = vmatpush1.bf16.msra.mxu1 %v3810_v50  ;;  %v2254_v50 = vld [vmem:[%s6259_s6 + $0xea8] sm:$0xff]  ;;  %v1892_v49 = vld [vmem:[%s6259_s6 + $0x358] sm:$0xff]  ;;  %v2273_v22 = vld [vmem:[%s6259_s6 + $0xf40] sm:$0xff] }
 0x1e3   : > { %4195 = vmatpush1.bf16.msra.mxu0 %v4194_v51  ;;  %3813 = vmatprep.subr.bf16.mxu1 %v3812_v52  ;;  %v2256_v51 = vld [vmem:[%s6259_s6 + $0xeb8] sm:$0xff]  ;;  %v3830_v52 = vpack.c.bf16 %v1867_v44, %v1865_v43  ;;  %v1885_v43 = vld [vmem:[%s6259_s6 + $0x320] sm:$0xff]  ;;  %v1887_v44 = vld [vmem:[%s6259_s6 + $0x330] sm:$0xff] }
 0x1e4   : > { %4197 = vmatprep.subr.bf16.mxu0 %v4196_v55  ;;  %v1871_v55 = vld [vmem:[%s6259_s6 + $0x2b0] sm:$0xff]  ;;  %v4216_v56 = vpack.c.bf16 %v2256_v51, %v2254_v50  ;;  %v1890_v48 = vld [vmem:[%s6259_s6 + $0x348] sm:$0xff]  ;;  %v2276_v51 = vld [vmem:[%s6259_s6 + $0xf58] sm:$0xff] }
 0x1e5   : > { %2789 = vmatmul.mubr.f32.vlgmr.msra.gmra.mrb[0].mxu1 %v6278_v40  ;;  %v1859_v40 = vld [vmem:[%s6259_s6 + $0x250] sm:$0xff]  ;;  %v2274_v50 = vld [vmem:[%s6259_s6 + $0xf48] sm:$0xff]  ;;  %v1896_v60 = vld [vmem:[%s6259_s6 + $0x378] sm:$0xff] }
 0x1e6   : > { %3815 = vmatpush1.bf16.msra.mxu1 %v3814_v62  ;;  %3215 = vmatmul.mubr.f32.vlgmr.msra.gmra.mrb[0].mxu0 %v6282_v41  ;;  %v2246_v41 = vld [vmem:[%s6259_s6 + $0xe68] sm:$0xff]  ;;  %v3822_v25 = vpack.c.bf16 %v1859_v40, %v1857_v15  ;;  %v1877_v15 = vld [vmem:[%s6259_s6 + $0x2e0] sm:$0xff]  ;;  %v1879_v40 = vld [vmem:[%s6259_s6 + $0x2f0] sm:$0xff] }
 0x1e7   : > { %4199 = vmatpush1.bf16.msra.mxu0 %v4198_v63  ;;  %3817 = vmatprep.subr.bf16.mxu1 %v3816_v0  ;;  %v4208_v32 = vpack.c.bf16 %v2248_v24, %v2246_v41  ;;  %v2258_v62 = vld [vmem:[%s6259_s6 + $0xec8] sm:$0xff]  ;;  %v2260_v63 = vld [vmem:[%s6259_s6 + $0xed8] sm:$0xff]  ;;  %v3834_v0 = vpack.c.bf16 %v1871_v55, %v1869_v54  ;;  %v1889_v54 = vld [vmem:[%s6259_s6 + $0x340] sm:$0xff] }
 0x1e8   : > { %4201 = vmatprep.subr.bf16.mxu0 %v4200_v4  ;;  %2859 = vmatprep.mubr.f32.mxu1 %v2604_v8  ;;  %v1875_v4 = vld [vmem:[%s6259_s6 + $0x2d0] sm:$0xff]  ;;  %v4220_v6 = vpack.c.bf16 %v2260_v63, %v2258_v62  ;;  %v1878_v8 = vld [vmem:[%s6259_s6 + $0x2e8] sm:$0xff]  ;;  %v2268_v24 = vld [vmem:[%s6259_s6 + $0xf18] sm:$0xff] }
 0x1e9   : > { %3285 = vmatprep.mubr.f32.mxu0 %v2655_v11  ;;  %v2264_v11 = vld [vmem:[%s6259_s6 + $0xef8] sm:$0xff]  ;;  %v2266_v41 = vld [vmem:[%s6259_s6 + $0xf08] sm:$0xff]  ;;  %v1891_v55 = vld [vmem:[%s6259_s6 + $0x350] sm:$0xff] }
 0x1ea   : > { %3819 = vmatpush1.bf16.msra.mxu1 %v3818_v12  ;;  %v3838_v12 = vpack.c.bf16 %v1875_v4, %v1873_v3  ;;  %v2275_v57 = vld [vmem:[%s6259_s6 + $0xf50] sm:$0xff]  ;;  %v1894_v59 = vld [vmem:[%s6259_s6 + $0x368] sm:$0xff]  ;;  %v2280_v63 = vld [vmem:[%s6259_s6 + $0xf78] sm:$0xff] }
 0x1eb   : > { %4203 = vmatpush1.bf16.msra.mxu0 %v4202_v13  ;;  %3821 = vmatprep.subr.bf16.mxu1 %v3820_v14  ;;  %v4222_v13 = vpack.c.bf16 %v2259_v7, %v2257_v5  ;;  %v3840_v14 = vpack.c.bf16 %v1880_v9, %v1878_v8  ;;  %v2278_v62 = vld [vmem:[%s6259_s6 + $0xf68] sm:$0xff]  ;;  %v1893_v3 = vld [vmem:[%s6259_s6 + $0x360] sm:$0xff]  ;;  %v1895_v4 = vld [vmem:[%s6259_s6 + $0x370] sm:$0xff] }
 0x1ec   : > { %4205 = vmatprep.subr.bf16.mxu0 %v4204_v17  ;;  %v4224_v17 = vpack.c.bf16 %v2264_v11, %v2262_v10  ;;  %v2277_v5 = vld [vmem:[%s6259_s6 + $0xf60] sm:$0xff]  ;;  %v2279_v7 = vld [vmem:[%s6259_s6 + $0xf70] sm:$0xff]  ;;  %v1898_v8 = vld [vmem:[%s6259_s6 + $0x388] sm:$0xff] }
 0x1ed   : > { %v1900_v9 = vld [vmem:[%s6259_s6 + $0x398] sm:$0xff]  ;;  %v2282_v10 = vld [vmem:[%s6259_s6 + $0xf88] sm:$0xff] }
 0x1ee   : > { %3823 = vmatpush1.bf16.msra.mxu1 %v3822_v25  ;;  %v3842_v25 = vpack.c.bf16 %v1879_v40, %v1877_v15  ;;  %v2284_v11 = vld [vmem:[%s6259_s6 + $0xf98] sm:$0xff]  ;;  %v1897_v15 = vld [vmem:[%s6259_s6 + $0x380] sm:$0xff]  ;;  %v1899_v40 = vld [vmem:[%s6259_s6 + $0x390] sm:$0xff] }
 0x1ef   : > { %4207 = vmatpush1.bf16.msra.mxu0 %v4206_v26  ;;  %3825 = vmatprep.subr.bf16.mxu1 %v3824_v27  ;;  %v4226_v26 = vpack.c.bf16 %v2263_v18, %v2261_v16  ;;  %v3844_v27 = vpack.c.bf16 %v1884_v23, %v1882_v21  ;;  %v2281_v16 = vld [vmem:[%s6259_s6 + $0xf80] sm:$0xff]  ;;  %v2283_v18 = vld [vmem:[%s6259_s6 + $0xf90] sm:$0xff]  ;;  %v1902_v21 = vld [vmem:[%s6259_s6 + $0x3a8] sm:$0xff] }
 0x1f0   : > { %4209 = vmatprep.subr.bf16.mxu0 %v4208_v32  ;;  %v4228_v32 = vpack.c.bf16 %v2268_v24, %v2266_v41  ;;  %v1904_v23 = vld [vmem:[%s6259_s6 + $0x3b8] sm:$0xff]  ;;  %v2286_v41 = vld [vmem:[%s6259_s6 + $0xfa8] sm:$0xff] }
 0x1f1   : > { %v2288_v24 = vld [vmem:[%s6259_s6 + $0xfb8] sm:$0xff] }
 0x1f2   : > { %3827 = vmatpush1.bf16.msra.mxu1 %v3826_v38  ;;  %v3846_v38 = vpack.c.bf16 %v1883_v29, %v1881_v28  ;;  %v1901_v28 = vld [vmem:[%s6259_s6 + $0x3a0] sm:$0xff]  ;;  %v1903_v29 = vld [vmem:[%s6259_s6 + $0x3b0] sm:$0xff] }
 0x1f3   : > { %4211 = vmatpush1.bf16.msra.mxu0 %v4210_v39  ;;  %3829 = vmatprep.subr.bf16.mxu1 %v3828_v42  ;;  %v4230_v39 = vpack.c.bf16 %v2267_v33, %v2265_v31  ;;  %v3848_v42 = vpack.c.bf16 %v1888_v35, %v1886_v34  ;;  %v2285_v31 = vld [vmem:[%s6259_s6 + $0xfa0] sm:$0xff]  ;;  %v2287_v33 = vld [vmem:[%s6259_s6 + $0xfb0] sm:$0xff]  ;;  %v1906_v34 = vld [vmem:[%s6259_s6 + $0x3c8] sm:$0xff] }
 0x1f4   : > { %4213 = vmatprep.subr.bf16.mxu0 %v4212_v46  ;;  %v4232_v46 = vpack.c.bf16 %v2272_v37, %v2270_v36  ;;  %v1908_v35 = vld [vmem:[%s6259_s6 + $0x3d8] sm:$0xff]  ;;  %v2290_v36 = vld [vmem:[%s6259_s6 + $0xfc8] sm:$0xff] }
 0x1f5   : > { %v2292_v37 = vld [vmem:[%s6259_s6 + $0xfd8] sm:$0xff] }
 0x1f6   : > { %3831 = vmatpush1.bf16.msra.mxu1 %v3830_v52  ;;  %v3850_v52 = vpack.c.bf16 %v1887_v44, %v1885_v43  ;;  %v1905_v43 = vld [vmem:[%s6259_s6 + $0x3c0] sm:$0xff]  ;;  %v1907_v44 = vld [vmem:[%s6259_s6 + $0x3d0] sm:$0xff] }
 0x1f7   : > { %4215 = vmatpush1.bf16.msra.mxu0 %v4214_v53  ;;  %3833 = vmatprep.subr.bf16.mxu1 %v3832_v20  ;;  %v4234_v53 = vpack.c.bf16 %v2271_v47, %v2269_v45  ;;  %v3852_v20 = vpack.c.bf16 %v1892_v49, %v1890_v48  ;;  %v2289_v45 = vld [vmem:[%s6259_s6 + $0xfc0] sm:$0xff]  ;;  %v2291_v47 = vld [vmem:[%s6259_s6 + $0xfd0] sm:$0xff]  ;;  %v1910_v48 = vld [vmem:[%s6259_s6 + $0x3e8] sm:$0xff] }
 0x1f8   : > { %4217 = vmatprep.subr.bf16.mxu0 %v4216_v56  ;;  %v4236_v56 = vpack.c.bf16 %v2276_v51, %v2274_v50  ;;  %v1912_v49 = vld [vmem:[%s6259_s6 + $0x3f8] sm:$0xff]  ;;  %v2294_v50 = vld [vmem:[%s6259_s6 + $0xfe8] sm:$0xff] }
 0x1f9   : > { %v2296_v51 = vld [vmem:[%s6259_s6 + $0xff8] sm:$0xff] }
 0x1fa   : > { %3835 = vmatpush1.bf16.msra.mxu1 %v3834_v0  ;;  %v3854_v0 = vpack.c.bf16 %v1891_v55, %v1889_v54  ;;  %v1909_v54 = vld [vmem:[%s6259_s6 + $0x3e0] sm:$0xff]  ;;  %v1911_v55 = vld [vmem:[%s6259_s6 + $0x3f0] sm:$0xff] }
 0x1fb   : > { %4219 = vmatpush1.bf16.msra.mxu0 %v4218_v1  ;;  %3837 = vmatprep.subr.bf16.mxu1 %v3836_v2  ;;  %v4238_v1 = vpack.c.bf16 %v2275_v57, %v2273_v22  ;;  %v3856_v2 = vpack.c.bf16 %v1896_v60, %v1894_v59  ;;  %v2293_v22 = vld [vmem:[%s6259_s6 + $0xfe0] sm:$0xff]  ;;  %v2295_v57 = vld [vmem:[%s6259_s6 + $0xff0] sm:$0xff]  ;;  %v1914_v59 = vld [vmem:[%s6259_s6 + $0x408] sm:$0xff] }
 0x1fc   : > { %4221 = vmatprep.subr.bf16.mxu0 %v4220_v6  ;;  %v4240_v6 = vpack.c.bf16 %v2280_v63, %v2278_v62  ;;  %v1916_v60 = vld [vmem:[%s6259_s6 + $0x418] sm:$0xff]  ;;  %v2298_v62 = vld [vmem:[%s6259_s6 + $0x1008] sm:$0xff] }
 0x1fd   : > { %v2300_v63 = vld [vmem:[%s6259_s6 + $0x1018] sm:$0xff] }
 0x1fe   : > { %3839 = vmatpush1.bf16.msra.mxu1 %v3838_v12  ;;  %v3858_v12 = vpack.c.bf16 %v1895_v4, %v1893_v3  ;;  %v1913_v3 = vld [vmem:[%s6259_s6 + $0x400] sm:$0xff]  ;;  %v1915_v4 = vld [vmem:[%s6259_s6 + $0x410] sm:$0xff] }
 0x1ff   : > { %4223 = vmatpush1.bf16.msra.mxu0 %v4222_v13  ;;  %3841 = vmatprep.subr.bf16.mxu1 %v3840_v14  ;;  %v4242_v13 = vpack.c.bf16 %v2279_v7, %v2277_v5  ;;  %v3860_v14 = vpack.c.bf16 %v1900_v9, %v1898_v8  ;;  %v2297_v5 = vld [vmem:[%s6259_s6 + $0x1000] sm:$0xff]  ;;  %v2299_v7 = vld [vmem:[%s6259_s6 + $0x1010] sm:$0xff]  ;;  %v1918_v8 = vld [vmem:[%s6259_s6 + $0x428] sm:$0xff] }
 0x200   : > { %4225 = vmatprep.subr.bf16.mxu0 %v4224_v17  ;;  %v4244_v17 = vpack.c.bf16 %v2284_v11, %v2282_v10  ;;  %v1920_v9 = vld [vmem:[%s6259_s6 + $0x438] sm:$0xff]  ;;  %v2302_v10 = vld [vmem:[%s6259_s6 + $0x1028] sm:$0xff] }
 0x201   : > { %v2304_v11 = vld [vmem:[%s6259_s6 + $0x1038] sm:$0xff] }
 0x202   : > { %3843 = vmatpush1.bf16.msra.mxu1 %v3842_v25  ;;  %v3862_v25 = vpack.c.bf16 %v1899_v40, %v1897_v15  ;;  %v4262_v15 = vpack.c.bf16 %v2299_v7, %v2297_v5  ;;  %v3880_v40 = vpack.c.bf16 %v1920_v9, %v1918_v8  ;;  %v1933_v7 = vld [vmem:[%s6259_s6 + $0x4a0] sm:$0xff]  ;;  %v1935_v8 = vld [vmem:[%s6259_s6 + $0x4b0] sm:$0xff] }
 0x203   : > { %4227 = vmatpush1.bf16.msra.mxu0 %v4226_v26  ;;  %3845 = vmatprep.subr.bf16.mxu1 %v3844_v27  ;;  %v4246_v26 = vpack.c.bf16 %v2283_v18, %v2281_v16  ;;  %v3864_v27 = vpack.c.bf16 %v1904_v23, %v1902_v21  ;;  %v1919_v16 = vld [vmem:[%s6259_s6 + $0x430] sm:$0xff]  ;;  %v6575_v21 = vld [vmem:[%s7181_s0 + $0x20] sm:$0xff]  ;;  %v4264_v23 = vpack.c.bf16 %v2304_v11, %v2302_v10 }
 0x204   : > { %4229 = vmatprep.subr.bf16.mxu0 %v4228_v32  ;;  %v4248_v32 = vpack.c.bf16 %v2288_v24, %v2286_v41  ;;  %v2303_v41 = vld [vmem:[%s6259_s6 + $0x1030] sm:$0xff]  ;;  %v1922_v24 = vld [vmem:[%s6259_s6 + $0x448] sm:$0xff]  ;;  %v2317_v9 = vld [vmem:[%s6259_s6 + $0x10a0] sm:$0xff] }
 0x205   : > { %v2319_v11 = vld [vmem:[%s6259_s6 + $0x10b0] sm:$0xff] }
 0x206   : > { %3847 = vmatpush1.bf16.msra.mxu1 %v3846_v38  ;;  %v3866_v38 = vpack.c.bf16 %v1903_v29, %v1901_v28  ;;  %v2308_v28 = vld [vmem:[%s6259_s6 + $0x1058] sm:$0xff] }
 0x207   : > { %4231 = vmatpush1.bf16.msra.mxu0 %v4230_v39  ;;  %3849 = vmatprep.subr.bf16.mxu1 %v3848_v42  ;;  %v4250_v39 = vpack.c.bf16 %v2287_v33, %v2285_v31  ;;  %v3868_v42 = vpack.c.bf16 %v1908_v35, %v1906_v34  ;;  %v1921_v34 = vld [vmem:[%s6259_s6 + $0x440] sm:$0xff]  ;;  %v1923_v35 = vld [vmem:[%s6259_s6 + $0x450] sm:$0xff] }
 0x208   : > { %4233 = vmatprep.subr.bf16.mxu0 %v4232_v46  ;;  %v4252_v46 = vpack.c.bf16 %v2292_v37, %v2290_v36  ;;  %v2305_v36 = vld [vmem:[%s6259_s6 + $0x1040] sm:$0xff] }
 0x20a   : > { %3851 = vmatpush1.bf16.msra.mxu1 %v3850_v52  ;;  %v3870_v52 = vpack.c.bf16 %v1907_v44, %v1905_v43  ;;  %v2312_v43 = vld [vmem:[%s6259_s6 + $0x1078] sm:$0xff]  ;;  %v3886_v44 = vpack.c.bf16 %v1923_v35, %v1921_v34 }
 0x20b   : > { %4235 = vmatpush1.bf16.msra.mxu0 %v4234_v53  ;;  %3853 = vmatprep.subr.bf16.mxu1 %v3852_v20  ;;  %v4254_v53 = vpack.c.bf16 %v2291_v47, %v2289_v45  ;;  %v3872_v20 = vpack.c.bf16 %v1912_v49, %v1910_v48  ;;  %v1925_v47 = vld [vmem:[%s6259_s6 + $0x460] sm:$0xff]  ;;  %v1927_v48 = vld [vmem:[%s6259_s6 + $0x470] sm:$0xff] }
 0x20c   : > { %4237 = vmatprep.subr.bf16.mxu0 %v4236_v56  ;;  %v4256_v56 = vpack.c.bf16 %v2296_v51, %v2294_v50  ;;  %v2309_v49 = vld [vmem:[%s6259_s6 + $0x1060] sm:$0xff]  ;;  %v2311_v51 = vld [vmem:[%s6259_s6 + $0x1070] sm:$0xff] }
 0x20e   : > { %3855 = vmatpush1.bf16.msra.mxu1 %v3854_v0  ;;  %v3874_v0 = vpack.c.bf16 %v1911_v55, %v1909_v54  ;;  %v2316_v54 = vld [vmem:[%s6259_s6 + $0x1098] sm:$0xff]  ;;  %v3890_v55 = vpack.c.bf16 %v1927_v48, %v1925_v47 }
 0x20f   : > { %4239 = vmatpush1.bf16.msra.mxu0 %v4238_v1  ;;  %3857 = vmatprep.subr.bf16.mxu1 %v3856_v2  ;;  %v4258_v1 = vpack.c.bf16 %v2295_v57, %v2293_v22  ;;  %v3876_v2 = vpack.c.bf16 %v1916_v60, %v1914_v59  ;;  %v4274_v22 = vpack.c.bf16 %v2311_v51, %v2309_v49  ;;  %v1929_v57 = vld [vmem:[%s6259_s6 + $0x480] sm:$0xff]  ;;  %v1931_v59 = vld [vmem:[%s6259_s6 + $0x490] sm:$0xff] }
 0x210   : > { %4241 = vmatprep.subr.bf16.mxu0 %v4240_v6  ;;  %v4260_v6 = vpack.c.bf16 %v2300_v63, %v2298_v62  ;;  %v2313_v60 = vld [vmem:[%s6259_s6 + $0x1080] sm:$0xff]  ;;  %v2315_v63 = vld [vmem:[%s6259_s6 + $0x1090] sm:$0xff] }
 0x211   : > { %v4278_v5 = vpack.c.bf16 %v2315_v63, %v2313_v60  ;;  %v1945_v49 = vld [vmem:[%s6259_s6 + $0x500] sm:$0xff] }
 0x212   : > { %3859 = vmatpush1.bf16.msra.mxu1 %v3858_v12  ;;  %v3878_v12 = vpack.c.bf16 %v1915_v4, %v1913_v3  ;;  %v2320_v3 = vld [vmem:[%s6259_s6 + $0x10b8] sm:$0xff]  ;;  %v3894_v4 = vpack.c.bf16 %v1931_v59, %v1929_v57  ;;  %v2329_v51 = vld [vmem:[%s6259_s6 + $0x1100] sm:$0xff] }
 0x213   : > { %4243 = vmatpush1.bf16.msra.mxu0 %v4242_v13  ;;  %3861 = vmatprep.subr.bf16.mxu1 %v3860_v14  ;;  %v1917_v13 = vld [vmem:[%s6259_s6 + $0x420] sm:$0xff]  ;;  %v6564_v14 = vld [vmem:[%s7181_s0 + $0x8] sm:$0xff] }
 0x214   : > { %4245 = vmatprep.subr.bf16.mxu0 %v4244_v17  ;;  %v2301_v17 = vld [vmem:[%s6259_s6 + $0x1020] sm:$0xff]  ;;  %v6570_v18 = vrot.slane %v6564_v14, %v6268_v30  ;;  %v3882_v31 = vpack.c.bf16 %v1919_v16, %v1917_v13  ;;  %v1940_v13 = vld [vmem:[%s6259_s6 + $0x4d8] sm:$0xff]  ;;  %v3898_v16 = vpack.c.bf16 %v1935_v8, %v1933_v7 }
 0x215   : > { %v1949_v60 = vld [vmem:[%s6259_s6 + $0x520] sm:$0xff] }
 0x216   : > { %3863 = vmatpush1.bf16.msra.mxu1 %v3862_v25  ;;  %v1924_v25 = vld [vmem:[%s6259_s6 + $0x458] sm:$0xff]  ;;  %v2620_v29 = vcombine.high %v6570_v18, %v6570_v18  ;;  %v2333_v63 = vld [vmem:[%s6259_s6 + $0x1120] sm:$0xff] }
 0x217   : > { %4247 = vmatpush1.bf16.msra.mxu0 %v4246_v26  ;;  %3865 = vmatprep.subr.bf16.mxu1 %v3864_v27  ;;  %v6582_v26 = vrot.slane %v6575_v21, %v6268_v30  ;;  %v2306_v27 = vld [vmem:[%s6259_s6 + $0x1048] sm:$0xff]  ;;  %v3884_v33 = vpack.c.bf16 %v1924_v25, %v1922_v24  ;;  %v1939_v24 = vld [vmem:[%s6259_s6 + $0x4d0] sm:$0xff]  ;;  %v2321_v25 = vld [vmem:[%s6259_s6 + $0x10c0] sm:$0xff] }
 0x218   : > { %4249 = vmatprep.subr.bf16.mxu0 %v4248_v32  ;;  %v4268_v37 = vpack.c.bf16 %v2308_v28, %v2306_v27  ;;  %v2323_v28 = vld [vmem:[%s6259_s6 + $0x10d0] sm:$0xff] }
 0x219   : > { %v2671_v32 = vcombine.high %v6582_v26, %v6582_v26  ;;  %v4286_v34 = vpack.c.bf16 %v2323_v28, %v2321_v25  ;;  %v1957_v25 = vld [vmem:[%s6259_s6 + $0x560] sm:$0xff] }
 0x21a   : > { %3867 = vmatpush1.bf16.msra.mxu1 %v3866_v38  ;;  %v2307_v38 = vld [vmem:[%s6259_s6 + $0x1050] sm:$0xff]  ;;  %v2341_v28 = vld [vmem:[%s6259_s6 + $0x1160] sm:$0xff] }
 0x21b   : > { %4251 = vmatpush1.bf16.msra.mxu0 %v4250_v39  ;;  %3869 = vmatprep.subr.bf16.mxu1 %v3868_v42  ;;  %v1928_v39 = vld [vmem:[%s6259_s6 + $0x478] sm:$0xff]  ;;  %v2310_v42 = vld [vmem:[%s6259_s6 + $0x1068] sm:$0xff]  ;;  %v4270_v45 = vpack.c.bf16 %v2307_v38, %v2305_v36  ;;  %v1941_v36 = vld [vmem:[%s6259_s6 + $0x4e0] sm:$0xff] }
 0x21c   : > { %4253 = vmatprep.subr.bf16.mxu0 %v4252_v46  ;;  %v4272_v50 = vpack.c.bf16 %v2312_v43, %v2310_v42  ;;  %v2325_v38 = vld [vmem:[%s6259_s6 + $0x10e0] sm:$0xff]  ;;  %v1946_v42 = vld [vmem:[%s6259_s6 + $0x508] sm:$0xff]  ;;  %v1948_v43 = vld [vmem:[%s6259_s6 + $0x518] sm:$0xff] }
 0x21d   : > { %v3908_v48 = vpack.c.bf16 %v1948_v43, %v1946_v42  ;;  %v2347_v43 = vld [vmem:[%s6259_s6 + $0x1190] sm:$0xff] }
 0x21e   : > { %3871 = vmatpush1.bf16.msra.mxu1 %v3870_v52  ;;  %v1930_v52 = vld [vmem:[%s6259_s6 + $0x488] sm:$0xff] }
 0x21f   : > { %4255 = vmatpush1.bf16.msra.mxu0 %v4254_v53  ;;  %3873 = vmatprep.subr.bf16.mxu1 %v3872_v20  ;;  %v1932_v53 = vld [vmem:[%s6259_s6 + $0x498] sm:$0xff]  ;;  %v2314_v20 = vld [vmem:[%s6259_s6 + $0x1088] sm:$0xff] }
 0x220   : > { %4257 = vmatprep.subr.bf16.mxu0 %v4256_v56  ;;  %v3892_v56 = vpack.c.bf16 %v1932_v53, %v1930_v52  ;;  %v4276_v62 = vpack.c.bf16 %v2316_v54, %v2314_v20  ;;  %v2331_v53 = vld [vmem:[%s6259_s6 + $0x1110] sm:$0xff]  ;;  %v1950_v20 = vld [vmem:[%s6259_s6 + $0x528] sm:$0xff]  ;;  %v1952_v54 = vld [vmem:[%s6259_s6 + $0x538] sm:$0xff] }
 0x221   : > { %v4294_v57 = vpack.c.bf16 %v2331_v53, %v2329_v51  ;;  %v3912_v59 = vpack.c.bf16 %v1952_v54, %v1950_v20  ;;  %v1965_v51 = vld [vmem:[%s6259_s6 + $0x5a0] sm:$0xff]  ;;  %v2351_v54 = vld [vmem:[%s6259_s6 + $0x11b0] sm:$0xff] }
 0x222   : > { %3875 = vmatpush1.bf16.msra.mxu1 %v3874_v0  ;;  %v1934_v0 = vld [vmem:[%s6259_s6 + $0x4a8] sm:$0xff]  ;;  %v2349_v53 = vld [vmem:[%s6259_s6 + $0x11a0] sm:$0xff] }
 0x223   : > { %4259 = vmatpush1.bf16.msra.mxu0 %v4258_v1  ;;  %3877 = vmatprep.subr.bf16.mxu1 %v3876_v2  ;;  %v1936_v1 = vld [vmem:[%s6259_s6 + $0x4b8] sm:$0xff]  ;;  %v2318_v2 = vld [vmem:[%s6259_s6 + $0x10a8] sm:$0xff] }
 0x224   : > { %4261 = vmatprep.subr.bf16.mxu0 %v4260_v6  ;;  %v3896_v6 = vpack.c.bf16 %v1936_v1, %v1934_v0  ;;  %v4280_v10 = vpack.c.bf16 %v2320_v3, %v2318_v2  ;;  %v2335_v1 = vld [vmem:[%s6259_s6 + $0x1130] sm:$0xff]  ;;  %v1954_v2 = vld [vmem:[%s6259_s6 + $0x548] sm:$0xff]  ;;  %v1956_v3 = vld [vmem:[%s6259_s6 + $0x558] sm:$0xff] }
 0x225   : > { %2860 = vmatmul.mubr.f32.vlgmr.msra.gmra.mrb[0].mxu1 %v6419_v58  ;;  %v4266_v58 = vpack.c.bf16 %v2303_v41, %v2301_v17  ;;  %v4282_v17 = vpack.c.bf16 %v2319_v11, %v2317_v9  ;;  %v1937_v41 = vld [vmem:[%s6259_s6 + $0x4c0] sm:$0xff]  ;;  %v4298_v7 = vpack.c.bf16 %v2335_v1, %v2333_v63  ;;  %v3916_v8 = vpack.c.bf16 %v1956_v3, %v1954_v2  ;;  %v2355_v3 = vld [vmem:[%s6259_s6 + $0x11d0] sm:$0xff] }
 0x226   : > { %3879 = vmatpush1.bf16.msra.mxu1 %v3878_v12  ;;  %3286 = vmatmul.mubr.f32.vlgmr.msra.gmra.mrb[0].mxu0 %v6424_v61  ;;  %v1926_v61 = vld [vmem:[%s6259_s6 + $0x468] sm:$0xff]  ;;  %v1953_v9 = vld [vmem:[%s6259_s6 + $0x540] sm:$0xff] }
 0x227   : > { %4263 = vmatpush1.bf16.msra.mxu0 %v4262_v15  ;;  %3881 = vmatprep.subr.bf16.mxu1 %v3880_v40  ;;  %v3888_v46 = vpack.c.bf16 %v1928_v39, %v1926_v61  ;;  %v1938_v12 = vld [vmem:[%s6259_s6 + $0x4c8] sm:$0xff]  ;;  %v2324_v40 = vld [vmem:[%s6259_s6 + $0x10d8] sm:$0xff]  ;;  %v2327_v39 = vld [vmem:[%s6259_s6 + $0x10f0] sm:$0xff] }
 0x228   : > { %4265 = vmatprep.subr.bf16.mxu0 %v4264_v23  ;;  %2930 = vmatprep.mubr.f32.mxu1 %v2620_v29  ;;  %v2322_v15 = vld [vmem:[%s6259_s6 + $0x10c8] sm:$0xff]  ;;  %v3900_v23 = vpack.c.bf16 %v1940_v13, %v1938_v12  ;;  %v4290_v47 = vpack.c.bf16 %v2327_v39, %v2325_v38  ;;  %v2337_v11 = vld [vmem:[%s6259_s6 + $0x1140] sm:$0xff]  ;;  %v2339_v13 = vld [vmem:[%s6259_s6 + $0x1150] sm:$0xff] }
 0x229   : > { %3356 = vmatprep.mubr.f32.mxu0 %v2671_v32  ;;  %v4284_v27 = vpack.c.bf16 %v2324_v40, %v2322_v15  ;;  %v1942_v29 = vld [vmem:[%s6259_s6 + $0x4e8] sm:$0xff]  ;;  %v1960_v40 = vld [vmem:[%s6259_s6 + $0x578] sm:$0xff]  ;;  %v1961_v38 = vld [vmem:[%s6259_s6 + $0x580] sm:$0xff] }
 0x22a   : > { %3883 = vmatpush1.bf16.msra.mxu1 %v3882_v31  ;;  %v1944_v31 = vld [vmem:[%s6259_s6 + $0x4f8] sm:$0xff]  ;;  %v2326_v32 = vld [vmem:[%s6259_s6 + $0x10e8] sm:$0xff]  ;;  %v2345_v39 = vld [vmem:[%s6259_s6 + $0x1180] sm:$0xff] }
 0x22b   : > { %4267 = vmatpush1.bf16.msra.mxu0 %v4266_v58  ;;  %3885 = vmatprep.subr.bf16.mxu1 %v3884_v33  ;;  %v2328_v58 = vld [vmem:[%s6259_s6 + $0x10f8] sm:$0xff]  ;;  %v3902_v33 = vpack.c.bf16 %v1939_v24, %v1937_v41  ;;  %v3904_v35 = vpack.c.bf16 %v1944_v31, %v1942_v29  ;;  %v1958_v15 = vld [vmem:[%s6259_s6 + $0x568] sm:$0xff]  ;;  %v4302_v41 = vpack.c.bf16 %v2339_v13, %v2337_v11  ;;  %v2343_v31 = vld [vmem:[%s6259_s6 + $0x1170] sm:$0xff] }
 0x22c   : > { %4269 = vmatprep.subr.bf16.mxu0 %v4268_v37  ;;  %v1943_v37 = vld [vmem:[%s6259_s6 + $0x4f0] sm:$0xff]  ;;  %v4288_v61 = vpack.c.bf16 %v2328_v58, %v2326_v32  ;;  %v3920_v24 = vpack.c.bf16 %v1960_v40, %v1958_v15  ;;  %v1962_v32 = vld [vmem:[%s6259_s6 + $0x588] sm:$0xff]  ;;  %v1964_v58 = vld [vmem:[%s6259_s6 + $0x598] sm:$0xff] }
 0x22d   : > { %v1969_v63 = vld [vmem:[%s6259_s6 + $0x5c0] sm:$0xff]  ;;  %v2359_v40 = vld [vmem:[%s6259_s6 + $0x11f0] sm:$0xff] }
 0x22e   : > { %3887 = vmatpush1.bf16.msra.mxu1 %v3886_v44  ;;  %v2330_v44 = vld [vmem:[%s6259_s6 + $0x1108] sm:$0xff]  ;;  %v2353_v1 = vld [vmem:[%s6259_s6 + $0x11c0] sm:$0xff] }
 0x22f   : > { %4271 = vmatpush1.bf16.msra.mxu0 %v4270_v45  ;;  %3889 = vmatprep.subr.bf16.mxu1 %v3888_v46  ;;  %v2332_v45 = vld [vmem:[%s6259_s6 + $0x1118] sm:$0xff]  ;;  %v3906_v46 = vpack.c.bf16 %v1943_v37, %v1941_v36  ;;  %v4306_v36 = vpack.c.bf16 %v2343_v31, %v2341_v28  ;;  %v3924_v37 = vpack.c.bf16 %v1964_v58, %v1962_v32  ;;  %v1973_v11 = vld [vmem:[%s6259_s6 + $0x5e0] sm:$0xff]  ;;  %v1979_v32 = vld [vmem:[%s6259_s6 + $0x610] sm:$0xff] }
 0x230   : > { %4273 = vmatprep.subr.bf16.mxu0 %v4272_v50  ;;  %v1947_v50 = vld [vmem:[%s6259_s6 + $0x510] sm:$0xff]  ;;  %v4292_v52 = vpack.c.bf16 %v2332_v45, %v2330_v44  ;;  %v1966_v44 = vld [vmem:[%s6259_s6 + $0x5a8] sm:$0xff]  ;;  %v1968_v45 = vld [vmem:[%s6259_s6 + $0x5b8] sm:$0xff] }
 0x231   : > { %v2357_v13 = vld [vmem:[%s6259_s6 + $0x11e0] sm:$0xff] }
 0x232   : > { %3891 = vmatpush1.bf16.msra.mxu1 %v3890_v55  ;;  %v2334_v55 = vld [vmem:[%s6259_s6 + $0x1128] sm:$0xff]  ;;  %v4322_v28 = vpack.c.bf16 %v2359_v40, %v2357_v13  ;;  %v1977_v31 = vld [vmem:[%s6259_s6 + $0x600] sm:$0xff] }
 0x233   : > { %4275 = vmatpush1.bf16.msra.mxu0 %v4274_v22  ;;  %3893 = vmatprep.subr.bf16.mxu1 %v3892_v56  ;;  %v2336_v22 = vld [vmem:[%s6259_s6 + $0x1138] sm:$0xff]  ;;  %v3910_v56 = vpack.c.bf16 %v1947_v50, %v1945_v49  ;;  %v4310_v49 = vpack.c.bf16 %v2347_v43, %v2345_v39  ;;  %v3928_v50 = vpack.c.bf16 %v1968_v45, %v1966_v44  ;;  %v2361_v58 = vld [vmem:[%s6259_s6 + $0x1200] sm:$0xff]  ;;  %v1983_v44 = vld [vmem:[%s6259_s6 + $0x630] sm:$0xff] }
 0x234   : > { %4277 = vmatprep.subr.bf16.mxu0 %v4276_v62  ;;  %v1951_v62 = vld [vmem:[%s6259_s6 + $0x530] sm:$0xff]  ;;  %v4296_v0 = vpack.c.bf16 %v2336_v22, %v2334_v55  ;;  %v1970_v55 = vld [vmem:[%s6259_s6 + $0x5c8] sm:$0xff]  ;;  %v1972_v22 = vld [vmem:[%s6259_s6 + $0x5d8] sm:$0xff] }
 0x235   : > { %v1981_v43 = vld [vmem:[%s6259_s6 + $0x620] sm:$0xff] }
 0x236   : > { %3895 = vmatpush1.bf16.msra.mxu1 %v3894_v4  ;;  %v2338_v4 = vld [vmem:[%s6259_s6 + $0x1148] sm:$0xff]  ;;  %v2365_v45 = vld [vmem:[%s6259_s6 + $0x1220] sm:$0xff] }
 0x237   : > { %4279 = vmatpush1.bf16.msra.mxu0 %v4278_v5  ;;  %3897 = vmatprep.subr.bf16.mxu1 %v3896_v6  ;;  %v2340_v5 = vld [vmem:[%s6259_s6 + $0x1158] sm:$0xff]  ;;  %v3914_v6 = vpack.c.bf16 %v1951_v62, %v1949_v60  ;;  %v4314_v60 = vpack.c.bf16 %v2351_v54, %v2349_v53  ;;  %v3932_v62 = vpack.c.bf16 %v1972_v22, %v1970_v55  ;;  %v1985_v22 = vld [vmem:[%s6259_s6 + $0x640] sm:$0xff] }
 0x238   : > { %4281 = vmatprep.subr.bf16.mxu0 %v4280_v10  ;;  %v1955_v10 = vld [vmem:[%s6259_s6 + $0x550] sm:$0xff]  ;;  %v4300_v12 = vpack.c.bf16 %v2340_v5, %v2338_v4  ;;  %v1974_v4 = vld [vmem:[%s6259_s6 + $0x5e8] sm:$0xff]  ;;  %v1976_v5 = vld [vmem:[%s6259_s6 + $0x5f8] sm:$0xff] }
 0x239   : > { %v1993_v40 = vld [vmem:[%s6259_s6 + $0x680] sm:$0xff] }
 0x23a   : > { %3899 = vmatpush1.bf16.msra.mxu1 %v3898_v16  ;;  %v2342_v16 = vld [vmem:[%s6259_s6 + $0x1168] sm:$0xff] }
 0x23b   : > { %4283 = vmatpush1.bf16.msra.mxu0 %v4282_v17  ;;  %3901 = vmatprep.subr.bf16.mxu1 %v3900_v23  ;;  %v2344_v17 = vld [vmem:[%s6259_s6 + $0x1178] sm:$0xff]  ;;  %v3918_v23 = vpack.c.bf16 %v1955_v10, %v1953_v9  ;;  %v4318_v9 = vpack.c.bf16 %v2355_v3, %v2353_v1  ;;  %v3936_v10 = vpack.c.bf16 %v1976_v5, %v1974_v4  ;;  %v1989_v3 = vld [vmem:[%s6259_s6 + $0x660] sm:$0xff]  ;;  %v1991_v4 = vld [vmem:[%s6259_s6 + $0x670] sm:$0xff] }
 0x23c   : > { %4285 = vmatprep.subr.bf16.mxu0 %v4284_v27  ;;  %v1959_v27 = vld [vmem:[%s6259_s6 + $0x570] sm:$0xff]  ;;  %v4304_v29 = vpack.c.bf16 %v2344_v17, %v2342_v16  ;;  %v1978_v16 = vld [vmem:[%s6259_s6 + $0x608] sm:$0xff]  ;;  %v1980_v17 = vld [vmem:[%s6259_s6 + $0x618] sm:$0xff] }
 0x23d   : > { %v2373_v5 = vld [vmem:[%s6259_s6 + $0x1260] sm:$0xff] }
 0x23e   : > { %3903 = vmatpush1.bf16.msra.mxu1 %v3902_v33  ;;  %v2346_v33 = vld [vmem:[%s6259_s6 + $0x1188] sm:$0xff] }
 0x23f   : > { %4287 = vmatpush1.bf16.msra.mxu0 %v4286_v34  ;;  %3905 = vmatprep.subr.bf16.mxu1 %v3904_v35  ;;  %v2348_v34 = vld [vmem:[%s6259_s6 + $0x1198] sm:$0xff]  ;;  %v3922_v35 = vpack.c.bf16 %v1959_v27, %v1957_v25  ;;  %v2656_v25 = vcombine.high %v6575_v21, %v6575_v21 }
 0x240   : > { %4289 = vmatprep.subr.bf16.mxu0 %v4288_v61  ;;  %v1963_v61 = vld [vmem:[%s6259_s6 + $0x590] sm:$0xff]  ;;  %v4308_v42 = vpack.c.bf16 %v2348_v34, %v2346_v33  ;;  %v1982_v34 = vld [vmem:[%s6259_s6 + $0x628] sm:$0xff] }
 0x241   : > { %v2363_v33 = vld [vmem:[%s6259_s6 + $0x1210] sm:$0xff] }
 0x242   : > { %3907 = vmatpush1.bf16.msra.mxu1 %v3906_v46  ;;  %v2350_v46 = vld [vmem:[%s6259_s6 + $0x11a8] sm:$0xff]  ;;  %v4326_v39 = vpack.c.bf16 %v2363_v33, %v2361_v58  ;;  %v1997_v58 = vld [vmem:[%s6259_s6 + $0x6a0] sm:$0xff] }
 0x243   : > { %4291 = vmatpush1.bf16.msra.mxu0 %v4290_v47  ;;  %3909 = vmatprep.subr.bf16.mxu1 %v3908_v48  ;;  %v2352_v47 = vld [vmem:[%s6259_s6 + $0x11b8] sm:$0xff]  ;;  %v3926_v48 = vpack.c.bf16 %v1963_v61, %v1961_v38  ;;  %v6720_v38 = vrot.slane %v2656_v25, %v6268_v30  ;;  %v3942_v61 = vpack.c.bf16 %v1979_v32, %v1977_v31  ;;  %v2381_v33 = vld [vmem:[%s6259_s6 + $0x12a0] sm:$0xff] }
 0x244   : > { %4293 = vmatprep.subr.bf16.mxu0 %v4292_v52  ;;  %v1967_v52 = vld [vmem:[%s6259_s6 + $0x5b0] sm:$0xff]  ;;  %v4312_v20 = vpack.c.bf16 %v2352_v47, %v2350_v46  ;;  %v2000_v25 = vld [vmem:[%s6259_s6 + $0x6b8] sm:$0xff] }
 0x245   : > { %v2367_v47 = vld [vmem:[%s6259_s6 + $0x1230] sm:$0xff]  ;;  %v2672_v53 = vcombine.high %v6720_v38, %v6720_v38 }
 0x246   : > { %3911 = vmatpush1.bf16.msra.mxu1 %v3910_v56  ;;  %v2354_v56 = vld [vmem:[%s6259_s6 + $0x11c8] sm:$0xff]  ;;  %v4330_v54 = vpack.c.bf16 %v2367_v47, %v2365_v45  ;;  %v2001_v45 = vld [vmem:[%s6259_s6 + $0x6c0] sm:$0xff] }
 0x247   : > { %4295 = vmatpush1.bf16.msra.mxu0 %v4294_v57  ;;  %3913 = vmatprep.subr.bf16.mxu1 %v3912_v59  ;;  %v2356_v57 = vld [vmem:[%s6259_s6 + $0x11d8] sm:$0xff]  ;;  %v3930_v59 = vpack.c.bf16 %v1967_v52, %v1965_v51  ;;  %v2370_v51 = vld [vmem:[%s6259_s6 + $0x1248] sm:$0xff]  ;;  %v2385_v47 = vld [vmem:[%s6259_s6 + $0x12c0] sm:$0xff] }
 0x248   : > { %4297 = vmatprep.subr.bf16.mxu0 %v4296_v0  ;;  %v1971_v0 = vld [vmem:[%s6259_s6 + $0x5d0] sm:$0xff]  ;;  %v4316_v2 = vpack.c.bf16 %v2356_v57, %v2354_v56  ;;  %v2372_v52 = vld [vmem:[%s6259_s6 + $0x1258] sm:$0xff]  ;;  %v2369_v56 = vld [vmem:[%s6259_s6 + $0x1240] sm:$0xff] }
 0x249   : > { %v4332_v57 = vpack.c.bf16 %v2372_v52, %v2370_v51  ;;  %v2008_v51 = vld [vmem:[%s6259_s6 + $0x6f8] sm:$0xff]  ;;  %v2390_v52 = vld [vmem:[%s6259_s6 + $0x12e8] sm:$0xff] }
 0x24a   : > { %3915 = vmatpush1.bf16.msra.mxu1 %v3914_v6  ;;  %v2358_v6 = vld [vmem:[%s6259_s6 + $0x11e8] sm:$0xff] }
 0x24b   : > { %4299 = vmatpush1.bf16.msra.mxu0 %v4298_v7  ;;  %3917 = vmatprep.subr.bf16.mxu1 %v3916_v8  ;;  %v2360_v7 = vld [vmem:[%s6259_s6 + $0x11f8] sm:$0xff]  ;;  %v3934_v8 = vpack.c.bf16 %v1971_v0, %v1969_v63 }
 0x24c   : > { %4301 = vmatprep.subr.bf16.mxu0 %v4300_v12  ;;  %v1975_v12 = vld [vmem:[%s6259_s6 + $0x5f0] sm:$0xff]  ;;  %v4320_v15 = vpack.c.bf16 %v2360_v7, %v2358_v6  ;;  %v2376_v63 = vld [vmem:[%s6259_s6 + $0x1278] sm:$0xff] }
 0x24d   : > { %v3938_v27 = vpack.c.bf16 %v1975_v12, %v1973_v11  ;;  %v2375_v7 = vld [vmem:[%s6259_s6 + $0x1270] sm:$0xff]  ;;  %v2380_v11 = vld [vmem:[%s6259_s6 + $0x1298] sm:$0xff]  ;;  %v3954_v12 = vpack.c.bf16 %v1991_v4, %v1989_v3  ;;  %v2009_v3 = vld [vmem:[%s6259_s6 + $0x700] sm:$0xff] }
 0x24e   : > { %3919 = vmatpush1.bf16.msra.mxu1 %v3918_v23  ;;  %v2605_v23 = vcombine.high %v6564_v14, %v6564_v14  ;;  %v4338_v13 = vpack.c.bf16 %v2375_v7, %v2373_v5  ;;  %v2011_v4 = vld [vmem:[%s6259_s6 + $0x710] sm:$0xff]  ;;  %v2393_v5 = vld [vmem:[%s6259_s6 + $0x1300] sm:$0xff] }
 0x24f   : > { %4303 = vmatpush1.bf16.msra.mxu0 %v4302_v41  ;;  %3921 = vmatprep.subr.bf16.mxu1 %v3920_v24  ;;  %v2362_v41 = vld [vmem:[%s6259_s6 + $0x1208] sm:$0xff]  ;;  %v2364_v24 = vld [vmem:[%s6259_s6 + $0x1218] sm:$0xff]  ;;  %v2395_v7 = vld [vmem:[%s6259_s6 + $0x1310] sm:$0xff] }
 0x250   : > { %4305 = vmatprep.subr.bf16.mxu0 %v4304_v29  ;;  %v3940_v29 = vpack.c.bf16 %v1980_v17, %v1978_v16  ;;  %v4324_v14 = vpack.c.bf16 %v2364_v24, %v2362_v41  ;;  %v6715_v21 = vrot.slane %v2605_v23, %v6268_v30  ;;  %v1995_v16 = vld [vmem:[%s6259_s6 + $0x690] sm:$0xff]  ;;  %v2377_v17 = vld [vmem:[%s6259_s6 + $0x1280] sm:$0xff]  ;;  %v1998_v24 = vld [vmem:[%s6259_s6 + $0x6a8] sm:$0xff] }
 0x251   : > { %v2379_v41 = vld [vmem:[%s6259_s6 + $0x1290] sm:$0xff]  ;;  %v3960_v32 = vpack.c.bf16 %v2000_v25, %v1998_v24  ;;  %v2018_v24 = vld [vmem:[%s6259_s6 + $0x748] sm:$0xff]  ;;  %v2020_v25 = vld [vmem:[%s6259_s6 + $0x758] sm:$0xff] }
 0x252   : > { %3923 = vmatpush1.bf16.msra.mxu1 %v3922_v35  ;;  %v1984_v35 = vld [vmem:[%s6259_s6 + $0x638] sm:$0xff]  ;;  %v4342_v31 = vpack.c.bf16 %v2379_v41, %v2377_v17  ;;  %v2397_v17 = vld [vmem:[%s6259_s6 + $0x1320] sm:$0xff]  ;;  %v2399_v41 = vld [vmem:[%s6259_s6 + $0x1330] sm:$0xff] }
 0x253   : > { %4307 = vmatpush1.bf16.msra.mxu0 %v4306_v36  ;;  %3925 = vmatprep.subr.bf16.mxu1 %v3924_v37  ;;  %v2366_v36 = vld [vmem:[%s6259_s6 + $0x1228] sm:$0xff]  ;;  %v2368_v37 = vld [vmem:[%s6259_s6 + $0x1238] sm:$0xff] }
 0x254   : > { %4309 = vmatprep.subr.bf16.mxu0 %v4308_v42  ;;  %v3944_v42 = vpack.c.bf16 %v1984_v35, %v1982_v34  ;;  %v4328_v46 = vpack.c.bf16 %v2368_v37, %v2366_v36  ;;  %v2383_v35 = vld [vmem:[%s6259_s6 + $0x12b0] sm:$0xff]  ;;  %v2002_v36 = vld [vmem:[%s6259_s6 + $0x6c8] sm:$0xff]  ;;  %v2004_v37 = vld [vmem:[%s6259_s6 + $0x6d8] sm:$0xff] }
 0x256   : > { %3927 = vmatpush1.bf16.msra.mxu1 %v3926_v48  ;;  %v1986_v48 = vld [vmem:[%s6259_s6 + $0x648] sm:$0xff] }
 0x257   : > { %4311 = vmatpush1.bf16.msra.mxu0 %v4310_v49  ;;  %3929 = vmatprep.subr.bf16.mxu1 %v3928_v50  ;;  %v1988_v49 = vld [vmem:[%s6259_s6 + $0x658] sm:$0xff]  ;;  %v2621_v50 = vcombine.high %v6715_v21, %v6715_v21 }
 0x258   : > { %4313 = vmatprep.subr.bf16.mxu0 %v4312_v20  ;;  %v3946_v20 = vpack.c.bf16 %v1983_v44, %v1981_v43  ;;  %v3948_v55 = vpack.c.bf16 %v1988_v49, %v1986_v48  ;;  %v4346_v43 = vpack.c.bf16 %v2383_v35, %v2381_v33  ;;  %v3964_v44 = vpack.c.bf16 %v2004_v37, %v2002_v36  ;;  %v2387_v49 = vld [vmem:[%s6259_s6 + $0x12d0] sm:$0xff]  ;;  %v2401_v33 = vld [vmem:[%s6259_s6 + $0x1340] sm:$0xff]  ;;  %v2022_v36 = vld [vmem:[%s6259_s6 + $0x768] sm:$0xff] }
 0x259   : > { %v2403_v35 = vld [vmem:[%s6259_s6 + $0x1350] sm:$0xff]  ;;  %v2024_v37 = vld [vmem:[%s6259_s6 + $0x778] sm:$0xff] }
 0x25a   : > { %3931 = vmatpush1.bf16.msra.mxu1 %v3930_v59  ;;  %v2371_v59 = vld [vmem:[%s6259_s6 + $0x1250] sm:$0xff] }
 0x25b   : > { %4315 = vmatpush1.bf16.msra.mxu0 %v4314_v60  ;;  %3933 = vmatprep.subr.bf16.mxu1 %v3932_v62  ;;  %v1990_v60 = vld [vmem:[%s6259_s6 + $0x668] sm:$0xff]  ;;  %v1992_v62 = vld [vmem:[%s6259_s6 + $0x678] sm:$0xff]  ;;  %v4334_v1 = vpack.c.bf16 %v2371_v59, %v2369_v56  ;;  %v2389_v56 = vld [vmem:[%s6259_s6 + $0x12e0] sm:$0xff] }
 0x25c   : > { %4317 = vmatprep.subr.bf16.mxu0 %v4316_v2  ;;  %v3952_v2 = vpack.c.bf16 %v1992_v62, %v1990_v60  ;;  %v2391_v59 = vld [vmem:[%s6259_s6 + $0x12f0] sm:$0xff]  ;;  %v2010_v60 = vld [vmem:[%s6259_s6 + $0x708] sm:$0xff]  ;;  %v2012_v62 = vld [vmem:[%s6259_s6 + $0x718] sm:$0xff] }
 0x25e   : > { %3935 = vmatpush1.bf16.msra.mxu1 %v3934_v8  ;;  %v1994_v8 = vld [vmem:[%s6259_s6 + $0x688] sm:$0xff] }
 0x25f   : > { %4319 = vmatpush1.bf16.msra.mxu0 %v4318_v9  ;;  %3937 = vmatprep.subr.bf16.mxu1 %v3936_v10  ;;  %v1996_v9 = vld [vmem:[%s6259_s6 + $0x698] sm:$0xff]  ;;  %v2378_v10 = vld [vmem:[%s6259_s6 + $0x1288] sm:$0xff] }
 0x260   : > { %4321 = vmatprep.subr.bf16.mxu0 %v4320_v15  ;;  %v3956_v15 = vpack.c.bf16 %v1996_v9, %v1994_v8  ;;  %v4340_v23 = vpack.c.bf16 %v2380_v11, %v2378_v10  ;;  %v2014_v8 = vld [vmem:[%s6259_s6 + $0x728] sm:$0xff]  ;;  %v2016_v9 = vld [vmem:[%s6259_s6 + $0x738] sm:$0xff] }
 0x261   : > { %v2398_v10 = vld [vmem:[%s6259_s6 + $0x1328] sm:$0xff]  ;;  %v2400_v11 = vld [vmem:[%s6259_s6 + $0x1338] sm:$0xff] }
 0x262   : > { %3939 = vmatpush1.bf16.msra.mxu1 %v3938_v27  ;;  %v2382_v27 = vld [vmem:[%s6259_s6 + $0x12a8] sm:$0xff] }
 0x263   : > { %4323 = vmatpush1.bf16.msra.mxu0 %v4322_v28  ;;  %3941 = vmatprep.subr.bf16.mxu1 %v3940_v29  ;;  %v2384_v28 = vld [vmem:[%s6259_s6 + $0x12b8] sm:$0xff]  ;;  %v3958_v29 = vpack.c.bf16 %v1995_v16, %v1993_v40  ;;  %v2013_v40 = vld [vmem:[%s6259_s6 + $0x720] sm:$0xff]  ;;  %v2015_v16 = vld [vmem:[%s6259_s6 + $0x730] sm:$0xff] }
 0x264   : > { %4325 = vmatprep.subr.bf16.mxu0 %v4324_v14  ;;  %v1999_v14 = vld [vmem:[%s6259_s6 + $0x6b0] sm:$0xff]  ;;  %v4344_v34 = vpack.c.bf16 %v2384_v28, %v2382_v27  ;;  %v2402_v27 = vld [vmem:[%s6259_s6 + $0x1348] sm:$0xff]  ;;  %v2404_v28 = vld [vmem:[%s6259_s6 + $0x1358] sm:$0xff] }
 0x265   : > { %2931 = vmatmul.mubr.f32.vlgmr.msra.gmra.mrb[0].mxu1 %v6570_v18  ;;  %v1987_v18 = vld [vmem:[%s6259_s6 + $0x650] sm:$0xff] }
 0x266   : > { %3943 = vmatpush1.bf16.msra.mxu1 %v3942_v61  ;;  %3357 = vmatmul.mubr.f32.vlgmr.msra.gmra.mrb[0].mxu0 %v6582_v26  ;;  %v2374_v26 = vld [vmem:[%s6259_s6 + $0x1268] sm:$0xff]  ;;  %v3950_v0 = vpack.c.bf16 %v1987_v18, %v1985_v22  ;;  %v2005_v22 = vld [vmem:[%s6259_s6 + $0x6e0] sm:$0xff]  ;;  %v2007_v18 = vld [vmem:[%s6259_s6 + $0x6f0] sm:$0xff] }
 0x267   : > { %4327 = vmatpush1.bf16.msra.mxu0 %v4326_v39  ;;  %3945 = vmatprep.subr.bf16.mxu1 %v3944_v42  ;;  %v4336_v6 = vpack.c.bf16 %v2376_v63, %v2374_v26  ;;  %v2386_v61 = vld [vmem:[%s6259_s6 + $0x12c8] sm:$0xff]  ;;  %v2388_v39 = vld [vmem:[%s6259_s6 + $0x12d8] sm:$0xff]  ;;  %v3962_v42 = vpack.c.bf16 %v1999_v14, %v1997_v58  ;;  %v2017_v58 = vld [vmem:[%s6259_s6 + $0x740] sm:$0xff] }
 0x268   : > { %4329 = vmatprep.subr.bf16.mxu0 %v4328_v46  ;;  %3001 = vmatprep.mubr.f32.mxu1 %v2621_v50  ;;  %v2003_v46 = vld [vmem:[%s6259_s6 + $0x6d0] sm:$0xff]  ;;  %v4348_v48 = vpack.c.bf16 %v2388_v39, %v2386_v61  ;;  %v2006_v50 = vld [vmem:[%s6259_s6 + $0x6e8] sm:$0xff]  ;;  %v2396_v63 = vld [vmem:[%s6259_s6 + $0x1318] sm:$0xff] }
 0x269   : > { %3427 = vmatprep.mubr.f32.mxu0 %v2672_v53  ;;  %v2392_v53 = vld [vmem:[%s6259_s6 + $0x12f8] sm:$0xff]  ;;  %v2394_v26 = vld [vmem:[%s6259_s6 + $0x1308] sm:$0xff]  ;;  %v2019_v14 = vld [vmem:[%s6259_s6 + $0x750] sm:$0xff] }
 0x26a   : > { %3947 = vmatpush1.bf16.msra.mxu1 %v3946_v20  ;;  %v3966_v20 = vpack.c.bf16 %v2003_v46, %v2001_v45  ;;  %v2406_v61 = vld [vmem:[%s6259_s6 + $0x1368] sm:$0xff]  ;;  %v2408_v39 = vld [vmem:[%s6259_s6 + $0x1378] sm:$0xff]  ;;  %v2021_v45 = vld [vmem:[%s6259_s6 + $0x760] sm:$0xff] }
 0x26b   : > { %4331 = vmatpush1.bf16.msra.mxu0 %v4330_v54  ;;  %3949 = vmatprep.subr.bf16.mxu1 %v3948_v55  ;;  %v4350_v54 = vpack.c.bf16 %v2387_v49, %v2385_v47  ;;  %v3968_v55 = vpack.c.bf16 %v2008_v51, %v2006_v50  ;;  %v2023_v46 = vld [vmem:[%s6259_s6 + $0x770] sm:$0xff]  ;;  %v2405_v47 = vld [vmem:[%s6259_s6 + $0x1360] sm:$0xff]  ;;  %v2026_v50 = vld [vmem:[%s6259_s6 + $0x788] sm:$0xff] }
 0x26c   : > { %4333 = vmatprep.subr.bf16.mxu0 %v4332_v57  ;;  %v4352_v57 = vpack.c.bf16 %v2392_v53, %v2390_v52  ;;  %v2407_v49 = vld [vmem:[%s6259_s6 + $0x1370] sm:$0xff]  ;;  %v2028_v51 = vld [vmem:[%s6259_s6 + $0x798] sm:$0xff]  ;;  %v2410_v52 = vld [vmem:[%s6259_s6 + $0x1388] sm:$0xff] }
 0x26d   : > { %v2412_v53 = vld [vmem:[%s6259_s6 + $0x1398] sm:$0xff] }
 0x26e   : > { %3951 = vmatpush1.bf16.msra.mxu1 %v3950_v0  ;;  %v3970_v0 = vpack.c.bf16 %v2007_v18, %v2005_v22  ;;  %v2025_v22 = vld [vmem:[%s6259_s6 + $0x780] sm:$0xff]  ;;  %v2027_v18 = vld [vmem:[%s6259_s6 + $0x790] sm:$0xff] }
 0x26f   : > { %4335 = vmatpush1.bf16.msra.mxu0 %v4334_v1  ;;  %3953 = vmatprep.subr.bf16.mxu1 %v3952_v2  ;;  %v4354_v1 = vpack.c.bf16 %v2391_v59, %v2389_v56  ;;  %v3972_v2 = vpack.c.bf16 %v2012_v62, %v2010_v60  ;;  %v2409_v56 = vld [vmem:[%s6259_s6 + $0x1380] sm:$0xff]  ;;  %v2411_v59 = vld [vmem:[%s6259_s6 + $0x1390] sm:$0xff]  ;;  %v2030_v60 = vld [vmem:[%s6259_s6 + $0x7a8] sm:$0xff] }
 0x270   : > { %4337 = vmatprep.subr.bf16.mxu0 %v4336_v6  ;;  %v4356_v6 = vpack.c.bf16 %v2396_v63, %v2394_v26  ;;  %v2032_v62 = vld [vmem:[%s6259_s6 + $0x7b8] sm:$0xff]  ;;  %v2414_v26 = vld [vmem:[%s6259_s6 + $0x13a8] sm:$0xff] }
 0x271   : > { %v2416_v63 = vld [vmem:[%s6259_s6 + $0x13b8] sm:$0xff] }
 0x272   : > { %3955 = vmatpush1.bf16.msra.mxu1 %v3954_v12  ;;  %v3974_v12 = vpack.c.bf16 %v2011_v4, %v2009_v3  ;;  %v2029_v3 = vld [vmem:[%s6259_s6 + $0x7a0] sm:$0xff]  ;;  %v2031_v4 = vld [vmem:[%s6259_s6 + $0x7b0] sm:$0xff] }
 0x273   : > { %4339 = vmatpush1.bf16.msra.mxu0 %v4338_v13  ;;  %3957 = vmatprep.subr.bf16.mxu1 %v3956_v15  ;;  %v4358_v13 = vpack.c.bf16 %v2395_v7, %v2393_v5  ;;  %v3976_v15 = vpack.c.bf16 %v2016_v9, %v2014_v8  ;;  %v2413_v5 = vld [vmem:[%s6259_s6 + $0x13a0] sm:$0xff]  ;;  %v2415_v7 = vld [vmem:[%s6259_s6 + $0x13b0] sm:$0xff]  ;;  %v2034_v8 = vld [vmem:[%s6259_s6 + $0x7c8] sm:$0xff] }
 0x274   : > { %4341 = vmatprep.subr.bf16.mxu0 %v4340_v23  ;;  %v4360_v23 = vpack.c.bf16 %v2400_v11, %v2398_v10  ;;  %v2036_v9 = vld [vmem:[%s6259_s6 + $0x7d8] sm:$0xff]  ;;  %v2418_v10 = vld [vmem:[%s6259_s6 + $0x13c8] sm:$0xff] }
 0x275   : > { %v2420_v11 = vld [vmem:[%s6259_s6 + $0x13d8] sm:$0xff] }
 0x276   : > { %3959 = vmatpush1.bf16.msra.mxu1 %v3958_v29  ;;  %v3978_v29 = vpack.c.bf16 %v2015_v16, %v2013_v40  ;;  %v2033_v40 = vld [vmem:[%s6259_s6 + $0x7c0] sm:$0xff]  ;;  %v2035_v16 = vld [vmem:[%s6259_s6 + $0x7d0] sm:$0xff] }
 0x277   : > { %4343 = vmatpush1.bf16.msra.mxu0 %v4342_v31  ;;  %3961 = vmatprep.subr.bf16.mxu1 %v3960_v32  ;;  %v4362_v31 = vpack.c.bf16 %v2399_v41, %v2397_v17  ;;  %v3980_v32 = vpack.c.bf16 %v2020_v25, %v2018_v24  ;;  %v2417_v17 = vld [vmem:[%s6259_s6 + $0x13c0] sm:$0xff]  ;;  %v2419_v41 = vld [vmem:[%s6259_s6 + $0x13d0] sm:$0xff]  ;;  %v2038_v24 = vld [vmem:[%s6259_s6 + $0x7e8] sm:$0xff] }
 0x278   : > { %4345 = vmatprep.subr.bf16.mxu0 %v4344_v34  ;;  %v4364_v34 = vpack.c.bf16 %v2404_v28, %v2402_v27  ;;  %v2040_v25 = vld [vmem:[%s6259_s6 + $0x7f8] sm:$0xff]  ;;  %v2422_v27 = vld [vmem:[%s6259_s6 + $0x13e8] sm:$0xff] }
 0x279   : > { %v2424_v28 = vld [vmem:[%s6259_s6 + $0x13f8] sm:$0xff] }
 0x27a   : > { %3963 = vmatpush1.bf16.msra.mxu1 %v3962_v42  ;;  %v3982_v42 = vpack.c.bf16 %v2019_v14, %v2017_v58  ;;  %v2037_v58 = vld [vmem:[%s6259_s6 + $0x7e0] sm:$0xff]  ;;  %v2039_v14 = vld [vmem:[%s6259_s6 + $0x7f0] sm:$0xff] }
 0x27b   : > { %4347 = vmatpush1.bf16.msra.mxu0 %v4346_v43  ;;  %3965 = vmatprep.subr.bf16.mxu1 %v3964_v44  ;;  %v4366_v43 = vpack.c.bf16 %v2403_v35, %v2401_v33  ;;  %v3984_v44 = vpack.c.bf16 %v2024_v37, %v2022_v36  ;;  %v2421_v33 = vld [vmem:[%s6259_s6 + $0x13e0] sm:$0xff]  ;;  %v2423_v35 = vld [vmem:[%s6259_s6 + $0x13f0] sm:$0xff]  ;;  %v2042_v36 = vld [vmem:[%s6259_s6 + $0x808] sm:$0xff] }
 0x27c   : > { %4349 = vmatprep.subr.bf16.mxu0 %v4348_v48  ;;  %v4368_v48 = vpack.c.bf16 %v2408_v39, %v2406_v61  ;;  %v2044_v37 = vld [vmem:[%s6259_s6 + $0x818] sm:$0xff]  ;;  %v2426_v61 = vld [vmem:[%s6259_s6 + $0x1408] sm:$0xff] }
 0x27d   : > { %v2428_v39 = vld [vmem:[%s6259_s6 + $0x1418] sm:$0xff] }
 0x27e   : > { %3967 = vmatpush1.bf16.msra.mxu1 %v3966_v20  ;;  %v3986_v20 = vpack.c.bf16 %v2023_v46, %v2021_v45  ;;  %v4386_v45 = vpack.c.bf16 %v2423_v35, %v2421_v33  ;;  %v4004_v46 = vpack.c.bf16 %v2044_v37, %v2042_v36  ;;  %v2057_v35 = vld [vmem:[%s6259_s6 + $0x880] sm:$0xff]  ;;  %v2059_v36 = vld [vmem:[%s6259_s6 + $0x890] sm:$0xff] }
 0x27f   : > { %4351 = vmatpush1.bf16.msra.mxu0 %v4350_v54  ;;  %3969 = vmatprep.subr.bf16.mxu1 %v3968_v55  ;;  %v4370_v54 = vpack.c.bf16 %v2407_v49, %v2405_v47  ;;  %v3988_v55 = vpack.c.bf16 %v2028_v51, %v2026_v50  ;;  %v2041_v47 = vld [vmem:[%s6259_s6 + $0x800] sm:$0xff]  ;;  %v4388_v50 = vpack.c.bf16 %v2428_v39, %v2426_v61  ;;  %v2427_v51 = vld [vmem:[%s6259_s6 + $0x1410] sm:$0xff] }
 0x280   : > { %4353 = vmatprep.subr.bf16.mxu0 %v4352_v57  ;;  %v4372_v57 = vpack.c.bf16 %v2412_v53, %v2410_v52  ;;  %v2425_v49 = vld [vmem:[%s6259_s6 + $0x1400] sm:$0xff]  ;;  %v2046_v52 = vld [vmem:[%s6259_s6 + $0x828] sm:$0xff]  ;;  %v2048_v53 = vld [vmem:[%s6259_s6 + $0x838] sm:$0xff] }
 0x281   : > { %v2441_v37 = vld [vmem:[%s6259_s6 + $0x1480] sm:$0xff]  ;;  %v2443_v39 = vld [vmem:[%s6259_s6 + $0x1490] sm:$0xff] }
 0x282   : > { %3971 = vmatpush1.bf16.msra.mxu1 %v3970_v0  ;;  %v3990_v0 = vpack.c.bf16 %v2027_v18, %v2025_v22 }
 0x283   : > { %4355 = vmatpush1.bf16.msra.mxu0 %v4354_v1  ;;  %3973 = vmatprep.subr.bf16.mxu1 %v3972_v2  ;;  %v4374_v1 = vpack.c.bf16 %v2411_v59, %v2409_v56  ;;  %v3992_v2 = vpack.c.bf16 %v2032_v62, %v2030_v60  ;;  %v4390_v56 = vpack.c.bf16 %v2427_v51, %v2425_v49  ;;  %v2045_v59 = vld [vmem:[%s6259_s6 + $0x820] sm:$0xff]  ;;  %v2047_v60 = vld [vmem:[%s6259_s6 + $0x830] sm:$0xff] }
 0x284   : > { %4357 = vmatprep.subr.bf16.mxu0 %v4356_v6  ;;  %v4376_v6 = vpack.c.bf16 %v2416_v63, %v2414_v26  ;;  %v2429_v62 = vld [vmem:[%s6259_s6 + $0x1420] sm:$0xff]  ;;  %v2431_v63 = vld [vmem:[%s6259_s6 + $0x1430] sm:$0xff]  ;;  %v4406_v49 = vpack.c.bf16 %v2443_v39, %v2441_v37 }
 0x285   : > { %v2061_v51 = vld [vmem:[%s6259_s6 + $0x8a0] sm:$0xff] }
 0x286   : > { %3975 = vmatpush1.bf16.msra.mxu1 %v3974_v12  ;;  %v3994_v12 = vpack.c.bf16 %v2031_v4, %v2029_v3  ;;  %v2434_v3 = vld [vmem:[%s6259_s6 + $0x1448] sm:$0xff]  ;;  %v2436_v4 = vld [vmem:[%s6259_s6 + $0x1458] sm:$0xff]  ;;  %v2077_v37 = vld [vmem:[%s6259_s6 + $0x920] sm:$0xff] }
 0x287   : > { %4359 = vmatpush1.bf16.msra.mxu0 %v4358_v13  ;;  %3977 = vmatprep.subr.bf16.mxu1 %v3976_v15  ;;  %v4378_v13 = vpack.c.bf16 %v2415_v7, %v2413_v5  ;;  %v3996_v15 = vpack.c.bf16 %v2036_v9, %v2034_v8  ;;  %v4394_v7 = vpack.c.bf16 %v2431_v63, %v2429_v62  ;;  %v2049_v9 = vld [vmem:[%s6259_s6 + $0x840] sm:$0xff] }
 0x288   : > { %4361 = vmatprep.subr.bf16.mxu0 %v4360_v23  ;;  %v4380_v23 = vpack.c.bf16 %v2420_v11, %v2418_v10  ;;  %v2433_v10 = vld [vmem:[%s6259_s6 + $0x1440] sm:$0xff]  ;;  %v4396_v11 = vpack.c.bf16 %v2436_v4, %v2434_v3  ;;  %v2451_v3 = vld [vmem:[%s6259_s6 + $0x14d0] sm:$0xff]  ;;  %v2070_v4 = vld [vmem:[%s6259_s6 + $0x8e8] sm:$0xff] }
 0x289   : > { %v2065_v63 = vld [vmem:[%s6259_s6 + $0x8c0] sm:$0xff] }
 0x28a   : > { %3979 = vmatpush1.bf16.msra.mxu1 %v3978_v29  ;;  %v3998_v29 = vpack.c.bf16 %v2035_v16, %v2033_v40  ;;  %v2440_v40 = vld [vmem:[%s6259_s6 + $0x1478] sm:$0xff]  ;;  %v2461_v39 = vld [vmem:[%s6259_s6 + $0x1520] sm:$0xff] }
 0x28b   : > { %4363 = vmatpush1.bf16.msra.mxu0 %v4362_v31  ;;  %3981 = vmatprep.subr.bf16.mxu1 %v3980_v32  ;;  %v4382_v31 = vpack.c.bf16 %v2419_v41, %v2417_v17  ;;  %v4000_v32 = vpack.c.bf16 %v2040_v25, %v2038_v24  ;;  %v2053_v41 = vld [vmem:[%s6259_s6 + $0x860] sm:$0xff]  ;;  %v2055_v24 = vld [vmem:[%s6259_s6 + $0x870] sm:$0xff] }
 0x28c   : > { %4365 = vmatprep.subr.bf16.mxu0 %v4364_v34  ;;  %v4384_v34 = vpack.c.bf16 %v2424_v28, %v2422_v27  ;;  %v2437_v25 = vld [vmem:[%s6259_s6 + $0x1460] sm:$0xff]  ;;  %v2439_v28 = vld [vmem:[%s6259_s6 + $0x1470] sm:$0xff] }
 0x28d   : > { %v4402_v33 = vpack.c.bf16 %v2439_v28, %v2437_v25  ;;  %v2073_v25 = vld [vmem:[%s6259_s6 + $0x900] sm:$0xff] }
 0x28e   : > { %3983 = vmatpush1.bf16.msra.mxu1 %v3982_v42  ;;  %v6851_v42 = vld [vmem:[%s7181_s0 + $0x10] sm:$0xff]  ;;  %v2457_v28 = vld [vmem:[%s6259_s6 + $0x1500] sm:$0xff] }
 0x28f   : > { %4367 = vmatpush1.bf16.msra.mxu0 %v4366_v43  ;;  %3985 = vmatprep.subr.bf16.mxu1 %v3984_v44  ;;  %v4002_v43 = vpack.c.bf16 %v2039_v14, %v2037_v58  ;;  %v6856_v44 = vld [vmem:[%s7181_s0 + $0x28] sm:$0xff]  ;;  %v2444_v58 = vld [vmem:[%s6259_s6 + $0x1498] sm:$0xff]  ;;  %v4018_v14 = vpack.c.bf16 %v2055_v24, %v2053_v41 }
 0x290   : > { %4369 = vmatprep.subr.bf16.mxu0 %v4368_v48  ;;  %v2043_v48 = vld [vmem:[%s6259_s6 + $0x810] sm:$0xff]  ;;  %v6872_v22 = vrot.slane %v6856_v44, %v6268_v30 }
 0x291   : > { %v4006_v18 = vpack.c.bf16 %v2043_v48, %v2041_v47  ;;  %v2448_v47 = vld [vmem:[%s6259_s6 + $0x14b8] sm:$0xff]  ;;  %v4022_v48 = vpack.c.bf16 %v2059_v36, %v2057_v35 }
 0x292   : > { %3987 = vmatpush1.bf16.msra.mxu1 %v3986_v20  ;;  %v6866_v20 = vrot.slane %v6851_v42, %v6268_v30  ;;  %v2688_v5 = vcombine.high %v6872_v22, %v6872_v22 }
 0x293   : > { %4371 = vmatpush1.bf16.msra.mxu0 %v4370_v54  ;;  %3989 = vmatprep.subr.bf16.mxu1 %v3988_v55  ;;  %v2430_v54 = vld [vmem:[%s6259_s6 + $0x1428] sm:$0xff]  ;;  %v2432_v55 = vld [vmem:[%s6259_s6 + $0x1438] sm:$0xff] }
 0x294   : > { %4373 = vmatprep.subr.bf16.mxu0 %v4372_v57  ;;  %v4008_v57 = vpack.c.bf16 %v2048_v53, %v2046_v52  ;;  %v4392_v26 = vpack.c.bf16 %v2432_v55, %v2430_v54  ;;  %v2063_v52 = vld [vmem:[%s6259_s6 + $0x8b0] sm:$0xff]  ;;  %v2445_v53 = vld [vmem:[%s6259_s6 + $0x14a0] sm:$0xff] }
 0x295   : > { %v2447_v55 = vld [vmem:[%s6259_s6 + $0x14b0] sm:$0xff] }
 0x296   : > { %3991 = vmatpush1.bf16.msra.mxu1 %v3990_v0  ;;  %v2050_v0 = vld [vmem:[%s6259_s6 + $0x848] sm:$0xff]  ;;  %v4410_v62 = vpack.c.bf16 %v2447_v55, %v2445_v53  ;;  %v2081_v53 = vld [vmem:[%s6259_s6 + $0x940] sm:$0xff] }
 0x297   : > { %4375 = vmatpush1.bf16.msra.mxu0 %v4374_v1  ;;  %3993 = vmatprep.subr.bf16.mxu1 %v3992_v2  ;;  %v2052_v1 = vld [vmem:[%s6259_s6 + $0x858] sm:$0xff]  ;;  %v2637_v2 = vcombine.high %v6866_v20, %v6866_v20  ;;  %v2465_v55 = vld [vmem:[%s6259_s6 + $0x1540] sm:$0xff] }
 0x298   : > { %4377 = vmatprep.subr.bf16.mxu0 %v4376_v6  ;;  %v4010_v6 = vpack.c.bf16 %v2047_v60, %v2045_v59  ;;  %v4012_v8 = vpack.c.bf16 %v2052_v1, %v2050_v0  ;;  %v2452_v59 = vld [vmem:[%s6259_s6 + $0x14d8] sm:$0xff]  ;;  %v4026_v60 = vpack.c.bf16 %v2063_v52, %v2061_v51  ;;  %v2067_v0 = vld [vmem:[%s6259_s6 + $0x8d0] sm:$0xff]  ;;  %v2449_v1 = vld [vmem:[%s6259_s6 + $0x14c0] sm:$0xff] }
 0x29a   : > { %3995 = vmatpush1.bf16.msra.mxu1 %v3994_v12  ;;  %v2435_v12 = vld [vmem:[%s6259_s6 + $0x1450] sm:$0xff] }
 0x29b   : > { %4379 = vmatpush1.bf16.msra.mxu0 %v4378_v13  ;;  %3997 = vmatprep.subr.bf16.mxu1 %v3996_v15  ;;  %v2054_v13 = vld [vmem:[%s6259_s6 + $0x868] sm:$0xff]  ;;  %v2056_v15 = vld [vmem:[%s6259_s6 + $0x878] sm:$0xff]  ;;  %v4398_v17 = vpack.c.bf16 %v2435_v12, %v2433_v10  ;;  %v2069_v10 = vld [vmem:[%s6259_s6 + $0x8e0] sm:$0xff] }
 0x29c   : > { %4381 = vmatprep.subr.bf16.mxu0 %v4380_v23  ;;  %v4016_v23 = vpack.c.bf16 %v2056_v15, %v2054_v13  ;;  %v2453_v12 = vld [vmem:[%s6259_s6 + $0x14e0] sm:$0xff]  ;;  %v2455_v15 = vld [vmem:[%s6259_s6 + $0x14f0] sm:$0xff] }
 0x29d   : > { %v4418_v41 = vpack.c.bf16 %v2455_v15, %v2453_v12  ;;  %v2089_v12 = vld [vmem:[%s6259_s6 + $0x980] sm:$0xff] }
 0x29e   : > { %3999 = vmatpush1.bf16.msra.mxu1 %v3998_v29  ;;  %v2058_v29 = vld [vmem:[%s6259_s6 + $0x888] sm:$0xff]  ;;  %v2473_v15 = vld [vmem:[%s6259_s6 + $0x1580] sm:$0xff] }
 0x29f   : > { %4383 = vmatpush1.bf16.msra.mxu0 %v4382_v31  ;;  %4001 = vmatprep.subr.bf16.mxu1 %v4000_v32  ;;  %v2060_v31 = vld [vmem:[%s6259_s6 + $0x898] sm:$0xff]  ;;  %v2442_v32 = vld [vmem:[%s6259_s6 + $0x1488] sm:$0xff] }
 0x2a0   : > { %4385 = vmatprep.subr.bf16.mxu0 %v4384_v34  ;;  %v4020_v34 = vpack.c.bf16 %v2060_v31, %v2058_v29  ;;  %v4404_v61 = vpack.c.bf16 %v2444_v58, %v2442_v32  ;;  %v2459_v31 = vld [vmem:[%s6259_s6 + $0x1510] sm:$0xff]  ;;  %v2078_v32 = vld [vmem:[%s6259_s6 + $0x928] sm:$0xff]  ;;  %v2080_v58 = vld [vmem:[%s6259_s6 + $0x938] sm:$0xff] }
 0x2a1   : > { %v4422_v35 = vpack.c.bf16 %v2459_v31, %v2457_v28  ;;  %v4040_v36 = vpack.c.bf16 %v2080_v58, %v2078_v32  ;;  %v2093_v28 = vld [vmem:[%s6259_s6 + $0x9a0] sm:$0xff]  ;;  %v2479_v58 = vld [vmem:[%s6259_s6 + $0x15b0] sm:$0xff] }
 0x2a2   : > { %4003 = vmatpush1.bf16.msra.mxu1 %v4002_v43  ;;  %v2062_v43 = vld [vmem:[%s6259_s6 + $0x8a8] sm:$0xff]  ;;  %v2477_v31 = vld [vmem:[%s6259_s6 + $0x15a0] sm:$0xff] }
 0x2a3   : > { %4387 = vmatpush1.bf16.msra.mxu0 %v4386_v45  ;;  %4005 = vmatprep.subr.bf16.mxu1 %v4004_v46  ;;  %v2064_v45 = vld [vmem:[%s6259_s6 + $0x8b8] sm:$0xff]  ;;  %v2446_v46 = vld [vmem:[%s6259_s6 + $0x14a8] sm:$0xff] }
 0x2a4   : > { %4389 = vmatprep.subr.bf16.mxu0 %v4388_v50  ;;  %v4024_v50 = vpack.c.bf16 %v2064_v45, %v2062_v43  ;;  %v4408_v54 = vpack.c.bf16 %v2448_v47, %v2446_v46  ;;  %v2463_v45 = vld [vmem:[%s6259_s6 + $0x1530] sm:$0xff]  ;;  %v2082_v46 = vld [vmem:[%s6259_s6 + $0x948] sm:$0xff]  ;;  %v2084_v47 = vld [vmem:[%s6259_s6 + $0x958] sm:$0xff] }
 0x2a5   : > { %3002 = vmatmul.mubr.f32.vlgmr.msra.gmra.mrb[0].mxu1 %v6715_v21  ;;  %v2051_v21 = vld [vmem:[%s6259_s6 + $0x850] sm:$0xff]  ;;  %v4426_v51 = vpack.c.bf16 %v2463_v45, %v2461_v39  ;;  %v4044_v52 = vpack.c.bf16 %v2084_v47, %v2082_v46  ;;  %v2097_v39 = vld [vmem:[%s6259_s6 + $0x9c0] sm:$0xff] }
 0x2a6   : > { %4007 = vmatpush1.bf16.msra.mxu1 %v4006_v18  ;;  %3428 = vmatmul.mubr.f32.vlgmr.msra.gmra.mrb[0].mxu0 %v6720_v38  ;;  %v2438_v38 = vld [vmem:[%s6259_s6 + $0x1468] sm:$0xff]  ;;  %v4014_v16 = vpack.c.bf16 %v2051_v21, %v2049_v9  ;;  %v4414_v9 = vpack.c.bf16 %v2451_v3, %v2449_v1  ;;  %v2085_v1 = vld [vmem:[%s6259_s6 + $0x960] sm:$0xff]  ;;  %v2483_v47 = vld [vmem:[%s6259_s6 + $0x15d0] sm:$0xff] }
 0x2a7   : > { %4391 = vmatpush1.bf16.msra.mxu0 %v4390_v56  ;;  %4009 = vmatprep.subr.bf16.mxu1 %v4008_v57  ;;  %v4400_v27 = vpack.c.bf16 %v2440_v40, %v2438_v38  ;;  %v2066_v18 = vld [vmem:[%s6259_s6 + $0x8c8] sm:$0xff]  ;;  %v2068_v56 = vld [vmem:[%s6259_s6 + $0x8d8] sm:$0xff]  ;;  %v2469_v3 = vld [vmem:[%s6259_s6 + $0x1560] sm:$0xff] }
 0x2a8   : > { %4393 = vmatprep.subr.bf16.mxu0 %v4392_v26  ;;  %3072 = vmatprep.mubr.f32.mxu1 %v2637_v2  ;;  %v2450_v57 = vld [vmem:[%s6259_s6 + $0x14c8] sm:$0xff]  ;;  %v4028_v26 = vpack.c.bf16 %v2068_v56, %v2066_v18  ;;  %v2076_v40 = vld [vmem:[%s6259_s6 + $0x918] sm:$0xff]  ;;  %v2467_v56 = vld [vmem:[%s6259_s6 + $0x1550] sm:$0xff] }
 0x2a9   : > { %3498 = vmatprep.mubr.f32.mxu0 %v2688_v5  ;;  %v4412_v2 = vpack.c.bf16 %v2452_v59, %v2450_v57  ;;  %v2072_v5 = vld [vmem:[%s6259_s6 + $0x8f8] sm:$0xff]  ;;  %v2074_v38 = vld [vmem:[%s6259_s6 + $0x908] sm:$0xff]  ;;  %v2481_v45 = vld [vmem:[%s6259_s6 + $0x15c0] sm:$0xff] }
 0x2aa   : > { %4011 = vmatpush1.bf16.msra.mxu1 %v4010_v6  ;;  %v2454_v6 = vld [vmem:[%s6259_s6 + $0x14e8] sm:$0xff]  ;;  %v4032_v21 = vpack.c.bf16 %v2072_v5, %v2070_v4  ;;  %v4036_v24 = vpack.c.bf16 %v2076_v40, %v2074_v38  ;;  %v2088_v59 = vld [vmem:[%s6259_s6 + $0x978] sm:$0xff]  ;;  %v2471_v5 = vld [vmem:[%s6259_s6 + $0x1570] sm:$0xff] }
 0x2ab   : > { %4395 = vmatpush1.bf16.msra.mxu0 %v4394_v7  ;;  %4013 = vmatprep.subr.bf16.mxu1 %v4012_v8  ;;  %v2456_v7 = vld [vmem:[%s6259_s6 + $0x14f8] sm:$0xff]  ;;  %v4030_v8 = vpack.c.bf16 %v2067_v0, %v2065_v63  ;;  %v2086_v57 = vld [vmem:[%s6259_s6 + $0x968] sm:$0xff]  ;;  %v4430_v63 = vpack.c.bf16 %v2467_v56, %v2465_v55  ;;  %v2475_v40 = vld [vmem:[%s6259_s6 + $0x1590] sm:$0xff] }
 0x2ac   : > { %4397 = vmatprep.subr.bf16.mxu0 %v4396_v11  ;;  %v2071_v11 = vld [vmem:[%s6259_s6 + $0x8f0] sm:$0xff]  ;;  %v4416_v13 = vpack.c.bf16 %v2456_v7, %v2454_v6  ;;  %v4048_v0 = vpack.c.bf16 %v2088_v59, %v2086_v57  ;;  %v2090_v6 = vld [vmem:[%s6259_s6 + $0x988] sm:$0xff]  ;;  %v2092_v7 = vld [vmem:[%s6259_s6 + $0x998] sm:$0xff] }
 0x2ad   : > { %v2101_v55 = vld [vmem:[%s6259_s6 + $0x9e0] sm:$0xff]  ;;  %v2487_v59 = vld [vmem:[%s6259_s6 + $0x15f0] sm:$0xff] }
 0x2ae   : > { %4015 = vmatpush1.bf16.msra.mxu1 %v4014_v16  ;;  %v2458_v16 = vld [vmem:[%s6259_s6 + $0x1508] sm:$0xff]  ;;  %v2485_v56 = vld [vmem:[%s6259_s6 + $0x15e0] sm:$0xff] }
 0x2af   : > { %4399 = vmatpush1.bf16.msra.mxu0 %v4398_v17  ;;  %4017 = vmatprep.subr.bf16.mxu1 %v4016_v23  ;;  %v2460_v17 = vld [vmem:[%s6259_s6 + $0x1518] sm:$0xff]  ;;  %v4034_v23 = vpack.c.bf16 %v2071_v11, %v2069_v10  ;;  %v4434_v10 = vpack.c.bf16 %v2471_v5, %v2469_v3  ;;  %v4052_v11 = vpack.c.bf16 %v2092_v7, %v2090_v6  ;;  %v2105_v5 = vld [vmem:[%s6259_s6 + $0xa00] sm:$0xff]  ;;  %v2107_v6 = vld [vmem:[%s6259_s6 + $0xa10] sm:$0xff] }
 0x2b0   : > { %4401 = vmatprep.subr.bf16.mxu0 %v4400_v27  ;;  %v2075_v27 = vld [vmem:[%s6259_s6 + $0x910] sm:$0xff]  ;;  %v4420_v29 = vpack.c.bf16 %v2460_v17, %v2458_v16  ;;  %v2094_v16 = vld [vmem:[%s6259_s6 + $0x9a8] sm:$0xff]  ;;  %v2096_v17 = vld [vmem:[%s6259_s6 + $0x9b8] sm:$0xff]  ;;  %v4450_v3 = vpack.c.bf16 %v2487_v59, %v2485_v56 }
 0x2b1   : > { %v2489_v7 = vld [vmem:[%s6259_s6 + $0x1600] sm:$0xff]  ;;  %v2123_v59 = vld [vmem:[%s6259_s6 + $0xa90] sm:$0xff] }
 0x2b2   : > { %4019 = vmatpush1.bf16.msra.mxu1 %v4018_v14  ;;  %v2462_v14 = vld [vmem:[%s6259_s6 + $0x1528] sm:$0xff] }
 0x2b3   : > { %4403 = vmatpush1.bf16.msra.mxu0 %v4402_v33  ;;  %4021 = vmatprep.subr.bf16.mxu1 %v4020_v34  ;;  %v2464_v33 = vld [vmem:[%s6259_s6 + $0x1538] sm:$0xff]  ;;  %v4038_v34 = vpack.c.bf16 %v2075_v27, %v2073_v25  ;;  %v4438_v25 = vpack.c.bf16 %v2475_v40, %v2473_v15  ;;  %v4056_v27 = vpack.c.bf16 %v2096_v17, %v2094_v16  ;;  %v2109_v40 = vld [vmem:[%s6259_s6 + $0xa20] sm:$0xff]  ;;  %v2111_v16 = vld [vmem:[%s6259_s6 + $0xa30] sm:$0xff] }
 0x2b4   : > { %4405 = vmatprep.subr.bf16.mxu0 %v4404_v61  ;;  %v2079_v61 = vld [vmem:[%s6259_s6 + $0x930] sm:$0xff]  ;;  %v4424_v43 = vpack.c.bf16 %v2464_v33, %v2462_v14  ;;  %v2098_v14 = vld [vmem:[%s6259_s6 + $0x9c8] sm:$0xff]  ;;  %v2100_v33 = vld [vmem:[%s6259_s6 + $0x9d8] sm:$0xff] }
 0x2b5   : > { %v2493_v17 = vld [vmem:[%s6259_s6 + $0x1620] sm:$0xff] }
 0x2b6   : > { %4023 = vmatpush1.bf16.msra.mxu1 %v4022_v48  ;;  %v2466_v48 = vld [vmem:[%s6259_s6 + $0x1548] sm:$0xff] }
 0x2b7   : > { %4407 = vmatpush1.bf16.msra.mxu0 %v4406_v49  ;;  %4025 = vmatprep.subr.bf16.mxu1 %v4024_v50  ;;  %v2468_v49 = vld [vmem:[%s6259_s6 + $0x1558] sm:$0xff]  ;;  %v4042_v50 = vpack.c.bf16 %v2079_v61, %v2077_v37  ;;  %v4442_v37 = vpack.c.bf16 %v2479_v58, %v2477_v31  ;;  %v4060_v61 = vpack.c.bf16 %v2100_v33, %v2098_v14  ;;  %v2113_v14 = vld [vmem:[%s6259_s6 + $0xa40] sm:$0xff] }
 0x2b8   : > { %4409 = vmatprep.subr.bf16.mxu0 %v4408_v54  ;;  %v2083_v54 = vld [vmem:[%s6259_s6 + $0x950] sm:$0xff]  ;;  %v4428_v18 = vpack.c.bf16 %v2468_v49, %v2466_v48  ;;  %v2102_v48 = vld [vmem:[%s6259_s6 + $0x9e8] sm:$0xff]  ;;  %v2104_v49 = vld [vmem:[%s6259_s6 + $0x9f8] sm:$0xff]  ;;  %v4074_v31 = vpack.c.bf16 %v2111_v16, %v2109_v40 }
 0x2b9   : > { %v2497_v33 = vld [vmem:[%s6259_s6 + $0x1640] sm:$0xff] }
 0x2ba   : > { %4027 = vmatpush1.bf16.msra.mxu1 %v4026_v60  ;;  %v2470_v60 = vld [vmem:[%s6259_s6 + $0x1568] sm:$0xff]  ;;  %v2129_v16 = vld [vmem:[%s6259_s6 + $0xac0] sm:$0xff] }
 0x2bb   : > { %4411 = vmatpush1.bf16.msra.mxu0 %v4410_v62  ;;  %4029 = vmatprep.subr.bf16.mxu1 %v4028_v26  ;;  %v2472_v62 = vld [vmem:[%s6259_s6 + $0x1578] sm:$0xff]  ;;  %v4046_v26 = vpack.c.bf16 %v2083_v54, %v2081_v53  ;;  %v4446_v53 = vpack.c.bf16 %v2483_v47, %v2481_v45  ;;  %v4064_v54 = vpack.c.bf16 %v2104_v49, %v2102_v48  ;;  %v2119_v47 = vld [vmem:[%s6259_s6 + $0xa70] sm:$0xff]  ;;  %v2501_v48 = vld [vmem:[%s6259_s6 + $0x1660] sm:$0xff] }
 0x2bc   : > { %4413 = vmatprep.subr.bf16.mxu0 %v4412_v2  ;;  %v2087_v2 = vld [vmem:[%s6259_s6 + $0x970] sm:$0xff]  ;;  %v4432_v4 = vpack.c.bf16 %v2472_v62, %v2470_v60  ;;  %v2106_v60 = vld [vmem:[%s6259_s6 + $0xa08] sm:$0xff]  ;;  %v2108_v62 = vld [vmem:[%s6259_s6 + $0xa18] sm:$0xff] }
 0x2be   : > { %4031 = vmatpush1.bf16.msra.mxu1 %v4030_v8  ;;  %v2474_v8 = vld [vmem:[%s6259_s6 + $0x1588] sm:$0xff] }
 0x2bf   : > { %4415 = vmatpush1.bf16.msra.mxu0 %v4414_v9  ;;  %4033 = vmatprep.subr.bf16.mxu1 %v4032_v21  ;;  %v2476_v9 = vld [vmem:[%s6259_s6 + $0x1598] sm:$0xff]  ;;  %v4050_v21 = vpack.c.bf16 %v2087_v2, %v2085_v1  ;;  %v2673_v1 = vcombine.high %v6856_v44, %v6856_v44 }
 0x2c0   : > { %4417 = vmatprep.subr.bf16.mxu0 %v4416_v13  ;;  %v2091_v13 = vld [vmem:[%s6259_s6 + $0x990] sm:$0xff]  ;;  %v4436_v38 = vpack.c.bf16 %v2476_v9, %v2474_v8  ;;  %v2110_v9 = vld [vmem:[%s6259_s6 + $0xa28] sm:$0xff] }
 0x2c1   : > { %v2491_v8 = vld [vmem:[%s6259_s6 + $0x1610] sm:$0xff] }
 0x2c2   : > { %4035 = vmatpush1.bf16.msra.mxu1 %v4034_v23  ;;  %v2478_v23 = vld [vmem:[%s6259_s6 + $0x15a8] sm:$0xff]  ;;  %v4454_v15 = vpack.c.bf16 %v2491_v8, %v2489_v7  ;;  %v2127_v7 = vld [vmem:[%s6259_s6 + $0xab0] sm:$0xff] }
 0x2c3   : > { %4419 = vmatpush1.bf16.msra.mxu0 %v4418_v41  ;;  %4037 = vmatprep.subr.bf16.mxu1 %v4036_v24  ;;  %v2480_v41 = vld [vmem:[%s6259_s6 + $0x15b8] sm:$0xff]  ;;  %v4054_v24 = vpack.c.bf16 %v2091_v13, %v2089_v12  ;;  %v7016_v12 = vrot.slane %v2673_v1, %v6268_v30  ;;  %v4070_v13 = vpack.c.bf16 %v2107_v6, %v2105_v5  ;;  %v2510_v1 = vld [vmem:[%s6259_s6 + $0x16a8] sm:$0xff]  ;;  %v2125_v6 = vld [vmem:[%s6259_s6 + $0xaa0] sm:$0xff] }
 0x2c4   : > { %4421 = vmatprep.subr.bf16.mxu0 %v4420_v29  ;;  %v2095_v29 = vld [vmem:[%s6259_s6 + $0x9b0] sm:$0xff]  ;;  %v4440_v32 = vpack.c.bf16 %v2480_v41, %v2478_v23 }
 0x2c5   : > { %v2495_v41 = vld [vmem:[%s6259_s6 + $0x1630] sm:$0xff] }
 0x2c6   : > { %4039 = vmatpush1.bf16.msra.mxu1 %v4038_v34  ;;  %v2482_v34 = vld [vmem:[%s6259_s6 + $0x15c8] sm:$0xff] }
 0x2c7   : > { %4423 = vmatpush1.bf16.msra.mxu0 %v4422_v35  ;;  %4041 = vmatprep.subr.bf16.mxu1 %v4040_v36  ;;  %v2484_v35 = vld [vmem:[%s6259_s6 + $0x15d8] sm:$0xff]  ;;  %v4058_v36 = vpack.c.bf16 %v2095_v29, %v2093_v28  ;;  %v2689_v29 = vcombine.high %v7016_v12, %v7016_v12 }
 0x2c8   : > { %4425 = vmatprep.subr.bf16.mxu0 %v4424_v43  ;;  %v2099_v43 = vld [vmem:[%s6259_s6 + $0x9d0] sm:$0xff]  ;;  %v4444_v46 = vpack.c.bf16 %v2484_v35, %v2482_v34  ;;  %v2500_v28 = vld [vmem:[%s6259_s6 + $0x1658] sm:$0xff] }
 0x2c9   : > { %v2499_v35 = vld [vmem:[%s6259_s6 + $0x1650] sm:$0xff] }
 0x2ca   : > { %4043 = vmatpush1.bf16.msra.mxu1 %v4042_v50  ;;  %v2486_v50 = vld [vmem:[%s6259_s6 + $0x15e8] sm:$0xff] }
 0x2cb   : > { %4427 = vmatpush1.bf16.msra.mxu0 %v4426_v51  ;;  %4045 = vmatprep.subr.bf16.mxu1 %v4044_v52  ;;  %v2488_v51 = vld [vmem:[%s6259_s6 + $0x15f8] sm:$0xff]  ;;  %v4062_v52 = vpack.c.bf16 %v2099_v43, %v2097_v39  ;;  %v4462_v43 = vpack.c.bf16 %v2499_v35, %v2497_v33  ;;  %v2138_v35 = vld [vmem:[%s6259_s6 + $0xb08] sm:$0xff] }
 0x2cc   : > { %4429 = vmatprep.subr.bf16.mxu0 %v4428_v18  ;;  %v2103_v18 = vld [vmem:[%s6259_s6 + $0x9f0] sm:$0xff]  ;;  %v4448_v57 = vpack.c.bf16 %v2488_v51, %v2486_v50  ;;  %v2122_v51 = vld [vmem:[%s6259_s6 + $0xa88] sm:$0xff] }
 0x2cd   : > { %v4066_v2 = vpack.c.bf16 %v2103_v18, %v2101_v55  ;;  %v2503_v50 = vld [vmem:[%s6259_s6 + $0x1670] sm:$0xff] }
 0x2ce   : > { %4047 = vmatpush1.bf16.msra.mxu1 %v4046_v26  ;;  %v2622_v26 = vcombine.high %v6851_v42, %v6851_v42  ;;  %v4466_v18 = vpack.c.bf16 %v2503_v50, %v2501_v48  ;;  %v2142_v50 = vld [vmem:[%s6259_s6 + $0xb28] sm:$0xff] }
 0x2cf   : > { %4431 = vmatpush1.bf16.msra.mxu0 %v4430_v63  ;;  %4049 = vmatprep.subr.bf16.mxu1 %v4048_v0  ;;  %v2490_v63 = vld [vmem:[%s6259_s6 + $0x1608] sm:$0xff]  ;;  %v2492_v0 = vld [vmem:[%s6259_s6 + $0x1618] sm:$0xff] }
 0x2d0   : > { %4433 = vmatprep.subr.bf16.mxu0 %v4432_v4  ;;  %v4068_v4 = vpack.c.bf16 %v2108_v62, %v2106_v60  ;;  %v4452_v42 = vpack.c.bf16 %v2492_v0, %v2490_v63  ;;  %v7011_v44 = vrot.slane %v2622_v26, %v6268_v30  ;;  %v2116_v30 = vld [vmem:[%s6259_s6 + $0xa58] sm:$0xff]  ;;  %v2505_v60 = vld [vmem:[%s6259_s6 + $0x1680] sm:$0xff]  ;;  %v2507_v26 = vld [vmem:[%s6259_s6 + $0x1690] sm:$0xff] }
 0x2d1   : > { %v2126_v63 = vld [vmem:[%s6259_s6 + $0xaa8] sm:$0xff]  ;;  %v2128_v0 = vld [vmem:[%s6259_s6 + $0xab8] sm:$0xff] }
 0x2d2   : > { %4051 = vmatpush1.bf16.msra.mxu1 %v4050_v21  ;;  %v2112_v21 = vld [vmem:[%s6259_s6 + $0xa38] sm:$0xff]  ;;  %v4088_v5 = vpack.c.bf16 %v2128_v0, %v2126_v63  ;;  %v2530_v0 = vld [vmem:[%s6259_s6 + $0x1748] sm:$0xff] }
 0x2d3   : > { %4435 = vmatpush1.bf16.msra.mxu0 %v4434_v10  ;;  %4053 = vmatprep.subr.bf16.mxu1 %v4052_v11  ;;  %v2494_v10 = vld [vmem:[%s6259_s6 + $0x1628] sm:$0xff]  ;;  %v2496_v11 = vld [vmem:[%s6259_s6 + $0x1638] sm:$0xff] }
 0x2d4   : > { %4437 = vmatprep.subr.bf16.mxu0 %v4436_v38  ;;  %v4072_v38 = vpack.c.bf16 %v2112_v21, %v2110_v9  ;;  %v4456_v23 = vpack.c.bf16 %v2496_v11, %v2494_v10  ;;  %v2511_v9 = vld [vmem:[%s6259_s6 + $0x16b0] sm:$0xff]  ;;  %v2130_v21 = vld [vmem:[%s6259_s6 + $0xac8] sm:$0xff]  ;;  %v2132_v10 = vld [vmem:[%s6259_s6 + $0xad8] sm:$0xff] }
 0x2d5   : > { %v2514_v11 = vld [vmem:[%s6259_s6 + $0x16c8] sm:$0xff]  ;;  %v4092_v40 = vpack.c.bf16 %v2132_v10, %v2130_v21  ;;  %v2148_v63 = vld [vmem:[%s6259_s6 + $0xb58] sm:$0xff] }
 0x2d6   : > { %4055 = vmatpush1.bf16.msra.mxu1 %v4054_v24  ;;  %v2114_v24 = vld [vmem:[%s6259_s6 + $0xa48] sm:$0xff]  ;;  %v2152_v21 = vld [vmem:[%s6259_s6 + $0xb78] sm:$0xff] }
 0x2d7   : > { %4439 = vmatpush1.bf16.msra.mxu0 %v4438_v25  ;;  %4057 = vmatprep.subr.bf16.mxu1 %v4056_v27  ;;  %v2638_v25 = vcombine.high %v7011_v44, %v7011_v44  ;;  %v2498_v27 = vld [vmem:[%s6259_s6 + $0x1648] sm:$0xff]  ;;  %v4076_v58 = vpack.c.bf16 %v2116_v30, %v2114_v24  ;;  %v2515_v24 = vld [vmem:[%s6259_s6 + $0x16d0] sm:$0xff] }
 0x2d8   : > { %4441 = vmatprep.subr.bf16.mxu0 %v4440_v32  ;;  %v4458_v32 = vpack.c.bf16 %v2495_v41, %v2493_v17  ;;  %v4460_v34 = vpack.c.bf16 %v2500_v28, %v2498_v27  ;;  %v2131_v17 = vld [vmem:[%s6259_s6 + $0xad0] sm:$0xff]  ;;  %v2134_v30 = vld [vmem:[%s6259_s6 + $0xae8] sm:$0xff]  ;;  %v2520_v28 = vld [vmem:[%s6259_s6 + $0x16f8] sm:$0xff] }
 0x2d9   : > { %v2518_v27 = vld [vmem:[%s6259_s6 + $0x16e8] sm:$0xff] }
 0x2da   : > { %4059 = vmatpush1.bf16.msra.mxu1 %v4058_v36  ;;  %v2118_v36 = vld [vmem:[%s6259_s6 + $0xa68] sm:$0xff]  ;;  %v4480_v33 = vpack.c.bf16 %v2520_v28, %v2518_v27  ;;  %v2540_v27 = vld [vmem:[%s6259_s6 + $0x1798] sm:$0xff] }
 0x2db   : > { %4443 = vmatpush1.bf16.msra.mxu0 %v4442_v37  ;;  %4061 = vmatprep.subr.bf16.mxu1 %v4060_v61  ;;  %v2120_v37 = vld [vmem:[%s6259_s6 + $0xa78] sm:$0xff]  ;;  %v2534_v10 = vld [vmem:[%s6259_s6 + $0x1768] sm:$0xff] }
 0x2dc   : > { %4445 = vmatprep.subr.bf16.mxu0 %v4444_v46  ;;  %v2504_v61 = vld [vmem:[%s6259_s6 + $0x1678] sm:$0xff]  ;;  %v4080_v45 = vpack.c.bf16 %v2120_v37, %v2118_v36  ;;  %v2117_v46 = vld [vmem:[%s6259_s6 + $0xa60] sm:$0xff]  ;;  %v2522_v37 = vld [vmem:[%s6259_s6 + $0x1708] sm:$0xff] }
 0x2dd   : > { %v4082_v55 = vpack.c.bf16 %v2119_v47, %v2117_v46  ;;  %v2140_v36 = vld [vmem:[%s6259_s6 + $0xb18] sm:$0xff]  ;;  %v2139_v46 = vld [vmem:[%s6259_s6 + $0xb10] sm:$0xff]  ;;  %v2521_v47 = vld [vmem:[%s6259_s6 + $0x1700] sm:$0xff] }
 0x2de   : > { %4063 = vmatpush1.bf16.msra.mxu1 %v4062_v52  ;;  %v2124_v52 = vld [vmem:[%s6259_s6 + $0xa98] sm:$0xff] }
 0x2df   : > { %4447 = vmatpush1.bf16.msra.mxu0 %v4446_v53  ;;  %4065 = vmatprep.subr.bf16.mxu1 %v4064_v54  ;;  %v2506_v53 = vld [vmem:[%s6259_s6 + $0x1688] sm:$0xff]  ;;  %v2508_v54 = vld [vmem:[%s6259_s6 + $0x1698] sm:$0xff]  ;;  %v4084_v56 = vpack.c.bf16 %v2124_v52, %v2122_v51 }
 0x2e0   : > { %4449 = vmatprep.subr.bf16.mxu0 %v4448_v57  ;;  %v2121_v57 = vld [vmem:[%s6259_s6 + $0xa80] sm:$0xff]  ;;  %v4468_v62 = vpack.c.bf16 %v2508_v54, %v2506_v53  ;;  %v2144_v51 = vld [vmem:[%s6259_s6 + $0xb38] sm:$0xff]  ;;  %v2526_v52 = vld [vmem:[%s6259_s6 + $0x1728] sm:$0xff] }
 0x2e1   : > { %v2528_v53 = vld [vmem:[%s6259_s6 + $0x1738] sm:$0xff] }
 0x2e2   : > { %4067 = vmatpush1.bf16.msra.mxu1 %v4066_v2  ;;  %v2512_v2 = vld [vmem:[%s6259_s6 + $0x16b8] sm:$0xff] }
 0x2e3   : > { %4451 = vmatpush1.bf16.msra.mxu0 %v4450_v3  ;;  %4069 = vmatprep.subr.bf16.mxu1 %v4068_v4  ;;  %v4086_v3 = vpack.c.bf16 %v2123_v59, %v2121_v57  ;;  %v4470_v4 = vpack.c.bf16 %v2507_v26, %v2505_v60  ;;  %v4472_v8 = vpack.c.bf16 %v2512_v2, %v2510_v1  ;;  %v2143_v57 = vld [vmem:[%s6259_s6 + $0xb30] sm:$0xff]  ;;  %v2525_v59 = vld [vmem:[%s6259_s6 + $0x1720] sm:$0xff]  ;;  %v2146_v26 = vld [vmem:[%s6259_s6 + $0xb48] sm:$0xff] }
 0x2e4   : > { %4453 = vmatprep.subr.bf16.mxu0 %v4452_v42  ;;  %v2509_v42 = vld [vmem:[%s6259_s6 + $0x16a0] sm:$0xff]  ;;  %v4488_v60 = vpack.c.bf16 %v2528_v53, %v2526_v52  ;;  %v2532_v1 = vld [vmem:[%s6259_s6 + $0x1758] sm:$0xff] }
 0x2e5   : > { %3073 = vmatmul.mubr.f32.vlgmr.msra.gmra.mrb[0].mxu1 %v6866_v20  ;;  %v2115_v20 = vld [vmem:[%s6259_s6 + $0xa50] sm:$0xff]  ;;  %v2548_v52 = vld [vmem:[%s6259_s6 + $0x17d8] sm:$0xff] }
 0x2e6   : > { %4071 = vmatpush1.bf16.msra.mxu1 %v4070_v13  ;;  %3499 = vmatmul.mubr.f32.vlgmr.msra.gmra.mrb[0].mxu0 %v6872_v22  ;;  %v2502_v22 = vld [vmem:[%s6259_s6 + $0x1668] sm:$0xff]  ;;  %v4078_v39 = vpack.c.bf16 %v2115_v20, %v2113_v14  ;;  %v2516_v13 = vld [vmem:[%s6259_s6 + $0x16d8] sm:$0xff]  ;;  %v2135_v14 = vld [vmem:[%s6259_s6 + $0xaf0] sm:$0xff] }
 0x2e7   : > { %4455 = vmatpush1.bf16.msra.mxu0 %v4454_v15  ;;  %4073 = vmatprep.subr.bf16.mxu1 %v4072_v38  ;;  %v4464_v49 = vpack.c.bf16 %v2504_v61, %v2502_v22  ;;  %v4090_v15 = vpack.c.bf16 %v2127_v7, %v2125_v6  ;;  %v4474_v38 = vpack.c.bf16 %v2511_v9, %v2509_v42  ;;  %v2517_v20 = vld [vmem:[%s6259_s6 + $0x16e0] sm:$0xff]  ;;  %v2524_v22 = vld [vmem:[%s6259_s6 + $0x1718] sm:$0xff]  ;;  %v2147_v6 = vld [vmem:[%s6259_s6 + $0xb50] sm:$0xff] }
 0x2e8   : > { %4457 = vmatprep.subr.bf16.mxu0 %v4456_v23  ;;  %3143 = vmatprep.mubr.f32.mxu1 %v2638_v25  ;;  %v2513_v23 = vld [vmem:[%s6259_s6 + $0x16c0] sm:$0xff]  ;;  %v4476_v41 = vpack.c.bf16 %v2516_v13, %v2514_v11  ;;  %v2136_v25 = vld [vmem:[%s6259_s6 + $0xaf8] sm:$0xff]  ;;  %v4484_v48 = vpack.c.bf16 %v2524_v22, %v2522_v37  ;;  %v4492_v42 = vpack.c.bf16 %v2532_v1, %v2530_v0  ;;  %v2150_v9 = vld [vmem:[%s6259_s6 + $0xb68] sm:$0xff] }
 0x2e9   : > { %3569 = vmatprep.mubr.f32.mxu0 %v2689_v29  ;;  %v4094_v29 = vpack.c.bf16 %v2131_v17, %v2129_v16  ;;  %v2529_v7 = vld [vmem:[%s6259_s6 + $0x1740] sm:$0xff]  ;;  %v2536_v11 = vld [vmem:[%s6259_s6 + $0x1778] sm:$0xff]  ;;  %v2151_v16 = vld [vmem:[%s6259_s6 + $0xb70] sm:$0xff] }
 0x2ea   : > { %4075 = vmatpush1.bf16.msra.mxu1 %v4074_v31  ;;  %v4478_v31 = vpack.c.bf16 %v2515_v24, %v2513_v23  ;;  %v2533_v17 = vld [vmem:[%s6259_s6 + $0x1760] sm:$0xff]  ;;  %v4496_v23 = vpack.c.bf16 %v2536_v11, %v2534_v10  ;;  %v2154_v24 = vld [vmem:[%s6259_s6 + $0xb88] sm:$0xff]  ;;  %v2544_v37 = vld [vmem:[%s6259_s6 + $0x17b8] sm:$0xff] }
 0x2eb   : > { %4459 = vmatpush1.bf16.msra.mxu0 %v4458_v32  ;;  %4077 = vmatprep.subr.bf16.mxu1 %v4076_v58  ;;  %v4096_v32 = vpack.c.bf16 %v2136_v25, %v2134_v30  ;;  %v2133_v58 = vld [vmem:[%s6259_s6 + $0xae0] sm:$0xff]  ;;  %v2156_v30 = vld [vmem:[%s6259_s6 + $0xb98] sm:$0xff]  ;;  %v2538_v25 = vld [vmem:[%s6259_s6 + $0x1788] sm:$0xff] }
 0x2ec   : > { %4461 = vmatprep.subr.bf16.mxu0 %v4460_v34  ;;  %v2519_v34 = vld [vmem:[%s6259_s6 + $0x16f0] sm:$0xff]  ;;  %v4098_v61 = vpack.c.bf16 %v2135_v14, %v2133_v58  ;;  %v2537_v14 = vld [vmem:[%s6259_s6 + $0x1780] sm:$0xff]  ;;  %v2552_v0 = vld [vmem:[%s6259_s6 + $0x17f8] sm:$0xff] }
 0x2ed   : > { %v2155_v58 = vld [vmem:[%s6259_s6 + $0xb90] sm:$0xff] }
 0x2ee   : > { %4079 = vmatpush1.bf16.msra.mxu1 %v4078_v39  ;;  %v4482_v39 = vpack.c.bf16 %v2519_v34, %v2517_v20  ;;  %v4500_v20 = vpack.c.bf16 %v2540_v27, %v2538_v25  ;;  %v2158_v34 = vld [vmem:[%s6259_s6 + $0xba8] sm:$0xff]  ;;  %v4617_v27 = vmov 0.0  }
 0x2ef   : > { %4463 = vmatpush1.bf16.msra.mxu0 %v4462_v43  ;;  %4081 = vmatprep.subr.bf16.mxu1 %v4080_v45  ;;  %v4100_v43 = vpack.c.bf16 %v2140_v36, %v2138_v35  ;;  %v2137_v45 = vld [vmem:[%s6259_s6 + $0xb00] sm:$0xff]  ;;  %v2160_v35 = vld [vmem:[%s6259_s6 + $0xbb8] sm:$0xff]  ;;  %v2542_v36 = vld [vmem:[%s6259_s6 + $0x17a8] sm:$0xff] }
 0x2f0   : > { %4465 = vmatprep.subr.bf16.mxu0 %v4464_v49  ;;  %v2523_v49 = vld [vmem:[%s6259_s6 + $0x1710] sm:$0xff]  ;;  %v4102_v54 = vpack.c.bf16 %v2139_v46, %v2137_v45  ;;  %v2541_v46 = vld [vmem:[%s6259_s6 + $0x17a0] sm:$0xff] }
 0x2f1   : > { %v2159_v45 = vld [vmem:[%s6259_s6 + $0xbb0] sm:$0xff] }
 0x2f2   : > { %4083 = vmatpush1.bf16.msra.mxu1 %v4082_v55  ;;  %v4486_v55 = vpack.c.bf16 %v2523_v49, %v2521_v47  ;;  %v4504_v47 = vpack.c.bf16 %v2544_v37, %v2542_v36  ;;  %v2162_v49 = vld [vmem:[%s6259_s6 + $0xbc8] sm:$0xff]  ;;  %v2573_v37 = vsub.s32 0, %v6247_v19 }
 0x2f3   : > { %4467 = vmatpush1.bf16.msra.mxu0 %v4466_v18  ;;  %4085 = vmatprep.subr.bf16.mxu1 %v4084_v56  ;;  %v4104_v18 = vpack.c.bf16 %v2144_v51, %v2142_v50  ;;  %v2141_v56 = vld [vmem:[%s6259_s6 + $0xb20] sm:$0xff]  ;;  %v2164_v50 = vld [vmem:[%s6259_s6 + $0xbd8] sm:$0xff]  ;;  %v2546_v51 = vld [vmem:[%s6259_s6 + $0x17c8] sm:$0xff] }
 0x2f4   : > { %4469 = vmatprep.subr.bf16.mxu0 %v4468_v62  ;;  %v2527_v62 = vld [vmem:[%s6259_s6 + $0x1730] sm:$0xff]  ;;  %v4106_v2 = vpack.c.bf16 %v2143_v57, %v2141_v56  ;;  %v2545_v57 = vld [vmem:[%s6259_s6 + $0x17c0] sm:$0xff] }
 0x2f5   : > { %v2163_v56 = vld [vmem:[%s6259_s6 + $0xbd0] sm:$0xff] }
 0x2f6   : > { %4087 = vmatpush1.bf16.msra.mxu1 %v4086_v3  ;;  %v4490_v3 = vpack.c.bf16 %v2527_v62, %v2525_v59  ;;  %v4508_v59 = vpack.c.bf16 %v2548_v52, %v2546_v51  ;;  %v2166_v62 = vld [vmem:[%s6259_s6 + $0xbe8] sm:$0xff] }
 0x2f7   : > { %4471 = vmatpush1.bf16.msra.mxu0 %v4470_v4  ;;  %4089 = vmatprep.subr.bf16.mxu1 %v4088_v5  ;;  %v4108_v4 = vpack.c.bf16 %v2148_v63, %v2146_v26  ;;  %v2145_v5 = vld [vmem:[%s6259_s6 + $0xb40] sm:$0xff]  ;;  %v2168_v26 = vld [vmem:[%s6259_s6 + $0xbf8] sm:$0xff]  ;;  %v2550_v63 = vld [vmem:[%s6259_s6 + $0x17e8] sm:$0xff] }
 0x2f8   : > { %4473 = vmatprep.subr.bf16.mxu0 %v4472_v8  ;;  %v2531_v8 = vld [vmem:[%s6259_s6 + $0x1750] sm:$0xff]  ;;  %v4110_v13 = vpack.c.bf16 %v2147_v6, %v2145_v5  ;;  %v4512_v6 = vpack.c.bf16 %v2552_v0, %v2550_v63 }
 0x2f9   : > { %v2167_v5 = vld [vmem:[%s6259_s6 + $0xbf0] sm:$0xff] }
 0x2fa   : > { %4091 = vmatpush1.bf16.msra.mxu1 %v4090_v15  ;;  %v4494_v15 = vpack.c.bf16 %v2531_v8, %v2529_v7  ;;  %v2549_v7 = vld [vmem:[%s6259_s6 + $0x17e0] sm:$0xff]  ;;  %v2554_v8 = vld [vmem:[%s6259_s6 + $0x1808] sm:$0xff] }
 0x2fb   : > { %4475 = vmatpush1.bf16.msra.mxu0 %v4474_v38  ;;  %4093 = vmatprep.subr.bf16.mxu1 %v4092_v40  ;;  %v4112_v38 = vpack.c.bf16 %v2152_v21, %v2150_v9  ;;  %v2149_v40 = vld [vmem:[%s6259_s6 + $0xb60] sm:$0xff]  ;;  %v2556_v9 = vld [vmem:[%s6259_s6 + $0x1818] sm:$0xff] }
 0x2fc   : > { %4477 = vmatprep.subr.bf16.mxu0 %v4476_v41  ;;  %v2535_v41 = vld [vmem:[%s6259_s6 + $0x1770] sm:$0xff]  ;;  %v4114_v28 = vpack.c.bf16 %v2151_v16, %v2149_v40  ;;  %v4516_v11 = vpack.c.bf16 %v2556_v9, %v2554_v8  ;;  %v2560_v40 = vld [vmem:[%s6259_s6 + $0x1838] sm:$0xff] }
 0x2fe   : > { %4095 = vmatpush1.bf16.msra.mxu1 %v4094_v29  ;;  %v4498_v29 = vpack.c.bf16 %v2535_v41, %v2533_v17  ;;  %v2559_v41 = vld [vmem:[%s6259_s6 + $0x1830] sm:$0xff] }
 0x2ff   : > { %4479 = vmatpush1.bf16.msra.mxu0 %v4478_v31  ;;  %4097 = vmatprep.subr.bf16.mxu1 %v4096_v32  ;;  %v4116_v31 = vpack.c.bf16 %v2156_v30, %v2154_v24  ;;  %v2153_v32 = vld [vmem:[%s6259_s6 + $0xb80] sm:$0xff]  ;;  %v2562_v24 = vld [vmem:[%s6259_s6 + $0x1848] sm:$0xff]  ;;  %v2564_v30 = vld [vmem:[%s6259_s6 + $0x1858] sm:$0xff] }
 0x300   : > { %4481 = vmatprep.subr.bf16.mxu0 %v4480_v33  ;;  %v2539_v33 = vld [vmem:[%s6259_s6 + $0x1790] sm:$0xff]  ;;  %v4118_v22 = vpack.c.bf16 %v2155_v58, %v2153_v32  ;;  %v2566_v32 = vld [vmem:[%s6259_s6 + $0x1868] sm:$0xff]  ;;  %v2568_v58 = vld [vmem:[%s6259_s6 + $0x1878] sm:$0xff] }
 0x302   : > { %4099 = vmatpush1.bf16.msra.mxu1 %v4098_v61  ;;  %v4502_v61 = vpack.c.bf16 %v2539_v33, %v2537_v14  ;;  %v2567_v33 = vld [vmem:[%s6259_s6 + $0x1870] sm:$0xff] }
 0x303   : > { %4483 = vmatpush1.bf16.msra.mxu0 %v4482_v39  ;;  %4101 = vmatprep.subr.bf16.mxu1 %v4100_v43  ;;  %v4120_v39 = vpack.c.bf16 %v2160_v35, %v2158_v34  ;;  %v2157_v43 = vld [vmem:[%s6259_s6 + $0xba0] sm:$0xff]  ;;  %v3742_v34 = vld.sshfl [vmem:[%s7181_s0 + $0x30] sm:$0x3 pattern:$0x76325410] }
 0x304   : > { %4485 = vmatprep.subr.bf16.mxu0 %v4484_v48  ;;  %v2543_v48 = vld [vmem:[%s6259_s6 + $0x17b0] sm:$0xff]  ;;  %v4122_v53 = vpack.c.bf16 %v2159_v45, %v2157_v43 }
 0x306   : > { %4103 = vmatpush1.bf16.msra.mxu1 %v4102_v54  ;;  %v4506_v54 = vpack.c.bf16 %v2543_v48, %v2541_v46 }
 0x307   : > { %4487 = vmatpush1.bf16.msra.mxu0 %v4486_v55  ;;  %4105 = vmatprep.subr.bf16.mxu1 %v4104_v18  ;;  %v4124_v55 = vpack.c.bf16 %v2164_v50, %v2162_v49  ;;  %v2161_v18 = vld [vmem:[%s6259_s6 + $0xbc0] sm:$0xff] }
 0x308   : > { %4489 = vmatprep.subr.bf16.mxu0 %v4488_v60  ;;  %v2547_v60 = vld [vmem:[%s6259_s6 + $0x17d0] sm:$0xff]  ;;  %v4126_v1 = vpack.c.bf16 %v2163_v56, %v2161_v18 }
 0x30a   : > { %4107 = vmatpush1.bf16.msra.mxu1 %v4106_v2  ;;  %v4510_v2 = vpack.c.bf16 %v2547_v60, %v2545_v57 }
 0x30b   : > { %4491 = vmatpush1.bf16.msra.mxu0 %v4490_v3  ;;  %4109 = vmatprep.subr.bf16.mxu1 %v4108_v4  ;;  %v4128_v3 = vpack.c.bf16 %v2168_v26, %v2166_v62  ;;  %v2165_v4 = vld [vmem:[%s6259_s6 + $0xbe0] sm:$0xff] }
 0x30c   : > { %4493 = vmatprep.subr.bf16.mxu0 %v4492_v42  ;;  %v2551_v42 = vld [vmem:[%s6259_s6 + $0x17f0] sm:$0xff]  ;;  %v4130_v21 = vpack.c.bf16 %v2167_v5, %v2165_v4 }
 0x30d   : > { %v4514_v10 = vpack.c.bf16 %v2551_v42, %v2549_v7 }
 0x30e   : > { %4111 = vmatpush1.bf16.msra.mxu1 %v4110_v13  ;;  %v2553_v13 = vld [vmem:[%s6259_s6 + $0x1800] sm:$0xff] }
 0x30f   : > { %4495 = vmatpush1.bf16.msra.mxu0 %v4494_v15  ;;  %4113 = vmatprep.subr.bf16.mxu1 %v4112_v38  ;;  %v2555_v15 = vld [vmem:[%s6259_s6 + $0x1810] sm:$0xff]  ;;  %v2558_v38 = vld [vmem:[%s6259_s6 + $0x1828] sm:$0xff] }
 0x310   : > { %4497 = vmatprep.subr.bf16.mxu0 %v4496_v23  ;;  %v4518_v16 = vpack.c.bf16 %v2555_v15, %v2553_v13  ;;  %v4520_v17 = vpack.c.bf16 %v2560_v40, %v2558_v38  ;;  %v2557_v23 = vld [vmem:[%s6259_s6 + $0x1820] sm:$0xff] }
 0x311   : > { %v4522_v25 = vpack.c.bf16 %v2559_v41, %v2557_v23 }
 0x312   : > { %4115 = vmatpush1.bf16.msra.mxu1 %v4114_v28  ;;  %v4524_v28 = vpack.c.bf16 %v2564_v30, %v2562_v24 }
 0x313   : > { %4499 = vmatpush1.bf16.msra.mxu0 %v4498_v29  ;;  %4117 = vmatprep.subr.bf16.mxu1 %v4116_v31  ;;  %v2561_v29 = vld [vmem:[%s6259_s6 + $0x1840] sm:$0xff]  ;;  %v2563_v31 = vld [vmem:[%s6259_s6 + $0x1850] sm:$0xff] }
 0x314   : > { %4501 = vmatprep.subr.bf16.mxu0 %v4500_v20  ;;  %v4526_v14 = vpack.c.bf16 %v2563_v31, %v2561_v29  ;;  %v2565_v20 = vld [vmem:[%s6259_s6 + $0x1860] sm:$0xff] }
 0x316   : > { %4119 = vmatpush1.bf16.msra.mxu1 %v4118_v22  ;;  %v2569_v22 = vld [vmem:[%s1770_s25] sm:$0x3] }
 0x317   : > { %4503 = vmatpush1.bf16.msra.mxu0 %v4502_v61  ;;  %4121 = vmatprep.subr.bf16.mxu1 %v4120_v39  ;;  %v2577_v61 = vsub.s32 1, %v6247_v19  ;;  %v2574_v39 = vrot.slane %v2569_v22, %v2573_v37 }
 0x318   : > { %4505 = vmatprep.subr.bf16.mxu0 %v4504_v47 }
 0x319   : > { %v2578_v43 = vrot.slane %v2569_v22, %v2577_v61 }
 0x31a   : > { %4123 = vmatpush1.bf16.msra.mxu1 %v4122_v53 }
 0x31b   : > { %4507 = vmatpush1.bf16.msra.mxu0 %v4506_v54  ;;  %4125 = vmatprep.subr.bf16.mxu1 %v4124_v55 }
 0x31c   : > { %4509 = vmatprep.subr.bf16.mxu0 %v4508_v59 }
 0x31e   : > { %4127 = vmatpush1.bf16.msra.mxu1 %v4126_v1 }
 0x31f   : > { %4511 = vmatpush1.bf16.msra.mxu0 %v4510_v2  ;;  %4129 = vmatprep.subr.bf16.mxu1 %v4128_v3 }
 0x320   : > { %4513 = vmatprep.subr.bf16.mxu0 %v4512_v6 }
 0x322   : > { %4131 = vmatpush1.bf16.msra.mxu1 %v4130_v21 }
 0x323   : > { %4515 = vmatpush1.bf16.msra.mxu0 %v4514_v10 }
 0x324   : > { %4517 = vmatprep.subr.bf16.mxu0 %v4516_v11 }
 0x325   : > { %3144 = vmatmul.mubr.f32.vlgmr.msra.gmra.mrb[0].mxu1 %v7011_v44  ;;  %v4528_v44 = vpack.c.bf16 %v2568_v58, %v2566_v32 }
 0x326   : > { %3570 = vmatmul.mubr.f32.vlgmr.msra.gmra.mrb[0].mxu0 %v7016_v12  ;;  %v4530_v12 = vpack.c.bf16 %v2567_v33, %v2565_v20 }
 0x327   : > { %4519 = vmatpush1.bf16.msra.mxu0 %v4518_v16  ;;  %3640 = vmatprep.mubr.f32.mxu0 %v4617_v27 }
 0x328   : > { %4521 = vmatprep.subr.bf16.mxu0 %v4520_v17 }
 0x32b   : > { %4523 = vmatpush1.bf16.msra.mxu0 %v4522_v25 }
 0x32c   : > { %4525 = vmatprep.subr.bf16.mxu0 %v4524_v28 }
 0x32f   : > { %4527 = vmatpush1.bf16.msra.mxu0 %v4526_v14 }
 0x330   : > { %4529 = vmatprep.subr.bf16.mxu0 %v4528_v44 }
 0x333   : > { %4531 = vmatpush1.bf16.msra.mxu0 %v4530_v12 }
 0x336   : > { %3743 = vmatmul.mubr.msk.f32.vlgmr.msra.gmra.mrb[0].mxu0 %vm2721_vm0, %v3742_v34 }
 0x3f8   : > { %v3145_v35 = vpop.f32.mrb[0].mxu1 }
 0x3f9   : > { %v3147_v36 = vpop.f32.mrb[1].mxu1  ;;  %v4532_v45 = vadd.f32 %v3145_v35, %v2574_v39 }
 0x3fa   : > { %v4534_v46 = vadd.f32 %v3147_v36, %v2578_v43 }
 0x409   : > { %v3642_v47 = vpop.f32.mrb[0].mxu0 }
 0x40a   : > { %v4533_v48 = vadd.f32 %v4532_v45, %v3642_v47  ;;  %v3644_v49 = vpop.f32.mrb[1].mxu0 }
 0x40b   : > { %v4535_v50 = vadd.f32 %v4534_v46, %v3644_v49 }
 0x40c   : > { %v3647_v51 = vmax.f32 %v4533_v48, 0.0 }
 0x40d   : > { %v3648_v52 = vmax.f32 %v4535_v50, 0.0 }
 0x40f   : > { %v3651_v53 = vcombine.low %v3647_v51, %v3648_v52 }
 0x411   : > { %3744 = vst.sshfl [vmem:[%s1776_s27] sm:$0x33 pattern:$0x76325410] %v3651_v53 }
 0x412 PF: > { %p10_p9 = scmp.ge.s32.totalorder %s4655_s16, 6   ;;  %s7185_s12 = smov %s4610_s13 }
 0x413   : > { %s7186_s13 = smov %s4664_s19  ;;  %s7187_s14 = smov %s4655_s16 }
 0x414   :  { %12 = sbr.rel (!%p10_p9) target bundleno = 2 (0x2), region = 93 }

</bundles_post_ra>
